<compile_context>
chip_gen: v6e
topology: v6e:2x2x1
jax: 0.10.0
libtpu: 0.0.40
codegen_flags: <defaults>
</compile_context>

<pallas_src>
import jax
import jax.numpy as jnp
from jax.experimental import pallas as pl
from jax.experimental.pallas import tpu as pltpu


CP = 128       # padded channel width -> lane-dense last dim everywhere
CIN_P = 128    # padded input-image channel width


# ------------------------------ Pallas kernel ------------------------------

def _make_resnet_kernel(block_meta, H, W, n_in):
    """Single fused kernel: expand + all ResBlocks + avg-pool + linear head."""
    HW = H * W
    Hp, Wp = H + 2, W + 2
    taps = [(dh, dw) for dh in range(3) for dw in range(3)]   # tap 4 = centre

    def kernel(*refs):
        it = iter(refs[:n_in])
        out_ref = refs[n_in]
        xpad_ref = refs[n_in + 1]      # (H+2, W+2, CP) f32 VMEM scratch

        x_ref, we_ref, be_ref = next(it), next(it), next(it)

        # ---- expand: 1x1 conv + BN (no ReLU); BN scale folded into we ----
        act = jnp.dot(x_ref[0], we_ref[...],
                      preferred_element_type=jnp.float32) + be_ref[...]

        # ---- ResBlocks (dense evaluation at input resolution) -------------
        for meta in block_meta:
            has_skip = meta['has_skip']
            if has_skip:
                w1_ref, w1c_ref, b1_ref, bsk_ref, w2_ref, b2_ref = (
                    next(it), next(it), next(it), next(it), next(it), next(it))
            else:
                w1_ref, b1_ref, w2_ref, b2_ref = (
                    next(it), next(it), next(it), next(it))

            # Zero-padded activation tile in VMEM scratch (spatial pad = 1).
            xpad_ref[...] = jnp.zeros((Hp, Wp, CP), jnp.float32)
            xpad_ref[1:H + 1, 1:W + 1, :] = act.reshape(H, W, CP)

            # 3x3 conv as 9 accumulating dots over shifted views of the
            # padded tile -- no im2col materialization, no HBM traffic.
            acc = jnp.zeros((HW, CP), jnp.float32)
            skip = None
            for t, (dh, dw) in enumerate(taps):
                v = xpad_ref[dh:dh + H, dw:dw + W, :]
                v = v.reshape(HW, CP).astype(jnp.bfloat16)
                if has_skip and t == 4:
                    # Centre tap fused with the 1x1 skip conv: one N=256 dot
                    # produces [conv-contribution | skip].
                    both = jnp.dot(v, w1c_ref[...],
                                   preferred_element_type=jnp.float32)
                    acc = acc + both[:, :CP]
                    skip = both[:, CP:] + bsk_ref[...]
                else:
                    idx = t if (not has_skip or t < 4) else t - 1
                    acc = acc + jnp.dot(v, w1_ref[idx],
                                        preferred_element_type=jnp.float32)

            h = jnp.maximum(acc + b1_ref[...], 0.0)             # BN1 + ReLU
            y = jnp.dot(h.astype(jnp.bfloat16), w2_ref[...],    # 1x1 + BN2
                        preferred_element_type=jnp.float32) + b2_ref[...]
            y = y + (skip if has_skip else act)                  # residual
            act = jnp.maximum(y, 0.0)                            # block ReLU

        # ---- head: (masked) global average pool + linear ------------------
        hw_ref, hb_ref = next(it), next(it)
        stride = block_meta[-1]['stride']
        if stride == 1:
            ym = act
            n_valid = HW
        else:
            # The strided last block was computed densely; keep only its
            # (even, even) output positions (stride is a power of two here).
            hi = jax.lax.broadcasted_iota(jnp.int32, (H, W, CP), 0)
            wi = jax.lax.broadcasted_iota(jnp.int32, (H, W, CP), 1)
            sel = jnp.logical_and((hi & (stride - 1)) == 0,
                                  (wi & (stride - 1)) == 0)
            ym = act * sel.astype(jnp.float32).reshape(HW, CP)
            n_valid = (((H - 1) // stride) + 1) * (((W - 1) // stride) + 1)
        z = jnp.dot(ym, hw_ref[...], preferred_element_type=jnp.float32)
        logits = jnp.sum(z, axis=0, keepdims=True) * (1.0 / n_valid)
        out_ref[...] = (logits + hb_ref[...]).reshape(1, 1, CP)

    return kernel


# ------------------------------ param packing ------------------------------

def _pad_axis(a, target, axis):
    pad = target - a.shape[axis]
    if pad <= 0:
        return a
    widths = [(0, 0)] * a.ndim
    widths[axis] = (0, pad)
    return jnp.pad(a, widths)


def bn_fold(bn, eps=1e-5):
    scale = bn['gamma'] / jnp.sqrt(bn['var'] + eps)
    shift = bn['beta'] - bn['mean'] * scale
    return scale, shift


def pack_shift(shift):
    return _pad_axis(shift, CP, 0).reshape(1, CP).astype(jnp.float32)


def pack_conv3x3_taps(w, scale):
    # w: (Cout, Cin, 3, 3) -> (9, CP, CP); BN scale folded into output cols.
    wt = jnp.transpose(w, (2, 3, 1, 0)) * scale[None, None, None, :]
    wt = _pad_axis(_pad_axis(wt, CP, 2), CP, 3)          # (3, 3, CP, CP)
    return wt.reshape(9, CP, CP).astype(jnp.bfloat16)


def pack_conv1x1(w, scale):
    # w: (Cout, Cin, 1, 1) -> (CP, CP); BN scale folded into output columns.
    cout, cin = w.shape[0], w.shape[1]
    wt = w.reshape(cout, cin).T * scale[None, :]
    return _pad_axis(_pad_axis(wt, CP, 0), CP, 1).astype(jnp.bfloat16)


def pack_params(params):
    """Fold BN, zero-pad channels to CP, cast matmul operands to bf16."""
    packed = {}
    se, be = bn_fold(params['expand']['bn'])
    we = params['expand']['w']                            # (C0, Cin, 1, 1)
    c0, cin = we.shape[0], we.shape[1]
    w = we.reshape(c0, cin).T * se[None, :]               # (Cin, C0)
    packed['expand_w'] = _pad_axis(_pad_axis(w, CIN_P, 0), CP, 1).astype(jnp.bfloat16)
    packed['expand_b'] = pack_shift(be)

    blocks = []
    n_blocks = len(params['blocks'])
    for i, blk in enumerate(params['blocks']):
        stride = int(blk['stride'])
        has_skip = 'wskip' in blk
        if stride != 1 and i != n_blocks - 1:
            # TODO(synk): dense-with-mask evaluation only supports a strided
            # ResBlock in the last position; intermediate strided blocks would
            # need real spatial subsampling between blocks.
            raise NotImplementedError("strided ResBlock must be the last block")
        s1, b1 = bn_fold(blk['bn1'])
        s2, b2 = bn_fold(blk['bn2'])
        taps = pack_conv3x3_taps(blk['w1'], s1)           # (9, CP, CP)
        pb = dict(stride=stride, has_skip=has_skip,
                  b1=pack_shift(b1),
                  w2=pack_conv1x1(blk['w2'], s2), b2=pack_shift(b2))
        if has_skip:
            ss, bs = bn_fold(blk['bnskip'])
            wsk = pack_conv1x1(blk['wskip'], ss)          # (CP, CP)
            # centre tap fused with the skip conv -> one (CP, 2*CP) operand
            pb['w1c'] = jnp.concatenate([taps[4], wsk], axis=1)
            pb['w1'] = jnp.concatenate([taps[:4], taps[5:]], axis=0)  # (8,CP,CP)
            pb['bskip'] = pack_shift(bs)
        else:
            pb['w1'] = taps
        blocks.append(pb)
    packed['blocks'] = blocks

    hw = params['head_w']                                 # (num_classes, C_last)
    packed['head_w'] = _pad_axis(_pad_axis(hw.T, CP, 0), CP, 1).astype(jnp.float32)
    packed['head_b'] = pack_shift(params['head_b'])
    packed['num_classes'] = int(hw.shape[0])
    return packed


# ------------------------------ forward glue -------------------------------

def _const_spec(shape):
    zeros = (0,) * len(shape)
    return pl.BlockSpec(tuple(shape), lambda b, _z=zeros: _z)


def resnet_forward(packed, x_nchw):
    B, cin, H, W = x_nchw.shape
    HW = H * W

    # NCHW -> (B, H*W, CIN_P) bf16 (tiny XLA prologue; everything else fused).
    x = jnp.transpose(x_nchw, (0, 2, 3, 1)).reshape(B, HW, cin)
    x = jnp.pad(x, ((0, 0), (0, 0), (0, CIN_P - cin))).astype(jnp.bfloat16)

    args = [x, packed['expand_w'], packed['expand_b']]
    in_specs = [pl.BlockSpec((1, HW, CIN_P), lambda b: (b, 0, 0)),
                _const_spec(packed['expand_w'].shape),
                _const_spec(packed['expand_b'].shape)]

    block_meta = []
    flops = 2 * HW * CIN_P * CP
    for blk in packed['blocks']:
        block_meta.append({'stride': blk['stride'], 'has_skip': blk['has_skip']})
        names = (('w1', 'w1c', 'b1', 'bskip', 'w2', 'b2') if blk['has_skip']
                 else ('w1', 'b1', 'w2', 'b2'))
        for n in names:
            args.append(blk[n])
            in_specs.append(_const_spec(blk[n].shape))
        flops += 9 * 2 * HW * CP * CP + 2 * HW * CP * CP
        if blk['has_skip']:
            flops += 2 * HW * CP * CP
    flops += 2 * HW * CP * CP                              # head
    flops *= B

    args += [packed['head_w'], packed['head_b']]
    in_specs += [_const_spec(packed['head_w'].shape),
                 _const_spec(packed['head_b'].shape)]

    n_in = len(args)
    bytes_accessed = int(sum(int(a.size) * a.dtype.itemsize for a in args)
                         + B * CP * 4)

    out = pl.pallas_call(
        _make_resnet_kernel(block_meta, H, W, n_in),
        out_shape=jax.ShapeDtypeStruct((B, 1, CP), jnp.float32),
        grid=(B,),
        in_specs=in_specs,
        out_specs=pl.BlockSpec((1, 1, CP), lambda b: (b, 0, 0)),
        scratch_shapes=[pltpu.VMEM((H + 2, W + 2, CP), jnp.float32)],
        compiler_params=pltpu.CompilerParams(
            dimension_semantics=("parallel",)),
        cost_estimate=pl.CostEstimate(flops=int(flops), transcendentals=0,
                                      bytes_accessed=bytes_accessed),
    )(*args)

    return out.reshape(B, CP)[:, :packed['num_classes']]


# --------------------------- deterministic init ----------------------------

def init_params(key, in_channels, block_features, num_classes):
    bf = [block_features[0]] + list(block_features)        # headless=False path
    keys = iter(jax.random.split(key, 128))

    def conv_w(shape):
        return 0.1 * jax.random.normal(next(keys), shape, jnp.float32)

    def bn_p(c):
        return dict(
            gamma=1.0 + 0.1 * jax.random.normal(next(keys), (c,), jnp.float32),
            beta=0.1 * jax.random.normal(next(keys), (c,), jnp.float32),
            mean=0.1 * jax.random.normal(next(keys), (c,), jnp.float32),
            var=1.0 + 0.1 * jnp.abs(jax.random.normal(next(keys), (c,), jnp.float32)),
        )

    params = {'expand': dict(w=conv_w((bf[0], in_channels, 1, 1)), bn=bn_p(bf[0]))}
    blocks = []
    for i in range(len(bf) - 1):
        cin, cout = bf[i], bf[i + 1]
        stride = 1 if cin >= cout else 2
        blk = dict(stride=stride,
                   w1=conv_w((cout, cin, 3, 3)), bn1=bn_p(cout),
                   w2=conv_w((cout, cout, 1, 1)), bn2=bn_p(cout))
        if not (stride == 1 and cin == cout):
            blk['wskip'] = conv_w((cout, cin, 1, 1))
            blk['bnskip'] = bn_p(cout)
        blocks.append(blk)
    params['blocks'] = blocks
    params['head_w'] = conv_w((num_classes, bf[-1]))       # nn.Linear weight (out, in)
    params['head_b'] = 0.1 * jax.random.normal(next(keys), (num_classes,), jnp.float32)
    return params


# --------------------------------- main ------------------------------------

if __name__ == "__main__":
    key = jax.random.PRNGKey(0)
    kp, kx = jax.random.split(key)

    in_channels = 1            # MNIST-style
    block_features = [8, 16]   # internal [8, 8, 16]: ResBlock(8,8), ResBlock(8,16,s=2)
    num_classes = 10

    params = init_params(kp, in_channels, block_features, num_classes)
    packed = pack_params(params)
    x = jax.random.normal(kx, (2, in_channels, 16, 16), jnp.float32)  # NCHW

    fwd = jax.jit(lambda xx: resnet_forward(packed, xx))
    out = jax.block_until_ready(fwd(x))

    assert out.shape == (2, num_classes), out.shape
    assert bool(jnp.all(jnp.isfinite(out)))
    print("KERNEL_OK")
</pallas_src>

<mosaic_0001>
module attributes {stable_mosaic.version = 11 : i64} {
  func.func @kernel(%arg0: i32, %arg1: memref<1x256x128xbf16, #tpu.memory_space<vmem>>, %arg2: memref<128x128xbf16, #tpu.memory_space<vmem>>, %arg3: memref<1x128xf32, #tpu.memory_space<vmem>>, %arg4: memref<9x128x128xbf16, #tpu.memory_space<vmem>>, %arg5: memref<1x128xf32, #tpu.memory_space<vmem>>, %arg6: memref<128x128xbf16, #tpu.memory_space<vmem>>, %arg7: memref<1x128xf32, #tpu.memory_space<vmem>>, %arg8: memref<8x128x128xbf16, #tpu.memory_space<vmem>>, %arg9: memref<128x256xbf16, #tpu.memory_space<vmem>>, %arg10: memref<1x128xf32, #tpu.memory_space<vmem>>, %arg11: memref<1x128xf32, #tpu.memory_space<vmem>>, %arg12: memref<128x128xbf16, #tpu.memory_space<vmem>>, %arg13: memref<1x128xf32, #tpu.memory_space<vmem>>, %arg14: memref<128x128xf32, #tpu.memory_space<vmem>>, %arg15: memref<1x128xf32, #tpu.memory_space<vmem>>, %arg16: memref<1x1x128xf32, #tpu.memory_space<vmem>>, %arg17: memref<18x18x128xf32, #tpu.memory_space<vmem>>) attributes {dimension_semantics = [#tpu.dimension_semantics<parallel>], iteration_bounds = array<i64: 2>, scalar_prefetch = 0 : i64, scratch_operands = 1 : i64, tpu.core_type = #tpu.core_type<tc>, window_params = [{transform_indices = @transform_0, window_bounds = array<i64: 1, 256, 128>}, {pipeline_mode = #tpu.pipeline_mode<synchronous>, transform_indices = @transform_1, window_bounds = array<i64: 128, 128>}, {pipeline_mode = #tpu.pipeline_mode<synchronous>, transform_indices = @transform_2, window_bounds = array<i64: 1, 128>}, {pipeline_mode = #tpu.pipeline_mode<synchronous>, transform_indices = @transform_3, window_bounds = array<i64: 9, 128, 128>}, {pipeline_mode = #tpu.pipeline_mode<synchronous>, transform_indices = @transform_4, window_bounds = array<i64: 1, 128>}, {pipeline_mode = #tpu.pipeline_mode<synchronous>, transform_indices = @transform_5, window_bounds = array<i64: 128, 128>}, {pipeline_mode = #tpu.pipeline_mode<synchronous>, transform_indices = @transform_6, window_bounds = array<i64: 1, 128>}, {pipeline_mode = #tpu.pipeline_mode<synchronous>, transform_indices = @transform_7, window_bounds = array<i64: 8, 128, 128>}, {pipeline_mode = #tpu.pipeline_mode<synchronous>, transform_indices = @transform_8, window_bounds = array<i64: 128, 256>}, {pipeline_mode = #tpu.pipeline_mode<synchronous>, transform_indices = @transform_9, window_bounds = array<i64: 1, 128>}, {pipeline_mode = #tpu.pipeline_mode<synchronous>, transform_indices = @transform_10, window_bounds = array<i64: 1, 128>}, {pipeline_mode = #tpu.pipeline_mode<synchronous>, transform_indices = @transform_11, window_bounds = array<i64: 128, 128>}, {pipeline_mode = #tpu.pipeline_mode<synchronous>, transform_indices = @transform_12, window_bounds = array<i64: 1, 128>}, {pipeline_mode = #tpu.pipeline_mode<synchronous>, transform_indices = @transform_13, window_bounds = array<i64: 128, 128>}, {pipeline_mode = #tpu.pipeline_mode<synchronous>, transform_indices = @transform_14, window_bounds = array<i64: 1, 128>}, {transform_indices = @transform_15, window_bounds = array<i64: 1, 1, 128>}]} {
    %c0 = arith.constant 0 : index
    %c0_0 = arith.constant 0 : index
    %c0_1 = arith.constant 0 : index
    %0 = vector.load %arg1[%c0, %c0_0, %c0_1] : memref<1x256x128xbf16, #tpu.memory_space<vmem>>, vector<1x256x128xbf16>
    %1 = vector.shape_cast %0 : vector<1x256x128xbf16> to vector<256x128xbf16>
    %c0_2 = arith.constant 0 : index
    %c0_3 = arith.constant 0 : index
    %2 = vector.load %arg2[%c0_2, %c0_3] : memref<128x128xbf16, #tpu.memory_space<vmem>>, vector<128x128xbf16>
    %cst = arith.constant dense<0.000000e+00> : vector<256x128xf32>
    %3 = tpu.matmul %1, %2, %cst {dimension_numbers = #tpu.dot_dimension_numbers<[1], [0], [0], [1], [0, 0, 1, 1], [], []>} : vector<256x128xbf16>, vector<128x128xbf16>, vector<256x128xf32> -> vector<256x128xf32>
    %c0_4 = arith.constant 0 : index
    %c0_5 = arith.constant 0 : index
    %4 = vector.load %arg3[%c0_4, %c0_5] : memref<1x128xf32, #tpu.memory_space<vmem>>, vector<1x128xf32>
    %5 = vector.broadcast %4 : vector<1x128xf32> to vector<256x128xf32>
    %6 = arith.addf %3, %5 : vector<256x128xf32>
    %cst_6 = arith.constant 0.000000e+00 : f32
    %7 = vector.broadcast %cst_6 : f32 to vector<18x18x128xf32>
    %c0_7 = arith.constant 0 : index
    %c0_8 = arith.constant 0 : index
    %c0_9 = arith.constant 0 : index
    %8 = vector.load %arg17[%c0_7, %c0_8, %c0_9] : memref<18x18x128xf32, #tpu.memory_space<vmem>>, vector<18x18x128xf32>
    tpu.vector_store %arg17[%c0_7, %c0_8, %c0_9], %7 {strides = array<i32>} : memref<18x18x128xf32, #tpu.memory_space<vmem>>, vector<18x18x128xf32>,
    %9 = vector.shape_cast %6 : vector<256x128xf32> to vector<16x16x128xf32>
    %c1 = arith.constant 1 : index
    %c1_10 = arith.constant 1 : index
    %c0_11 = arith.constant 0 : index
    %10 = vector.load %arg17[%c1, %c1_10, %c0_11] : memref<18x18x128xf32, #tpu.memory_space<vmem>>, vector<16x16x128xf32>
    tpu.vector_store %arg17[%c1, %c1_10, %c0_11], %9 {strides = array<i32>} : memref<18x18x128xf32, #tpu.memory_space<vmem>>, vector<16x16x128xf32>,
    %cst_12 = arith.constant 0.000000e+00 : f32
    %11 = vector.broadcast %cst_12 : f32 to vector<256x128xf32>
    %c0_13 = arith.constant 0 : index
    %c0_14 = arith.constant 0 : index
    %c0_15 = arith.constant 0 : index
    %12 = vector.load %arg17[%c0_13, %c0_14, %c0_15] : memref<18x18x128xf32, #tpu.memory_space<vmem>>, vector<16x16x128xf32>
    %13 = vector.shape_cast %12 : vector<16x16x128xf32> to vector<256x128xf32>
    %14 = arith.truncf %13 : vector<256x128xf32> to vector<256x128xbf16>
    %c0_16 = arith.constant 0 : index
    %c0_17 = arith.constant 0 : index
    %c0_18 = arith.constant 0 : index
    %15 = vector.load %arg4[%c0_16, %c0_17, %c0_18] : memref<9x128x128xbf16, #tpu.memory_space<vmem>>, vector<1x128x128xbf16>
    %16 = vector.shape_cast %15 : vector<1x128x128xbf16> to vector<128x128xbf16>
    %cst_19 = arith.constant dense<0.000000e+00> : vector<256x128xf32>
    %17 = tpu.matmul %14, %16, %cst_19 {dimension_numbers = #tpu.dot_dimension_numbers<[1], [0], [0], [1], [0, 0, 1, 1], [], []>} : vector<256x128xbf16>, vector<128x128xbf16>, vector<256x128xf32> -> vector<256x128xf32>
    %18 = arith.addf %11, %17 : vector<256x128xf32>
    %c0_20 = arith.constant 0 : index
    %c1_21 = arith.constant 1 : index
    %c0_22 = arith.constant 0 : index
    %19 = vector.load %arg17[%c0_20, %c1_21, %c0_22] : memref<18x18x128xf32, #tpu.memory_space<vmem>>, vector<16x16x128xf32>
    %20 = vector.shape_cast %19 : vector<16x16x128xf32> to vector<256x128xf32>
    %21 = arith.truncf %20 : vector<256x128xf32> to vector<256x128xbf16>
    %c1_23 = arith.constant 1 : index
    %c0_24 = arith.constant 0 : index
    %c0_25 = arith.constant 0 : index
    %22 = vector.load %arg4[%c1_23, %c0_24, %c0_25] : memref<9x128x128xbf16, #tpu.memory_space<vmem>>, vector<1x128x128xbf16>
    %23 = vector.shape_cast %22 : vector<1x128x128xbf16> to vector<128x128xbf16>
    %cst_26 = arith.constant dense<0.000000e+00> : vector<256x128xf32>
    %24 = tpu.matmul %21, %23, %cst_26 {dimension_numbers = #tpu.dot_dimension_numbers<[1], [0], [0], [1], [0, 0, 1, 1], [], []>} : vector<256x128xbf16>, vector<128x128xbf16>, vector<256x128xf32> -> vector<256x128xf32>
    %25 = arith.addf %18, %24 : vector<256x128xf32>
    %c0_27 = arith.constant 0 : index
    %c2 = arith.constant 2 : index
    %c0_28 = arith.constant 0 : index
    %26 = vector.load %arg17[%c0_27, %c2, %c0_28] : memref<18x18x128xf32, #tpu.memory_space<vmem>>, vector<16x16x128xf32>
    %27 = vector.shape_cast %26 : vector<16x16x128xf32> to vector<256x128xf32>
    %28 = arith.truncf %27 : vector<256x128xf32> to vector<256x128xbf16>
    %c2_29 = arith.constant 2 : index
    %c0_30 = arith.constant 0 : index
    %c0_31 = arith.constant 0 : index
    %29 = vector.load %arg4[%c2_29, %c0_30, %c0_31] : memref<9x128x128xbf16, #tpu.memory_space<vmem>>, vector<1x128x128xbf16>
    %30 = vector.shape_cast %29 : vector<1x128x128xbf16> to vector<128x128xbf16>
    %cst_32 = arith.constant dense<0.000000e+00> : vector<256x128xf32>
    %31 = tpu.matmul %28, %30, %cst_32 {dimension_numbers = #tpu.dot_dimension_numbers<[1], [0], [0], [1], [0, 0, 1, 1], [], []>} : vector<256x128xbf16>, vector<128x128xbf16>, vector<256x128xf32> -> vector<256x128xf32>
    %32 = arith.addf %25, %31 : vector<256x128xf32>
    %c1_33 = arith.constant 1 : index
    %c0_34 = arith.constant 0 : index
    %c0_35 = arith.constant 0 : index
    %33 = vector.load %arg17[%c1_33, %c0_34, %c0_35] : memref<18x18x128xf32, #tpu.memory_space<vmem>>, vector<16x16x128xf32>
    %34 = vector.shape_cast %33 : vector<16x16x128xf32> to vector<256x128xf32>
    %35 = arith.truncf %34 : vector<256x128xf32> to vector<256x128xbf16>
    %c3 = arith.constant 3 : index
    %c0_36 = arith.constant 0 : index
    %c0_37 = arith.constant 0 : index
    %36 = vector.load %arg4[%c3, %c0_36, %c0_37] : memref<9x128x128xbf16, #tpu.memory_space<vmem>>, vector<1x128x128xbf16>
    %37 = vector.shape_cast %36 : vector<1x128x128xbf16> to vector<128x128xbf16>
    %cst_38 = arith.constant dense<0.000000e+00> : vector<256x128xf32>
    %38 = tpu.matmul %35, %37, %cst_38 {dimension_numbers = #tpu.dot_dimension_numbers<[1], [0], [0], [1], [0, 0, 1, 1], [], []>} : vector<256x128xbf16>, vector<128x128xbf16>, vector<256x128xf32> -> vector<256x128xf32>
    %39 = arith.addf %32, %38 : vector<256x128xf32>
    %c1_39 = arith.constant 1 : index
    %c1_40 = arith.constant 1 : index
    %c0_41 = arith.constant 0 : index
    %40 = vector.load %arg17[%c1_39, %c1_40, %c0_41] : memref<18x18x128xf32, #tpu.memory_space<vmem>>, vector<16x16x128xf32>
    %41 = vector.shape_cast %40 : vector<16x16x128xf32> to vector<256x128xf32>
    %42 = arith.truncf %41 : vector<256x128xf32> to vector<256x128xbf16>
    %c4 = arith.constant 4 : index
    %c0_42 = arith.constant 0 : index
    %c0_43 = arith.constant 0 : index
    %43 = vector.load %arg4[%c4, %c0_42, %c0_43] : memref<9x128x128xbf16, #tpu.memory_space<vmem>>, vector<1x128x128xbf16>
    %44 = vector.shape_cast %43 : vector<1x128x128xbf16> to vector<128x128xbf16>
    %cst_44 = arith.constant dense<0.000000e+00> : vector<256x128xf32>
    %45 = tpu.matmul %42, %44, %cst_44 {dimension_numbers = #tpu.dot_dimension_numbers<[1], [0], [0], [1], [0, 0, 1, 1], [], []>} : vector<256x128xbf16>, vector<128x128xbf16>, vector<256x128xf32> -> vector<256x128xf32>
    %46 = arith.addf %39, %45 : vector<256x128xf32>
    %c1_45 = arith.constant 1 : index
    %c2_46 = arith.constant 2 : index
    %c0_47 = arith.constant 0 : index
    %47 = vector.load %arg17[%c1_45, %c2_46, %c0_47] : memref<18x18x128xf32, #tpu.memory_space<vmem>>, vector<16x16x128xf32>
    %48 = vector.shape_cast %47 : vector<16x16x128xf32> to vector<256x128xf32>
    %49 = arith.truncf %48 : vector<256x128xf32> to vector<256x128xbf16>
    %c5 = arith.constant 5 : index
    %c0_48 = arith.constant 0 : index
    %c0_49 = arith.constant 0 : index
    %50 = vector.load %arg4[%c5, %c0_48, %c0_49] : memref<9x128x128xbf16, #tpu.memory_space<vmem>>, vector<1x128x128xbf16>
    %51 = vector.shape_cast %50 : vector<1x128x128xbf16> to vector<128x128xbf16>
    %cst_50 = arith.constant dense<0.000000e+00> : vector<256x128xf32>
    %52 = tpu.matmul %49, %51, %cst_50 {dimension_numbers = #tpu.dot_dimension_numbers<[1], [0], [0], [1], [0, 0, 1, 1], [], []>} : vector<256x128xbf16>, vector<128x128xbf16>, vector<256x128xf32> -> vector<256x128xf32>
    %53 = arith.addf %46, %52 : vector<256x128xf32>
    %c2_51 = arith.constant 2 : index
    %c0_52 = arith.constant 0 : index
    %c0_53 = arith.constant 0 : index
    %54 = vector.load %arg17[%c2_51, %c0_52, %c0_53] : memref<18x18x128xf32, #tpu.memory_space<vmem>>, vector<16x16x128xf32>
    %55 = vector.shape_cast %54 : vector<16x16x128xf32> to vector<256x128xf32>
    %56 = arith.truncf %55 : vector<256x128xf32> to vector<256x128xbf16>
    %c6 = arith.constant 6 : index
    %c0_54 = arith.constant 0 : index
    %c0_55 = arith.constant 0 : index
    %57 = vector.load %arg4[%c6, %c0_54, %c0_55] : memref<9x128x128xbf16, #tpu.memory_space<vmem>>, vector<1x128x128xbf16>
    %58 = vector.shape_cast %57 : vector<1x128x128xbf16> to vector<128x128xbf16>
    %cst_56 = arith.constant dense<0.000000e+00> : vector<256x128xf32>
    %59 = tpu.matmul %56, %58, %cst_56 {dimension_numbers = #tpu.dot_dimension_numbers<[1], [0], [0], [1], [0, 0, 1, 1], [], []>} : vector<256x128xbf16>, vector<128x128xbf16>, vector<256x128xf32> -> vector<256x128xf32>
    %60 = arith.addf %53, %59 : vector<256x128xf32>
    %c2_57 = arith.constant 2 : index
    %c1_58 = arith.constant 1 : index
    %c0_59 = arith.constant 0 : index
    %61 = vector.load %arg17[%c2_57, %c1_58, %c0_59] : memref<18x18x128xf32, #tpu.memory_space<vmem>>, vector<16x16x128xf32>
    %62 = vector.shape_cast %61 : vector<16x16x128xf32> to vector<256x128xf32>
    %63 = arith.truncf %62 : vector<256x128xf32> to vector<256x128xbf16>
    %c7 = arith.constant 7 : index
    %c0_60 = arith.constant 0 : index
    %c0_61 = arith.constant 0 : index
    %64 = vector.load %arg4[%c7, %c0_60, %c0_61] : memref<9x128x128xbf16, #tpu.memory_space<vmem>>, vector<1x128x128xbf16>
    %65 = vector.shape_cast %64 : vector<1x128x128xbf16> to vector<128x128xbf16>
    %cst_62 = arith.constant dense<0.000000e+00> : vector<256x128xf32>
    %66 = tpu.matmul %63, %65, %cst_62 {dimension_numbers = #tpu.dot_dimension_numbers<[1], [0], [0], [1], [0, 0, 1, 1], [], []>} : vector<256x128xbf16>, vector<128x128xbf16>, vector<256x128xf32> -> vector<256x128xf32>
    %67 = arith.addf %60, %66 : vector<256x128xf32>
    %c2_63 = arith.constant 2 : index
    %c2_64 = arith.constant 2 : index
    %c0_65 = arith.constant 0 : index
    %68 = vector.load %arg17[%c2_63, %c2_64, %c0_65] : memref<18x18x128xf32, #tpu.memory_space<vmem>>, vector<16x16x128xf32>
    %69 = vector.shape_cast %68 : vector<16x16x128xf32> to vector<256x128xf32>
    %70 = arith.truncf %69 : vector<256x128xf32> to vector<256x128xbf16>
    %c8 = arith.constant 8 : index
    %c0_66 = arith.constant 0 : index
    %c0_67 = arith.constant 0 : index
    %71 = vector.load %arg4[%c8, %c0_66, %c0_67] : memref<9x128x128xbf16, #tpu.memory_space<vmem>>, vector<1x128x128xbf16>
    %72 = vector.shape_cast %71 : vector<1x128x128xbf16> to vector<128x128xbf16>
    %cst_68 = arith.constant dense<0.000000e+00> : vector<256x128xf32>
    %73 = tpu.matmul %70, %72, %cst_68 {dimension_numbers = #tpu.dot_dimension_numbers<[1], [0], [0], [1], [0, 0, 1, 1], [], []>} : vector<256x128xbf16>, vector<128x128xbf16>, vector<256x128xf32> -> vector<256x128xf32>
    %74 = arith.addf %67, %73 : vector<256x128xf32>
    %c0_69 = arith.constant 0 : index
    %c0_70 = arith.constant 0 : index
    %75 = vector.load %arg5[%c0_69, %c0_70] : memref<1x128xf32, #tpu.memory_space<vmem>>, vector<1x128xf32>
    %76 = vector.broadcast %75 : vector<1x128xf32> to vector<256x128xf32>
    %77 = arith.addf %74, %76 : vector<256x128xf32>
    %cst_71 = arith.constant 0.000000e+00 : f32
    %78 = vector.broadcast %cst_71 : f32 to vector<256x128xf32>
    %79 = arith.maximumf %77, %78 : vector<256x128xf32>
    %80 = arith.truncf %79 : vector<256x128xf32> to vector<256x128xbf16>
    %c0_72 = arith.constant 0 : index
    %c0_73 = arith.constant 0 : index
    %81 = vector.load %arg6[%c0_72, %c0_73] : memref<128x128xbf16, #tpu.memory_space<vmem>>, vector<128x128xbf16>
    %cst_74 = arith.constant dense<0.000000e+00> : vector<256x128xf32>
    %82 = tpu.matmul %80, %81, %cst_74 {dimension_numbers = #tpu.dot_dimension_numbers<[1], [0], [0], [1], [0, 0, 1, 1], [], []>} : vector<256x128xbf16>, vector<128x128xbf16>, vector<256x128xf32> -> vector<256x128xf32>
    %c0_75 = arith.constant 0 : index
    %c0_76 = arith.constant 0 : index
    %83 = vector.load %arg7[%c0_75, %c0_76] : memref<1x128xf32, #tpu.memory_space<vmem>>, vector<1x128xf32>
    %84 = vector.broadcast %83 : vector<1x128xf32> to vector<256x128xf32>
    %85 = arith.addf %82, %84 : vector<256x128xf32>
    %86 = arith.addf %85, %6 : vector<256x128xf32>
    %cst_77 = arith.constant 0.000000e+00 : f32
    %87 = vector.broadcast %cst_77 : f32 to vector<256x128xf32>
    %88 = arith.maximumf %86, %87 : vector<256x128xf32>
    %cst_78 = arith.constant 0.000000e+00 : f32
    %89 = vector.broadcast %cst_78 : f32 to vector<18x18x128xf32>
    %c0_79 = arith.constant 0 : index
    %c0_80 = arith.constant 0 : index
    %c0_81 = arith.constant 0 : index
    %90 = vector.load %arg17[%c0_79, %c0_80, %c0_81] : memref<18x18x128xf32, #tpu.memory_space<vmem>>, vector<18x18x128xf32>
    tpu.vector_store %arg17[%c0_79, %c0_80, %c0_81], %89 {strides = array<i32>} : memref<18x18x128xf32, #tpu.memory_space<vmem>>, vector<18x18x128xf32>,
    %91 = vector.shape_cast %88 : vector<256x128xf32> to vector<16x16x128xf32>
    %c1_82 = arith.constant 1 : index
    %c1_83 = arith.constant 1 : index
    %c0_84 = arith.constant 0 : index
    %92 = vector.load %arg17[%c1_82, %c1_83, %c0_84] : memref<18x18x128xf32, #tpu.memory_space<vmem>>, vector<16x16x128xf32>
    tpu.vector_store %arg17[%c1_82, %c1_83, %c0_84], %91 {strides = array<i32>} : memref<18x18x128xf32, #tpu.memory_space<vmem>>, vector<16x16x128xf32>,
    %cst_85 = arith.constant 0.000000e+00 : f32
    %93 = vector.broadcast %cst_85 : f32 to vector<256x128xf32>
    %c0_86 = arith.constant 0 : index
    %c0_87 = arith.constant 0 : index
    %c0_88 = arith.constant 0 : index
    %94 = vector.load %arg17[%c0_86, %c0_87, %c0_88] : memref<18x18x128xf32, #tpu.memory_space<vmem>>, vector<16x16x128xf32>
    %95 = vector.shape_cast %94 : vector<16x16x128xf32> to vector<256x128xf32>
    %96 = arith.truncf %95 : vector<256x128xf32> to vector<256x128xbf16>
    %c0_89 = arith.constant 0 : index
    %c0_90 = arith.constant 0 : index
    %c0_91 = arith.constant 0 : index
    %97 = vector.load %arg8[%c0_89, %c0_90, %c0_91] : memref<8x128x128xbf16, #tpu.memory_space<vmem>>, vector<1x128x128xbf16>
    %98 = vector.shape_cast %97 : vector<1x128x128xbf16> to vector<128x128xbf16>
    %cst_92 = arith.constant dense<0.000000e+00> : vector<256x128xf32>
    %99 = tpu.matmul %96, %98, %cst_92 {dimension_numbers = #tpu.dot_dimension_numbers<[1], [0], [0], [1], [0, 0, 1, 1], [], []>} : vector<256x128xbf16>, vector<128x128xbf16>, vector<256x128xf32> -> vector<256x128xf32>
    %100 = arith.addf %93, %99 : vector<256x128xf32>
    %c0_93 = arith.constant 0 : index
    %c1_94 = arith.constant 1 : index
    %c0_95 = arith.constant 0 : index
    %101 = vector.load %arg17[%c0_93, %c1_94, %c0_95] : memref<18x18x128xf32, #tpu.memory_space<vmem>>, vector<16x16x128xf32>
    %102 = vector.shape_cast %101 : vector<16x16x128xf32> to vector<256x128xf32>
    %103 = arith.truncf %102 : vector<256x128xf32> to vector<256x128xbf16>
    %c1_96 = arith.constant 1 : index
    %c0_97 = arith.constant 0 : index
    %c0_98 = arith.constant 0 : index
    %104 = vector.load %arg8[%c1_96, %c0_97, %c0_98] : memref<8x128x128xbf16, #tpu.memory_space<vmem>>, vector<1x128x128xbf16>
    %105 = vector.shape_cast %104 : vector<1x128x128xbf16> to vector<128x128xbf16>
    %cst_99 = arith.constant dense<0.000000e+00> : vector<256x128xf32>
    %106 = tpu.matmul %103, %105, %cst_99 {dimension_numbers = #tpu.dot_dimension_numbers<[1], [0], [0], [1], [0, 0, 1, 1], [], []>} : vector<256x128xbf16>, vector<128x128xbf16>, vector<256x128xf32> -> vector<256x128xf32>
    %107 = arith.addf %100, %106 : vector<256x128xf32>
    %c0_100 = arith.constant 0 : index
    %c2_101 = arith.constant 2 : index
    %c0_102 = arith.constant 0 : index
    %108 = vector.load %arg17[%c0_100, %c2_101, %c0_102] : memref<18x18x128xf32, #tpu.memory_space<vmem>>, vector<16x16x128xf32>
    %109 = vector.shape_cast %108 : vector<16x16x128xf32> to vector<256x128xf32>
    %110 = arith.truncf %109 : vector<256x128xf32> to vector<256x128xbf16>
    %c2_103 = arith.constant 2 : index
    %c0_104 = arith.constant 0 : index
    %c0_105 = arith.constant 0 : index
    %111 = vector.load %arg8[%c2_103, %c0_104, %c0_105] : memref<8x128x128xbf16, #tpu.memory_space<vmem>>, vector<1x128x128xbf16>
    %112 = vector.shape_cast %111 : vector<1x128x128xbf16> to vector<128x128xbf16>
    %cst_106 = arith.constant dense<0.000000e+00> : vector<256x128xf32>
    %113 = tpu.matmul %110, %112, %cst_106 {dimension_numbers = #tpu.dot_dimension_numbers<[1], [0], [0], [1], [0, 0, 1, 1], [], []>} : vector<256x128xbf16>, vector<128x128xbf16>, vector<256x128xf32> -> vector<256x128xf32>
    %114 = arith.addf %107, %113 : vector<256x128xf32>
    %c1_107 = arith.constant 1 : index
    %c0_108 = arith.constant 0 : index
    %c0_109 = arith.constant 0 : index
    %115 = vector.load %arg17[%c1_107, %c0_108, %c0_109] : memref<18x18x128xf32, #tpu.memory_space<vmem>>, vector<16x16x128xf32>
    %116 = vector.shape_cast %115 : vector<16x16x128xf32> to vector<256x128xf32>
    %117 = arith.truncf %116 : vector<256x128xf32> to vector<256x128xbf16>
    %c3_110 = arith.constant 3 : index
    %c0_111 = arith.constant 0 : index
    %c0_112 = arith.constant 0 : index
    %118 = vector.load %arg8[%c3_110, %c0_111, %c0_112] : memref<8x128x128xbf16, #tpu.memory_space<vmem>>, vector<1x128x128xbf16>
    %119 = vector.shape_cast %118 : vector<1x128x128xbf16> to vector<128x128xbf16>
    %cst_113 = arith.constant dense<0.000000e+00> : vector<256x128xf32>
    %120 = tpu.matmul %117, %119, %cst_113 {dimension_numbers = #tpu.dot_dimension_numbers<[1], [0], [0], [1], [0, 0, 1, 1], [], []>} : vector<256x128xbf16>, vector<128x128xbf16>, vector<256x128xf32> -> vector<256x128xf32>
    %121 = arith.addf %114, %120 : vector<256x128xf32>
    %c1_114 = arith.constant 1 : index
    %c1_115 = arith.constant 1 : index
    %c0_116 = arith.constant 0 : index
    %122 = vector.load %arg17[%c1_114, %c1_115, %c0_116] : memref<18x18x128xf32, #tpu.memory_space<vmem>>, vector<16x16x128xf32>
    %123 = vector.shape_cast %122 : vector<16x16x128xf32> to vector<256x128xf32>
    %124 = arith.truncf %123 : vector<256x128xf32> to vector<256x128xbf16>
    %c0_117 = arith.constant 0 : index
    %c0_118 = arith.constant 0 : index
    %125 = vector.load %arg9[%c0_117, %c0_118] : memref<128x256xbf16, #tpu.memory_space<vmem>>, vector<128x256xbf16>
    %cst_119 = arith.constant dense<0.000000e+00> : vector<256x256xf32>
    %126 = tpu.matmul %124, %125, %cst_119 {dimension_numbers = #tpu.dot_dimension_numbers<[1], [0], [0], [1], [0, 0, 1, 1], [], []>} : vector<256x128xbf16>, vector<128x256xbf16>, vector<256x256xf32> -> vector<256x256xf32>
    %127 = vector.extract_strided_slice %126 {offsets = [0, 0], sizes = [256, 128], strides = [1, 1]} : vector<256x256xf32> to vector<256x128xf32>
    %128 = arith.addf %121, %127 : vector<256x128xf32>
    %129 = vector.extract_strided_slice %126 {offsets = [0, 128], sizes = [256, 128], strides = [1, 1]} : vector<256x256xf32> to vector<256x128xf32>
    %c0_120 = arith.constant 0 : index
    %c0_121 = arith.constant 0 : index
    %130 = vector.load %arg11[%c0_120, %c0_121] : memref<1x128xf32, #tpu.memory_space<vmem>>, vector<1x128xf32>
    %131 = vector.broadcast %130 : vector<1x128xf32> to vector<256x128xf32>
    %132 = arith.addf %129, %131 : vector<256x128xf32>
    %c1_122 = arith.constant 1 : index
    %c2_123 = arith.constant 2 : index
    %c0_124 = arith.constant 0 : index
    %133 = vector.load %arg17[%c1_122, %c2_123, %c0_124] : memref<18x18x128xf32, #tpu.memory_space<vmem>>, vector<16x16x128xf32>
    %134 = vector.shape_cast %133 : vector<16x16x128xf32> to vector<256x128xf32>
    %135 = arith.truncf %134 : vector<256x128xf32> to vector<256x128xbf16>
    %c4_125 = arith.constant 4 : index
    %c0_126 = arith.constant 0 : index
    %c0_127 = arith.constant 0 : index
    %136 = vector.load %arg8[%c4_125, %c0_126, %c0_127] : memref<8x128x128xbf16, #tpu.memory_space<vmem>>, vector<1x128x128xbf16>
    %137 = vector.shape_cast %136 : vector<1x128x128xbf16> to vector<128x128xbf16>
    %cst_128 = arith.constant dense<0.000000e+00> : vector<256x128xf32>
    %138 = tpu.matmul %135, %137, %cst_128 {dimension_numbers = #tpu.dot_dimension_numbers<[1], [0], [0], [1], [0, 0, 1, 1], [], []>} : vector<256x128xbf16>, vector<128x128xbf16>, vector<256x128xf32> -> vector<256x128xf32>
    %139 = arith.addf %128, %138 : vector<256x128xf32>
    %c2_129 = arith.constant 2 : index
    %c0_130 = arith.constant 0 : index
    %c0_131 = arith.constant 0 : index
    %140 = vector.load %arg17[%c2_129, %c0_130, %c0_131] : memref<18x18x128xf32, #tpu.memory_space<vmem>>, vector<16x16x128xf32>
    %141 = vector.shape_cast %140 : vector<16x16x128xf32> to vector<256x128xf32>
    %142 = arith.truncf %141 : vector<256x128xf32> to vector<256x128xbf16>
    %c5_132 = arith.constant 5 : index
    %c0_133 = arith.constant 0 : index
    %c0_134 = arith.constant 0 : index
    %143 = vector.load %arg8[%c5_132, %c0_133, %c0_134] : memref<8x128x128xbf16, #tpu.memory_space<vmem>>, vector<1x128x128xbf16>
    %144 = vector.shape_cast %143 : vector<1x128x128xbf16> to vector<128x128xbf16>
    %cst_135 = arith.constant dense<0.000000e+00> : vector<256x128xf32>
    %145 = tpu.matmul %142, %144, %cst_135 {dimension_numbers = #tpu.dot_dimension_numbers<[1], [0], [0], [1], [0, 0, 1, 1], [], []>} : vector<256x128xbf16>, vector<128x128xbf16>, vector<256x128xf32> -> vector<256x128xf32>
    %146 = arith.addf %139, %145 : vector<256x128xf32>
    %c2_136 = arith.constant 2 : index
    %c1_137 = arith.constant 1 : index
    %c0_138 = arith.constant 0 : index
    %147 = vector.load %arg17[%c2_136, %c1_137, %c0_138] : memref<18x18x128xf32, #tpu.memory_space<vmem>>, vector<16x16x128xf32>
    %148 = vector.shape_cast %147 : vector<16x16x128xf32> to vector<256x128xf32>
    %149 = arith.truncf %148 : vector<256x128xf32> to vector<256x128xbf16>
    %c6_139 = arith.constant 6 : index
    %c0_140 = arith.constant 0 : index
    %c0_141 = arith.constant 0 : index
    %150 = vector.load %arg8[%c6_139, %c0_140, %c0_141] : memref<8x128x128xbf16, #tpu.memory_space<vmem>>, vector<1x128x128xbf16>
    %151 = vector.shape_cast %150 : vector<1x128x128xbf16> to vector<128x128xbf16>
    %cst_142 = arith.constant dense<0.000000e+00> : vector<256x128xf32>
    %152 = tpu.matmul %149, %151, %cst_142 {dimension_numbers = #tpu.dot_dimension_numbers<[1], [0], [0], [1], [0, 0, 1, 1], [], []>} : vector<256x128xbf16>, vector<128x128xbf16>, vector<256x128xf32> -> vector<256x128xf32>
    %153 = arith.addf %146, %152 : vector<256x128xf32>
    %c2_143 = arith.constant 2 : index
    %c2_144 = arith.constant 2 : index
    %c0_145 = arith.constant 0 : index
    %154 = vector.load %arg17[%c2_143, %c2_144, %c0_145] : memref<18x18x128xf32, #tpu.memory_space<vmem>>, vector<16x16x128xf32>
    %155 = vector.shape_cast %154 : vector<16x16x128xf32> to vector<256x128xf32>
    %156 = arith.truncf %155 : vector<256x128xf32> to vector<256x128xbf16>
    %c7_146 = arith.constant 7 : index
    %c0_147 = arith.constant 0 : index
    %c0_148 = arith.constant 0 : index
    %157 = vector.load %arg8[%c7_146, %c0_147, %c0_148] : memref<8x128x128xbf16, #tpu.memory_space<vmem>>, vector<1x128x128xbf16>
    %158 = vector.shape_cast %157 : vector<1x128x128xbf16> to vector<128x128xbf16>
    %cst_149 = arith.constant dense<0.000000e+00> : vector<256x128xf32>
    %159 = tpu.matmul %156, %158, %cst_149 {dimension_numbers = #tpu.dot_dimension_numbers<[1], [0], [0], [1], [0, 0, 1, 1], [], []>} : vector<256x128xbf16>, vector<128x128xbf16>, vector<256x128xf32> -> vector<256x128xf32>
    %160 = arith.addf %153, %159 : vector<256x128xf32>
    %c0_150 = arith.constant 0 : index
    %c0_151 = arith.constant 0 : index
    %161 = vector.load %arg10[%c0_150, %c0_151] : memref<1x128xf32, #tpu.memory_space<vmem>>, vector<1x128xf32>
    %162 = vector.broadcast %161 : vector<1x128xf32> to vector<256x128xf32>
    %163 = arith.addf %160, %162 : vector<256x128xf32>
    %cst_152 = arith.constant 0.000000e+00 : f32
    %164 = vector.broadcast %cst_152 : f32 to vector<256x128xf32>
    %165 = arith.maximumf %163, %164 : vector<256x128xf32>
    %166 = arith.truncf %165 : vector<256x128xf32> to vector<256x128xbf16>
    %c0_153 = arith.constant 0 : index
    %c0_154 = arith.constant 0 : index
    %167 = vector.load %arg12[%c0_153, %c0_154] : memref<128x128xbf16, #tpu.memory_space<vmem>>, vector<128x128xbf16>
    %cst_155 = arith.constant dense<0.000000e+00> : vector<256x128xf32>
    %168 = tpu.matmul %166, %167, %cst_155 {dimension_numbers = #tpu.dot_dimension_numbers<[1], [0], [0], [1], [0, 0, 1, 1], [], []>} : vector<256x128xbf16>, vector<128x128xbf16>, vector<256x128xf32> -> vector<256x128xf32>
    %c0_156 = arith.constant 0 : index
    %c0_157 = arith.constant 0 : index
    %169 = vector.load %arg13[%c0_156, %c0_157] : memref<1x128xf32, #tpu.memory_space<vmem>>, vector<1x128xf32>
    %170 = vector.broadcast %169 : vector<1x128xf32> to vector<256x128xf32>
    %171 = arith.addf %168, %170 : vector<256x128xf32>
    %172 = arith.addf %171, %132 : vector<256x128xf32>
    %cst_158 = arith.constant 0.000000e+00 : f32
    %173 = vector.broadcast %cst_158 : f32 to vector<256x128xf32>
    %174 = arith.maximumf %172, %173 : vector<256x128xf32>
    %175 = tpu.iota {dimensions = array<i32: 0>} : vector<16x16x128xi32>
    %176 = tpu.iota {dimensions = array<i32: 1>} : vector<16x16x128xi32>
    %c1_i32 = arith.constant 1 : i32
    %177 = vector.broadcast %c1_i32 : i32 to vector<16x16x128xi32>
    %178 = arith.andi %175, %177 : vector<16x16x128xi32>
    %c0_i32 = arith.constant 0 : i32
    %179 = vector.broadcast %c0_i32 : i32 to vector<16x16x128xi32>
    %180 = arith.cmpi eq, %178, %179 : vector<16x16x128xi32>
    %c1_i32_159 = arith.constant 1 : i32
    %181 = vector.broadcast %c1_i32_159 : i32 to vector<16x16x128xi32>
    %182 = arith.andi %176, %181 : vector<16x16x128xi32>
    %c0_i32_160 = arith.constant 0 : i32
    %183 = vector.broadcast %c0_i32_160 : i32 to vector<16x16x128xi32>
    %184 = arith.cmpi eq, %182, %183 : vector<16x16x128xi32>
    %185 = arith.andi %180, %184 : vector<16x16x128xi1>
    %186 = arith.extui %185 : vector<16x16x128xi1> to vector<16x16x128xi32>
    %187 = arith.sitofp %186 : vector<16x16x128xi32> to vector<16x16x128xf32>
    %188 = vector.shape_cast %187 : vector<16x16x128xf32> to vector<256x128xf32>
    %189 = arith.mulf %174, %188 : vector<256x128xf32>
    %c0_161 = arith.constant 0 : index
    %c0_162 = arith.constant 0 : index
    %190 = vector.load %arg14[%c0_161, %c0_162] : memref<128x128xf32, #tpu.memory_space<vmem>>, vector<128x128xf32>
    %cst_163 = arith.constant dense<0.000000e+00> : vector<256x128xf32>
    %191 = tpu.matmul %189, %190, %cst_163 {dimension_numbers = #tpu.dot_dimension_numbers<[1], [0], [0], [1], [0, 0, 1, 1], [], []>} : vector<256x128xf32>, vector<128x128xf32>, vector<256x128xf32> -> vector<256x128xf32>
    %cst_164 = arith.constant dense<0.000000e+00> : vector<128xf32>
    %192 = vector.multi_reduction <add>, %191, %cst_164 [0] : vector<256x128xf32> to vector<128xf32>
    %193 = vector.shape_cast %192 : vector<128xf32> to vector<1x128xf32>
    %cst_165 = arith.constant 1.562500e-02 : f32
    %194 = vector.broadcast %cst_165 : f32 to vector<1x128xf32>
    %195 = arith.mulf %193, %194 : vector<1x128xf32>
    %c0_166 = arith.constant 0 : index
    %c0_167 = arith.constant 0 : index
    %196 = vector.load %arg15[%c0_166, %c0_167] : memref<1x128xf32, #tpu.memory_space<vmem>>, vector<1x128xf32>
    %197 = arith.addf %195, %196 : vector<1x128xf32>
    %198 = vector.shape_cast %197 : vector<1x128xf32> to vector<1x1x128xf32>
    %c0_168 = arith.constant 0 : index
    %c0_169 = arith.constant 0 : index
    %c0_170 = arith.constant 0 : index
    %199 = vector.load %arg16[%c0_168, %c0_169, %c0_170] : memref<1x1x128xf32, #tpu.memory_space<vmem>>, vector<1x1x128xf32>
    tpu.vector_store %arg16[%c0_168, %c0_169, %c0_170], %198 {strides = array<i32>} : memref<1x1x128xf32, #tpu.memory_space<vmem>>, vector<1x1x128xf32>,
    return
  }
  func.func @transform_0(%arg0: i32) -> (i32, i32, i32) {
    %c0_i32 = arith.constant 0 : i32
    %c0_i32_0 = arith.constant 0 : i32
    %c0_i32_1 = arith.constant 0 : i32
    return %arg0, %c0_i32, %c0_i32_0 : i32, i32, i32
  }
  func.func @transform_1(%arg0: i32) -> (i32, i32) {
    %c0_i32 = arith.constant 0 : i32
    %c0_i32_0 = arith.constant 0 : i32
    %c0_i32_1 = arith.constant 0 : i32
    return %c0_i32, %c0_i32_0 : i32, i32
  }
  func.func @transform_2(%arg0: i32) -> (i32, i32) {
    %c0_i32 = arith.constant 0 : i32
    %c0_i32_0 = arith.constant 0 : i32
    %c0_i32_1 = arith.constant 0 : i32
    return %c0_i32, %c0_i32_0 : i32, i32
  }
  func.func @transform_3(%arg0: i32) -> (i32, i32, i32) {
    %c0_i32 = arith.constant 0 : i32
    %c0_i32_0 = arith.constant 0 : i32
    %c0_i32_1 = arith.constant 0 : i32
    %c0_i32_2 = arith.constant 0 : i32
    return %c0_i32, %c0_i32_0, %c0_i32_1 : i32, i32, i32
  }
  func.func @transform_4(%arg0: i32) -> (i32, i32) {
    %c0_i32 = arith.constant 0 : i32
    %c0_i32_0 = arith.constant 0 : i32
    %c0_i32_1 = arith.constant 0 : i32
    return %c0_i32, %c0_i32_0 : i32, i32
  }
  func.func @transform_5(%arg0: i32) -> (i32, i32) {
    %c0_i32 = arith.constant 0 : i32
    %c0_i32_0 = arith.constant 0 : i32
    %c0_i32_1 = arith.constant 0 : i32
    return %c0_i32, %c0_i32_0 : i32, i32
  }
  func.func @transform_6(%arg0: i32) -> (i32, i32) {
    %c0_i32 = arith.constant 0 : i32
    %c0_i32_0 = arith.constant 0 : i32
    %c0_i32_1 = arith.constant 0 : i32
    return %c0_i32, %c0_i32_0 : i32, i32
  }
  func.func @transform_7(%arg0: i32) -> (i32, i32, i32) {
    %c0_i32 = arith.constant 0 : i32
    %c0_i32_0 = arith.constant 0 : i32
    %c0_i32_1 = arith.constant 0 : i32
    %c0_i32_2 = arith.constant 0 : i32
    return %c0_i32, %c0_i32_0, %c0_i32_1 : i32, i32, i32
  }
  func.func @transform_8(%arg0: i32) -> (i32, i32) {
    %c0_i32 = arith.constant 0 : i32
    %c0_i32_0 = arith.constant 0 : i32
    %c0_i32_1 = arith.constant 0 : i32
    return %c0_i32, %c0_i32_0 : i32, i32
  }
  func.func @transform_9(%arg0: i32) -> (i32, i32) {
    %c0_i32 = arith.constant 0 : i32
    %c0_i32_0 = arith.constant 0 : i32
    %c0_i32_1 = arith.constant 0 : i32
    return %c0_i32, %c0_i32_0 : i32, i32
  }
  func.func @transform_10(%arg0: i32) -> (i32, i32) {
    %c0_i32 = arith.constant 0 : i32
    %c0_i32_0 = arith.constant 0 : i32
    %c0_i32_1 = arith.constant 0 : i32
    return %c0_i32, %c0_i32_0 : i32, i32
  }
  func.func @transform_11(%arg0: i32) -> (i32, i32) {
    %c0_i32 = arith.constant 0 : i32
    %c0_i32_0 = arith.constant 0 : i32
    %c0_i32_1 = arith.constant 0 : i32
    return %c0_i32, %c0_i32_0 : i32, i32
  }
  func.func @transform_12(%arg0: i32) -> (i32, i32) {
    %c0_i32 = arith.constant 0 : i32
    %c0_i32_0 = arith.constant 0 : i32
    %c0_i32_1 = arith.constant 0 : i32
    return %c0_i32, %c0_i32_0 : i32, i32
  }
  func.func @transform_13(%arg0: i32) -> (i32, i32) {
    %c0_i32 = arith.constant 0 : i32
    %c0_i32_0 = arith.constant 0 : i32
    %c0_i32_1 = arith.constant 0 : i32
    return %c0_i32, %c0_i32_0 : i32, i32
  }
  func.func @transform_14(%arg0: i32) -> (i32, i32) {
    %c0_i32 = arith.constant 0 : i32
    %c0_i32_0 = arith.constant 0 : i32
    %c0_i32_1 = arith.constant 0 : i32
    return %c0_i32, %c0_i32_0 : i32, i32
  }
  func.func @transform_15(%arg0: i32) -> (i32, i32, i32) {
    %c0_i32 = arith.constant 0 : i32
    %c0_i32_0 = arith.constant 0 : i32
    %c0_i32_1 = arith.constant 0 : i32
    return %arg0, %c0_i32, %c0_i32_0 : i32, i32, i32
  }
}

</mosaic_0001>

<bundles_post_ra>
// kernel: _lambda_.1
= control target key start
LH: loop header
LB: loop body
LE: loop exit
PB: predicated region body
PF: predicated region fallthrough
CT: control target
= control target key end

     0   :  { %s13281_s0 = inlined_call_operand.vmem [shape: bf16[2,256,128], index: 0, kind: input, shape index: {}]   ;;  %s13282_s1 = inlined_call_operand.hbm [shape: bf16[128,128], index: 1, kind: input, shape index: {}]   ;;  %s13283_s2 = inlined_call_operand.hbm [shape: f32[1,128], index: 2, kind: input, shape index: {}]   ;;  %s13284_s3 = inlined_call_operand.vmem [shape: bf16[9,128,128], index: 3, kind: input, shape index: {}]   ;;  %s13285_s4 = inlined_call_operand.vmem [shape: f32[1,128], index: 4, kind: input, shape index: {}]   ;;  %s13286_s5 = inlined_call_operand.hbm [shape: bf16[128,128], index: 5, kind: input, shape index: {}]   ;;  %s13287_s6 = inlined_call_operand.vmem [shape: f32[1,128], index: 6, kind: input, shape index: {}]   ;;  %s13288_s7 = inlined_call_operand.hbm [shape: bf16[8,128,128], index: 7, kind: input, shape index: {}]   ;;  %s13289_s8 = inlined_call_operand.vmem [shape: bf16[128,256], index: 8, kind: input, shape index: {}]   ;;  %s13290_s9 = inlined_call_operand.vmem [shape: f32[1,128], index: 9, kind: input, shape index: {}]   ;;  %s13291_s10 = inlined_call_operand.vmem [shape: f32[1,128], index: 10, kind: input, shape index: {}]   ;;  %s13292_s11 = inlined_call_operand.hbm [shape: bf16[128,128], index: 11, kind: input, shape index: {}]   ;;  %s13293_s12 = inlined_call_operand.vmem [shape: f32[1,128], index: 12, kind: input, shape index: {}]   ;;  %s13294_s13 = inlined_call_operand.vmem [shape: f32[128,128], index: 13, kind: input, shape index: {}]   ;;  %s13295_s14 = inlined_call_operand.vmem [shape: f32[1,128], index: 14, kind: input, shape index: {}]   ;;  %s13296_s15 = inlined_call_operand.hbm [shape: f32[2,1,128], index: 15, kind: output, shape index: {}]  }
   0x1   :  { %13383 = sst [smem:[#allocation144_spill]] %s13283_s2 }
   0x2   :  { %13384 = sst [smem:[#allocation145_spill]] %s13288_s7 }
   0x3   :  { %20 = vsyncpa [#allocation4], 0 }
   0x4   :  { %21 = vsyncpa [#allocation7], 0 }
   0x5   :  { %22 = vsyncpa [#allocation10], 0 }
   0x6   :  { %23 = vsyncpa [#allocation5], 0 }
   0x7   :  { %25 = vsyncpa [#allocation5 + $0x1], 0  ;;  %s10320_s18 = smov 0   ;;  %s10322_s19 = smov 0  }
   0x8   :  { %s10324_s20 = smov 0   ;;  %s10326_s21 = smov 0  }
   0x9 LB: > { %13385 = sst [smem:[#allocation17_spill]] %s10215_s18  ;;  %s10341_s22 = sadd.s32 4294967295, %s10227_s21   ;;  %s10227_s21 = sphi %s10326_s21, %s13864_s21   ;;  %s10223_s20 = sphi %s10324_s20, %s13866_s20   ;;  %s10219_s19 = sphi %s10322_s19, %s13868_s19   ;;  %s10215_s18 = sphi %s10320_s18, %s13867_s18  }
   0xa   : > { %13386 = sst [smem:[#allocation18_spill]] %s10223_s20  ;;  %s7795_s23 = sadd.s32 4294967294, %s10227_s21  }
   0xb   : > { %13387 = sst [smem:[#allocation19_spill]] %s10227_s21  ;;  %s10345_s24 = sadd.s32 1, %s10227_s21  }
   0xc   : > { %13388 = sst [smem:[#allocation20_spill]] %s10345_s24  ;;  %s358_s25 = sadd.s32 1, %s10223_s20 }
   0xd   : > { %s355_s26 = ssub.s32 %s10227_s21, %s10345_s24  ;;  %p368_p0 = scmp.ne.s32.totalorder %s10223_s20, %s10219_s19 }
   0xe   : > { %p356_p1 = scmp.eq.s32.totalorder %s355_s26, 0  ;;  %p369_p2 = scmp.eq.s32.totalorder %s10341_s22, 1 }
   0xf   : > { %p374_p3 = scmp.ne.s32.totalorder %s10219_s19, %s10215_s18  ;;  %p375_p4 = scmp.eq.s32.totalorder %s7795_s23, 1 }
  0x10   : > { %s10356_s27 = scalar_select %p356_p1, %s10223_s20, %s358_s25  }
  0x11   : > { %p10358_p5 = por %p369_p2, %p368_p0  ;;  %p10362_p6 = por %p375_p4, %p374_p3 }
  0x12   : > { %13389 = sst [smem:[#allocation21_spill]] %s10356_s27  ;;  %p7796_p7 = scmp.ge.s32.totalorder %s10227_s21, 1 }
  0x13   : > { %s13391_s29 = scalar_select %p10362_p6, 1, 0 }
  0x14   : > { %p382_p8 = scmp.lt.s32.totalorder %s10227_s21, 3  ;;  %p13302_p9 = scmp.eq.s32.totalorder %s10341_s22, 0 }
  0x15   : > { %13392 = sst [smem:[#allocation22_spill]] %s13391_s29  ;;  %s10229_s16 = smov [#allocation6]  }
  0x16   : > { %p10369_p10 = pnand %p7796_p7, %p382_p8  ;;  %s408_s17 = sshll.u32 %s10229_s16, 4  ;;  %s409_s17 = int_to_ptr.vmem [resolvable:$true] %s408_s17 }
  0x17   : > { %s10230_s25 = smov [#allocation9]   ;;  %s10231_s27 = smov [#allocation3]  }
  0x18   : > { %p9749_p11 = pneg %p10369_p10  ;;  %s440_s26 = sshll.u32 %s10230_s25, 4  ;;  %s10381_s26 = int_to_ptr.vmem [resolvable:$true] %s440_s26 }
  0x19   : > { %s394_s20 = sshll.u32 %s10231_s27, 4  ;;  %s10036_s16 = scalar_lea.vmem %s409_s17, 16  ;;  %s395_s20 = int_to_ptr.vmem [resolvable:$true] %s394_s20 }
  0x1a   : > { %p10377_p12 = pnand %p13302_p9, %p9749_p11  ;;  %p10037_p0 = scmp.ne.s32.totalorder %s409_s17, %s10036_s16 }
  0x1b   : > { %s10043_s29 = scalar_lea.vmem %s409_s17, 32  ;;  %p10044_p3 = scmp.lt.s32.totalorder %s409_s17, %s409_s17 }
  0x1c   : > { %p10385_p13 = pneg %p10377_p12  ;;  %p10045_p4 = scmp.lt.s32.totalorder %s10043_s29, %s10036_s16 }
  0x1e   : > { %p10039_p1 = pnand %p10037_p0, %p10385_p13  ;;  %p10046_p7 = por %p10045_p4, %p10044_p3 }
  0x20   : > { %p10040_p2 = pneg %p10039_p1 }
  0x22   : > { %p10047_p8 = pnand %p10046_p7, %p10040_p2 }
  0x24   : > { %10050 = shalt.err (!%p10047_p8)
}
  0x25   : > { %s13396_s2 = sld [smem:[#allocation144_spill]]  ;;  %s10062_s18 = scalar_lea.vmem %s10381_s26, 8192 }
  0x26   : > { %p10063_p11 = scmp.ne.s32.totalorder %s10381_s26, %s10062_s18  ;;  %p10070_p9 = scmp.lt.s32.totalorder %s10381_s26, %s10381_s26 }
  0x27   : > { %p10071_p3 = scmp.lt.s32.totalorder %s10062_s18, %s10062_s18 }
  0x28   : > { %p10065_p0 = pnand %p10063_p11, %p10385_p13 }
  0x29   : > { %p10072_p2 = por %p10071_p3, %p10070_p9 }
  0x2a   : > { %p10066_p1 = pneg %p10065_p0 }
  0x2b   : > { %9755 = dma.hbm_to_vmem [thread:$0]  (!%p10377_p12), %s13396_s2, 16, %s409_s17, [#allocation7]  }
  0x2c   : > { %p10073_p4 = pnand %p10072_p2, %p10066_p1 }
  0x2e   : > { %10076 = shalt.err (!%p10073_p4)
}
  0x2f   : > { %s10232_s29 = smov 64   ;;  %s10233_s16 = smov 4  }
  0x30   : > { %s13397_s7 = sld [smem:[#allocation145_spill]]  ;;  %s10088_s25 = scalar_lea.vmem %s395_s20, 1024 }
  0x31   : > { %p10089_p7 = scmp.ne.s32.totalorder %s395_s20, %s10088_s25  ;;  %p10096_p11 = scmp.lt.s32.totalorder %s395_s20, %s395_s20 }
  0x32   : > { %p10097_p0 = scmp.lt.s32.totalorder %s10088_s25, %s10088_s25 }
  0x33   : > { %p10091_p9 = pnand %p10089_p7, %p10385_p13 }
  0x34   : > { %p10098_p1 = por %p10097_p0, %p10096_p11 }
  0x35   : > { %p10092_p8 = pneg %p10091_p9 }
  0x36   : > { %9761 = dma.hbm_to_vmem [thread:$0]  (!%p10377_p12), %s13397_s7, 8192, %s10381_s26, [#allocation10], %s10232_s29, %s10232_s29, %s10233_s16  }
  0x37   : > { %p10099_p3 = pnand %p10098_p1, %p10092_p8 }
  0x39   : > { %10102 = shalt.err (!%p10099_p3)
}
  0x3a   : > { %9752 = dma.hbm_to_vmem [thread:$0]  (!%p10377_p12), %s13282_s1, 1024, %s395_s20, [#allocation4], %s10232_s29, %s10232_s29, %s10233_s16  }
  0x3b   : > { %s10234_s26 = smov [#allocation8]   ;;  %s10235_s27 = smov [#allocation11]  }
  0x3c   : > { %s424_s17 = sshll.u32 %s10234_s26, 4  ;;  %s462_s7 = sshll.u32 %s10235_s27, 4  ;;  %s425_s17 = int_to_ptr.vmem [resolvable:$true] %s424_s17  ;;  %s463_s7 = int_to_ptr.vmem [resolvable:$true] %s462_s7 }
  0x3d   : > { %s10114_s21 = scalar_lea.vmem %s425_s17, 1024  ;;  %p10122_p9 = scmp.lt.s32.totalorder %s425_s17, %s425_s17 }
  0x3e   : > { %p10115_p2 = scmp.ne.s32.totalorder %s425_s17, %s10114_s21  ;;  %p10123_p8 = scmp.lt.s32.totalorder %s10114_s21, %s10114_s21 }
  0x40   : > { %p10117_p4 = pnand %p10115_p2, %p10385_p13  ;;  %p10124_p11 = por %p10123_p8, %p10122_p9 }
  0x42   : > { %p10118_p7 = pneg %p10117_p4 }
  0x44   : > { %p10125_p0 = pnand %p10124_p11, %p10118_p7 }
  0x46   : > { %10128 = shalt.err (!%p10125_p0)
}
  0x47   : > { %9758 = dma.hbm_to_vmem [thread:$0]  (!%p10377_p12), %s13286_s5, 1024, %s425_s17, [#allocation7], %s10232_s29, %s10232_s29, %s10233_s16  }
  0x48   : > { %s10140_s25 = scalar_lea.vmem %s463_s7, 1024  ;;  %p10148_p4 = scmp.lt.s32.totalorder %s463_s7, %s463_s7 }
  0x49   : > { %p10141_p1 = scmp.ne.s32.totalorder %s463_s7, %s10140_s25  ;;  %p10149_p9 = scmp.lt.s32.totalorder %s10140_s25, %s10140_s25 }
  0x4b   : > { %p10143_p3 = pnand %p10141_p1, %p10385_p13  ;;  %p10150_p7 = por %p10149_p9, %p10148_p4 }
  0x4d   : > { %p10144_p2 = pneg %p10143_p3 }
  0x4f   : > { %p10151_p8 = pnand %p10150_p7, %p10144_p2 }
  0x51   : > { %10154 = shalt.err (!%p10151_p8)
}
  0x52   : > { %9764 = dma.hbm_to_vmem [thread:$0]  (!%p10377_p12), %s13292_s11, 1024, %s463_s7, [#allocation10], %s10232_s29, %s10232_s29, %s10233_s16  }
  0x53   : > { %495 = sbr.rel (%p10369_p10) target bundleno = 2006 (0x7d6), region = 80 }
  0x58   : > { %p13398_p13 = scmp.eq.s32.totalorder %s10341_s22, 0 }
  0x5a   : > { %10198 = dma.done.wait (%p13398_p13), [#allocation4], 1024   ;;  %p13399_p11 = pmov %p13398_p13 }
  0x5c   : > { %10200 = vsyncadd (%p13399_p11), [#allocation4], 4294966272  ;;  %p13400_p0 = pmov %p13399_p11 }
  0x5e   : > { %10202 = dma.done.wait (%p13400_p0), [#allocation7], 1040   ;;  %p13401_p1 = pmov %p13400_p0 }
  0x5f   : > { %p13402_p3 = pmov %p13400_p0 }
  0x60   : > { %10204 = vsyncadd (%p13401_p1), [#allocation7], 4294966256 }
  0x61   : > { %10206 = dma.done.wait (%p13402_p3), [#allocation10], 9216   ;;  %p13403_p12 = pmov %p13400_p0 }
  0x62   : > { %p558_p10 = scmp.lt.s32.totalorder %s10341_s22, 1  ;;  %v9821_v0 = vld [vmem:[#allocation3 + $0x38] sm:$0xff]   ;;  %v9822_v1 = vld [vmem:[#allocation3 + $0x30] sm:$0xff]   ;;  %v9823_v2 = vld [vmem:[#allocation3 + $0x28] sm:$0xff]   ;;  %v13304_v34 = vmov 0.0   ;;  %v10237_v44 = vmov 0.0|0.0  }
  0x63   : > { %10208 = vsyncadd (%p13403_p12), [#allocation10], 4294958080  ;;  %8671 = vmatprep.subr.bf16.mxu0 %v9821_v0  ;;  %9711 = vmatprep.subr.bf16.mxu1 %v9821_v0  ;;  %v9824_v3 = vld [vmem:[#allocation3 + $0x20] sm:$0xff]   ;;  %v9825_v5 = vld [vmem:[#allocation3 + $0x18] sm:$0xff]   ;;  %930 = vst [vmem:[#allocation2 + $0x30] sm:$0xff] %v13304_v34  ;;  %s556_s18 = sand.u32 1, %s10219_s19  }
  0x64   : > { %s559_s7 = scalar_select %p558_p10, %s10341_s22, 1  ;;  %8672 = vmatpush3.bf16.msra.mxu0 %v9821_v0  ;;  %9719 = vmatpush3.bf16.msra.mxu1 %v9821_v0  ;;  %v9826_v6 = vld [vmem:[#allocation3 + $0x10] sm:$0xff]   ;;  %v9827_v8 = vld [vmem:[#allocation3 + $0x8] sm:$0xff]   ;;  %v9828_v9 = vld [vmem:[#allocation3] sm:$0xff]   ;;  %931 = vst [vmem:[#allocation2 + $0x38] sm:$0xff] %v13304_v34 }
  0x65   : > { %8673 = vmatprep.subr.bf16.mxu0 %v9822_v1  ;;  %9712 = vmatprep.subr.bf16.mxu1 %v9822_v1  ;;  %v9845_v10 = vld [vmem:[%s13284_s3 + $0x78] sm:$0xff]   ;;  %v9847_v16 = vld [vmem:[%s13284_s3 + $0x70] sm:$0xff]   ;;  %v9849_v18 = vld [vmem:[%s13284_s3 + $0x68] sm:$0xff]   ;;  %924 = vst [vmem:[#allocation2] sm:$0xff] %v13304_v34  ;;  %s8139_s30 = sshll.u32 %s10341_s22, 4  ;;  %s557_s23 = scalar_lea.vmem [#allocation12], %s556_s18 }
  0x66   : > { %s8142_s24 = sshll.u32 %s559_s7, 7  ;;  %v9846_v12 = vld [vmem:[%s13284_s3 + $0x38] sm:$0xff]   ;;  %v9848_v17 = vld [vmem:[%s13284_s3 + $0x30] sm:$0xff]   ;;  %v9850_v19 = vld [vmem:[%s13284_s3 + $0x28] sm:$0xff]   ;;  %925 = vst [vmem:[#allocation2 + $0x8] sm:$0xff] %v13304_v34  ;;  %s7690_s16 = sshll.u32 %s557_s23, 4  ;;  %s7691_s16 = int_to_ptr.vmem [resolvable:$true] %s7690_s16 }
  0x67   : > { %s10460_s29 = scalar_lea.vmem %s13281_s0, %s8142_s24  ;;  %v9851_v24 = vld [vmem:[%s13284_s3 + $0x60] sm:$0xff]   ;;  %v9853_v32 = vld [vmem:[%s13284_s3 + $0x58] sm:$0xff]   ;;  %v9855_v33 = vld [vmem:[%s13284_s3 + $0x50] sm:$0xff]   ;;  %926 = vst [vmem:[#allocation2 + $0x10] sm:$0x3] %v13304_v34  ;;  %s7688_s27 = scalar_lea.hbm %s13296_s15, %s8139_s30 }
  0x68   : > { %8674 = vmatpush3.bf16.msra.mxu0 %v9822_v1  ;;  %9720 = vmatpush3.bf16.msra.mxu1 %v9822_v1  ;;  %v9829_v4 = vld [vmem:[%s10460_s29] sm:$0xff]   ;;  %v9830_v11 = vld [vmem:[%s10460_s29 + $0x8] sm:$0xff]   ;;  %v9831_v13 = vld [vmem:[%s10460_s29 + $0x10] sm:$0xff]   ;;  %927 = vst [vmem:[#allocation2 + $0x18] sm:$0xff] %v13304_v34  ;;  %s7678_s2 = scalar_lea.sflag [#allocation5], %s556_s18  ;;  %s10155_s20 = scalar_lea.vmem %s7691_s16, 16 }
  0x69   : > { %8675 = vmatprep.subr.bf16.mxu0 %v9823_v2  ;;  %9713 = vmatprep.subr.bf16.mxu1 %v9823_v2  ;;  %v9837_v7 = vld [vmem:[%s10460_s29 + $0x40] sm:$0xff]   ;;  %v9838_v14 = vld [vmem:[%s10460_s29 + $0x48] sm:$0xff]   ;;  %v9839_v15 = vld [vmem:[%s10460_s29 + $0x50] sm:$0xff]   ;;  %928 = vst [vmem:[#allocation2 + $0x20] sm:$0xff] %v13304_v34  ;;  %p10156_p2 = scmp.ne.s32.totalorder %s7691_s16, %s10155_s20  ;;  %s10239_s25 = smov [#allocation12]  }
  0x6a   : > { %8687 = vmatprep.mubr.bf16.mxu0 %v9829_v4  ;;  %8703 = vmatprep.mubr.bf16.mxu1 %v9837_v7  ;;  %v9832_v20 = vld [vmem:[%s10460_s29 + $0x18] sm:$0xff]   ;;  %v9833_v22 = vld [vmem:[%s10460_s29 + $0x20] sm:$0xff]   ;;  %v9834_v26 = vld [vmem:[%s10460_s29 + $0x28] sm:$0xff]   ;;  %929 = vst [vmem:[#allocation2 + $0x28] sm:$0x3] %v13304_v34 }
  0x6b   : > { %v9840_v21 = vld [vmem:[%s10460_s29 + $0x58] sm:$0xff]   ;;  %v9841_v23 = vld [vmem:[%s10460_s29 + $0x60] sm:$0xff]   ;;  %v9842_v27 = vld [vmem:[%s10460_s29 + $0x68] sm:$0xff]   ;;  %932 = vst [vmem:[#allocation2 + $0x40] sm:$0x3] %v13304_v34  ;;  %p10157_p4 = pnand %p10156_p2, %p10358_p5 }
  0x6c   : > { %8676 = vmatpush3.bf16.msra.mxu0 %v9823_v2  ;;  %9721 = vmatpush3.bf16.msra.mxu1 %v9823_v2  ;;  %v9852_v25 = vld [vmem:[%s13284_s3 + $0x20] sm:$0xff]   ;;  %v9835_v28 = vld [vmem:[%s10460_s29 + $0x30] sm:$0xff]   ;;  %v9836_v30 = vld [vmem:[%s10460_s29 + $0x38] sm:$0xff]   ;;  %933 = vst [vmem:[#allocation2 + $0x48] sm:$0xff] %v13304_v34 }
  0x6d   : > { %8677 = vmatprep.subr.bf16.mxu0 %v9824_v3  ;;  %9714 = vmatprep.subr.bf16.mxu1 %v9824_v3  ;;  %v9843_v29 = vld [vmem:[%s10460_s29 + $0x70] sm:$0xff]   ;;  %v9844_v31 = vld [vmem:[%s10460_s29 + $0x78] sm:$0xff]   ;;  %934 = vst [vmem:[#allocation2 + $0x50] sm:$0xff] %v13304_v34  ;;  %935 = vst [vmem:[#allocation2 + $0x58] sm:$0x3] %v13304_v34  ;;  %p10158_p9 = pneg %p10157_p4  ;;  %s10159_s29 = sshll.u32 %s10239_s25, 4  ;;  %s10160_s29 = int_to_ptr.vmem [resolvable:$false] %s10159_s29 }
  0x6e   : > { %936 = vst [vmem:[#allocation2 + $0x60] sm:$0xff] %v13304_v34  ;;  %937 = vst [vmem:[#allocation2 + $0x68] sm:$0xff] %v13304_v34  ;;  %v9854_v35 = vld [vmem:[%s13284_s3 + $0x18] sm:$0xff]   ;;  %v9857_v36 = vld [vmem:[%s13284_s3 + $0x48] sm:$0xff]   ;;  %s10161_s22 = scalar_lea.vmem %s10160_s29, 32  ;;  %p10162_p7 = scmp.lt.s32.totalorder %s7691_s16, %s10160_s29 }
  0x6f   : > { %938 = vst [vmem:[#allocation2 + $0x70] sm:$0x3] %v13304_v34  ;;  %939 = vst [vmem:[#allocation2 + $0x78] sm:$0xff] %v13304_v34  ;;  %v9856_v37 = vld [vmem:[%s13284_s3 + $0x10] sm:$0xff]   ;;  %v9859_v38 = vld [vmem:[%s13284_s3 + $0x40] sm:$0xff]   ;;  %p10163_p8 = scmp.lt.s32.totalorder %s10161_s22, %s10155_s20 }
  0x70   : > { %8678 = vmatpush3.bf16.msra.mxu0 %v9824_v3  ;;  %9722 = vmatpush3.bf16.msra.mxu1 %v9824_v3  ;;  %940 = vst [vmem:[#allocation2 + $0x80] sm:$0xff] %v13304_v34  ;;  %941 = vst [vmem:[#allocation2 + $0x88] sm:$0x3] %v13304_v34  ;;  %v1075_v39 = vld [vmem:[#allocation2 + $0x1] sm:$0xff]  ;;  %v1076_v40 = vld [vmem:[#allocation2 + $0x9] sm:$0xff] }
  0x71   : > { %8679 = vmatprep.subr.bf16.mxu0 %v9825_v5  ;;  %9715 = vmatprep.subr.bf16.mxu1 %v9825_v5  ;;  %942 = vst [vmem:[#allocation2 + $0x90] sm:$0xff] %v13304_v34  ;;  %943 = vst [vmem:[#allocation2 + $0x98] sm:$0xff] %v13304_v34  ;;  %v1107_v41 = vpack.c.bf16 %v1076_v40, %v1075_v39  ;;  %v9858_v42 = vld [vmem:[%s13284_s3 + $0x8] sm:$0xff]   ;;  %v9860_v43 = vld [vmem:[%s13284_s3] sm:$0xff]   ;;  %p10164_p13 = por %p10163_p8, %p10162_p7 }
  0x72   : > { %944 = vst [vmem:[#allocation2 + $0xa0] sm:$0x3] %v13304_v34  ;;  %945 = vst [vmem:[#allocation2 + $0xa8] sm:$0xff] %v13304_v34  ;;  %v9861_v45 = vld [vmem:[%s13284_s3 + $0xb8] sm:$0xff]   ;;  %v10589_v47 = vld [vmem:[#allocation2 + $0x2] sm:$0xff] }
  0x73   : > { %946 = vst [vmem:[#allocation2 + $0xb0] sm:$0xff] %v13304_v34  ;;  %947 = vst [vmem:[#allocation2 + $0xb8] sm:$0x3] %v13304_v34  ;;  %v10586_v46 = vld [vmem:[%s13284_s3 + $0xf8] sm:$0xff]   ;;  %v10591_v48 = vld [vmem:[#allocation2 + $0xa] sm:$0xff]  ;;  %p10165_p11 = pnand %p10164_p13, %p10158_p9 }
  0x74   : > { %8680 = vmatpush3.bf16.msra.mxu0 %v9825_v5  ;;  %9723 = vmatpush3.bf16.msra.mxu1 %v9825_v5  ;;  %948 = vst [vmem:[#allocation2 + $0xc0] sm:$0xff] %v13304_v34  ;;  %949 = vst [vmem:[#allocation2 + $0xc8] sm:$0xff] %v13304_v34  ;;  %v10598_v50 = vld [vmem:[#allocation6] ss:$0 sm:$0xff] }
  0x75   : > { %8681 = vmatprep.subr.bf16.mxu0 %v9826_v6  ;;  %9716 = vmatprep.subr.bf16.mxu1 %v9826_v6  ;;  %950 = vst [vmem:[#allocation2 + $0xd0] sm:$0x3] %v13304_v34  ;;  %951 = vst [vmem:[#allocation2 + $0xd8] sm:$0xff] %v13304_v34  ;;  %v9862_v7 = vld [vmem:[%s13284_s3 + $0xb0] sm:$0xff]  }
  0x76   : > { %952 = vst [vmem:[#allocation2 + $0xe0] sm:$0xff] %v13304_v34  ;;  %953 = vst [vmem:[#allocation2 + $0xe8] sm:$0x3] %v13304_v34 }
  0x77   : > { %954 = vst [vmem:[#allocation2 + $0xf0] sm:$0xff] %v13304_v34  ;;  %955 = vst [vmem:[#allocation2 + $0xf8] sm:$0xff] %v13304_v34 }
  0x78   : > { %8682 = vmatpush3.bf16.msra.mxu0 %v9826_v6  ;;  %9724 = vmatpush3.bf16.msra.mxu1 %v9826_v6  ;;  %956 = vst [vmem:[#allocation2 + $0x100] sm:$0x3] %v13304_v34  ;;  %957 = vst [vmem:[#allocation2 + $0x108] sm:$0xff] %v13304_v34 }
  0x79   : > { %8683 = vmatprep.subr.bf16.mxu0 %v9827_v8  ;;  %9717 = vmatprep.subr.bf16.mxu1 %v9827_v8  ;;  %958 = vst [vmem:[#allocation2 + $0x110] sm:$0xff] %v13304_v34  ;;  %959 = vst [vmem:[#allocation2 + $0x118] sm:$0x3] %v13304_v34 }
  0x7a   : > { %960 = vst [vmem:[#allocation2 + $0x120] sm:$0xff] %v13304_v34  ;;  %961 = vst [vmem:[#allocation2 + $0x128] sm:$0xff] %v13304_v34 }
  0x7b   : > { %962 = vst [vmem:[#allocation2 + $0x130] sm:$0x3] %v13304_v34  ;;  %963 = vst [vmem:[#allocation2 + $0x138] sm:$0xff] %v13304_v34 }
  0x7c   : > { %8684 = vmatpush3.bf16.msra.mxu0 %v9827_v8  ;;  %9725 = vmatpush3.bf16.msra.mxu1 %v9827_v8  ;;  %964 = vst [vmem:[#allocation2 + $0x140] sm:$0xff] %v13304_v34  ;;  %965 = vst [vmem:[#allocation2 + $0x148] sm:$0x3] %v13304_v34 }
  0x7d   : > { %8685 = vmatprep.subr.bf16.mxu0 %v9828_v9  ;;  %9718 = vmatprep.subr.bf16.mxu1 %v9828_v9  ;;  %966 = vst [vmem:[#allocation2 + $0x150] sm:$0xff] %v13304_v34  ;;  %967 = vst [vmem:[#allocation2 + $0x158] sm:$0xff] %v13304_v34 }
  0x7e   : > { %968 = vst [vmem:[#allocation2 + $0x160] sm:$0x3] %v13304_v34  ;;  %969 = vst [vmem:[#allocation2 + $0x168] sm:$0xff] %v13304_v34 }
  0x7f   : > { %970 = vst [vmem:[#allocation2 + $0x170] sm:$0xff] %v13304_v34  ;;  %971 = vst [vmem:[#allocation2 + $0x178] sm:$0x3] %v13304_v34 }
  0x80   : > { %8686 = vmatpush3.bf16.msra.mxu0 %v9828_v9  ;;  %9726 = vmatpush3.bf16.msra.mxu1 %v9828_v9  ;;  %972 = vst [vmem:[#allocation2 + $0x180] sm:$0xff] %v13304_v34  ;;  %973 = vst [vmem:[#allocation2 + $0x188] sm:$0xff] %v13304_v34 }
  0x81   : > { %8719 = vmatprep.subr.bf16.mxu1 %v9845_v10  ;;  %8767 = vmatprep.subr.bf16.mxu0 %v9846_v12  ;;  %974 = vst [vmem:[#allocation2 + $0x190] sm:$0x3] %v13304_v34  ;;  %975 = vst [vmem:[#allocation2 + $0x198] sm:$0xff] %v13304_v34 }
  0x82   : > { %976 = vst [vmem:[#allocation2 + $0x1a0] sm:$0xff] %v13304_v34  ;;  %977 = vst [vmem:[#allocation2 + $0x1a8] sm:$0x3] %v13304_v34 }
  0x83   : > { %8688 = vmatmul.mubr.bf16.vlgmr.msra.gmra.mxu0 %v9830_v11  ;;  %8704 = vmatmul.mubr.bf16.vlgmr.msra.gmra.mxu1 %v9838_v14  ;;  %4084 = vst [vmem:[#allocation2] sm:$0xff] %v13304_v34  ;;  %4085 = vst [vmem:[#allocation2 + $0x8] sm:$0xff] %v13304_v34 }
  0x84   : > { %8691 = vmatprep.mubr.bf16.mxu0 %v9831_v13  ;;  %8707 = vmatprep.mubr.bf16.mxu1 %v9839_v15  ;;  %4086 = vst [vmem:[#allocation2 + $0x10] sm:$0x3] %v13304_v34 }
  0x85   : > { %8720 = vmatpush3.bf16.msra.mxu1 %v9845_v10  ;;  %8768 = vmatpush3.bf16.msra.mxu0 %v9846_v12 }
  0x86   : > { %8721 = vmatprep.subr.bf16.mxu1 %v9847_v16  ;;  %8769 = vmatprep.subr.bf16.mxu0 %v9848_v17 }
  0x89   : > { %8722 = vmatpush3.bf16.msra.mxu1 %v9847_v16  ;;  %8770 = vmatpush3.bf16.msra.mxu0 %v9848_v17  ;;  %v9863_v17 = vld [vmem:[%s13284_s3 + $0xa8] sm:$0xff]  }
  0x8a   : > { %8723 = vmatprep.subr.bf16.mxu1 %v9849_v18  ;;  %8771 = vmatprep.subr.bf16.mxu0 %v9850_v19 }
  0x8b   : > { %8692 = vmatmul.mubr.bf16.gmra.mxu0 %v9832_v20  ;;  %8708 = vmatmul.mubr.bf16.gmra.mxu1 %v9840_v21 }
  0x8c   : > { %8695 = vmatprep.mubr.bf16.mxu0 %v9833_v22  ;;  %8711 = vmatprep.mubr.bf16.mxu1 %v9841_v23 }
  0x8d   : > { %8724 = vmatpush3.bf16.msra.mxu1 %v9849_v18  ;;  %8772 = vmatpush3.bf16.msra.mxu0 %v9850_v19 }
  0x8e   : > { %8725 = vmatprep.subr.bf16.mxu1 %v9851_v24  ;;  %8773 = vmatprep.subr.bf16.mxu0 %v9852_v25 }
  0x91   : > { %8726 = vmatpush3.bf16.msra.mxu1 %v9851_v24  ;;  %8774 = vmatpush3.bf16.msra.mxu0 %v9852_v25 }
  0x92   : > { %8727 = vmatprep.subr.bf16.mxu1 %v9853_v32  ;;  %8775 = vmatprep.subr.bf16.mxu0 %v9854_v35 }
  0x93   : > { %8696 = vmatmul.mubr.bf16.gmra.mxu0 %v9834_v26  ;;  %8712 = vmatmul.mubr.bf16.gmra.mxu1 %v9842_v27 }
  0x94   : > { %8699 = vmatprep.mubr.bf16.mxu0 %v9835_v28  ;;  %8715 = vmatprep.mubr.bf16.mxu1 %v9843_v29 }
  0x95   : > { %8728 = vmatpush3.bf16.msra.mxu1 %v9853_v32  ;;  %8776 = vmatpush3.bf16.msra.mxu0 %v9854_v35 }
  0x96   : > { %8729 = vmatprep.subr.bf16.mxu1 %v9855_v33  ;;  %8777 = vmatprep.subr.bf16.mxu0 %v9856_v37 }
  0x99   : > { %8730 = vmatpush3.bf16.msra.mxu1 %v9855_v33  ;;  %8778 = vmatpush3.bf16.msra.mxu0 %v9856_v37 }
  0x9a   : > { %8731 = vmatprep.subr.bf16.mxu1 %v9857_v36  ;;  %8779 = vmatprep.subr.bf16.mxu0 %v9858_v42 }
  0x9b   : > { %8700 = vmatmul.mubr.bf16.gmra.mxu0 %v9836_v30  ;;  %8716 = vmatmul.mubr.bf16.gmra.mxu1 %v9844_v31 }
  0x9c   : > { %8735 = vmatprep.mubr.bf16.mxu1 %v1107_v41  ;;  %8783 = vmatprep.mubr.bf16.mxu0 %v10237_v44  ;;  %v9867_v41 = vld [vmem:[%s13284_s3 + $0xf0] sm:$0xff]  }
  0x9d   : > { %8732 = vmatpush3.bf16.msra.mxu1 %v9857_v36  ;;  %8780 = vmatpush3.bf16.msra.mxu0 %v9858_v42  ;;  %v9864_v36 = vld [vmem:[%s13284_s3 + $0xa0] sm:$0xff]  }
  0x9e   : > { %8733 = vmatprep.subr.bf16.mxu1 %v9859_v38  ;;  %8781 = vmatprep.subr.bf16.mxu0 %v9860_v43 }
  0xa1   : > { %8734 = vmatpush3.bf16.msra.mxu1 %v9859_v38  ;;  %8782 = vmatpush3.bf16.msra.mxu0 %v9860_v43 }
  0xa2   : > { %8815 = vmatprep.subr.bf16.mxu1 %v9861_v45  ;;  %8863 = vmatprep.subr.bf16.mxu0 %v10586_v46 }
 0x143   : > { %v8689_v51 = vpop.f32.mrf.mxu0  ;;  %v8705_v52 = vpop.f32.mrf.mxu1 }
 0x144   : > { %v10601_v53 = vadd.f32 %v8689_v51, %v10598_v50  ;;  %v10604_v54 = vadd.f32 %v8705_v52, %v10598_v50 }
 0x145   : > { %v797_v55 = vpop.f32.mrf.mxu0  ;;  %v861_v56 = vpop.f32.mrf.mxu1 }
 0x146   : > { %13404 = vst [vmem:[#allocation23_spill] sm:$0xff] %v10601_v53  ;;  %13405 = vst [vmem:[#allocation24_spill] sm:$0xff] %v10604_v54  ;;  %v10608_v57 = vadd.f32 %v10598_v50, %v797_v55  ;;  %v10612_v58 = vadd.f32 %v10598_v50, %v861_v56 }
 0x147   : > { %981 = vst [vmem:[#allocation2 + $0x31] sm:$0xff] %v10601_v53  ;;  %997 = vst [vmem:[#allocation2 + $0xf1] sm:$0xff] %v10604_v54  ;;  %v8690_v59 = vpop.f32.mrf.mxu0  ;;  %v8706_v60 = vpop.f32.mrf.mxu1 }
 0x148   : > { %13406 = vst [vmem:[#allocation25_spill] sm:$0xff] %v10608_v57  ;;  %13407 = vst [vmem:[#allocation26_spill] sm:$0xff] %v10612_v58  ;;  %v10616_v61 = vadd.f32 %v8690_v59, %v10598_v50  ;;  %v10620_v62 = vadd.f32 %v8706_v60, %v10598_v50 }
 0x149   : > { %979 = vst [vmem:[#allocation2 + $0x19] sm:$0xff] %v10608_v57  ;;  %995 = vst [vmem:[#allocation2 + $0xd9] sm:$0xff] %v10612_v58  ;;  %v800_v63 = vpop.f32.mrf.mxu0  ;;  %v864_v0 = vpop.f32.mrf.mxu1 }
 0x14a   : > { %13408 = vst [vmem:[#allocation27_spill] sm:$0xff] %v10616_v61  ;;  %13409 = vst [vmem:[#allocation28_spill] sm:$0xff] %v10620_v62  ;;  %v10624_v1 = vadd.f32 %v10598_v50, %v800_v63  ;;  %v10628_v2 = vadd.f32 %v10598_v50, %v864_v0  ;;  %v1109_v10 = vpack.c.bf16 %v10616_v61, %v10601_v53 }
 0x14b   : > { %982 = vst [vmem:[#allocation2 + $0x39] sm:$0xff] %v10616_v61  ;;  %998 = vst [vmem:[#allocation2 + $0xf9] sm:$0xff] %v10620_v62  ;;  %v8693_v3 = vpop.f32.mrf.mxu0  ;;  %v8709_v4 = vpop.f32.mrf.mxu1 }
 0x14c   : > { %13410 = vst [vmem:[#allocation29_spill] sm:$0xff] %v10624_v1  ;;  %13411 = vst [vmem:[#allocation30_spill] sm:$0xff] %v10628_v2  ;;  %v10632_v5 = vadd.f32 %v8693_v3, %v10598_v50  ;;  %v1108_v6 = vpack.c.bf16 %v10624_v1, %v10608_v57  ;;  %v10641_v8 = vadd.f32 %v8709_v4, %v10598_v50  ;;  %v9865_v3 = vld [vmem:[%s13284_s3 + $0x98] sm:$0xff]  }
 0x14d   : > { %980 = vst [vmem:[#allocation2 + $0x21] sm:$0xff] %v10624_v1  ;;  %996 = vst [vmem:[#allocation2 + $0xe1] sm:$0xff] %v10628_v2  ;;  %v813_v9 = vpop.f32.mrf.mxu0  ;;  %v877_v11 = vpop.f32.mrf.mxu1 }
 0x14e   : > { %13412 = vst [vmem:[#allocation31_spill] sm:$0xff] %v10632_v5  ;;  %13413 = vst [vmem:[#allocation32_spill] sm:$0xff] %v10641_v8  ;;  %v10647_v12 = vadd.f32 %v10598_v50, %v813_v9  ;;  %8736 = vmatmul.mubr.bf16.vlgmr.msra.gmra.mxu1 %v1108_v6  ;;  %v10651_v13 = vadd.f32 %v10598_v50, %v877_v11  ;;  %v1015_v32 = vld [vmem:[#allocation2 + $0x30] sm:$0xff] }
 0x14f   : > { %985 = vst [vmem:[#allocation2 + $0x61] sm:$0xff] %v10632_v5  ;;  %1001 = vst [vmem:[#allocation2 + $0x121] sm:$0xff] %v10641_v8  ;;  %v8694_v14 = vpop.f32.mrf.mxu0  ;;  %8816 = vmatpush3.bf16.msra.mxu1 %v9861_v45  ;;  %8739 = vmatprep.mubr.bf16.mxu1 %v1109_v10  ;;  %v8710_v15 = vpop.f32.mrf.mxu1  ;;  %v10724_v59 = vld [vmem:[#allocation2 + $0x30] sm:$0xff] }
 0x150   : > { %13414 = vst [vmem:[#allocation33_spill] sm:$0xff] %v10647_v12  ;;  %13415 = vst [vmem:[#allocation34_spill] sm:$0xff] %v10651_v13  ;;  %v10655_v16 = vadd.f32 %v8694_v14, %v10598_v50  ;;  %8817 = vmatprep.subr.bf16.mxu1 %v9862_v7  ;;  %v10662_v18 = vadd.f32 %v8710_v15, %v10598_v50  ;;  %v1013_v22 = vld [vmem:[#allocation2 + $0x18] sm:$0xff] }
 0x151   : > { %983 = vst [vmem:[#allocation2 + $0x49] sm:$0xff] %v10647_v12  ;;  %999 = vst [vmem:[#allocation2 + $0x109] sm:$0xff] %v10651_v13  ;;  %v816_v19 = vpop.f32.mrf.mxu0  ;;  %v880_v20 = vpop.f32.mrf.mxu1  ;;  %v10674_v29 = vld [vmem:[#allocation2 + $0x19] sm:$0xff] }
 0x152   : > { %13416 = vst [vmem:[#allocation35_spill] sm:$0xff] %v10655_v16  ;;  %13417 = vst [vmem:[#allocation36_spill] sm:$0xff] %v10662_v18  ;;  %v10666_v21 = vadd.f32 %v10598_v50, %v816_v19  ;;  %v1016_v23 = vld [vmem:[#allocation2 + $0x38] sm:$0xff]  ;;  %v10670_v24 = vadd.f32 %v10598_v50, %v880_v20  ;;  %v1111_v39 = vpack.c.bf16 %v10655_v16, %v10632_v5  ;;  %v10893_v5 = vld [vmem:[#allocation2 + $0xf0] sm:$0xff] }
 0x153   : > { %986 = vst [vmem:[#allocation2 + $0x69] sm:$0xff] %v10655_v16  ;;  %1002 = vst [vmem:[#allocation2 + $0x129] sm:$0xff] %v10662_v18  ;;  %v8697_v25 = vpop.f32.mrf.mxu0  ;;  %8818 = vmatpush3.bf16.msra.mxu1 %v9862_v7  ;;  %v8713_v27 = vpop.f32.mrf.mxu1  ;;  %v10692_v38 = vpack.c.bf16 %v1016_v23, %v1015_v32  ;;  %v10726_v60 = vld [vmem:[#allocation2 + $0x38] sm:$0xff]  ;;  %v9869_v23 = vld [vmem:[%s13284_s3 + $0xe8] sm:$0xff]  }
 0x154   : > { %13418 = vst [vmem:[#allocation37_spill] sm:$0xff] %v10666_v21  ;;  %13419 = vst [vmem:[#allocation38_spill] sm:$0xff] %v10670_v24  ;;  %v1014_v26 = vld [vmem:[#allocation2 + $0x20] sm:$0xff]  ;;  %v10678_v30 = vadd.f32 %v8697_v25, %v10598_v50  ;;  %v1110_v33 = vpack.c.bf16 %v10666_v21, %v10647_v12  ;;  %8819 = vmatprep.subr.bf16.mxu1 %v9863_v17  ;;  %v10686_v35 = vadd.f32 %v8713_v27, %v10598_v50  ;;  %v1032_v1 = vld [vmem:[#allocation2 + $0xf8] sm:$0xff] }
 0x155   : > { %v10672_v28 = vld [vmem:[#allocation2 + $0x1a] sm:$0xff]  ;;  %984 = vst [vmem:[#allocation2 + $0x51] sm:$0xff] %v10666_v21  ;;  %v10680_v31 = vpack.c.bf16 %v1014_v26, %v1013_v22  ;;  %1000 = vst [vmem:[#allocation2 + $0x111] sm:$0xff] %v10670_v24  ;;  %v829_v37 = vpop.f32.mrf.mxu0  ;;  %v893_v40 = vpop.f32.mrf.mxu1  ;;  %v10699_v42 = vld [vmem:[#allocation2 + $0x22] sm:$0xff] }
 0x156   : > { %13420 = vst [vmem:[#allocation39_spill] sm:$0xff] %v10678_v30  ;;  %13421 = vst [vmem:[#allocation40_spill] sm:$0xff] %v10686_v35  ;;  %v10701_v43 = vld [vmem:[#allocation2 + $0x21] sm:$0xff]  ;;  %v10705_v44 = vadd.f32 %v10598_v50, %v829_v37  ;;  %8740 = vmatmul.mubr.bf16.gmra.mxu1 %v1110_v33  ;;  %v10710_v45 = vadd.f32 %v10598_v50, %v893_v40  ;;  %v9868_v33 = vld [vmem:[%s13284_s3 + $0x90] sm:$0xff]  }
 0x157   : > { %4087 = vst [vmem:[#allocation2 + $0x18] sm:$0xff] %v13304_v34  ;;  %989 = vst [vmem:[#allocation2 + $0x91] sm:$0xff] %v10678_v30  ;;  %8784 = vmatmul.mubr.bf16.vlgmr.msra.gmra.mxu0 %v10680_v31  ;;  %v8698_v51 = vpop.f32.mrf.mxu0  ;;  %8743 = vmatprep.mubr.bf16.mxu1 %v1111_v39  ;;  %v8714_v52 = vpop.f32.mrf.mxu1  ;;  %v1019_v19 = vld [vmem:[#allocation2 + $0x60] sm:$0xff]  ;;  %v1031_v21 = vld [vmem:[#allocation2 + $0xf0] sm:$0xff] }
 0x158   : > { %13422 = vst [vmem:[#allocation41_spill] sm:$0xff] %v10705_v44  ;;  %1005 = vst [vmem:[#allocation2 + $0x151] sm:$0xff] %v10686_v35  ;;  %8787 = vmatprep.mubr.bf16.mxu0 %v10692_v38  ;;  %v10717_v55 = vadd.f32 %v8698_v51, %v10598_v50  ;;  %8820 = vmatpush3.bf16.msra.mxu1 %v9863_v17  ;;  %v10721_v56 = vadd.f32 %v8714_v52, %v10598_v50  ;;  %v1017_v10 = vld [vmem:[#allocation2 + $0x48] sm:$0xff]  ;;  %v9870_v39 = vld [vmem:[%s13284_s3 + $0xe0] sm:$0xff]  }
 0x159   : > { %13423 = vst [vmem:[#allocation42_spill] sm:$0xff] %v10710_v45  ;;  %4089 = vst [vmem:[#allocation2 + $0x28] sm:$0x3] %v13304_v34  ;;  %8864 = vmatpush3.bf16.msra.mxu0 %v10586_v46  ;;  %v832_v63 = vpop.f32.mrf.mxu0  ;;  %8821 = vmatprep.subr.bf16.mxu1 %v9864_v36  ;;  %v896_v0 = vpop.f32.mrf.mxu1  ;;  %v10889_v16 = vld [vmem:[#allocation2 + $0xe0] sm:$0xff]  ;;  %v10899_v57 = vld [vmem:[#allocation2 + $0x108] sm:$0xff] }
 0x15a   : > { %4088 = vst [vmem:[#allocation2 + $0x20] sm:$0xff] %v13304_v34  ;;  %987 = vst [vmem:[#allocation2 + $0x79] sm:$0xff] %v10705_v44  ;;  %8865 = vmatprep.subr.bf16.mxu0 %v9867_v41  ;;  %v10735_v6 = vadd.f32 %v10598_v50, %v832_v63  ;;  %v1020_v46 = vld [vmem:[#allocation2 + $0x68] sm:$0xff]  ;;  %v10739_v7 = vadd.f32 %v10598_v50, %v896_v0  ;;  %v1113_v27 = vpack.c.bf16 %v10717_v55, %v10678_v30  ;;  %v1029_v30 = vld [vmem:[#allocation2 + $0xd8] sm:$0xff] }
 0x15b   : > { %13424 = vst [vmem:[#allocation43_spill] sm:$0xff] %v10717_v55  ;;  %1003 = vst [vmem:[#allocation2 + $0x139] sm:$0xff] %v10710_v45  ;;  %v8701_v9 = vpop.f32.mrf.mxu0  ;;  %v8717_v14 = vpop.f32.mrf.mxu1  ;;  %v10756_v26 = vpack.c.bf16 %v1020_v46, %v1019_v19  ;;  %v10784_v63 = vld [vmem:[#allocation2 + $0x48] sm:$0xff]  ;;  %v1030_v12 = vld [vmem:[#allocation2 + $0xe0] sm:$0xff] }
 0x15c   : > { %13425 = vst [vmem:[#allocation44_spill] sm:$0xff] %v10721_v56  ;;  %13426 = vst [vmem:[#allocation45_spill] sm:$0xff] %v10724_v59  ;;  %v1018_v11 = vld [vmem:[#allocation2 + $0x50] sm:$0xff]  ;;  %v10743_v15 = vadd.f32 %v8701_v9, %v10598_v50  ;;  %v1112_v20 = vpack.c.bf16 %v10735_v6, %v10705_v44  ;;  %8822 = vmatpush3.bf16.msra.mxu1 %v9864_v36  ;;  %v10751_v22 = vadd.f32 %v8717_v14, %v10598_v50  ;;  %v10918_v61 = vld [vmem:[#allocation2 + $0x128] sm:$0xff] }
 0x15d   : > { %13427 = vst [vmem:[#allocation46_spill] sm:$0xff] %v10726_v60  ;;  %990 = vst [vmem:[#allocation2 + $0x99] sm:$0xff] %v10717_v55  ;;  %v10745_v17 = vpack.c.bf16 %v1018_v11, %v1017_v10  ;;  %v845_v25 = vpop.f32.mrf.mxu0  ;;  %8823 = vmatprep.subr.bf16.mxu1 %v9865_v3  ;;  %v909_v32 = vpop.f32.mrf.mxu1  ;;  %8866 = vmatpush3.bf16.msra.mxu0 %v9867_v41  ;;  %v10786_v0 = vld [vmem:[#allocation2 + $0x50] sm:$0xff]  ;;  %v9871_v10 = vld [vmem:[%s13284_s3 + $0x88] sm:$0xff]   ;;  %v10853_v55 = vpack.c.bf16 %v10628_v2, %v10612_v58 }
 0x15e   : > { %13428 = vst [vmem:[#allocation47_spill] sm:$0xff] %v10735_v6  ;;  %1006 = vst [vmem:[#allocation2 + $0x159] sm:$0xff] %v10721_v56  ;;  %v10765_v36 = vadd.f32 %v10598_v50, %v845_v25  ;;  %8744 = vmatmul.mubr.bf16.gmra.mxu1 %v1112_v20  ;;  %v10770_v37 = vadd.f32 %v10598_v50, %v909_v32  ;;  %8867 = vmatprep.subr.bf16.mxu0 %v9869_v23  ;;  %v10895_v2 = vld [vmem:[#allocation2 + $0xf8] sm:$0xff]  ;;  %v10901_v53 = vld [vmem:[#allocation2 + $0x110] sm:$0xff] }
 0x15f   : > { %13429 = vst [vmem:[#allocation48_spill] sm:$0xff] %v10739_v7  ;;  %988 = vst [vmem:[#allocation2 + $0x81] sm:$0xff] %v10735_v6  ;;  %8788 = vmatmul.mubr.bf16.gmra.mxu0 %v10745_v17  ;;  %v8702_v40 = vpop.f32.mrf.mxu0  ;;  %8747 = vmatprep.mubr.bf16.mxu1 %v1113_v27  ;;  %v8718_v41 = vpop.f32.mrf.mxu1  ;;  %v1023_v27 = vld [vmem:[#allocation2 + $0x90] sm:$0xff] }
 0x160   : > { %13430 = vst [vmem:[#allocation49_spill] sm:$0xff] %v10743_v15  ;;  %1004 = vst [vmem:[#allocation2 + $0x141] sm:$0xff] %v10739_v7  ;;  %8791 = vmatprep.mubr.bf16.mxu0 %v10756_v26  ;;  %v10778_v51 = vadd.f32 %v8702_v40, %v10598_v50  ;;  %8824 = vmatpush3.bf16.msra.mxu1 %v9865_v3  ;;  %v10782_v52 = vadd.f32 %v8718_v41, %v10598_v50  ;;  %v10838_v3 = vld [vmem:[%s13284_s3 + $0x138] sm:$0xff]  }
 0x161   : > { %13431 = vst [vmem:[#allocation50_spill] sm:$0xff] %v10751_v22  ;;  %993 = vst [vmem:[#allocation2 + $0xc1] sm:$0xff] %v10743_v15  ;;  %v848_v46 = vpop.f32.mrf.mxu0  ;;  %v912_v9 = vpop.f32.mrf.mxu1  ;;  %8825 = vmatprep.subr.bf16.mxu1 %v9868_v33  ;;  %8868 = vmatpush3.bf16.msra.mxu0 %v9869_v23  ;;  %v1021_v20 = vld [vmem:[#allocation2 + $0x78] sm:$0xff] }
 0x162   : > { %13432 = vst [vmem:[#allocation51_spill] sm:$0xff] %v10765_v36  ;;  %1009 = vst [vmem:[#allocation2 + $0x181] sm:$0xff] %v10751_v22  ;;  %v10795_v11 = vadd.f32 %v10598_v50, %v848_v46  ;;  %v10799_v19 = vadd.f32 %v10598_v50, %v912_v9  ;;  %8869 = vmatprep.subr.bf16.mxu0 %v9870_v39  ;;  %v9872_v50 = vld [vmem:[%s13284_s3 + $0xd8] sm:$0xff]   ;;  %v1115_v41 = vpack.c.bf16 %v10778_v51, %v10743_v15  ;;  %v9874_v46 = vld [vmem:[%s13284_s3 + $0x80] sm:$0xff]  }
 0x163   : > { %13433 = vst [vmem:[#allocation52_spill] sm:$0xff] %v10770_v37  ;;  %991 = vst [vmem:[#allocation2 + $0xa9] sm:$0xff] %v10765_v36  ;;  %v10824_v9 = vld [vmem:[#allocation2 + $0x60] sm:$0xff]  ;;  %v10988_v59 = vld [vmem:[#allocation2 + $0x91] sm:$0xff] }
 0x164   : > { %13434 = vst [vmem:[#allocation53_spill] sm:$0xff] %v10778_v51  ;;  %1007 = vst [vmem:[#allocation2 + $0x169] sm:$0xff] %v10770_v37  ;;  %v1024_v14 = vld [vmem:[#allocation2 + $0x98] sm:$0xff]  ;;  %v10806_v32 = vpack.c.bf16 %v10795_v11, %v10765_v36  ;;  %8826 = vmatpush3.bf16.msra.mxu1 %v9868_v33  ;;  %v9873_v33 = vld [vmem:[%s13284_s3 + $0xd0] sm:$0xff]  }
 0x165   : > { %13435 = vst [vmem:[#allocation54_spill] sm:$0xff] %v10782_v52  ;;  %13436 = vst [vmem:[#allocation55_spill] sm:$0xff] %v10784_v63  ;;  %v10812_v40 = vpack.c.bf16 %v1024_v14, %v1023_v27  ;;  %8870 = vmatpush3.bf16.msra.mxu0 %v9870_v39  ;;  %8827 = vmatprep.subr.bf16.mxu1 %v9871_v10  ;;  %v10826_v14 = vld [vmem:[#allocation2 + $0x68] sm:$0xff]  ;;  %v10990_v60 = vld [vmem:[#allocation2 + $0x99] sm:$0xff] }
 0x166   : > { %13437 = vst [vmem:[#allocation56_spill] sm:$0xff] %v10786_v0  ;;  %994 = vst [vmem:[#allocation2 + $0xc9] sm:$0xff] %v10778_v51  ;;  %v1022_v23 = vld [vmem:[#allocation2 + $0x80] sm:$0xff]  ;;  %8748 = vmatmul.mubr.bf16.gmra.mxu1 %v10806_v32  ;;  %8871 = vmatprep.subr.bf16.mxu0 %v9872_v50  ;;  %v10984_v0 = vld [vmem:[#allocation2 + $0x92] sm:$0xff] }
 0x167   : > { %13438 = vst [vmem:[#allocation57_spill] sm:$0xff] %v10795_v11  ;;  %1010 = vst [vmem:[#allocation2 + $0x189] sm:$0xff] %v10782_v52  ;;  %v10802_v25 = vpack.c.bf16 %v1022_v23, %v1021_v20  ;;  %8751 = vmatprep.mubr.bf16.mxu1 %v1115_v41  ;;  %v10831_v23 = vld [vmem:[#allocation2 + $0x78] sm:$0xff]  ;;  %v10833_v27 = vld [vmem:[#allocation2 + $0x80] sm:$0xff] }
 0x168   : > { %13439 = vst [vmem:[#allocation58_spill] sm:$0xff] %v10799_v19  ;;  %992 = vst [vmem:[#allocation2 + $0xb1] sm:$0xff] %v10795_v11  ;;  %8828 = vmatpush3.bf16.msra.mxu1 %v9871_v10  ;;  %v1027_v15 = vld [vmem:[#allocation2 + $0xc0] sm:$0xff]  ;;  %v9875_v41 = vld [vmem:[%s13284_s3 + $0xc8] sm:$0xff]  }
 0x169   : > { %13440 = vst [vmem:[#allocation59_spill] sm:$0xff] %v10806_v32  ;;  %1008 = vst [vmem:[#allocation2 + $0x171] sm:$0xff] %v10799_v19  ;;  %8792 = vmatmul.mubr.bf16.gmra.mxu0 %v10802_v25  ;;  %v1894_v20 = vld [vmem:[#allocation2 + $0x180] sm:$0xff]  ;;  %8829 = vmatprep.subr.bf16.mxu1 %v9874_v46  ;;  %v1040_v32 = vld [vmem:[#allocation2 + $0x158] sm:$0xff] }
 0x16a   : > { %13441 = vst [vmem:[#allocation60_spill] sm:$0xff] %v10824_v9  ;;  %13442 = vst [vmem:[#allocation61_spill] sm:$0xff] %v10826_v14  ;;  %8795 = vmatprep.mubr.bf16.mxu0 %v10812_v40  ;;  %8872 = vmatpush3.bf16.msra.mxu0 %v9872_v50  ;;  %v10840_v4 = vld [vmem:[#allocation2 + $0x181] sm:$0xff]  ;;  %v13448_v50 = vmov 0.0   ;;  %v10980_v14 = vld [vmem:[#allocation2 + $0x32] sm:$0xff] }
 0x16b   : > { %13443 = vst [vmem:[#allocation62_spill] sm:$0xff] %v10831_v23  ;;  %13444 = vst [vmem:[#allocation63_spill] sm:$0xff] %v10833_v27  ;;  %8873 = vmatprep.subr.bf16.mxu0 %v9873_v33  ;;  %v1025_v34 = vld [vmem:[#allocation2 + $0xa8] sm:$0xff]  ;;  %v10883_v58 = vld [vmem:[#allocation2 + $0xc0] sm:$0xff] }
 0x16c   : > { %13445 = vst [vmem:[#allocation64_spill] sm:$0xff] %v10840_v4  ;;  %13449 = vst [vmem:[#allocation67_spill] sm:$0xff] %v10853_v55  ;;  %8830 = vmatpush3.bf16.msra.mxu1 %v9874_v46  ;;  %v10874_v46 = vld [vmem:[#allocation2 + $0xa8] sm:$0xff]  ;;  %v11038_v51 = vld [vmem:[#allocation2 + $0xd9] sm:$0xff] }
 0x16d   : > { %v1028_v39 = vld [vmem:[#allocation2 + $0xc8] sm:$0xff]  ;;  %8911 = vmatprep.subr.bf16.mxu1 %v10838_v3  ;;  %13452 = vst [vmem:[#allocation70_spill] sm:$0xff] %v10874_v46  ;;  %13455 = vst [vmem:[#allocation73_spill] sm:$0xff] %v10883_v58  ;;  %v10907_v58 = vpack.c.bf16 %v1030_v12, %v1029_v30  ;;  %v10928_v30 = vld [vmem:[#allocation2 + $0x140] sm:$0xff] }
 0x16e   : > { %v1895_v10 = vld [vmem:[#allocation2 + $0x188] sm:$0xff]  ;;  %v10858_v44 = vpack.c.bf16 %v1028_v39, %v1027_v15  ;;  %8874 = vmatpush3.bf16.msra.mxu0 %v9873_v33  ;;  %8752 = vmatmul.mubr.bf16.gmra.mxu1 %v10853_v55  ;;  %v10878_v39 = vld [vmem:[#allocation2 + $0xd8] sm:$0xff]  ;;  %13457 = vst [vmem:[#allocation75_spill] sm:$0xff] %v10889_v16  ;;  %13458 = vst [vmem:[#allocation76_spill] sm:$0xff] %v10893_v5  ;;  %v1119_v15 = vpack.c.bf16 %v10662_v18, %v10641_v8 }
 0x16f   : > { %v10844_v49 = vld [vmem:[#allocation2 + $0x182] sm:$0xff]  ;;  %v1026_v22 = vld [vmem:[#allocation2 + $0xb0] sm:$0xff]  ;;  %v10846_v11 = vpack.c.bf16 %v1895_v10, %v1894_v20  ;;  %v1117_v20 = vpack.c.bf16 %v10620_v62, %v10604_v54  ;;  %v10868_v10 = vld [vmem:[#allocation2 + $0x98] sm:$0xff]  ;;  %13454 = vst [vmem:[#allocation72_spill] sm:$0xff] %v10878_v39  ;;  %8875 = vmatprep.subr.bf16.mxu0 %v9875_v41 }
 0x170   : > { %13446 = vst [vmem:[#allocation65_spill] sm:$0xff] %v10844_v49  ;;  %4132 = vst [vmem:[#allocation2 + $0x180] sm:$0xff] %v13448_v50  ;;  %v10849_v36 = vpack.c.bf16 %v1026_v22, %v1025_v34  ;;  %v9876_v34 = vld [vmem:[%s13284_s3 + $0xc0] sm:$0xff]   ;;  %v10866_v22 = vld [vmem:[#allocation2 + $0x90] sm:$0xff] }
 0x171   : > { %13447 = vst [vmem:[#allocation66_spill] sm:$0xff] %v10846_v11  ;;  %13450 = vst [vmem:[#allocation68_spill] sm:$0xff] %v10866_v22  ;;  %v10876_v33 = vld [vmem:[#allocation2 + $0xb0] sm:$0xff]  ;;  %8755 = vmatprep.mubr.bf16.mxu1 %v1117_v20  ;;  %v10885_v54 = vld [vmem:[#allocation2 + $0xc8] sm:$0xff]  ;;  %v10911_v20 = vpack.c.bf16 %v10670_v24, %v10651_v13 }
 0x172   : > { %13451 = vst [vmem:[#allocation69_spill] sm:$0xff] %v10868_v10  ;;  %8796 = vmatmul.mubr.bf16.gmra.mxu0 %v10849_v36  ;;  %13453 = vst [vmem:[#allocation71_spill] sm:$0xff] %v10876_v33  ;;  %v10916_v39 = vld [vmem:[%s13284_s3 + $0x178] sm:$0xff]   ;;  %v10934_v13 = vld [vmem:[#allocation2 + $0x150] sm:$0xff] }
 0x173   : > { %8799 = vmatprep.mubr.bf16.mxu0 %v10858_v44  ;;  %13456 = vst [vmem:[#allocation74_spill] sm:$0xff] %v10885_v54  ;;  %8876 = vmatpush3.bf16.msra.mxu0 %v9875_v41  ;;  %13459 = vst [vmem:[#allocation77_spill] sm:$0xff] %v10895_v2  ;;  %v10905_v41 = vld [vmem:[#allocation2 + $0x120] sm:$0xff]  ;;  %v10920_v5 = vld [vmem:[#allocation2 + $0x138] sm:$0xff]  ;;  %v10922_v2 = vpack.c.bf16 %v1032_v1, %v1031_v21 }
 0x174   : > { %8877 = vmatprep.subr.bf16.mxu0 %v9876_v34  ;;  %13460 = vst [vmem:[#allocation78_spill] sm:$0xff] %v10899_v57  ;;  %13461 = vst [vmem:[#allocation79_spill] sm:$0xff] %v10901_v53  ;;  %v10936_v1 = vld [vmem:[#allocation2 + $0x158] sm:$0xff]  ;;  %v1033_v21 = vld [vmem:[#allocation2 + $0x108] sm:$0xff] }
 0x175   : > { %13462 = vst [vmem:[#allocation80_spill] sm:$0xff] %v10905_v41  ;;  %13463 = vst [vmem:[#allocation81_spill] sm:$0xff] %v10911_v20  ;;  %v10939_v8 = vld [vmem:[#allocation2 + $0x32] sm:$0xff]  ;;  %v1036_v57 = vld [vmem:[#allocation2 + $0x128] sm:$0xff] }
 0x176   : > { %13464 = vst [vmem:[#allocation82_spill] sm:$0xff] %v10918_v61  ;;  %13465 = vst [vmem:[#allocation83_spill] sm:$0xff] %v10920_v5  ;;  %8756 = vmatmul.mubr.bf16.gmra.mxu1 %v10911_v20  ;;  %v10941_v12 = vld [vmem:[#allocation2 + $0x31] sm:$0xff]  ;;  %v1035_v61 = vld [vmem:[#allocation2 + $0x120] sm:$0xff] }
 0x177   : > { %8878 = vmatpush3.bf16.msra.mxu0 %v9876_v34  ;;  %13466 = vst [vmem:[#allocation84_spill] sm:$0xff] %v10928_v30  ;;  %13467 = vst [vmem:[#allocation85_spill] sm:$0xff] %v10934_v13  ;;  %v1034_v34 = vld [vmem:[#allocation2 + $0x110] sm:$0xff]  ;;  %8759 = vmatprep.mubr.bf16.mxu1 %v1119_v15  ;;  %v10945_v53 = vld [vmem:[#allocation2 + $0x3a] sm:$0xff] }
 0x178   : > { %13468 = vst [vmem:[#allocation86_spill] sm:$0xff] %v10936_v1  ;;  %13469 = vst [vmem:[#allocation87_spill] sm:$0xff] %v10941_v12  ;;  %v10947_v24 = vld [vmem:[#allocation2 + $0x4a] sm:$0xff]  ;;  %v10949_v5 = vld [vmem:[#allocation2 + $0x52] sm:$0xff]  ;;  %8959 = vmatprep.subr.bf16.mxu0 %v10916_v39  ;;  %v11026_v20 = vpack.c.bf16 %v1034_v34, %v1033_v21 }
 0x179   : > { %v10952_v30 = vld [vmem:[#allocation2 + $0x39] sm:$0xff]  ;;  %v10954_v15 = vld [vmem:[#allocation2 + $0x49] sm:$0xff]  ;;  %v10956_v16 = vld [vmem:[#allocation2 + $0x51] sm:$0xff]  ;;  %13480 = vst [vmem:[#allocation98_spill] sm:$0xff] %v10980_v14 }
 0x17a   : > { %8800 = vmatmul.mubr.bf16.gmra.mxu0 %v10907_v58  ;;  %13470 = vst [vmem:[#allocation88_spill] sm:$0xff] %v10952_v30  ;;  %13471 = vst [vmem:[#allocation89_spill] sm:$0xff] %v10954_v15  ;;  %v10958_v54 = vld [vmem:[#allocation2 + $0x168] sm:$0xff]  ;;  %v10960_v46 = vld [vmem:[#allocation2 + $0x170] sm:$0xff] }
 0x17b   : > { %8803 = vmatprep.mubr.bf16.mxu0 %v10922_v2  ;;  %13472 = vst [vmem:[#allocation90_spill] sm:$0xff] %v10956_v16  ;;  %13473 = vst [vmem:[#allocation91_spill] sm:$0xff] %v10958_v54  ;;  %v10962_v41 = vld [vmem:[#allocation2 + $0x62] sm:$0xff]  ;;  %v10964_v13 = vld [vmem:[#allocation2 + $0x6a] sm:$0xff] }
 0x17c   : > { %13474 = vst [vmem:[#allocation92_spill] sm:$0xff] %v10960_v46  ;;  %v10966_v1 = vld [vmem:[#allocation2 + $0x7a] sm:$0xff]  ;;  %v10970_v22 = vld [vmem:[#allocation2 + $0x69] sm:$0xff]  ;;  %13481 = vst [vmem:[#allocation99_spill] sm:$0xff] %v10988_v59 }
 0x17d   : > { %v10968_v33 = vld [vmem:[#allocation2 + $0x61] sm:$0xff]  ;;  %13476 = vst [vmem:[#allocation94_spill] sm:$0xff] %v10970_v22  ;;  %v10972_v10 = vld [vmem:[#allocation2 + $0x79] sm:$0xff]  ;;  %v10974_v23 = vld [vmem:[#allocation2 + $0x18a] sm:$0xff] }
 0x17e   : > { %13475 = vst [vmem:[#allocation93_spill] sm:$0xff] %v10968_v33  ;;  %13477 = vst [vmem:[#allocation95_spill] sm:$0xff] %v10972_v10  ;;  %v10978_v9 = vld [vmem:[#allocation2 + $0x189] sm:$0xff]  ;;  %v10986_v49 = vld [vmem:[#allocation2 + $0x9a] sm:$0xff] }
 0x17f   : > { %13478 = vst [vmem:[#allocation96_spill] sm:$0xff] %v10974_v23  ;;  %13479 = vst [vmem:[#allocation97_spill] sm:$0xff] %v10978_v9  ;;  %v10982_v63 = vld [vmem:[#allocation2 + $0x82] sm:$0xff]  ;;  %v10994_v23 = vld [vmem:[#allocation2 + $0x3a] sm:$0xff] }
 0x180   : > { %13482 = vst [vmem:[#allocation100_spill] sm:$0xff] %v10990_v60  ;;  %v10992_v52 = vld [vmem:[#allocation2 + $0x81] sm:$0xff]  ;;  %13484 = vst [vmem:[#allocation102_spill] sm:$0xff] %v10994_v23  ;;  %v10997_v27 = vld [vmem:[#allocation2 + $0x4a] sm:$0xff] }
 0x181   : > { %13483 = vst [vmem:[#allocation101_spill] sm:$0xff] %v10992_v52  ;;  %4090 = vst [vmem:[#allocation2 + $0x30] sm:$0xff] %v13448_v50  ;;  %v10999_v9 = vld [vmem:[#allocation2 + $0x52] sm:$0xff]  ;;  %v11003_v14 = vld [vmem:[#allocation2 + $0xaa] sm:$0xff] }
 0x182   : > { %13485 = vst [vmem:[#allocation103_spill] sm:$0xff] %v10997_v27  ;;  %13486 = vst [vmem:[#allocation104_spill] sm:$0xff] %v10999_v9  ;;  %v11005_v54 = vld [vmem:[#allocation2 + $0xb2] sm:$0xff]  ;;  %v11007_v46 = vld [vmem:[#allocation2 + $0xc2] sm:$0xff]  ;;  %8804 = vmatmul.mubr.bf16.gmra.mxu0 %v11026_v20 }
 0x183   : > { %4134 = vst [vmem:[#allocation2 + $0x190] sm:$0x3] %v13448_v50  ;;  %4133 = vst [vmem:[#allocation2 + $0x188] sm:$0xff] %v13448_v50  ;;  %v11009_v4 = vld [vmem:[#allocation2 + $0xc1] sm:$0xff]  ;;  %v11011_v52 = vld [vmem:[#allocation2 + $0xa9] sm:$0xff] }
 0x184   : > { %13487 = vst [vmem:[#allocation105_spill] sm:$0xff] %v11009_v4  ;;  %13488 = vst [vmem:[#allocation106_spill] sm:$0xff] %v11011_v52  ;;  %v11013_v23 = vld [vmem:[#allocation2 + $0xb1] sm:$0xff]  ;;  %v11020_v9 = vld [vmem:[#allocation2 + $0x62] sm:$0xff] }
 0x185   : > { %13489 = vst [vmem:[#allocation107_spill] sm:$0xff] %v11013_v23  ;;  %4092 = vst [vmem:[#allocation2 + $0x40] sm:$0x3] %v13448_v50  ;;  %v11022_v27 = vld [vmem:[#allocation2 + $0x6a] sm:$0xff]  ;;  %v11024_v18 = vld [vmem:[#allocation2 + $0x7a] sm:$0xff]  ;;  %v11030_v23 = vpack.c.bf16 %v10739_v7, %v10710_v45  ;;  %v11050_v45 = vpack.c.bf16 %v1036_v57, %v1035_v61 }
 0x186   : > { %4091 = vst [vmem:[#allocation2 + $0x38] sm:$0xff] %v13448_v50  ;;  %4095 = vst [vmem:[#allocation2 + $0x58] sm:$0x3] %v13448_v50  ;;  %v11032_v52 = vld [vmem:[#allocation2 + $0xca] sm:$0xff]  ;;  %v11034_v62 = vld [vmem:[#allocation2 + $0xda] sm:$0xff] }
 0x187   : > { %4093 = vst [vmem:[#allocation2 + $0x48] sm:$0xff] %v13448_v50  ;;  %4094 = vst [vmem:[#allocation2 + $0x50] sm:$0xff] %v13448_v50  ;;  %v11036_v55 = vld [vmem:[#allocation2 + $0xc9] sm:$0xff]  ;;  %v11046_v34 = vld [vmem:[#allocation2 + $0x92] sm:$0xff]  ;;  %8760 = vmatmul.mubr.bf16.gmra.mxu1 %v11030_v23  ;;  %8807 = vmatprep.mubr.bf16.mxu0 %v11050_v45 }
 0x188   : > { %13490 = vst [vmem:[#allocation108_spill] sm:$0xff] %v11020_v9  ;;  %13491 = vst [vmem:[#allocation109_spill] sm:$0xff] %v11022_v27  ;;  %v11043_v21 = vld [vmem:[#allocation2 + $0x82] sm:$0xff]  ;;  %v11048_v7 = vld [vmem:[#allocation2 + $0x9a] sm:$0xff] }
 0x189   : > { %13492 = vst [vmem:[#allocation110_spill] sm:$0xff] %v11024_v18  ;;  %13493 = vst [vmem:[#allocation111_spill] sm:$0xff] %v11030_v23  ;;  %v1121_v18 = vpack.c.bf16 %v10721_v56, %v10686_v35  ;;  %v11054_v27 = vld [vmem:[#allocation2 + $0xe2] sm:$0xff]  ;;  %v11065_v57 = vld [vmem:[#allocation2 + $0xb2] sm:$0xff] }
 0x18a   : > { %13494 = vst [vmem:[#allocation112_spill] sm:$0xff] %v11036_v55  ;;  %13495 = vst [vmem:[#allocation113_spill] sm:$0xff] %v11038_v51  ;;  %v11056_v9 = vld [vmem:[#allocation2 + $0xe1] sm:$0xff]  ;;  %v11071_v35 = vld [vmem:[#allocation2 + $0xf2] sm:$0xff] }
 0x18b   : > { %4096 = vst [vmem:[#allocation2 + $0x60] sm:$0xff] %v13448_v50  ;;  %4098 = vst [vmem:[#allocation2 + $0x70] sm:$0x3] %v13448_v50  ;;  %v11067_v61 = vld [vmem:[#allocation2 + $0xc2] sm:$0xff]  ;;  %v11079_v51 = vld [vmem:[#allocation2 + $0xf9] sm:$0xff]  ;;  %8763 = vmatprep.mubr.bf16.mxu1 %v1121_v18 }
 0x18c   : > { %4097 = vst [vmem:[#allocation2 + $0x68] sm:$0xff] %v13448_v50  ;;  %13496 = vst [vmem:[#allocation114_spill] sm:$0xff] %v11043_v21  ;;  %v11075_v21 = vld [vmem:[#allocation2 + $0x10a] sm:$0xff]  ;;  %v1038_v56 = vld [vmem:[#allocation2 + $0x140] sm:$0xff] }
 0x18d   : > { %4099 = vst [vmem:[#allocation2 + $0x78] sm:$0xff] %v13448_v50  ;;  %13497 = vst [vmem:[#allocation115_spill] sm:$0xff] %v11046_v34  ;;  %v11073_v34 = vld [vmem:[#allocation2 + $0xfa] sm:$0xff]  ;;  %v11081_v55 = vld [vmem:[#allocation2 + $0x109] sm:$0xff] }
 0x18e   : > { %13498 = vst [vmem:[#allocation116_spill] sm:$0xff] %v11048_v7  ;;  %13499 = vst [vmem:[#allocation117_spill] sm:$0xff] %v11056_v9  ;;  %v11063_v7 = vld [vmem:[#allocation2 + $0xaa] sm:$0xff]  ;;  %v11109_v60 = vld [vmem:[#allocation2 + $0x13a] sm:$0xff] }
 0x18f   : > { %4101 = vst [vmem:[#allocation2 + $0x88] sm:$0x3] %v13448_v50  ;;  %4100 = vst [vmem:[#allocation2 + $0x80] sm:$0xff] %v13448_v50  ;;  %v11077_v9 = vld [vmem:[#allocation2 + $0xf1] sm:$0xff]  ;;  %v11111_v59 = vld [vmem:[#allocation2 + $0x142] sm:$0xff] }
 0x190   : > { %4102 = vst [vmem:[#allocation2 + $0x90] sm:$0xff] %v13448_v50  ;;  %4104 = vst [vmem:[#allocation2 + $0xa0] sm:$0x3] %v13448_v50  ;;  %v11096_v23 = vld [vmem:[#allocation2 + $0x12a] sm:$0xff]  ;;  %v11113_v6 = vld [vmem:[#allocation2 + $0x152] sm:$0xff] }
 0x191   : > { %4103 = vst [vmem:[#allocation2 + $0x98] sm:$0xff] %v13448_v50  ;;  %13500 = vst [vmem:[#allocation118_spill] sm:$0xff] %v11063_v7  ;;  %v1037_v7 = vld [vmem:[#allocation2 + $0x138] sm:$0xff]  ;;  %v1039_v18 = vld [vmem:[#allocation2 + $0x150] sm:$0xff] }
 0x192   : > { %13501 = vst [vmem:[#allocation119_spill] sm:$0xff] %v11065_v57  ;;  %13502 = vst [vmem:[#allocation120_spill] sm:$0xff] %v11067_v61  ;;  %v11086_v61 = vld [vmem:[#allocation2 + $0xca] sm:$0xff]  ;;  %v11089_v57 = vld [vmem:[#allocation2 + $0xda] sm:$0xff]  ;;  %v11174_v12 = vpack.c.bf16 %v1038_v56, %v1037_v7  ;;  %v13526_v56 = vpack.c.bf16 %v10591_v48, %v10589_v47  ;;  %v11216_v48 = vpack.c.bf16 %v10949_v5, %v10947_v24 }
 0x193   : > { %13503 = vst [vmem:[#allocation121_spill] sm:$0xff] %v11077_v9  ;;  %13504 = vst [vmem:[#allocation122_spill] sm:$0xff] %v11079_v51  ;;  %v11092_v51 = vld [vmem:[#allocation2 + $0x112] sm:$0xff]  ;;  %v11098_v9 = vld [vmem:[#allocation2 + $0x121] sm:$0xff]  ;;  %v11241_v24 = vpack.c.bf16 %v10982_v63, %v10966_v1 }
 0x194   : > { %13505 = vst [vmem:[#allocation123_spill] sm:$0xff] %v11081_v55  ;;  %4105 = vst [vmem:[#allocation2 + $0xa8] sm:$0xff] %v13448_v50  ;;  %v11094_v55 = vld [vmem:[#allocation2 + $0x122] sm:$0xff]  ;;  %v11100_v4 = vld [vmem:[#allocation2 + $0x111] sm:$0xff]  ;;  %8808 = vmatmul.mubr.bf16.gmra.mxu0 %v11174_v12 }
 0x195   : > { %4107 = vst [vmem:[#allocation2 + $0xb8] sm:$0x3] %v13448_v50  ;;  %4106 = vst [vmem:[#allocation2 + $0xb0] sm:$0xff] %v13448_v50  ;;  %v11121_v10 = vld [vmem:[#allocation2 + $0x198] sm:$0xff]  ;;  %v11129_v22 = vld [vmem:[#allocation2 + $0x10a] sm:$0xff] }
 0x196   : > { %13506 = vst [vmem:[#allocation124_spill] sm:$0xff] %v11086_v61  ;;  %4108 = vst [vmem:[#allocation2 + $0xc0] sm:$0xff] %v13448_v50  ;;  %v11102_v61 = vld [vmem:[#allocation2 + $0x129] sm:$0xff]  ;;  %v11131_v15 = vld [vmem:[#allocation2 + $0x15a] sm:$0xff] }
 0x197   : > { %13507 = vst [vmem:[#allocation125_spill] sm:$0xff] %v11089_v57  ;;  %13508 = vst [vmem:[#allocation126_spill] sm:$0xff] %v11098_v9  ;;  %v11106_v57 = vld [vmem:[#allocation2 + $0xe2] sm:$0xff]  ;;  %v11115_v9 = vld [vmem:[#allocation2 + $0x151] sm:$0xff] }
 0x198   : > { %13509 = vst [vmem:[#allocation127_spill] sm:$0xff] %v11100_v4  ;;  %13510 = vst [vmem:[#allocation128_spill] sm:$0xff] %v11102_v61  ;;  %v11117_v4 = vld [vmem:[#allocation2 + $0x139] sm:$0xff]  ;;  %v11119_v61 = vld [vmem:[#allocation2 + $0x141] sm:$0xff] }
 0x199   : > { %4110 = vst [vmem:[#allocation2 + $0xd0] sm:$0x3] %v13448_v50  ;;  %4109 = vst [vmem:[#allocation2 + $0xc8] sm:$0xff] %v13448_v50  ;;  %v1041_v33 = vld [vmem:[#allocation2 + $0x168] sm:$0xff]  ;;  %v1042_v16 = vld [vmem:[#allocation2 + $0x170] sm:$0xff] }
 0x19a   : > { %13511 = vst [vmem:[#allocation129_spill] sm:$0xff] %v11106_v57  ;;  %4111 = vst [vmem:[#allocation2 + $0xd8] sm:$0xff] %v13448_v50  ;;  %v11125_v50 = vld [vmem:[#allocation2 + $0xf2] sm:$0xff]  ;;  %v11127_v57 = vld [vmem:[#allocation2 + $0xfa] sm:$0xff]  ;;  %v11193_v7 = vpack.c.bf16 %v1042_v16, %v1041_v33 }
 0x19b   : > { %13512 = vst [vmem:[#allocation130_spill] sm:$0xff] %v11115_v9  ;;  %13513 = vst [vmem:[#allocation131_spill] sm:$0xff] %v11117_v4  ;;  %v11133_v9 = vld [vmem:[#allocation2 + $0x16a] sm:$0xff]  ;;  %v11135_v4 = vld [vmem:[#allocation2 + $0x172] sm:$0xff] }
 0x19c   : > { %13514 = vst [vmem:[#allocation132_spill] sm:$0xff] %v11119_v61  ;;  %4113 = vst [vmem:[#allocation2 + $0xe8] sm:$0x3] %v11121_v10  ;;  %v11137_v61 = vld [vmem:[#allocation2 + $0x159] sm:$0xff]  ;;  %v11139_v11 = vld [vmem:[#allocation2 + $0x169] sm:$0xff] }
 0x19d   : > { %4112 = vst [vmem:[#allocation2 + $0xe0] sm:$0xff] %v11121_v10  ;;  %13515 = vst [vmem:[#allocation133_spill] sm:$0xff] %v11125_v50  ;;  %v11141_v30 = vld [vmem:[#allocation2 + $0x171] sm:$0xff]  ;;  %v9879_v47 = vld [vmem:[%s13284_s3 + $0x128] sm:$0xff]  }
 0x19e   : > { %13516 = vst [vmem:[#allocation134_spill] sm:$0xff] %v11127_v57  ;;  %13517 = vst [vmem:[#allocation135_spill] sm:$0xff] %v11129_v22  ;;  %v11146_v22 = vld [vmem:[#allocation2 + $0x112] sm:$0xff]  ;;  %v11149_v57 = vld [vmem:[#allocation2 + $0x122] sm:$0xff] }
 0x19f   : > { %13518 = vst [vmem:[#allocation136_spill] sm:$0xff] %v11137_v61  ;;  %13519 = vst [vmem:[#allocation137_spill] sm:$0xff] %v11139_v11  ;;  %v11151_v50 = vld [vmem:[#allocation2 + $0x12a] sm:$0xff]  ;;  %v11160_v11 = vld [vmem:[#allocation2 + $0x142] sm:$0xff] }
 0x1a0   : > { %13520 = vst [vmem:[#allocation138_spill] sm:$0xff] %v11141_v30  ;;  %4114 = vst [vmem:[#allocation2 + $0xf0] sm:$0xff] %v11121_v10  ;;  %v11158_v30 = vld [vmem:[#allocation2 + $0x13a] sm:$0xff]  ;;  %v11172_v61 = vld [vmem:[#allocation2 + $0x172] sm:$0xff] }
 0x1a1   : > { %4116 = vst [vmem:[#allocation2 + $0x100] sm:$0x3] %v11121_v10  ;;  %4115 = vst [vmem:[#allocation2 + $0xf8] sm:$0xff] %v11121_v10  ;;  %v9883_v16 = vld [vmem:[%s13284_s3 + $0x170] sm:$0xff]   ;;  %v9881_v5 = vld [vmem:[%s13284_s3 + $0x118] sm:$0xff]  }
 0x1a2   : > { %13521 = vst [vmem:[#allocation139_spill] sm:$0xff] %v11146_v22  ;;  %4117 = vst [vmem:[#allocation2 + $0x108] sm:$0xff] %v11121_v10  ;;  %v11162_v22 = vld [vmem:[#allocation2 + $0x152] sm:$0xff] }
 0x1a3   : > { %13522 = vst [vmem:[#allocation140_spill] sm:$0xff] %v11149_v57  ;;  %13523 = vst [vmem:[#allocation141_spill] sm:$0xff] %v11151_v50  ;;  %v11167_v50 = vld [vmem:[#allocation2 + $0x15a] sm:$0xff]  ;;  %v11170_v57 = vld [vmem:[#allocation2 + $0x16a] sm:$0xff] }
 0x1a4   : > { %4119 = vst [vmem:[#allocation2 + $0x118] sm:$0x3] %v11121_v10  ;;  %4118 = vst [vmem:[#allocation2 + $0x110] sm:$0xff] %v11121_v10  ;;  %v9889_v63 = vld [vmem:[%s13284_s3 + $0x150] sm:$0xff]  }
 0x1a5   : > { %4120 = vst [vmem:[#allocation2 + $0x120] sm:$0xff] %v11121_v10  ;;  %4122 = vst [vmem:[#allocation2 + $0x130] sm:$0x3] %v11121_v10  ;;  %v13535_v33 = vld [vmem:[#allocation47_spill] sm:$0xff] }
 0x1a6   : > { %4121 = vst [vmem:[#allocation2 + $0x128] sm:$0xff] %v11121_v10  ;;  %13524 = vst [vmem:[#allocation142_spill] sm:$0xff] %v11160_v11  ;;  %v11178_v11 = vpack.c.bf16 %v10799_v19, %v10770_v37  ;;  %v11197_v19 = vpack.c.bf16 %v10699_v42, %v10672_v28  ;;  %v11245_v28 = vpack.c.bf16 %v10986_v49, %v10984_v0  ;;  %v9887_v49 = vld [vmem:[%s13284_s3 + $0x108] sm:$0xff]   ;;  %v9888_v42 = vld [vmem:[%s13284_s3 + $0x158] sm:$0xff]  }
 0x1a7   : > { %4123 = vst [vmem:[#allocation2 + $0x138] sm:$0xff] %v11121_v10  ;;  %4125 = vst [vmem:[#allocation2 + $0x148] sm:$0x3] %v11121_v10  ;;  %v9890_v0 = vld [vmem:[%s13284_s3 + $0x100] sm:$0xff]   ;;  %v13536_v1 = vld [vmem:[#allocation99_spill] sm:$0xff] }
 0x1a8   : > { %4124 = vst [vmem:[#allocation2 + $0x140] sm:$0xff] %v11121_v10  ;;  %13525 = vst [vmem:[#allocation143_spill] sm:$0xff] %v11167_v50  ;;  %v11185_v50 = vpack.c.bf16 %v1040_v32, %v1039_v18  ;;  %8764 = vmatmul.mubr.bf16.gmra.mxu1 %v11178_v11  ;;  %v9878_v32 = vld [vmem:[%s13284_s3 + $0x130] sm:$0xff]   ;;  %v11206_v18 = vpack.c.bf16 %v10945_v53, %v10939_v8  ;;  %v11220_v53 = vpack.c.bf16 %v10964_v13, %v10962_v41  ;;  %v9880_v8 = vld [vmem:[%s13284_s3 + $0x120] sm:$0xff]  }
 0x1a9   : > { %4126 = vst [vmem:[#allocation2 + $0x150] sm:$0xff] %v11121_v10  ;;  %4128 = vst [vmem:[#allocation2 + $0x160] sm:$0x3] %v11121_v10  ;;  %8831 = vmatprep.mubr.bf16.mxu1 %v13526_v56  ;;  %v9885_v13 = vld [vmem:[%s13284_s3 + $0x168] sm:$0xff]   ;;  %v9897_v41 = vld [vmem:[%s13284_s3 + $0x198] sm:$0xff]  }
 0x1aa   : > { %4127 = vst [vmem:[#allocation2 + $0x158] sm:$0xff] %v11121_v10  ;;  %4129 = vst [vmem:[#allocation2 + $0x168] sm:$0xff] %v11121_v10  ;;  %8811 = vmatprep.mubr.bf16.mxu0 %v11185_v50  ;;  %v13538_v56 = vld [vmem:[#allocation59_spill] sm:$0xff] }
 0x1ab   : > { %4131 = vst [vmem:[#allocation2 + $0x178] sm:$0x3] %v11121_v10  ;;  %4130 = vst [vmem:[#allocation2 + $0x170] sm:$0xff] %v11121_v10  ;;  %8812 = vmatmul.mubr.bf16.gmra.mxu0 %v11193_v7 }
 0x1ac   : > { %8879 = vmatprep.mubr.bf16.mxu0 %v10680_v31  ;;  %v9884_v31 = vld [vmem:[%s13284_s3 + $0x110] sm:$0xff]  }
 0x1b0   : > { %8832 = vmatmul.mubr.bf16.vlgmr.msra.gmra.mxu1 %v11197_v19 }
 0x1b1   : > { %8912 = vmatpush3.bf16.msra.mxu1 %v10838_v3  ;;  %8835 = vmatprep.mubr.bf16.mxu1 %v11206_v18  ;;  %v11289_v3 = vpack.c.bf16 %v11054_v27, %v11034_v62  ;;  %v9898_v62 = vld [vmem:[%s13284_s3 + $0x1f8] sm:$0xff]  }
 0x1b2   : > { %8913 = vmatprep.subr.bf16.mxu1 %v9878_v32 }
 0x1b3   : > { %8880 = vmatmul.mubr.bf16.vlgmr.msra.gmra.mxu0 %v10692_v38  ;;  %v9886_v38 = vld [vmem:[%s13284_s3 + $0x160] sm:$0xff]  }
 0x1b4   : > { %8883 = vmatprep.mubr.bf16.mxu0 %v10745_v17  ;;  %8960 = vmatpush3.bf16.msra.mxu0 %v10916_v39  ;;  %v11265_v17 = vpack.c.bf16 %v11005_v54, %v11003_v14  ;;  %v9891_v54 = vld [vmem:[%s13284_s3 + $0x148] sm:$0xff]  }
 0x1b5   : > { %8914 = vmatpush3.bf16.msra.mxu1 %v9878_v32  ;;  %8961 = vmatprep.subr.bf16.mxu0 %v9883_v16  ;;  %v13532_v14 = vld [vmem:[#allocation93_spill] sm:$0xff]  ;;  %v9904_v32 = vld [vmem:[%s13284_s3 + $0x1d8] sm:$0xff]  }
 0x1b6   : > { %8915 = vmatprep.subr.bf16.mxu1 %v9879_v47 }
 0x1b8   : > { %8836 = vmatmul.mubr.bf16.gmra.mxu1 %v11216_v48  ;;  %8962 = vmatpush3.bf16.msra.mxu0 %v9883_v16  ;;  %v13541_v16 = vld [vmem:[#allocation67_spill] sm:$0xff] }
 0x1b9   : > { %8839 = vmatprep.mubr.bf16.mxu1 %v11220_v53  ;;  %8916 = vmatpush3.bf16.msra.mxu1 %v9879_v47  ;;  %v13540_v47 = vld [vmem:[#allocation53_spill] sm:$0xff] }
 0x1ba   : > { %8917 = vmatprep.subr.bf16.mxu1 %v9880_v8  ;;  %8963 = vmatprep.subr.bf16.mxu0 %v9885_v13 }
 0x1bb   : > { %8884 = vmatmul.mubr.bf16.gmra.mxu0 %v10756_v26  ;;  %v11269_v26 = vpack.c.bf16 %v11032_v52, %v11007_v46  ;;  %v9893_v52 = vld [vmem:[%s13284_s3 + $0x1b8] sm:$0xff]  }
 0x1bc   : > { %8887 = vmatprep.mubr.bf16.mxu0 %v10802_v25  ;;  %8964 = vmatpush3.bf16.msra.mxu0 %v9885_v13  ;;  %v9892_v25 = vld [vmem:[%s13284_s3 + $0x140] sm:$0xff]   ;;  %v13534_v46 = vld [vmem:[#allocation95_spill] sm:$0xff] }
 0x1bd   : > { %8918 = vmatpush3.bf16.msra.mxu1 %v9880_v8  ;;  %8965 = vmatprep.subr.bf16.mxu0 %v9886_v38  ;;  %v2206_v39 = vpack.c.bf16 %v13535_v33, %v13534_v46  ;;  %v9906_v8 = vld [vmem:[%s13284_s3 + $0x180] sm:$0xff]   ;;  %v9909_v13 = vld [vmem:[%s13284_s3 + $0x238] sm:$0xff]  }
 0x1be   : > { %8919 = vmatprep.subr.bf16.mxu1 %v9881_v5 }
 0x1c0   : > { %8840 = vmatmul.mubr.bf16.gmra.mxu1 %v11241_v24  ;;  %8966 = vmatpush3.bf16.msra.mxu0 %v9886_v38  ;;  %v9908_v38 = vld [vmem:[%s13284_s3 + $0x1c0] sm:$0xff]  }
 0x1c1   : > { %8843 = vmatprep.mubr.bf16.mxu1 %v11245_v28  ;;  %8920 = vmatpush3.bf16.msra.mxu1 %v9881_v5  ;;  %v9907_v5 = vld [vmem:[%s13284_s3 + $0x1c8] sm:$0xff]  }
 0x1c2   : > { %8921 = vmatprep.subr.bf16.mxu1 %v9884_v31  ;;  %8967 = vmatprep.subr.bf16.mxu0 %v9888_v42 }
 0x1c3   : > { %8888 = vmatmul.mubr.bf16.gmra.mxu0 %v10812_v40 }
 0x1c4   : > { %8891 = vmatprep.mubr.bf16.mxu0 %v10849_v36  ;;  %8968 = vmatpush3.bf16.msra.mxu0 %v9888_v42  ;;  %v11293_v36 = vpack.c.bf16 %v11073_v34, %v11071_v35  ;;  %v11307_v35 = vpack.c.bf16 %v11092_v51, %v11075_v21  ;;  %v11323_v51 = vpack.c.bf16 %v11131_v15, %v11113_v6  ;;  %v9894_v6 = vld [vmem:[%s13284_s3 + $0x1b0] sm:$0xff]   ;;  %v13537_v15 = vld [vmem:[#allocation100_spill] sm:$0xff] }
 0x1c5   : > { %8922 = vmatpush3.bf16.msra.mxu1 %v9884_v31  ;;  %8969 = vmatprep.subr.bf16.mxu0 %v9889_v63  ;;  %v11379_v21 = vpack.c.bf16 %v13537_v15, %v13536_v1  ;;  %v9900_v34 = vld [vmem:[%s13284_s3 + $0x190] sm:$0xff]   ;;  %v13543_v31 = vld [vmem:[#allocation28_spill] sm:$0xff] }
 0x1c6   : > { %8923 = vmatprep.subr.bf16.mxu1 %v9887_v49  ;;  %v13545_v42 = vld [vmem:[#allocation126_spill] sm:$0xff]  ;;  %v9912_v15 = vld [vmem:[%s13284_s3 + $0x220] sm:$0xff]  }
 0x1c8   : > { %8844 = vmatmul.mubr.bf16.gmra.mxu1 %v11265_v17  ;;  %8970 = vmatpush3.bf16.msra.mxu0 %v9889_v63 }
 0x1c9   : > { %8847 = vmatprep.mubr.bf16.mxu1 %v11269_v26  ;;  %8924 = vmatpush3.bf16.msra.mxu1 %v9887_v49  ;;  %v13544_v49 = vld [vmem:[#allocation81_spill] sm:$0xff] }
 0x1ca   : > { %8925 = vmatprep.subr.bf16.mxu1 %v9890_v0  ;;  %8971 = vmatprep.subr.bf16.mxu0 %v9891_v54 }
 0x1cb   : > { %8892 = vmatmul.mubr.bf16.gmra.mxu0 %v10858_v44  ;;  %v11311_v44 = vpack.c.bf16 %v11096_v23, %v11094_v55  ;;  %v2202_v55 = vpack.c.bf16 %v10701_v43, %v10674_v29  ;;  %v13530_v29 = vld [vmem:[#allocation89_spill] sm:$0xff]  ;;  %v13531_v43 = vld [vmem:[#allocation90_spill] sm:$0xff] }
 0x1cc   : > { %8895 = vmatprep.mubr.bf16.mxu0 %v10907_v58  ;;  %8972 = vmatpush3.bf16.msra.mxu0 %v9891_v54  ;;  %v11319_v58 = vpack.c.bf16 %v11111_v59, %v11109_v60  ;;  %v13528_v59 = vld [vmem:[#allocation88_spill] sm:$0xff]  ;;  %v11349_v40 = vpack.c.bf16 %v13531_v43, %v13530_v29  ;;  %v13533_v23 = vld [vmem:[#allocation94_spill] sm:$0xff] }
 0x1cd   : > { %8926 = vmatpush3.bf16.msra.mxu1 %v9890_v0  ;;  %8973 = vmatprep.subr.bf16.mxu0 %v9892_v25  ;;  %v11358_v27 = vpack.c.bf16 %v13533_v23, %v13532_v14  ;;  %v13547_v0 = vld [vmem:[#allocation111_spill] sm:$0xff]  ;;  %v13548_v54 = vld [vmem:[#allocation130_spill] sm:$0xff]  ;;  %v11453_v43 = vld [vmem:[#allocation2 + $0x1a1] sm:$0xff] }
 0x1ce   : > { %9007 = vmatprep.subr.bf16.mxu1 %v9893_v52  ;;  %v11457_v14 = vld [vmem:[#allocation2 + $0x1a2] sm:$0xff] }
 0x1cf   : > { %v13560_v23 = vld [vmem:[#allocation61_spill] sm:$0xff]  ;;  %4137 = vst [vmem:[#allocation2 + $0x1a8] sm:$0x3] %v11121_v10 }
 0x1d0   : > { %8848 = vmatmul.mubr.bf16.gmra.mxu1 %v11289_v3  ;;  %8974 = vmatpush3.bf16.msra.mxu0 %v9892_v25  ;;  %v13551_v25 = vld [vmem:[#allocation54_spill] sm:$0xff] }
 0x1d1   : > { %8851 = vmatprep.mubr.bf16.mxu1 %v11293_v36  ;;  %9055 = vmatprep.subr.bf16.mxu0 %v9898_v62 }
 0x1d3   : > { %8896 = vmatmul.mubr.bf16.gmra.mxu0 %v10922_v2  ;;  %v11331_v2 = vpack.c.bf16 %v11135_v4, %v11133_v9  ;;  %v13529_v4 = vld [vmem:[#allocation66_spill] sm:$0xff] }
 0x1d4   : > { %8899 = vmatprep.mubr.bf16.mxu0 %v11026_v20  ;;  %v9895_v9 = vld [vmem:[%s13284_s3 + $0x1a8] sm:$0xff]   ;;  %v9899_v20 = vld [vmem:[%s13284_s3 + $0x1f0] sm:$0xff]  }
 0x1d8   : > { %8852 = vmatmul.mubr.bf16.gmra.mxu1 %v11307_v35 }
 0x1d9   : > { %8855 = vmatprep.mubr.bf16.mxu1 %v11311_v44 }
 0x1db   : > { %8900 = vmatmul.mubr.bf16.gmra.mxu0 %v11050_v45  ;;  %v13527_v45 = vld [vmem:[#allocation87_spill] sm:$0xff] }
 0x1dc   : > { %8903 = vmatprep.mubr.bf16.mxu0 %v11174_v12  ;;  %v11340_v60 = vpack.c.bf16 %v13528_v59, %v13527_v45  ;;  %v9901_v12 = vld [vmem:[%s13284_s3 + $0x1e8] sm:$0xff]   ;;  %v13556_v59 = vld [vmem:[#allocation96_spill] sm:$0xff] }
 0x1dd   : > { %v13555_v45 = vld [vmem:[#allocation65_spill] sm:$0xff] }
 0x1e0   : > { %8856 = vmatmul.mubr.bf16.gmra.mxu1 %v11319_v58 }
 0x1e1   : > { %8859 = vmatprep.mubr.bf16.mxu1 %v11323_v51 }
 0x1e3   : > { %8904 = vmatmul.mubr.bf16.gmra.mxu0 %v11185_v50  ;;  %v9902_v50 = vld [vmem:[%s13284_s3 + $0x1e0] sm:$0xff]  }
 0x1e4   : > { %8907 = vmatprep.mubr.bf16.mxu0 %v11193_v7  ;;  %v9903_v7 = vld [vmem:[%s13284_s3 + $0x188] sm:$0xff]  }
 0x1e8   : > { %8860 = vmatmul.mubr.bf16.gmra.mxu1 %v11331_v2 }
 0x1e9   : > { %8927 = vmatprep.mubr.bf16.mxu1 %v2202_v55 }
 0x1eb   : > { %8908 = vmatmul.mubr.bf16.gmra.mxu0 %v13529_v4 }
 0x1ec   : > { %8975 = vmatprep.mubr.bf16.mxu0 %v11197_v19  ;;  %v9896_v19 = vld [vmem:[%s13284_s3 + $0x1a0] sm:$0xff]  }
 0x1f0   : > { %8928 = vmatmul.mubr.bf16.vlgmr.msra.gmra.mxu1 %v11340_v60 }
 0x1f1   : > { %9008 = vmatpush3.bf16.msra.mxu1 %v9893_v52  ;;  %8931 = vmatprep.mubr.bf16.mxu1 %v11349_v40 }
 0x1f2   : > { %9009 = vmatprep.subr.bf16.mxu1 %v9894_v6 }
 0x1f3   : > { %8976 = vmatmul.mubr.bf16.vlgmr.msra.gmra.mxu0 %v11206_v18  ;;  %v13539_v18 = vld [vmem:[#allocation105_spill] sm:$0xff] }
 0x1f4   : > { %8979 = vmatprep.mubr.bf16.mxu0 %v11216_v48  ;;  %9056 = vmatpush3.bf16.msra.mxu0 %v9898_v62  ;;  %v2209_v48 = vpack.c.bf16 %v13540_v47, %v13539_v18 }
 0x1f5   : > { %9010 = vmatpush3.bf16.msra.mxu1 %v9894_v6  ;;  %9057 = vmatprep.subr.bf16.mxu0 %v9899_v20  ;;  %v13557_v6 = vld [vmem:[#allocation56_spill] sm:$0xff] }
 0x1f6   : > { %9011 = vmatprep.subr.bf16.mxu1 %v9895_v9 }
 0x1f8   : > { %8932 = vmatmul.mubr.bf16.gmra.mxu1 %v11358_v27  ;;  %9058 = vmatpush3.bf16.msra.mxu0 %v9899_v20 }
 0x1f9   : > { %8935 = vmatprep.mubr.bf16.mxu1 %v2206_v39  ;;  %9012 = vmatpush3.bf16.msra.mxu1 %v9895_v9  ;;  %v11455_v9 = vld [vmem:[#allocation2 + $0x19a] sm:$0xff] }
 0x1fa   : > { %9013 = vmatprep.subr.bf16.mxu1 %v9896_v19  ;;  %9059 = vmatprep.subr.bf16.mxu0 %v9901_v12  ;;  %v13561_v39 = vld [vmem:[#allocation60_spill] sm:$0xff] }
 0x1fb   : > { %8980 = vmatmul.mubr.bf16.gmra.mxu0 %v11220_v53  ;;  %v9905_v53 = vld [vmem:[%s13284_s3 + $0x1d0] sm:$0xff]  }
 0x1fc   : > { %8983 = vmatprep.mubr.bf16.mxu0 %v11241_v24  ;;  %9060 = vmatpush3.bf16.msra.mxu0 %v9901_v12  ;;  %v13542_v24 = vld [vmem:[#allocation121_spill] sm:$0xff] }
 0x1fd   : > { %9014 = vmatpush3.bf16.msra.mxu1 %v9896_v19  ;;  %9061 = vmatprep.subr.bf16.mxu0 %v9902_v50  ;;  %v13562_v19 = vpack.c.bf16 %v13560_v23, %v13561_v39 }
 0x1fe   : > { %9015 = vmatprep.subr.bf16.mxu1 %v9897_v41 }
 0x200   : > { %8936 = vmatmul.mubr.bf16.gmra.mxu1 %v11379_v21  ;;  %9062 = vmatpush3.bf16.msra.mxu0 %v9902_v50 }
 0x201   : > { %8939 = vmatprep.mubr.bf16.mxu1 %v13538_v56  ;;  %9016 = vmatpush3.bf16.msra.mxu1 %v9897_v41  ;;  %v9911_v41 = vld [vmem:[%s13284_s3 + $0x228] sm:$0xff]   ;;  %v13563_v56 = vld [vmem:[#allocation63_spill] sm:$0xff] }
 0x202   : > { %9017 = vmatprep.subr.bf16.mxu1 %v9900_v34  ;;  %9063 = vmatprep.subr.bf16.mxu0 %v9904_v32 }
 0x203   : > { %8984 = vmatmul.mubr.bf16.gmra.mxu0 %v11245_v28  ;;  %v2211_v28 = vpack.c.bf16 %v13543_v31, %v13542_v24 }
 0x204   : > { %8987 = vmatprep.mubr.bf16.mxu0 %v11265_v17  ;;  %9064 = vmatpush3.bf16.msra.mxu0 %v9904_v32  ;;  %v13546_v17 = vld [vmem:[#allocation36_spill] sm:$0xff] }
 0x205   : > { %9018 = vmatpush3.bf16.msra.mxu1 %v9900_v34  ;;  %9065 = vmatprep.subr.bf16.mxu0 %v9905_v53  ;;  %v2213_v63 = vpack.c.bf16 %v13546_v17, %v13545_v42  ;;  %v9918_v17 = vld [vmem:[#allocation8 + $0x30] sm:$0xff]  }
 0x206   : > { %9019 = vmatprep.subr.bf16.mxu1 %v9903_v7 }
 0x208   : > { %8940 = vmatmul.mubr.bf16.gmra.mxu1 %v2209_v48  ;;  %9066 = vmatpush3.bf16.msra.mxu0 %v9905_v53  ;;  %v13566_v53 = vld [vmem:[#allocation69_spill] sm:$0xff] }
 0x209   : > { %8943 = vmatprep.mubr.bf16.mxu1 %v13541_v16  ;;  %9020 = vmatpush3.bf16.msra.mxu1 %v9903_v7  ;;  %v13564_v7 = vld [vmem:[#allocation62_spill] sm:$0xff] }
 0x20a   : > { %9021 = vmatprep.subr.bf16.mxu1 %v9906_v8  ;;  %9067 = vmatprep.subr.bf16.mxu0 %v9907_v5  ;;  %v13565_v32 = vpack.c.bf16 %v13563_v56, %v13564_v7 }
 0x20b   : > { %8988 = vmatmul.mubr.bf16.gmra.mxu0 %v11269_v26  ;;  %v13549_v26 = vld [vmem:[#allocation44_spill] sm:$0xff] }
 0x20c   : > { %8991 = vmatprep.mubr.bf16.mxu0 %v11289_v3  ;;  %9068 = vmatpush3.bf16.msra.mxu0 %v9907_v5  ;;  %v2215_v52 = vpack.c.bf16 %v13549_v26, %v13548_v54  ;;  %v13550_v3 = vld [vmem:[#allocation64_spill] sm:$0xff] }
 0x20d   : > { %9022 = vmatpush3.bf16.msra.mxu1 %v9906_v8  ;;  %9069 = vmatprep.subr.bf16.mxu0 %v9908_v38  ;;  %v2217_v62 = vpack.c.bf16 %v13551_v25, %v13550_v3  ;;  %v13567_v8 = vld [vmem:[#allocation68_spill] sm:$0xff] }
 0x20e   : > { %9103 = vmatprep.subr.bf16.mxu1 %v9909_v13  ;;  %v13568_v16 = vpack.c.bf16 %v13566_v53, %v13567_v8  ;;  %v9916_v8 = vld [vmem:[%s13284_s3 + $0x200] sm:$0xff]  }
 0x210   : > { %8944 = vmatmul.mubr.bf16.gmra.mxu1 %v2211_v28  ;;  %9070 = vmatpush3.bf16.msra.mxu0 %v9908_v38 }
 0x211   : > { %8947 = vmatprep.mubr.bf16.mxu1 %v13544_v49 }
 0x213   : > { %8992 = vmatmul.mubr.bf16.gmra.mxu0 %v11293_v36  ;;  %v13552_v36 = vld [vmem:[#allocation46_spill] sm:$0xff] }
 0x214   : > { %8995 = vmatprep.mubr.bf16.mxu0 %v11307_v35  ;;  %v13553_v35 = vld [vmem:[#allocation45_spill] sm:$0xff] }
 0x215   : > { %v13554_v55 = vpack.c.bf16 %v13552_v36, %v13553_v35  ;;  %v9914_v35 = vld [vmem:[%s13284_s3 + $0x210] sm:$0xff]  }
 0x217   : > { %v8785_v34 = vpop.f32.mrf.mxu0 }
 0x218   : > { %8948 = vmatmul.mubr.bf16.gmra.mxu1 %v2213_v63 }
 0x219   : > { %8951 = vmatprep.mubr.bf16.mxu1 %v13547_v0  ;;  %v1431_v5 = vpop.f32.mrf.mxu0 }
 0x21b   : > { %8996 = vmatmul.mubr.bf16.gmra.mxu0 %v11311_v44  ;;  %v11441_v44 = vpack.c.bf16 %v13556_v59, %v13555_v45  ;;  %v8786_v38 = vpop.f32.mrf.mxu0  ;;  %v13570_v59 = vld [vmem:[#allocation71_spill] sm:$0xff] }
 0x21c   : > { %8999 = vmatprep.mubr.bf16.mxu0 %v11319_v58  ;;  %v8737_v58 = vpop.f32.mrf.mxu1 }
 0x21d   : > { %v11477_v48 = vadd.f32 %v8785_v34, %v8737_v58  ;;  %v1434_v0 = vpop.f32.mrf.mxu0  ;;  %v13577_v34 = vld [vmem:[#allocation107_spill] sm:$0xff] }
 0x21e   : > { %v1222_v20 = vpop.f32.mrf.mxu1 }
 0x21f   : > { %v11483_v28 = vadd.f32 %v1431_v5, %v1222_v20  ;;  %v9915_v20 = vld [vmem:[%s13284_s3 + $0x208] sm:$0xff]  }
 0x220   : > { %8952 = vmatmul.mubr.bf16.gmra.mxu1 %v2215_v52  ;;  %v8738_v12 = vpop.f32.mrf.mxu1 }
 0x221   : > { %8955 = vmatprep.mubr.bf16.mxu1 %v11178_v11  ;;  %v9910_v11 = vld [vmem:[%s13284_s3 + $0x230] sm:$0xff]   ;;  %v11488_v63 = vadd.f32 %v8786_v38, %v8738_v12 }
 0x222   : > { %v1225_v1 = vpop.f32.mrf.mxu1 }
 0x223   : > { %9000 = vmatmul.mubr.bf16.gmra.mxu0 %v11323_v51  ;;  %v13558_v51 = vld [vmem:[#allocation55_spill] sm:$0xff]  ;;  %v11492_v36 = vadd.f32 %v1434_v0, %v1225_v1  ;;  %v13582_v0 = vld [vmem:[#allocation77_spill] sm:$0xff] }
 0x224   : > { %9003 = vmatprep.mubr.bf16.mxu0 %v11331_v2  ;;  %v13559_v29 = vpack.c.bf16 %v13557_v6, %v13558_v51  ;;  %v11450_v2 = vld [vmem:[#allocation2 + $0x199] sm:$0xff]  ;;  %v8741_v50 = vpop.f32.mrf.mxu1  ;;  %v13574_v51 = vld [vmem:[#allocation73_spill] sm:$0xff] }
 0x225   : > { %4135 = vst [vmem:[#allocation2 + $0x198] sm:$0xff] %v11121_v10  ;;  %4136 = vst [vmem:[#allocation2 + $0x1a0] sm:$0xff] %v11121_v10 }
 0x228   : > { %8956 = vmatmul.mubr.bf16.gmra.mxu1 %v2217_v62 }
 0x229   : > { %9023 = vmatprep.mubr.bf16.mxu1 %v13554_v55  ;;  %v8789_v55 = vpop.f32.mrf.mxu0 }
 0x22a   : > { %v11500_v6 = vadd.f32 %v8789_v55, %v8741_v50 }
 0x22b   : > { %9004 = vmatmul.mubr.bf16.gmra.mxu0 %v11441_v44  ;;  %v1447_v23 = vpop.f32.mrf.mxu0 }
 0x22c   : > { %9071 = vmatprep.mubr.bf16.mxu0 %v11340_v60 }
 0x230   : > { %9024 = vmatmul.mubr.bf16.vlgmr.msra.gmra.mxu1 %v13559_v29 }
 0x231   : > { %9104 = vmatpush3.bf16.msra.mxu1 %v9909_v13  ;;  %9027 = vmatprep.mubr.bf16.mxu1 %v13562_v19  ;;  %v1238_v13 = vpop.f32.mrf.mxu1 }
 0x232   : > { %9105 = vmatprep.subr.bf16.mxu1 %v9910_v11  ;;  %v11506_v19 = vadd.f32 %v1447_v23, %v1238_v13  ;;  %v13579_v13 = vld [vmem:[#allocation75_spill] sm:$0xff] }
 0x233   : > { %9072 = vmatmul.mubr.bf16.vlgmr.msra.gmra.mxu0 %v11349_v40  ;;  %v9913_v40 = vld [vmem:[%s13284_s3 + $0x218] sm:$0xff]   ;;  %v8742_v49 = vpop.f32.mrf.mxu1 }
 0x234   : > { %9075 = vmatprep.mubr.bf16.mxu0 %v11358_v27  ;;  %v13569_v27 = vld [vmem:[#allocation101_spill] sm:$0xff] }
 0x235   : > { %9106 = vmatpush3.bf16.msra.mxu1 %v9910_v11  ;;  %v3124_v52 = vpack.c.bf16 %v13569_v27, %v13534_v46  ;;  %v1241_v62 = vpop.f32.mrf.mxu1  ;;  %v13571_v11 = vld [vmem:[#allocation70_spill] sm:$0xff]  ;;  %v13583_v27 = vld [vmem:[#allocation76_spill] sm:$0xff] }
 0x236   : > { %9107 = vmatprep.subr.bf16.mxu1 %v9911_v41  ;;  %v13572_v58 = vpack.c.bf16 %v13570_v59, %v13571_v11  ;;  %v13573_v46 = vld [vmem:[#allocation74_spill] sm:$0xff] }
 0x237   : > { %v8745_v45 = vpop.f32.mrf.mxu1  ;;  %v13575_v29 = vpack.c.bf16 %v13573_v46, %v13574_v51  ;;  %v13585_v46 = vld [vmem:[#allocation113_spill] sm:$0xff] }
 0x238   : > { %9028 = vmatmul.mubr.bf16.gmra.mxu1 %v13565_v32  ;;  %v13578_v32 = vld [vmem:[#allocation112_spill] sm:$0xff]  ;;  %v13586_v51 = vld [vmem:[#allocation117_spill] sm:$0xff] }
 0x239   : > { %9031 = vmatprep.mubr.bf16.mxu1 %v13568_v16  ;;  %9108 = vmatpush3.bf16.msra.mxu1 %v9911_v41  ;;  %v1254_v39 = vpop.f32.mrf.mxu1  ;;  %v8790_v41 = vpop.f32.mrf.mxu0  ;;  %v3127_v53 = vpack.c.bf16 %v13578_v32, %v13539_v18  ;;  %v13591_v32 = vld [vmem:[#allocation82_spill] sm:$0xff] }
 0x23a   : > { %9109 = vmatprep.subr.bf16.mxu1 %v9912_v15  ;;  %v11511_v1 = vadd.f32 %v8790_v41, %v8742_v49  ;;  %v13587_v41 = vld [vmem:[#allocation122_spill] sm:$0xff] }
 0x23b   : > { %9076 = vmatmul.mubr.bf16.gmra.mxu0 %v3124_v52  ;;  %v8746_v12 = vpop.f32.mrf.mxu1  ;;  %v13584_v52 = vpack.c.bf16 %v13582_v0, %v13583_v27  ;;  %v13594_v27 = vld [vmem:[#allocation123_spill] sm:$0xff] }
 0x23c   : > { %9079 = vmatprep.mubr.bf16.mxu0 %v11379_v21  ;;  %v13576_v21 = vld [vmem:[#allocation106_spill] sm:$0xff] }
 0x23d   : > { %9110 = vmatpush3.bf16.msra.mxu1 %v9912_v15  ;;  %v1450_v15 = vpop.f32.mrf.mxu0  ;;  %v3126_v50 = vpack.c.bf16 %v13577_v34, %v13576_v21  ;;  %v1257_v56 = vpop.f32.mrf.mxu1  ;;  %v13589_v34 = vld [vmem:[#allocation78_spill] sm:$0xff] }
 0x23e   : > { %9111 = vmatprep.subr.bf16.mxu1 %v9913_v40  ;;  %v11515_v7 = vadd.f32 %v1450_v15, %v1241_v62  ;;  %v3129_v15 = vpack.c.bf16 %v13587_v41, %v13542_v24  ;;  %v13599_v41 = vld [vmem:[#allocation83_spill] sm:$0xff] }
 0x23f   : > { %v8793_v16 = vpop.f32.mrf.mxu0  ;;  %v8749_v5 = vpop.f32.mrf.mxu1 }
 0x240   : > { %9032 = vmatmul.mubr.bf16.gmra.mxu1 %v13572_v58  ;;  %v11525_v49 = vadd.f32 %v8793_v16, %v8745_v45  ;;  %v3128_v45 = vpack.c.bf16 %v13586_v51, %v13585_v46 }
 0x241   : > { %9035 = vmatprep.mubr.bf16.mxu1 %v13575_v29  ;;  %9112 = vmatpush3.bf16.msra.mxu1 %v9913_v40  ;;  %v13580_v40 = vld [vmem:[#allocation72_spill] sm:$0xff]  ;;  %v1463_v18 = vpop.f32.mrf.mxu0  ;;  %v1270_v62 = vpop.f32.mrf.mxu1 }
 0x242   : > { %9113 = vmatprep.subr.bf16.mxu1 %v9914_v35  ;;  %v13581_v38 = vpack.c.bf16 %v13579_v13, %v13580_v40 }
 0x243   : > { %9080 = vmatmul.mubr.bf16.gmra.mxu0 %v3126_v50  ;;  %v8794_v55 = vpop.f32.mrf.mxu0  ;;  %v8750_v59 = vpop.f32.mrf.mxu1 }
 0x244   : > { %9083 = vmatprep.mubr.bf16.mxu0 %v3127_v53  ;;  %v11532_v11 = vadd.f32 %v8794_v55, %v8746_v12  ;;  %v13592_v53 = vld [vmem:[#allocation80_spill] sm:$0xff] }
 0x245   : > { %9114 = vmatpush3.bf16.msra.mxu1 %v9914_v35  ;;  %v11530_v35 = vadd.f32 %v1463_v18, %v1254_v39  ;;  %v1466_v58 = vpop.f32.mrf.mxu0  ;;  %v1273_v29 = vpop.f32.mrf.mxu1  ;;  %v13593_v16 = vpack.c.bf16 %v13591_v32, %v13592_v53 }
 0x246   : > { %9115 = vmatprep.subr.bf16.mxu1 %v9915_v20  ;;  %v11536_v23 = vadd.f32 %v1466_v58, %v1257_v56  ;;  %v13597_v58 = vld [vmem:[#allocation128_spill] sm:$0xff] }
 0x247   : > { %v8797_v21 = vpop.f32.mrf.mxu0  ;;  %v8753_v39 = vpop.f32.mrf.mxu1  ;;  %v3131_v46 = vpack.c.bf16 %v13597_v58, %v13545_v42 }
 0x248   : > { %9036 = vmatmul.mubr.bf16.gmra.mxu1 %v13581_v38  ;;  %v11543_v12 = vadd.f32 %v8797_v21, %v8749_v5  ;;  %v13601_v21 = vld [vmem:[#allocation86_spill] sm:$0xff] }
 0x249   : > { %9039 = vmatprep.mubr.bf16.mxu1 %v13584_v52  ;;  %9116 = vmatpush3.bf16.msra.mxu1 %v9915_v20  ;;  %v13588_v20 = vld [vmem:[#allocation79_spill] sm:$0xff]  ;;  %v1286_v56 = vpop.f32.mrf.mxu1 }
 0x24a   : > { %9117 = vmatprep.subr.bf16.mxu1 %v9916_v8  ;;  %v13590_v50 = vpack.c.bf16 %v13588_v20, %v13589_v34  ;;  %v13595_v52 = vld [vmem:[#allocation127_spill] sm:$0xff]  ;;  %v13602_v20 = vld [vmem:[#allocation85_spill] sm:$0xff] }
 0x24b   : > { %9084 = vmatmul.mubr.bf16.gmra.mxu0 %v3128_v45  ;;  %v8754_v24 = vpop.f32.mrf.mxu1  ;;  %v3130_v18 = vpack.c.bf16 %v13595_v52, %v13594_v27  ;;  %v13603_v34 = vpack.c.bf16 %v13601_v21, %v13602_v20  ;;  %v13608_v52 = vld [vmem:[#allocation136_spill] sm:$0xff] }
 0x24c   : > { %9087 = vmatprep.mubr.bf16.mxu0 %v3129_v15 }
 0x24d   : > { %9118 = vmatpush3.bf16.msra.mxu1 %v9916_v8  ;;  %v1479_v8 = vpop.f32.mrf.mxu0  ;;  %v11554_v55 = vpop.f32.mrf.mxu1 }
 0x24e   : > { %v11548_v13 = vadd.f32 %v1479_v8, %v1270_v62  ;;  %13596 = vst [vmem:[#allocation87_spill] sm:$0xff] %v11554_v55  ;;  %v13598_v62 = vld [vmem:[#allocation84_spill] sm:$0xff] }
 0x24f   : > { %v8798_v40 = vpop.f32.mrf.mxu0  ;;  %v8757_v45 = vpop.f32.mrf.mxu1  ;;  %v13600_v15 = vpack.c.bf16 %v13598_v62, %v13599_v41 }
 0x250   : > { %9040 = vmatmul.mubr.bf16.gmra.mxu1 %v13590_v50  ;;  %v11550_v38 = vadd.f32 %v8798_v40, %v8750_v59  ;;  %v13605_v40 = vld [vmem:[#allocation131_spill] sm:$0xff] }
 0x251   : > { %9043 = vmatprep.mubr.bf16.mxu1 %v13593_v16  ;;  %v1482_v0 = vpop.f32.mrf.mxu0 }
 0x252   : > { %v11556_v5 = vadd.f32 %v1482_v0, %v1273_v29  ;;  %v1302_v29 = vpop.f32.mrf.mxu1  ;;  %v13606_v0 = vld [vmem:[#allocation132_spill] sm:$0xff] }
 0x253   : > { %v8801_v51 = vpop.f32.mrf.mxu0  ;;  %9088 = vmatmul.mubr.bf16.gmra.mxu0 %v3130_v18  ;;  %v3132_v27 = vpack.c.bf16 %v13606_v0, %v13605_v40  ;;  %v3133_v18 = vpack.c.bf16 %v13608_v52, %v13548_v54  ;;  %v2830_v54 = vpack.c.bf16 %v11121_v10, %v11121_v10  ;;  %v13613_v40 = vld [vmem:[#allocation137_spill] sm:$0xff]  ;;  %v13614_v0 = vld [vmem:[#allocation138_spill] sm:$0xff] }
 0x254   : > { %v11563_v59 = vadd.f32 %v8801_v51, %v8753_v39  ;;  %9091 = vmatprep.mubr.bf16.mxu0 %v3131_v46  ;;  %v8758_v42 = vpop.f32.mrf.mxu1  ;;  %v13609_v51 = vld [vmem:[#allocation92_spill] sm:$0xff] }
 0x255   : > { %v1495_v50 = vpop.f32.mrf.mxu0 }
 0x256   : > { %v11568_v32 = vadd.f32 %v1495_v50, %v1286_v56  ;;  %v11576_v39 = vpop.f32.mrf.mxu1  ;;  %v13610_v56 = vld [vmem:[#allocation91_spill] sm:$0xff] }
 0x257   : > { %v8802_v53 = vpop.f32.mrf.mxu0  ;;  %13607 = vst [vmem:[#allocation66_spill] sm:$0xff] %v11576_v39  ;;  %v13611_v62 = vpack.c.bf16 %v13609_v51, %v13610_v56  ;;  %v9931_v39 = vld [vmem:[#allocation9 + $0x60] sm:$0xff]  }
 0x258   : > { %9044 = vmatmul.mubr.bf16.gmra.mxu1 %v13600_v15  ;;  %v11570_v16 = vadd.f32 %v8802_v53, %v8754_v24  ;;  %v8761_v46 = vpop.f32.mrf.mxu1 }
 0x259   : > { %9047 = vmatprep.mubr.bf16.mxu1 %v13603_v34  ;;  %v11572_v8 = vpop.f32.mrf.mxu0 }
 0x25a   : > { %13604 = vst [vmem:[#allocation88_spill] sm:$0xff] %v11572_v8  ;;  %v1318_v15 = vpop.f32.mrf.mxu1 }
 0x25b   : > { %v8805_v58 = vpop.f32.mrf.mxu0  ;;  %9092 = vmatmul.mubr.bf16.gmra.mxu0 %v3132_v27 }
 0x25c   : > { %v11583_v41 = vadd.f32 %v8805_v58, %v8757_v45  ;;  %9095 = vmatprep.mubr.bf16.mxu0 %v3133_v18  ;;  %v8762_v34 = vpop.f32.mrf.mxu1  ;;  %v3134_v45 = vpack.c.bf16 %v13614_v0, %v13613_v40  ;;  %v13617_v18 = vld [vmem:[#allocation98_spill] sm:$0xff]  ;;  %v3136_v40 = vpack.c.bf16 %v11453_v43, %v11450_v2 }
 0x25d   : > { %v1511_v24 = vpop.f32.mrf.mxu0 }
 0x25e   : > { %v11586_v21 = vadd.f32 %v1511_v24, %v1302_v29  ;;  %v11596_v27 = vpop.f32.mrf.mxu1  ;;  %v13618_v29 = vld [vmem:[#allocation102_spill] sm:$0xff] }
 0x25f   : > { %v8806_v20 = vpop.f32.mrf.mxu0  ;;  %13615 = vst [vmem:[#allocation90_spill] sm:$0xff] %v11596_v27  ;;  %v3427_v58 = vpack.c.bf16 %v13618_v29, %v13617_v18  ;;  %v13624_v29 = vld [vmem:[#allocation109_spill] sm:$0xff] }
 0x260   : > { %9048 = vmatmul.mubr.bf16.gmra.mxu1 %v13611_v62  ;;  %v11590_v50 = vadd.f32 %v8806_v20, %v8758_v42 }
 0x261   : > { %9051 = vmatprep.mubr.bf16.mxu1 %v13529_v4  ;;  %v11592_v53 = vpop.f32.mrf.mxu0  ;;  %v13616_v4 = vld [vmem:[#allocation97_spill] sm:$0xff] }
 0x262   : > { %13612 = vst [vmem:[#allocation89_spill] sm:$0xff] %v11592_v53  ;;  %v3135_v52 = vpack.c.bf16 %v13616_v4, %v13550_v3 }
 0x263   : > { %v8809_v51 = vpop.f32.mrf.mxu0  ;;  %9096 = vmatmul.mubr.bf16.gmra.mxu0 %v3134_v45 }
 0x264   : > { %v11602_v10 = vadd.f32 %v8809_v51, %v8761_v46  ;;  %9099 = vmatprep.mubr.bf16.mxu0 %v3135_v52  ;;  %v13622_v46 = vld [vmem:[#allocation104_spill] sm:$0xff] }
 0x265   : > { %v1527_v42 = vpop.f32.mrf.mxu0  ;;  %v13623_v52 = vld [vmem:[#allocation108_spill] sm:$0xff] }
 0x266   : > { %v11604_v24 = vadd.f32 %v1527_v42, %v1318_v15 }
 0x267   : > { %v8810_v20 = vpop.f32.mrf.mxu0 }
 0x268   : > { %v8765_v56 = vpop.f32.mrf.mxu1  ;;  %9052 = vmatmul.mubr.bf16.gmra.mxu1 %v2830_v54  ;;  %v11608_v0 = vadd.f32 %v8810_v20, %v8762_v34  ;;  %v13621_v54 = vld [vmem:[#allocation103_spill] sm:$0xff] }
 0x269   : > { %9119 = vmatprep.mubr.bf16.mxu1 %v3427_v58  ;;  %v11610_v4 = vpop.f32.mrf.mxu0  ;;  %v3428_v18 = vpack.c.bf16 %v13622_v46, %v13621_v54  ;;  %v3429_v58 = vpack.c.bf16 %v13624_v29, %v13623_v52  ;;  %v13627_v29 = vld [vmem:[#allocation114_spill] sm:$0xff] }
 0x26a   : > { %v1334_v62 = vpop.f32.mrf.mxu1  ;;  %13619 = vst [vmem:[#allocation93_spill] sm:$0xff] %v11610_v4 }
 0x26b   : > { %v8813_v51 = vpop.f32.mrf.mxu0  ;;  %9100 = vmatmul.mubr.bf16.gmra.mxu0 %v3136_v40 }
 0x26c   : > { %v8766_v3 = vpop.f32.mrf.mxu1  ;;  %v11618_v42 = vadd.f32 %v8813_v51, %v8765_v56  ;;  %v13626_v56 = vld [vmem:[#allocation110_spill] sm:$0xff] }
 0x26d   : > { %v1543_v43 = vpop.f32.mrf.mxu0  ;;  %v3430_v51 = vpack.c.bf16 %v13627_v29, %v13626_v56 }
 0x26e   : > { %v11612_v45 = vpop.f32.mrf.mxu1  ;;  %v11621_v20 = vadd.f32 %v1543_v43, %v1334_v62  ;;  %v13629_v62 = vld [vmem:[#allocation116_spill] sm:$0xff] }
 0x26f   : > { %13620 = vst [vmem:[#allocation94_spill] sm:$0xff] %v11612_v45  ;;  %v8814_v25 = vpop.f32.mrf.mxu0 }
 0x270   : > { %v8833_v15 = vpop.f32.mrf.mxu1  ;;  %9120 = vmatmul.mubr.bf16.vlgmr.msra.gmra.mxu1 %v3428_v18  ;;  %v11624_v46 = vadd.f32 %v8814_v25, %v8766_v3 }
 0x271   : > { %v1834_v2 = vadd.f32 %v8833_v15, %v11477_v48  ;;  %9123 = vmatprep.mubr.bf16.mxu1 %v3429_v58  ;;  %v11627_v40 = vpop.f32.mrf.mxu0  ;;  %v13628_v58 = vld [vmem:[#allocation115_spill] sm:$0xff] }
 0x272   : > { %v1705_v34 = vpop.f32.mrf.mxu1  ;;  %13625 = vst [vmem:[#allocation95_spill] sm:$0xff] %v11627_v40  ;;  %v3431_v15 = vpack.c.bf16 %v13629_v62, %v13628_v58 }
 0x273   : > { %v1832_v60 = vadd.f32 %v1705_v34, %v11483_v28  ;;  %v8881_v43 = vpop.f32.mrf.mxu0 }
 0x274   : > { %v8834_v54 = vpop.f32.mrf.mxu1  ;;  %v11636_v34 = vadd.f32 %v8881_v43, %v1834_v2  ;;  %v13630_v2 = vld [vmem:[#allocation118_spill] sm:$0xff]  ;;  %v13631_v43 = vld [vmem:[#allocation119_spill] sm:$0xff] }
 0x275   : > { %v1835_v52 = vadd.f32 %v8834_v54, %v11488_v63  ;;  %v2011_v63 = vpop.f32.mrf.mxu0  ;;  %v3432_v37 = vpack.c.bf16 %v13631_v43, %v13630_v2 }
 0x276   : > { %v1708_v18 = vpop.f32.mrf.mxu1  ;;  %v11639_v54 = vadd.f32 %v2011_v63, %v1832_v60  ;;  %v13633_v60 = vld [vmem:[#allocation124_spill] sm:$0xff] }
 0x277   : > { %v11632_v48 = vadd.f32 %v1708_v18, %v11492_v36  ;;  %v8882_v29 = vpop.f32.mrf.mxu0 }
 0x278   : > { %v8837_v28 = vpop.f32.mrf.mxu1  ;;  %9124 = vmatmul.mubr.bf16.gmra.mxu1 %v3430_v51  ;;  %v11642_v18 = vadd.f32 %v8882_v29, %v1835_v52 }
 0x279   : > { %v1838_v25 = vadd.f32 %v8837_v28, %v11500_v6  ;;  %9127 = vmatprep.mubr.bf16.mxu1 %v3431_v15  ;;  %v11645_v62 = vpop.f32.mrf.mxu0  ;;  %v13632_v15 = vld [vmem:[#allocation120_spill] sm:$0xff] }
 0x27a   : > { %v1721_v3 = vpop.f32.mrf.mxu1  ;;  %v3433_v28 = vpack.c.bf16 %v13633_v60, %v13632_v15 }
 0x27b   : > { %v1836_v56 = vadd.f32 %v1721_v3, %v11506_v19  ;;  %v8885_v63 = vpop.f32.mrf.mxu0 }
 0x27c   : > { %v8838_v36 = vpop.f32.mrf.mxu1  ;;  %v11654_v3 = vadd.f32 %v8885_v63, %v1838_v25  ;;  %v13634_v25 = vld [vmem:[#allocation125_spill] sm:$0xff] }
 0x27d   : > { %v1839_v58 = vadd.f32 %v8838_v36, %v11511_v1  ;;  %v2027_v1 = vpop.f32.mrf.mxu0  ;;  %v13635_v63 = vld [vmem:[#allocation129_spill] sm:$0xff] }
 0x27e   : > { %v1724_v51 = vpop.f32.mrf.mxu1  ;;  %v11657_v36 = vadd.f32 %v2027_v1, %v1836_v56  ;;  %v3434_v26 = vpack.c.bf16 %v13635_v63, %v13634_v25  ;;  %v13637_v56 = vld [vmem:[#allocation134_spill] sm:$0xff] }
 0x27f   : > { %v11650_v6 = vadd.f32 %v1724_v51, %v11515_v7  ;;  %v8886_v43 = vpop.f32.mrf.mxu0  ;;  %v9917_v1 = vld [vmem:[#allocation8 + $0x38] sm:$0xff]  }
 0x280   : > { %v8841_v19 = vpop.f32.mrf.mxu1  ;;  %9128 = vmatmul.mubr.bf16.gmra.mxu1 %v3432_v37  ;;  %v11660_v51 = vadd.f32 %v8886_v43, %v1839_v58  ;;  %9151 = vmatprep.subr.bf16.mxu0 %v9917_v1 }
 0x281   : > { %v1842_v52 = vadd.f32 %v8841_v19, %v11525_v49  ;;  %9131 = vmatprep.mubr.bf16.mxu1 %v3433_v28  ;;  %v11663_v60 = vpop.f32.mrf.mxu0  ;;  %v13636_v28 = vld [vmem:[#allocation133_spill] sm:$0xff]  ;;  %9152 = vmatpush3.bf16.msra.mxu0 %v9917_v1  ;;  %v13640_v1 = vld [vmem:[#allocation140_spill] sm:$0xff] }
 0x282   : > { %v1737_v29 = vpop.f32.mrf.mxu1  ;;  %v3435_v19 = vpack.c.bf16 %v13637_v56, %v13636_v28  ;;  %9153 = vmatprep.subr.bf16.mxu0 %v9918_v17 }
 0x283   : > { %v1840_v2 = vadd.f32 %v1737_v29, %v11530_v35  ;;  %v8889_v35 = vpop.f32.mrf.mxu0 }
 0x284   : > { %v8842_v7 = vpop.f32.mrf.mxu1  ;;  %v11672_v58 = vadd.f32 %v8889_v35, %v1842_v52  ;;  %v13638_v35 = vld [vmem:[#allocation135_spill] sm:$0xff] }
 0x285   : > { %v1843_v15 = vadd.f32 %v8842_v7, %v11532_v11  ;;  %v2043_v43 = vpop.f32.mrf.mxu0  ;;  %9154 = vmatpush3.bf16.msra.mxu0 %v9918_v17 }
 0x286   : > { %v1740_v37 = vpop.f32.mrf.mxu1  ;;  %v11675_v25 = vadd.f32 %v2043_v43, %v1840_v2  ;;  %v13641_v2 = vld [vmem:[#allocation141_spill] sm:$0xff] }
 0x287   : > { %v11668_v49 = vadd.f32 %v1740_v37, %v11536_v23  ;;  %v8890_v37 = vpop.f32.mrf.mxu0  ;;  %v3437_v43 = vpack.c.bf16 %v13641_v2, %v13640_v1 }
 0x288   : > { %v8845_v29 = vpop.f32.mrf.mxu1  ;;  %9132 = vmatmul.mubr.bf16.gmra.mxu1 %v3434_v26  ;;  %v11678_v28 = vadd.f32 %v8890_v37, %v1843_v15 }
 0x289   : > { %v1846_v11 = vadd.f32 %v8845_v29, %v11543_v12  ;;  %9135 = vmatprep.mubr.bf16.mxu1 %v3435_v19  ;;  %v11681_v26 = vpop.f32.mrf.mxu0  ;;  %v13639_v12 = vld [vmem:[#allocation139_spill] sm:$0xff] }
 0x28a   : > { %v1753_v7 = vpop.f32.mrf.mxu1  ;;  %v3436_v19 = vpack.c.bf16 %v13639_v12, %v13638_v35 }
 0x28b   : > { %v1844_v23 = vadd.f32 %v1753_v7, %v11548_v13  ;;  %v8893_v13 = vpop.f32.mrf.mxu0 }
 0x28c   : > { %v8846_v63 = vpop.f32.mrf.mxu1  ;;  %v11690_v15 = vadd.f32 %v8893_v13, %v1846_v11  ;;  %v13644_v13 = vld [vmem:[#allocation143_spill] sm:$0xff] }
 0x28d   : > { %v1847_v56 = vadd.f32 %v8846_v63, %v11550_v38  ;;  %v2059_v37 = vpop.f32.mrf.mxu0  ;;  %v3439_v17 = vpack.c.bf16 %v13644_v13, %v11162_v22 }
 0x28e   : > { %v1756_v52 = vpop.f32.mrf.mxu1  ;;  %v11693_v35 = vadd.f32 %v2059_v37, %v1844_v23  ;;  %v9919_v23 = vld [vmem:[#allocation8 + $0x28] sm:$0xff]  }
 0x28f   : > { %v11686_v29 = vadd.f32 %v1756_v52, %v11556_v5  ;;  %v8894_v52 = vpop.f32.mrf.mxu0  ;;  %9155 = vmatprep.subr.bf16.mxu0 %v9919_v23 }
 0x290   : > { %v8849_v7 = vpop.f32.mrf.mxu1  ;;  %9136 = vmatmul.mubr.bf16.gmra.mxu1 %v3436_v19  ;;  %v11696_v1 = vadd.f32 %v8894_v52, %v1847_v56  ;;  %9156 = vmatpush3.bf16.msra.mxu0 %v9919_v23 }
 0x291   : > { %v1850_v38 = vadd.f32 %v8849_v7, %v11563_v59  ;;  %9139 = vmatprep.mubr.bf16.mxu1 %v3437_v43  ;;  %v11699_v19 = vpop.f32.mrf.mxu0  ;;  %v13643_v59 = vld [vmem:[#allocation142_spill] sm:$0xff] }
 0x292   : > { %v1769_v63 = vpop.f32.mrf.mxu1  ;;  %v3438_v43 = vpack.c.bf16 %v13643_v59, %v11158_v30 }
 0x293   : > { %v1848_v5 = vadd.f32 %v1769_v63, %v11568_v32  ;;  %v8897_v7 = vpop.f32.mrf.mxu0 }
 0x294   : > { %v8850_v12 = vpop.f32.mrf.mxu1  ;;  %v11707_v32 = vadd.f32 %v8897_v7, %v1850_v38 }
 0x295   : > { %v1851_v2 = vadd.f32 %v8850_v12, %v11570_v16  ;;  %v2075_v16 = vpop.f32.mrf.mxu0 }
 0x296   : > { %v11701_v11 = vpop.f32.mrf.mxu1  ;;  %v11710_v52 = vadd.f32 %v2075_v16, %v1848_v5 }
 0x297   : > { %13642 = vst [vmem:[#allocation99_spill] sm:$0xff] %v11701_v11  ;;  %v8898_v12 = vpop.f32.mrf.mxu0 }
 0x298   : > { %v8853_v37 = vpop.f32.mrf.mxu1  ;;  %9140 = vmatmul.mubr.bf16.gmra.mxu1 %v3438_v43  ;;  %v11713_v22 = vadd.f32 %v8898_v12, %v1851_v2 }
 0x299   : > { %v1854_v56 = vadd.f32 %v8853_v37, %v11583_v41  ;;  %9143 = vmatprep.mubr.bf16.mxu1 %v3439_v17  ;;  %v11716_v43 = vpop.f32.mrf.mxu0  ;;  %v3440_v41 = vpack.c.bf16 %v11172_v61, %v11170_v57  ;;  %v9920_v17 = vld [vmem:[#allocation8 + $0x20] sm:$0xff]  }
 0x29a   : > { %v1785_v63 = vpop.f32.mrf.mxu1  ;;  %13645 = vst [vmem:[#allocation100_spill] sm:$0xff] %v11716_v43  ;;  %9157 = vmatprep.subr.bf16.mxu0 %v9920_v17 }
 0x29b   : > { %v1852_v30 = vadd.f32 %v1785_v63, %v11586_v21  ;;  %v8901_v7 = vpop.f32.mrf.mxu0  ;;  %9158 = vmatpush3.bf16.msra.mxu0 %v9920_v17  ;;  %v13649_v17 = vpack.c.bf16 %v11457_v14, %v11455_v9 }
 0x29c   : > { %v8854_v59 = vpop.f32.mrf.mxu1  ;;  %v11722_v5 = vadd.f32 %v8901_v7, %v1854_v56 }
 0x29d   : > { %v1855_v13 = vadd.f32 %v8854_v59, %v11590_v50  ;;  %v2091_v2 = vpop.f32.mrf.mxu0 }
 0x29e   : > { %v11718_v38 = vpop.f32.mrf.mxu1  ;;  %v11726_v37 = vadd.f32 %v2091_v2, %v1852_v30 }
 0x29f   : > { %13646 = vst [vmem:[#allocation59_spill] sm:$0xff] %v11718_v38  ;;  %v8902_v63 = vpop.f32.mrf.mxu0 }
 0x2a0   : > { %v8857_v23 = vpop.f32.mrf.mxu1  ;;  %9144 = vmatmul.mubr.bf16.gmra.mxu1 %v3440_v41  ;;  %v11729_v61 = vadd.f32 %v8902_v63, %v1855_v13 }
 0x2a1   : > { %v1858_v21 = vadd.f32 %v8857_v23, %v11602_v10  ;;  %9147 = vmatprep.mubr.bf16.mxu1 %v11441_v44  ;;  %v11732_v56 = vpop.f32.mrf.mxu0  ;;  %v9921_v10 = vld [vmem:[#allocation8 + $0x18] sm:$0xff]  }
 0x2a2   : > { %v1801_v50 = vpop.f32.mrf.mxu1  ;;  %13647 = vst [vmem:[#allocation105_spill] sm:$0xff] %v11732_v56  ;;  %9159 = vmatprep.subr.bf16.mxu0 %v9921_v10 }
 0x2a3   : > { %v1856_v16 = vadd.f32 %v1801_v50, %v11604_v24  ;;  %v8905_v44 = vpop.f32.mrf.mxu0  ;;  %9160 = vmatpush3.bf16.msra.mxu0 %v9921_v10 }
 0x2a4   : > { %v8858_v57 = vpop.f32.mrf.mxu1  ;;  %v11739_v30 = vadd.f32 %v8905_v44, %v1858_v21  ;;  %v9922_v21 = vld [vmem:[#allocation8 + $0x10] sm:$0xff]  }
 0x2a5   : > { %v1859_v12 = vadd.f32 %v8858_v57, %v11608_v0  ;;  %v2107_v13 = vpop.f32.mrf.mxu0  ;;  %9161 = vmatprep.subr.bf16.mxu0 %v9922_v21 }
 0x2a6   : > { %v11734_v59 = vpop.f32.mrf.mxu1  ;;  %v11742_v0 = vadd.f32 %v2107_v13, %v1856_v16 }
 0x2a7   : > { %13648 = vst [vmem:[#allocation67_spill] sm:$0xff] %v11734_v59  ;;  %v8906_v2 = vpop.f32.mrf.mxu0  ;;  %9162 = vmatpush3.bf16.msra.mxu0 %v9922_v21 }
 0x2a8   : > { %v8861_v41 = vpop.f32.mrf.mxu1  ;;  %9148 = vmatmul.mubr.bf16.gmra.mxu1 %v13649_v17  ;;  %v11745_v63 = vadd.f32 %v8906_v2, %v1859_v12 }
 0x2a9   : > { %v1862_v24 = vadd.f32 %v8861_v41, %v11618_v42  ;;  %v11748_v9 = vpop.f32.mrf.mxu0 }
 0x2aa   : > { %v1817_v7 = vpop.f32.mrf.mxu1  ;;  %13650 = vst [vmem:[#allocation121_spill] sm:$0xff] %v11748_v9 }
 0x2ab   : > { %v1860_v23 = vadd.f32 %v1817_v7, %v11621_v20  ;;  %v8909_v42 = vpop.f32.mrf.mxu0 }
 0x2ac   : > { %v8862_v50 = vpop.f32.mrf.mxu1  ;;  %v11752_v41 = vadd.f32 %v8909_v42, %v1862_v24 }
 0x2ad   : > { %v1863_v57 = vadd.f32 %v8862_v50, %v11624_v46  ;;  %v2123_v10 = vpop.f32.mrf.mxu0  ;;  %v9923_v50 = vld [vmem:[#allocation8 + $0x8] sm:$0xff]  }
 0x2ae   : > { %v11750_v14 = vpop.f32.mrf.mxu1  ;;  %v11755_v17 = vadd.f32 %v2123_v10, %v1860_v23  ;;  %9163 = vmatprep.subr.bf16.mxu0 %v9923_v50 }
 0x2af   : > { %13651 = vst [vmem:[#allocation81_spill] sm:$0xff] %v11750_v14  ;;  %v8910_v46 = vpop.f32.mrf.mxu0  ;;  %9164 = vmatpush3.bf16.msra.mxu0 %v9923_v50 }
 0x2b0   : > { %v8929_v44 = vpop.f32.mrf.mxu1  ;;  %v11758_v7 = vadd.f32 %v8910_v46, %v1863_v57 }
 0x2b1   : > { %v2446_v16 = vadd.f32 %v8929_v44, %v11636_v34  ;;  %v11763_v24 = vpop.f32.mrf.mxu0 }
 0x2b2   : > { %v2317_v20 = vpop.f32.mrf.mxu1  ;;  %13652 = vst [vmem:[#allocation126_spill] sm:$0xff] %v11763_v24 }
 0x2b3   : > { %v2444_v12 = vadd.f32 %v2317_v20, %v11639_v54  ;;  %v8977_v34 = vpop.f32.mrf.mxu0  ;;  %v9924_v20 = vld [vmem:[#allocation8] sm:$0xff]  }
 0x2b4   : > { %v8930_v13 = vpop.f32.mrf.mxu1  ;;  %v11767_v23 = vadd.f32 %v8977_v34, %v2446_v16  ;;  %9165 = vmatprep.subr.bf16.mxu0 %v9924_v20 }
 0x2b5   : > { %v11761_v2 = vadd.f32 %v8930_v13, %v11642_v18  ;;  %v2623_v21 = vpop.f32.mrf.mxu0  ;;  %9166 = vmatpush3.bf16.msra.mxu0 %v9924_v20 }
 0x2b6   : > { %v11765_v42 = vpop.f32.mrf.mxu1  ;;  %v11770_v57 = vadd.f32 %v2623_v21, %v2444_v12 }
 0x2b7   : > { %v11773_v46 = vpop.f32.mrf.mxu0 }
 0x2b8   : > { %v8933_v44 = vpop.f32.mrf.mxu1 }
 0x2b9   : > { %v2450_v54 = vadd.f32 %v8933_v44, %v11654_v3  ;;  %v11778_v47 = vpop.f32.mrf.mxu0 }
 0x2ba   : > { %v2333_v10 = vpop.f32.mrf.mxu1 }
 0x2bb   : > { %v2448_v18 = vadd.f32 %v2333_v10, %v11657_v36  ;;  %v8981_v3 = vpop.f32.mrf.mxu0 }
 0x2bc   : > { %v8934_v13 = vpop.f32.mrf.mxu1  ;;  %v11782_v34 = vadd.f32 %v8981_v3, %v2450_v54 }
 0x2bd   : > { %v11776_v31 = vadd.f32 %v8934_v13, %v11660_v51  ;;  %v2639_v36 = vpop.f32.mrf.mxu0 }
 0x2be   : > { %v11780_v16 = vpop.f32.mrf.mxu1  ;;  %v11785_v21 = vadd.f32 %v2639_v36, %v2448_v18 }
 0x2bf   : > { %v11788_v51 = vpop.f32.mrf.mxu0 }
 0x2c0   : > { %v8937_v50 = vpop.f32.mrf.mxu1 }
 0x2c1   : > { %v2454_v12 = vadd.f32 %v8937_v50, %v11672_v58  ;;  %v11793_v24 = vpop.f32.mrf.mxu0 }
 0x2c2   : > { %v2349_v44 = vpop.f32.mrf.mxu1 }
 0x2c3   : > { %v2452_v10 = vadd.f32 %v2349_v44, %v11675_v25  ;;  %v8985_v54 = vpop.f32.mrf.mxu0 }
 0x2c4   : > { %v8938_v13 = vpop.f32.mrf.mxu1  ;;  %v11797_v14 = vadd.f32 %v8985_v54, %v2454_v12 }
 0x2c5   : > { %v11791_v33 = vadd.f32 %v8938_v13, %v11678_v28  ;;  %v2655_v18 = vpop.f32.mrf.mxu0 }
 0x2c6   : > { %v11795_v20 = vpop.f32.mrf.mxu1  ;;  %v11800_v36 = vadd.f32 %v2655_v18, %v2452_v10 }
 0x2c7   : > { %v11803_v44 = vpop.f32.mrf.mxu0 }
 0x2c8   : > { %v8941_v3 = vpop.f32.mrf.mxu1 }
 0x2c9   : > { %v2458_v58 = vadd.f32 %v8941_v3, %v11690_v15  ;;  %v11808_v40 = vpop.f32.mrf.mxu0 }
 0x2ca   : > { %v2365_v50 = vpop.f32.mrf.mxu1 }
 0x2cb   : > { %v2456_v25 = vadd.f32 %v2365_v50, %v11693_v35  ;;  %v8989_v12 = vpop.f32.mrf.mxu0 }
 0x2cc   : > { %v8942_v28 = vpop.f32.mrf.mxu1  ;;  %v11812_v9 = vadd.f32 %v8989_v12, %v2458_v58 }
 0x2cd   : > { %v11806_v13 = vadd.f32 %v8942_v28, %v11696_v1  ;;  %v2671_v10 = vpop.f32.mrf.mxu0 }
 0x2ce   : > { %v11810_v45 = vpop.f32.mrf.mxu1  ;;  %v11815_v18 = vadd.f32 %v2671_v10, %v2456_v25 }
 0x2cf   : > { %13653 = vst [vmem:[#allocation111_spill] sm:$0xff] %v11810_v45  ;;  %v11818_v50 = vpop.f32.mrf.mxu0 }
 0x2d0   : > { %v8945_v54 = vpop.f32.mrf.mxu1 }
 0x2d1   : > { %v2462_v15 = vadd.f32 %v8945_v54, %v11707_v32  ;;  %v11823_v59 = vpop.f32.mrf.mxu0 }
 0x2d2   : > { %v2381_v3 = vpop.f32.mrf.mxu1  ;;  %13655 = vst [vmem:[#allocation64_spill] sm:$0xff] %v11823_v59 }
 0x2d3   : > { %v2460_v35 = vadd.f32 %v2381_v3, %v11710_v52  ;;  %v8993_v58 = vpop.f32.mrf.mxu0 }
 0x2d4   : > { %v8946_v1 = vpop.f32.mrf.mxu1  ;;  %v11827_v27 = vadd.f32 %v8993_v58, %v2462_v15 }
 0x2d5   : > { %v11821_v28 = vadd.f32 %v8946_v1, %v11713_v22  ;;  %v2687_v25 = vpop.f32.mrf.mxu0 }
 0x2d6   : > { %v11825_v4 = vpop.f32.mrf.mxu1  ;;  %v11830_v10 = vadd.f32 %v2687_v25, %v2460_v35 }
 0x2d7   : > { %13654 = vst [vmem:[#allocation130_spill] sm:$0xff] %v11821_v28  ;;  %13656 = vst [vmem:[#allocation46_spill] sm:$0xff] %v11825_v4  ;;  %v11833_v3 = vpop.f32.mrf.mxu0  ;;  %v9933_v28 = vld [vmem:[#allocation9 + $0x58] sm:$0xff]  }
 0x2d8   : > { %v8949_v12 = vpop.f32.mrf.mxu1  ;;  %13657 = vst [vmem:[#allocation45_spill] sm:$0xff] %v11833_v3 }
 0x2d9   : > { %v2466_v32 = vadd.f32 %v8949_v12, %v11722_v5  ;;  %v11838_v56 = vpop.f32.mrf.mxu0 }
 0x2da   : > { %v2397_v54 = vpop.f32.mrf.mxu1  ;;  %13659 = vst [vmem:[#allocation96_spill] sm:$0xff] %v11838_v56 }
 0x2db   : > { %v2464_v52 = vadd.f32 %v2397_v54, %v11726_v37  ;;  %v8997_v15 = vpop.f32.mrf.mxu0 }
 0x2dc   : > { %v8950_v22 = vpop.f32.mrf.mxu1  ;;  %v11842_v53 = vadd.f32 %v8997_v15, %v2466_v32 }
 0x2dd   : > { %v11836_v1 = vadd.f32 %v8950_v22, %v11729_v61  ;;  %v2703_v35 = vpop.f32.mrf.mxu0 }
 0x2de   : > { %v11840_v38 = vpop.f32.mrf.mxu1  ;;  %v11845_v25 = vadd.f32 %v2703_v35, %v2464_v52 }
 0x2df   : > { %13658 = vst [vmem:[#allocation65_spill] sm:$0xff] %v11836_v1  ;;  %13660 = vst [vmem:[#allocation56_spill] sm:$0xff] %v11840_v38  ;;  %v11848_v54 = vpop.f32.mrf.mxu0 }
 0x2e0   : > { %v8953_v58 = vpop.f32.mrf.mxu1  ;;  %13661 = vst [vmem:[#allocation55_spill] sm:$0xff] %v11848_v54 }
 0x2e1   : > { %v2470_v5 = vadd.f32 %v8953_v58, %v11739_v30  ;;  %v11853_v1 = vpop.f32.mrf.mxu0 }
 0x2e2   : > { %v2413_v12 = vpop.f32.mrf.mxu1  ;;  %13663 = vst [vmem:[#allocation60_spill] sm:$0xff] %v11853_v1 }
 0x2e3   : > { %v2468_v37 = vadd.f32 %v2413_v12, %v11742_v0  ;;  %v9001_v32 = vpop.f32.mrf.mxu0 }
 0x2e4   : > { %v8954_v61 = vpop.f32.mrf.mxu1  ;;  %v11857_v56 = vadd.f32 %v9001_v32, %v2470_v5 }
 0x2e5   : > { %v11851_v22 = vadd.f32 %v8954_v61, %v11745_v63  ;;  %v2719_v52 = vpop.f32.mrf.mxu0 }
 0x2e6   : > { %v11855_v38 = vpop.f32.mrf.mxu1  ;;  %v11860_v35 = vadd.f32 %v2719_v52, %v2468_v37 }
 0x2e7   : > { %13662 = vst [vmem:[#allocation61_spill] sm:$0xff] %v11851_v22  ;;  %13664 = vst [vmem:[#allocation63_spill] sm:$0xff] %v11855_v38  ;;  %v11863_v12 = vpop.f32.mrf.mxu0 }
 0x2e8   : > { %v8957_v15 = vpop.f32.mrf.mxu1  ;;  %13665 = vst [vmem:[#allocation62_spill] sm:$0xff] %v11863_v12 }
 0x2e9   : > { %v2474_v30 = vadd.f32 %v8957_v15, %v11752_v41  ;;  %v11868_v22 = vpop.f32.mrf.mxu0 }
 0x2ea   : > { %v2429_v58 = vpop.f32.mrf.mxu1  ;;  %13667 = vst [vmem:[#allocation68_spill] sm:$0xff] %v11868_v22  ;;  %v9929_v22 = vld [vmem:[#allocation9 + $0x68] sm:$0xff]  }
 0x2eb   : > { %v2472_v0 = vadd.f32 %v2429_v58, %v11755_v17  ;;  %v9005_v5 = vpop.f32.mrf.mxu0 }
 0x2ec   : > { %v8958_v63 = vpop.f32.mrf.mxu1  ;;  %v11872_v1 = vadd.f32 %v9005_v5, %v2474_v30 }
 0x2ed   : > { %v11866_v61 = vadd.f32 %v8958_v63, %v11758_v7  ;;  %v2735_v37 = vpop.f32.mrf.mxu0 }
 0x2ee   : > { %v11870_v38 = vpop.f32.mrf.mxu1  ;;  %v11877_v17 = vadd.f32 %v2735_v37, %v2472_v0 }
 0x2ef   : > { %13666 = vst [vmem:[#allocation69_spill] sm:$0xff] %v11866_v61  ;;  %13668 = vst [vmem:[#allocation101_spill] sm:$0xff] %v11870_v38  ;;  %v11882_v7 = vpop.f32.mrf.mxu0  ;;  %v9927_v61 = vld [vmem:[#allocation9 + $0x70] sm:$0xff]  }
 0x2f0   : > { %v9025_v32 = vpop.f32.mrf.mxu1  ;;  %13669 = vst [vmem:[#allocation71_spill] sm:$0xff] %v11882_v7 }
 0x2f1   : > { %v11875_v41 = vadd.f32 %v9025_v32, %v11767_v23  ;;  %v11886_v63 = vpop.f32.mrf.mxu0  ;;  %v9925_v23 = vld [vmem:[#allocation9 + $0x78] sm:$0xff]  }
 0x2f2   : > { %v2930_v15 = vpop.f32.mrf.mxu1  ;;  %13670 = vst [vmem:[#allocation70_spill] sm:$0xff] %v11886_v63  ;;  %v11892_v32 = vld [vmem:[#allocation9 + $0x38] sm:$0xff]   ;;  %9199 = vmatprep.subr.bf16.mxu1 %v9925_v23 }
 0x2f3   : > { %v11880_v52 = vadd.f32 %v2930_v15, %v11770_v57  ;;  %v11890_v30 = vpop.f32.mrf.mxu0  ;;  %9247 = vmatprep.subr.bf16.mxu0 %v11892_v32  ;;  %9200 = vmatpush3.bf16.msra.mxu1 %v9925_v23 }
 0x2f4   : > { %v11884_v58 = vpop.f32.mrf.mxu1  ;;  %9201 = vmatprep.subr.bf16.mxu1 %v9927_v61 }
 0x2f5   : > { %v11897_v57 = vpop.f32.mrf.mxu0 }
 0x2f6   : > { %v11888_v38 = vpop.f32.mrf.mxu1 }
 0x2f7   : > { %v11903_v63 = vpop.f32.mrf.mxu0  ;;  %9202 = vmatpush3.bf16.msra.mxu1 %v9927_v61 }
 0x2f8   : > { %v9029_v5 = vpop.f32.mrf.mxu1  ;;  %9203 = vmatprep.subr.bf16.mxu1 %v9929_v22 }
 0x2f9   : > { %v11895_v0 = vadd.f32 %v9029_v5, %v11782_v34  ;;  %v11907_v12 = vpop.f32.mrf.mxu0 }
 0x2fa   : > { %v2946_v37 = vpop.f32.mrf.mxu1 }
 0x2fb   : > { %v11901_v15 = vadd.f32 %v2946_v37, %v11785_v21  ;;  %v11911_v5 = vpop.f32.mrf.mxu0  ;;  %9204 = vmatpush3.bf16.msra.mxu1 %v9929_v22 }
 0x2fc   : > { %v11905_v7 = vpop.f32.mrf.mxu1  ;;  %9205 = vmatprep.subr.bf16.mxu1 %v9931_v39 }
 0x2fd   : > { %v11916_v23 = vpop.f32.mrf.mxu0 }
 0x2fe   : > { %v11909_v34 = vpop.f32.mrf.mxu1 }
 0x2ff   : > { %v11923_v61 = vpop.f32.mrf.mxu0  ;;  %9206 = vmatpush3.bf16.msra.mxu1 %v9931_v39 }
 0x300   : > { %v9033_v54 = vpop.f32.mrf.mxu1  ;;  %9207 = vmatprep.subr.bf16.mxu1 %v9933_v28 }
 0x301   : > { %v11914_v21 = vadd.f32 %v9033_v54, %v11797_v14  ;;  %v9935_v14 = vld [vmem:[#allocation9 + $0x50] sm:$0xff]   ;;  %v11930_v59 = vpop.f32.mrf.mxu0 }
 0x302   : > { %v2962_v37 = vpop.f32.mrf.mxu1 }
 0x303   : > { %v11919_v4 = vadd.f32 %v2962_v37, %v11800_v36  ;;  %9208 = vmatpush3.bf16.msra.mxu1 %v9933_v28  ;;  %v11937_v8 = vpop.f32.mrf.mxu0 }
 0x304   : > { %v11921_v3 = vpop.f32.mrf.mxu1  ;;  %9209 = vmatprep.subr.bf16.mxu1 %v9935_v14 }
 0x306   : > { %v11925_v43 = vpop.f32.mrf.mxu1 }
 0x307   : > { %9210 = vmatpush3.bf16.msra.mxu1 %v9935_v14 }
 0x308   : > { %v9037_v11 = vpop.f32.mrf.mxu1 }
 0x309   : > { %v11928_v54 = vadd.f32 %v9037_v11, %v11812_v9  ;;  %v11944_v11 = vpop.f32.mrf.mxu0 }
 0x30a   : > { %v2978_v36 = vpop.f32.mrf.mxu1 }
 0x30b   : > { %13671 = vst [vmem:[#allocation74_spill] sm:$0xff] %v11928_v54  ;;  %v11933_v22 = vadd.f32 %v2978_v36, %v11815_v18  ;;  %v11951_v28 = vpop.f32.mrf.mxu0 }
 0x30c   : > { %v11935_v37 = vpop.f32.mrf.mxu1 }
 0x30d   : > { %13672 = vst [vmem:[#allocation73_spill] sm:$0xff] %v11935_v37  ;;  %v11958_v14 = vpop.f32.mrf.mxu0 }
 0x30e   : > { %v11939_v55 = vpop.f32.mrf.mxu1 }
 0x30f   : > { %13673 = vst [vmem:[#allocation106_spill] sm:$0xff] %v11939_v55 }
 0x310   : > { %v9041_v39 = vpop.f32.mrf.mxu1 }
 0x311   : > { %v11942_v45 = vadd.f32 %v9041_v39, %v11827_v27 }
 0x312   : > { %v2994_v9 = vpop.f32.mrf.mxu1 }
 0x313   : > { %13674 = vst [vmem:[#allocation107_spill] sm:$0xff] %v11942_v45  ;;  %v11947_v54 = vadd.f32 %v2994_v9, %v11830_v10  ;;  %v11965_v10 = vpop.f32.mrf.mxu0 }
 0x314   : > { %v11949_v18 = vpop.f32.mrf.mxu1 }
 0x315   : > { %13675 = vst [vmem:[#allocation112_spill] sm:$0xff] %v11947_v54  ;;  %13676 = vst [vmem:[#allocation75_spill] sm:$0xff] %v11949_v18 }
 0x316   : > { %v11953_v36 = vpop.f32.mrf.mxu1 }
 0x317   : > { %13677 = vst [vmem:[#allocation72_spill] sm:$0xff] %v11953_v36  ;;  %v11972_v36 = vpop.f32.mrf.mxu0 }
 0x318   : > { %v9045_v37 = vpop.f32.mrf.mxu1 }
 0x319   : > { %v11956_v55 = vadd.f32 %v9045_v37, %v11842_v53 }
 0x31a   : > { %v3010_v27 = vpop.f32.mrf.mxu1 }
 0x31b   : > { %13678 = vst [vmem:[#allocation77_spill] sm:$0xff] %v11956_v55  ;;  %v11961_v39 = vadd.f32 %v3010_v27, %v11845_v25  ;;  %v11979_v25 = vpop.f32.mrf.mxu0 }
 0x31c   : > { %v11963_v45 = vpop.f32.mrf.mxu1 }
 0x31d   : > { %13679 = vst [vmem:[#allocation76_spill] sm:$0xff] %v11961_v39  ;;  %13680 = vst [vmem:[#allocation113_spill] sm:$0xff] %v11963_v45 }
 0x31e   : > { %v11967_v9 = vpop.f32.mrf.mxu1 }
 0x31f   : > { %13681 = vst [vmem:[#allocation117_spill] sm:$0xff] %v11967_v9  ;;  %v11986_v9 = vpop.f32.mrf.mxu0 }
 0x320   : > { %v9049_v18 = vpop.f32.mrf.mxu1 }
 0x321   : > { %v11970_v54 = vadd.f32 %v9049_v18, %v11857_v56 }
 0x322   : > { %v3026_v53 = vpop.f32.mrf.mxu1 }
 0x323   : > { %13682 = vst [vmem:[#allocation122_spill] sm:$0xff] %v11970_v54  ;;  %v11975_v37 = vadd.f32 %v3026_v53, %v11860_v35  ;;  %v2139_v35 = vadd.f32 %v11645_v62, %v11632_v48  ;;  %v11995_v53 = vpop.f32.mrf.mxu0 }
 0x324   : > { %v11977_v55 = vpop.f32.mrf.mxu1 }
 0x325   : > { %13683 = vst [vmem:[#allocation79_spill] sm:$0xff] %v11977_v55 }
 0x326   : > { %v11981_v27 = vpop.f32.mrf.mxu1 }
 0x327   : > { %13684 = vst [vmem:[#allocation78_spill] sm:$0xff] %v11981_v27  ;;  %v2753_v27 = vadd.f32 %v11773_v46, %v11761_v2  ;;  %v12013_v2 = vld [vmem:[%s13285_s4] ss:$0 sm:$0xff] }
 0x328   : > { %v9053_v45 = vpop.f32.mrf.mxu1 }
 0x329   : > { %v11984_v39 = vadd.f32 %v9053_v45, %v11872_v1  ;;  %v2445_v45 = vadd.f32 %v11765_v42, %v2139_v35  ;;  %v3365_v1 = vadd.f32 %v11890_v30, %v11875_v41  ;;  %v3060_v48 = vadd.f32 %v11884_v58, %v2753_v27 }
 0x32a   : > { %v3042_v56 = vpop.f32.mrf.mxu1  ;;  %v2757_v27 = vadd.f32 %v11788_v51, %v11776_v31 }
 0x32b   : > { %13685 = vst [vmem:[#allocation82_spill] sm:$0xff] %v11984_v39  ;;  %v11989_v18 = vadd.f32 %v3042_v56, %v11877_v17  ;;  %v2751_v17 = vadd.f32 %v11778_v47, %v2445_v45  ;;  %v3363_v56 = vadd.f32 %v11897_v57, %v11880_v52  ;;  %v3366_v46 = vadd.f32 %v11903_v63, %v3060_v48 }
 0x32c   : > { %v11991_v54 = vpop.f32.mrf.mxu1  ;;  %v2143_v47 = vadd.f32 %v11663_v60, %v11650_v6  ;;  %v3064_v31 = vadd.f32 %v11905_v7, %v2757_v27  ;;  %v2147_v7 = vadd.f32 %v11681_v26, %v11668_v49 }
 0x32d   : > { %13686 = vst [vmem:[#allocation80_spill] sm:$0xff] %v11989_v18  ;;  %v12008_v18 = vpop.f32.mrf.mxu0  ;;  %v3058_v41 = vadd.f32 %v11888_v38, %v2751_v17  ;;  %v3369_v38 = vadd.f32 %v11911_v5, %v11895_v0  ;;  %v3367_v17 = vadd.f32 %v11916_v23, %v11901_v15 }
 0x32e   : > { %v11997_v55 = vpop.f32.mrf.mxu1  ;;  %v2449_v35 = vadd.f32 %v11780_v16, %v2143_v47  ;;  %v3370_v0 = vadd.f32 %v11923_v61, %v3064_v31  ;;  %v2453_v61 = vadd.f32 %v11795_v20, %v2147_v7  ;;  %v13689_v7 = vld [vmem:[#allocation87_spill] sm:$0xff] }
 0x32f   : > { %v3364_v58 = vadd.f32 %v11907_v12, %v3058_v41  ;;  %v12024_v45 = vpop.f32.mrf.mxu0 }
 0x330   : > { %v9121_v39 = vpop.f32.mrf.mxu1  ;;  %v2755_v12 = vadd.f32 %v11793_v24, %v2449_v35  ;;  %v9928_v35 = vld [vmem:[#allocation9 + $0x30] sm:$0xff]  }
 0x331   : > { %v3671_v62 = vadd.f32 %v9121_v39, %v3365_v1 }
 0x332   : > { %v3542_v42 = vpop.f32.mrf.mxu1  ;;  %v3062_v5 = vadd.f32 %v11909_v34, %v2755_v12  ;;  %v2761_v34 = vadd.f32 %v11803_v44, %v11791_v33  ;;  %v3371_v33 = vadd.f32 %v11944_v11, %v11919_v4  ;;  %v9930_v4 = vld [vmem:[#allocation9 + $0x28] sm:$0xff]  }
 0x333   : > { %v3669_v30 = vadd.f32 %v3542_v42, %v3363_v56  ;;  %v3710_v57 = vadd.f32 %v12013_v2, %v3671_v62  ;;  %v12037_v42 = vpop.f32.mrf.mxu0 }
 0x334   : > { %v9122_v52 = vpop.f32.mrf.mxu1  ;;  %v3368_v23 = vadd.f32 %v11930_v59, %v3062_v5  ;;  %v3068_v20 = vadd.f32 %v11921_v3, %v2761_v34 }
 0x335   : > { %v3672_v39 = vadd.f32 %v9122_v52, %v3366_v46  ;;  %v3708_v1 = vadd.f32 %v12013_v2, %v3669_v30  ;;  %v3742_v16 = vmax.f32 %v3710_v57, 0.0 }
 0x336   : > { %v3545_v63 = vpop.f32.mrf.mxu1 }
 0x337   : > { %v3711_v6 = vadd.f32 %v12013_v2, %v3672_v39  ;;  %v3670_v60 = vadd.f32 %v3545_v63, %v3364_v58  ;;  %v3740_v41 = vmax.f32 %v3708_v1, 0.0  ;;  %v12046_v39 = vpop.f32.mrf.mxu0  ;;  %v3373_v63 = vadd.f32 %v11937_v8, %v11914_v21 }
 0x338   : > { %v9125_v51 = vpop.f32.mrf.mxu1  ;;  %v3374_v21 = vadd.f32 %v11951_v28, %v3068_v20 }
 0x339   : > { %v3743_v56 = vmax.f32 %v3711_v6, 0.0  ;;  %v3709_v48 = vadd.f32 %v12013_v2, %v3670_v60  ;;  %v3675_v62 = vadd.f32 %v9125_v51, %v3369_v38  ;;  %v2759_v38 = vadd.f32 %v11808_v40, %v2453_v61 }
 0x33a   : > { %v3558_v46 = vpop.f32.mrf.mxu1 }
 0x33b   : > { %v3773_v24 = vpack.c.bf16 %v3743_v56, %v3742_v16  ;;  %v3741_v30 = vmax.f32 %v3709_v48, 0.0  ;;  %v3673_v47 = vadd.f32 %v3558_v46, %v3367_v17  ;;  %v3714_v52 = vadd.f32 %v12013_v2, %v3675_v62  ;;  %v12060_v17 = vpop.f32.mrf.mxu0 }
 0x33c   : > { %v9126_v15 = vpop.f32.mrf.mxu1  ;;  %v3066_v12 = vadd.f32 %v11925_v43, %v2759_v38  ;;  %v2151_v16 = vadd.f32 %v11699_v19, %v11686_v29  ;;  %v2765_v43 = vadd.f32 %v11818_v50, %v11806_v13  ;;  %v13691_v13 = vld [vmem:[#allocation64_spill] sm:$0xff] }
 0x33d   : > { %v3676_v58 = vadd.f32 %v9126_v15, %v3370_v0  ;;  %v3772_v57 = vpack.c.bf16 %v3741_v30, %v3740_v41  ;;  %v3712_v49 = vadd.f32 %v12013_v2, %v3673_v47  ;;  %v3746_v1 = vmax.f32 %v3714_v52, 0.0  ;;  %v13687_v0 = vld [vmem:[#allocation111_spill] sm:$0xff]  ;;  %v12069_v46 = vpop.f32.mrf.mxu0  ;;  %v13688_v30 = vld [vmem:[#allocation74_spill] sm:$0xff]  ;;  %v13690_v15 = vld [vmem:[#allocation88_spill] sm:$0xff] }
 0x33e   : > { %v3561_v27 = vpop.f32.mrf.mxu1  ;;  %v3372_v48 = vadd.f32 %v11958_v14, %v3066_v12  ;;  %v2457_v5 = vadd.f32 %v13687_v0, %v2151_v16  ;;  %v3377_v29 = vadd.f32 %v11965_v10, %v13688_v30  ;;  %v3375_v52 = vadd.f32 %v11972_v36, %v11933_v22  ;;  %v9934_v22 = vld [vmem:[#allocation9 + $0x18] sm:$0xff]  }
 0x33f   : > { %v3715_v26 = vadd.f32 %v12013_v2, %v3676_v58  ;;  %v3674_v59 = vadd.f32 %v3561_v27, %v3368_v23  ;;  %9167 = vmatprep.mubr.bf16.mxu0 %v3772_v57  ;;  %v3744_v11 = vmax.f32 %v3712_v49, 0.0  ;;  %v1499_v23 = vadd.f32 %v13690_v15, %v13689_v7  ;;  %v13692_v58 = vld [vmem:[#allocation73_spill] sm:$0xff]  ;;  %v13700_v0 = vld [vmem:[#allocation66_spill] sm:$0xff] }
 0x340   : > { %v9129_v44 = vpop.f32.mrf.mxu1  ;;  %9168 = vmatmul.mubr.bf16.vlgmr.msra.gmra.mxu0 %v3773_v24  ;;  %v9932_v24 = vld [vmem:[#allocation9 + $0x20] sm:$0xff]   ;;  %v2763_v50 = vadd.f32 %v13691_v13, %v2457_v5  ;;  %v3072_v57 = vadd.f32 %v13692_v58, %v2765_v43  ;;  %v13701_v5 = vld [vmem:[#allocation89_spill] sm:$0xff] }
 0x341   : > { %v3747_v6 = vmax.f32 %v3715_v26, 0.0  ;;  %v3713_v60 = vadd.f32 %v12013_v2, %v3674_v59  ;;  %v3679_v8 = vadd.f32 %v9129_v44, %v3373_v63  ;;  %9248 = vmatpush3.bf16.msra.mxu0 %v11892_v32  ;;  %v13693_v63 = vld [vmem:[#allocation99_spill] sm:$0xff]  ;;  %v13694_v59 = vld [vmem:[#allocation106_spill] sm:$0xff] }
 0x342   : > { %v3574_v40 = vpop.f32.mrf.mxu1  ;;  %9249 = vmatprep.subr.bf16.mxu0 %v9928_v35  ;;  %v1849_v49 = vadd.f32 %v13693_v63, %v1499_v23  ;;  %v3378_v26 = vadd.f32 %v11979_v25, %v3072_v57  ;;  %v3070_v38 = vadd.f32 %v13694_v59, %v2763_v50  ;;  %v13705_v50 = vld [vmem:[#allocation59_spill] sm:$0xff]  ;;  %v13706_v57 = vld [vmem:[#allocation72_spill] sm:$0xff] }
 0x343   : > { %v3775_v3 = vpack.c.bf16 %v3747_v6, %v3746_v1  ;;  %v3745_v31 = vmax.f32 %v3713_v60, 0.0  ;;  %v3677_v51 = vadd.f32 %v3574_v40, %v3371_v33  ;;  %v3718_v32 = vadd.f32 %v12013_v2, %v3679_v8  ;;  %v12085_v33 = vpop.f32.mrf.mxu0  ;;  %v13695_v60 = vld [vmem:[#allocation100_spill] sm:$0xff] }
 0x344   : > { %v9130_v56 = vpop.f32.mrf.mxu1  ;;  %v2155_v8 = vadd.f32 %v13695_v60, %v1849_v49  ;;  %v3376_v12 = vadd.f32 %v11986_v9, %v3070_v38  ;;  %v13707_v49 = vld [vmem:[#allocation105_spill] sm:$0xff] }
 0x345   : > { %v3680_v28 = vadd.f32 %v9130_v56, %v3374_v21  ;;  %v3774_v62 = vpack.c.bf16 %v3745_v31, %v3744_v11  ;;  %9250 = vmatpush3.bf16.msra.mxu0 %v9928_v35  ;;  %v3716_v19 = vadd.f32 %v12013_v2, %v3677_v51  ;;  %v3750_v61 = vmax.f32 %v3718_v32, 0.0  ;;  %v13696_v11 = vld [vmem:[#allocation130_spill] sm:$0xff]  ;;  %v12093_v56 = vpop.f32.mrf.mxu0  ;;  %v13699_v32 = vld [vmem:[#allocation107_spill] sm:$0xff] }
 0x346   : > { %v3577_v41 = vpop.f32.mrf.mxu1  ;;  %9251 = vmatprep.subr.bf16.mxu0 %v9930_v4  ;;  %v13698_v51 = vld [vmem:[#allocation46_spill] sm:$0xff] }
 0x347   : > { %v3719_v14 = vadd.f32 %v12013_v2, %v3680_v28  ;;  %v3678_v47 = vadd.f32 %v3577_v41, %v3372_v48  ;;  %9171 = vmatprep.mubr.bf16.mxu0 %v3774_v62  ;;  %v3748_v36 = vmax.f32 %v3716_v19, 0.0  ;;  %v2461_v16 = vadd.f32 %v13698_v51, %v2155_v8  ;;  %v13714_v51 = vld [vmem:[#allocation60_spill] sm:$0xff] }
 0x348   : > { %v9133_v34 = vpop.f32.mrf.mxu1  ;;  %9172 = vmatmul.mubr.bf16.gmra.mxu0 %v3775_v3  ;;  %v13697_v3 = vld [vmem:[#allocation45_spill] sm:$0xff]  ;;  %v3381_v28 = vadd.f32 %v11995_v53, %v13699_v32  ;;  %v1515_v41 = vadd.f32 %v13701_v5, %v13700_v0 }
 0x349   : > { %v3751_v10 = vmax.f32 %v3719_v14, 0.0  ;;  %v3717_v27 = vadd.f32 %v12013_v2, %v3678_v47  ;;  %v3683_v35 = vadd.f32 %v9133_v34, %v3377_v29  ;;  %9252 = vmatpush3.bf16.msra.mxu0 %v9930_v4  ;;  %v2769_v31 = vadd.f32 %v13697_v3, %v13696_v11  ;;  %v13703_v29 = vld [vmem:[#allocation112_spill] sm:$0xff]  ;;  %v13704_v14 = vld [vmem:[#allocation75_spill] sm:$0xff]  ;;  %v13713_v3 = vld [vmem:[#allocation93_spill] sm:$0xff] }
 0x34a   : > { %v3590_v20 = vpop.f32.mrf.mxu1  ;;  %9253 = vmatprep.subr.bf16.mxu0 %v9932_v24  ;;  %v3379_v19 = vadd.f32 %v12008_v18, %v13703_v29  ;;  %v13718_v29 = vld [vmem:[#allocation117_spill] sm:$0xff] }
 0x34b   : > { %v3777_v44 = vpack.c.bf16 %v3751_v10, %v3750_v61  ;;  %v3749_v1 = vmax.f32 %v3717_v27, 0.0  ;;  %v3681_v6 = vadd.f32 %v3590_v20, %v3375_v52  ;;  %v3722_v40 = vadd.f32 %v12013_v2, %v3683_v35  ;;  %v3332_v61 = vpop.f32.mrf.mxu0 }
 0x34c   : > { %v9134_v21 = vpop.f32.mrf.mxu1  ;;  %v3076_v47 = vadd.f32 %v13704_v14, %v2769_v31  ;;  %v1853_v52 = vadd.f32 %v13705_v50, %v1515_v41  ;;  %v13717_v41 = vld [vmem:[#allocation67_spill] sm:$0xff] }
 0x34d   : > { %v3684_v4 = vadd.f32 %v9134_v21, %v3378_v26  ;;  %v3776_v25 = vpack.c.bf16 %v3749_v1, %v3748_v36  ;;  %9254 = vmatpush3.bf16.msra.mxu0 %v9932_v24  ;;  %v3720_v62 = vadd.f32 %v12013_v2, %v3681_v6  ;;  %v13702_v24 = vld [vmem:[#allocation96_spill] sm:$0xff]  ;;  %v3754_v15 = vmax.f32 %v3722_v40, 0.0  ;;  %v13709_v1 = vld [vmem:[#allocation55_spill] sm:$0xff]  ;;  %v9098_v8 = vpop.f32.mrf.mxu0 }
 0x34e   : > { %v3593_v48 = vpop.f32.mrf.mxu1  ;;  %9255 = vmatprep.subr.bf16.mxu0 %v9934_v22  ;;  %v2767_v30 = vadd.f32 %v13702_v24, %v2461_v16  ;;  %v3382_v58 = vadd.f32 %v12024_v45, %v3076_v47  ;;  %v2159_v26 = vadd.f32 %v13707_v49, %v1853_v52  ;;  %v13710_v6 = vld [vmem:[#allocation56_spill] sm:$0xff] }
 0x34f   : > { %v3723_v9 = vadd.f32 %v12013_v2, %v3684_v4  ;;  %v3682_v43 = vadd.f32 %v3593_v48, %v3376_v12  ;;  %9175 = vmatprep.mubr.bf16.mxu0 %v3776_v25  ;;  %v3752_v27 = vmax.f32 %v3720_v62, 0.0  ;;  %v13711_v12 = vld [vmem:[#allocation77_spill] sm:$0xff]  ;;  %v13715_v48 = vld [vmem:[#allocation76_spill] sm:$0xff]  ;;  %v3335_v14 = vpop.f32.mrf.mxu0 }
 0x350   : > { %v9137_v7 = vpop.f32.mrf.mxu1  ;;  %9176 = vmatmul.mubr.bf16.gmra.mxu0 %v3777_v44  ;;  %v3074_v34 = vadd.f32 %v13706_v57, %v2767_v30  ;;  %v13708_v44 = vld [vmem:[#allocation65_spill] sm:$0xff]  ;;  %v2465_v60 = vadd.f32 %v13710_v6, %v2159_v26  ;;  %v3385_v40 = vadd.f32 %v12046_v39, %v13711_v12  ;;  %v3383_v32 = vadd.f32 %v12060_v17, %v13715_v48  ;;  %v13723_v26 = vld [vmem:[#allocation122_spill] sm:$0xff] }
 0x351   : > { %v3755_v53 = vmax.f32 %v3723_v9, 0.0  ;;  %v3721_v23 = vadd.f32 %v12013_v2, %v3682_v43  ;;  %v3687_v13 = vadd.f32 %v9137_v7, %v3381_v28  ;;  %9256 = vmatpush3.bf16.msra.mxu0 %v9934_v22  ;;  %v2773_v45 = vadd.f32 %v13709_v1, %v13708_v44  ;;  %v13716_v28 = vld [vmem:[#allocation113_spill] sm:$0xff]  ;;  %v13726_v1 = vld [vmem:[#allocation68_spill] sm:$0xff] }
 0x352   : > { %v3606_v10 = vpop.f32.mrf.mxu1  ;;  %v3380_v38 = vadd.f32 %v12037_v42, %v3074_v34  ;;  %v13712_v42 = vld [vmem:[#allocation90_spill] sm:$0xff]  ;;  %v2771_v16 = vadd.f32 %v13714_v51, %v2465_v60  ;;  %v3387_v6 = vadd.f32 %v3332_v61, %v11975_v37  ;;  %v13727_v60 = vld [vmem:[#allocation79_spill] sm:$0xff] }
 0x353   : > { %v3779_v18 = vpack.c.bf16 %v3755_v53, %v3754_v15  ;;  %v3753_v35 = vmax.f32 %v3721_v23, 0.0  ;;  %v3685_v63 = vadd.f32 %v3606_v10, %v3379_v19  ;;  %v3726_v20 = vadd.f32 %v12013_v2, %v3687_v13  ;;  %v13719_v23 = vld [vmem:[#allocation121_spill] sm:$0xff]  ;;  %v13730_v61 = vld [vmem:[#allocation126_spill] sm:$0xff] }
 0x354   : > { %v9138_v59 = vpop.f32.mrf.mxu1  ;;  %v1531_v31 = vadd.f32 %v13713_v3, %v13712_v42  ;;  %v3080_v62 = vadd.f32 %v13716_v28, %v2773_v45  ;;  %v3078_v19 = vadd.f32 %v13718_v29, %v2771_v16  ;;  %v13720_v10 = vld [vmem:[#allocation61_spill] sm:$0xff] }
 0x355   : > { %v3688_v22 = vadd.f32 %v9138_v59, %v3382_v58  ;;  %v3778_v36 = vpack.c.bf16 %v3753_v35, %v3752_v27  ;;  %v3724_v4 = vadd.f32 %v12013_v2, %v3685_v63  ;;  %v3758_v43 = vmax.f32 %v3726_v20, 0.0  ;;  %v13721_v27 = vld [vmem:[#allocation62_spill] sm:$0xff]  ;;  %v9101_v63 = vpop.f32.mrf.mxu0 }
 0x356   : > { %v3609_v21 = vpop.f32.mrf.mxu1  ;;  %v1857_v24 = vadd.f32 %v13717_v41, %v1531_v31  ;;  %v3386_v30 = vadd.f32 %v12069_v46, %v3080_v62  ;;  %v3384_v52 = vadd.f32 %v12085_v33, %v3078_v19  ;;  %v2777_v46 = vadd.f32 %v13721_v27, %v13720_v10  ;;  %v13724_v33 = vld [vmem:[#allocation94_spill] sm:$0xff] }
 0x357   : > { %v3727_v25 = vadd.f32 %v12013_v2, %v3688_v22  ;;  %v3686_v11 = vadd.f32 %v3609_v21, %v3380_v38  ;;  %9179 = vmatprep.mubr.bf16.mxu0 %v3778_v36  ;;  %v3756_v7 = vmax.f32 %v3724_v4, 0.0  ;;  %v3389_v59 = vadd.f32 %v12093_v56, %v13723_v26  ;;  %v13725_v36 = vld [vmem:[#allocation95_spill] sm:$0xff]  ;;  %v13729_v31 = vld [vmem:[#allocation78_spill] sm:$0xff]  ;;  %v3348_v16 = vpop.f32.mrf.mxu0 }
 0x358   : > { %v9141_v9 = vpop.f32.mrf.mxu1  ;;  %9180 = vmatmul.mubr.bf16.gmra.mxu0 %v3779_v18  ;;  %v2163_v13 = vadd.f32 %v13719_v23, %v1857_v24  ;;  %v13722_v18 = vld [vmem:[#allocation63_spill] sm:$0xff]  ;;  %v1547_v44 = vadd.f32 %v13725_v36, %v13724_v33  ;;  %v3084_v21 = vadd.f32 %v13727_v60, %v2777_v46  ;;  %v13731_v24 = vld [vmem:[#allocation69_spill] sm:$0xff] }
 0x359   : > { %v3759_v39 = vmax.f32 %v3727_v25, 0.0  ;;  %v3725_v0 = vadd.f32 %v12013_v2, %v3686_v11  ;;  %v3691_v5 = vadd.f32 %v9141_v9, %v3385_v40  ;;  %v13728_v11 = vld [vmem:[#allocation81_spill] sm:$0xff] }
 0x35a   : > { %v3622_v47 = vpop.f32.mrf.mxu1  ;;  %v2469_v35 = vadd.f32 %v13722_v18, %v2163_v13  ;;  %v1861_v42 = vadd.f32 %v13728_v11, %v1547_v44  ;;  %v3390_v3 = vadd.f32 %v9098_v8, %v3084_v21  ;;  %v13733_v8 = vld [vmem:[#allocation101_spill] sm:$0xff] }
 0x35b   : > { %v3781_v15 = vpack.c.bf16 %v3759_v39, %v3758_v43  ;;  %v3757_v17 = vmax.f32 %v3725_v0, 0.0  ;;  %v3689_v53 = vadd.f32 %v3622_v47, %v3383_v32  ;;  %v3730_v58 = vadd.f32 %v12013_v2, %v3691_v5  ;;  %v9102_v47 = vpop.f32.mrf.mxu0 }
 0x35c   : > { %v9142_v50 = vpop.f32.mrf.mxu1  ;;  %v2775_v45 = vadd.f32 %v13726_v1, %v2469_v35  ;;  %v2167_v9 = vadd.f32 %v13730_v61, %v1861_v42  ;;  %v9936_v42 = vld [vmem:[#allocation9 + $0x10] sm:$0xff]   ;;  %v12164_v61 = vld [vmem:[#allocation9 + $0xf8] sm:$0xff]  }
 0x35d   : > { %v3692_v57 = vadd.f32 %v9142_v50, %v3386_v30  ;;  %v3780_v34 = vpack.c.bf16 %v3757_v17, %v3756_v7  ;;  %v3728_v38 = vadd.f32 %v12013_v2, %v3689_v53  ;;  %v3762_v40 = vmax.f32 %v3730_v58, 0.0  ;;  %v13732_v30 = vld [vmem:[#allocation71_spill] sm:$0xff]  ;;  %v13736_v58 = vld [vmem:[#allocation80_spill] sm:$0xff]  ;;  %9257 = vmatprep.subr.bf16.mxu0 %v9936_v42 }
 0x35e   : > { %v3625_v49 = vpop.f32.mrf.mxu1  ;;  %v3082_v51 = vadd.f32 %v13729_v31, %v2775_v45  ;;  %v2781_v29 = vadd.f32 %v13732_v30, %v13731_v24  ;;  %v2473_v19 = vadd.f32 %v13733_v8, %v2167_v9  ;;  %9258 = vmatpush3.bf16.msra.mxu0 %v9936_v42  ;;  %v9938_v31 = vld [vmem:[#allocation9 + $0x8] sm:$0xff]   ;;  %v13738_v8 = vld [vmem:[#allocation25_spill] sm:$0xff] }
 0x35f   : > { %v3731_v20 = vadd.f32 %v12013_v2, %v3692_v57  ;;  %v3690_v22 = vadd.f32 %v3625_v49, %v3384_v52  ;;  %9183 = vmatprep.mubr.bf16.mxu0 %v3780_v34  ;;  %v3760_v32 = vmax.f32 %v3728_v38, 0.0  ;;  %v3391_v57 = vadd.f32 %v3348_v16, %v13736_v58  ;;  %v3351_v49 = vpop.f32.mrf.mxu0  ;;  %9259 = vmatprep.subr.bf16.mxu0 %v9938_v31  ;;  %v9940_v16 = vld [vmem:[#allocation9] sm:$0xff]   ;;  %v12170_v9 = vld [vmem:[%s13287_s6] ss:$0 sm:$0xff] }
 0x360   : > { %v9145_v12 = vpop.f32.mrf.mxu1  ;;  %9184 = vmatmul.mubr.bf16.gmra.mxu0 %v3781_v15  ;;  %v3388_v39 = vadd.f32 %v3335_v14, %v3082_v51  ;;  %v13734_v15 = vld [vmem:[#allocation82_spill] sm:$0xff]  ;;  %v3088_v52 = vadd.f32 %v11991_v54, %v2781_v29 }
 0x361   : > { %v3763_v4 = vmax.f32 %v3731_v20, 0.0  ;;  %v3729_v56 = vadd.f32 %v12013_v2, %v3690_v22  ;;  %v3695_v25 = vadd.f32 %v9145_v12, %v3389_v59  ;;  %v3393_v17 = vadd.f32 %v9101_v63, %v13734_v15  ;;  %v13735_v14 = vld [vmem:[#allocation70_spill] sm:$0xff] }
 0x362   : > { %v3638_v48 = vpop.f32.mrf.mxu1  ;;  %v2779_v50 = vadd.f32 %v13735_v14, %v2473_v19  ;;  %v3394_v63 = vadd.f32 %v9102_v47, %v3088_v52  ;;  %9260 = vmatpush3.bf16.msra.mxu0 %v9938_v31  ;;  %v9939_v51 = vld [vmem:[#allocation9 + $0x40] sm:$0xff]  }
 0x363   : > { %v3783_v28 = vpack.c.bf16 %v3763_v4, %v3762_v40  ;;  %v3761_v62 = vmax.f32 %v3729_v56, 0.0  ;;  %v3693_v37 = vadd.f32 %v3638_v48, %v3387_v6  ;;  %v3734_v0 = vadd.f32 %v12013_v2, %v3695_v25  ;;  %9261 = vmatprep.subr.bf16.mxu0 %v9940_v16  ;;  %v4235_v48 = vld [vmem:[#allocation2 + $0x9] sm:$0xff] }
 0x364   : > { %v9146_v43 = vpop.f32.mrf.mxu1  ;;  %v3086_v35 = vadd.f32 %v11997_v55, %v2779_v50  ;;  %v13740_v50 = vld [vmem:[#allocation29_spill] sm:$0xff] }
 0x365   : > { %v3696_v5 = vadd.f32 %v9146_v43, %v3390_v3  ;;  %v3782_v41 = vpack.c.bf16 %v3761_v62, %v3760_v32  ;;  %v3732_v53 = vadd.f32 %v12013_v2, %v3693_v37  ;;  %v3766_v10 = vmax.f32 %v3734_v0, 0.0  ;;  %v9937_v3 = vld [vmem:[#allocation9 + $0x48] sm:$0xff]   ;;  %v9941_v62 = vld [vmem:[#allocation9 + $0xb8] sm:$0xff]  }
 0x366   : > { %v3641_v7 = vpop.f32.mrf.mxu1  ;;  %v3392_v54 = vadd.f32 %v3351_v49, %v3086_v35  ;;  %9211 = vmatprep.subr.bf16.mxu1 %v9937_v3  ;;  %9262 = vmatpush3.bf16.msra.mxu0 %v9940_v16  ;;  %v10022_v32 = vld [vmem:[#allocation2] sm:$0xff] }
 0x367   : > { %v3735_v23 = vadd.f32 %v12013_v2, %v3696_v5  ;;  %v3694_v13 = vadd.f32 %v3641_v7, %v3388_v39  ;;  %9187 = vmatprep.mubr.bf16.mxu0 %v3782_v41  ;;  %v3764_v59 = vmax.f32 %v3732_v53, 0.0  ;;  %9212 = vmatpush3.bf16.msra.mxu1 %v9937_v3  ;;  %v13737_v5 = vld [vmem:[#allocation23_spill] sm:$0xff]  ;;  %v13746_v16 = vld [vmem:[#allocation41_spill] sm:$0xff] }
 0x368   : > { %v9149_v34 = vpop.f32.mrf.mxu1  ;;  %9188 = vmatmul.mubr.bf16.gmra.mxu0 %v3783_v28  ;;  %9213 = vmatprep.subr.bf16.mxu1 %v9939_v51  ;;  %v4202_v28 = vpack.c.bf16 %v10022_v32, %v10022_v32 }
 0x369   : > { %v3767_v27 = vmax.f32 %v3735_v23, 0.0  ;;  %v3733_v46 = vadd.f32 %v12013_v2, %v3694_v13  ;;  %v3699_v18 = vadd.f32 %v9149_v34, %v3393_v17  ;;  %9343 = vmatprep.subr.bf16.mxu0 %v12164_v61  ;;  %v13739_v17 = vld [vmem:[#allocation27_spill] sm:$0xff] }
 0x36a   : > { %v3654_v26 = vpop.f32.mrf.mxu1 }
 0x36b   : > { %v3785_v38 = vpack.c.bf16 %v3767_v27, %v3766_v10  ;;  %v3765_v20 = vmax.f32 %v3733_v46, 0.0  ;;  %v3697_v22 = vadd.f32 %v3654_v26, %v3391_v57  ;;  %v3738_v36 = vadd.f32 %v12013_v2, %v3699_v18  ;;  %9214 = vmatpush3.bf16.msra.mxu1 %v9939_v51  ;;  %v13741_v10 = vld [vmem:[#allocation31_spill] sm:$0xff] }
 0x36c   : > { %v9150_v33 = vpop.f32.mrf.mxu1  ;;  %9295 = vmatprep.subr.bf16.mxu1 %v9941_v62 }
 0x36d   : > { %v3700_v44 = vadd.f32 %v9150_v33, %v3394_v63  ;;  %v3784_v1 = vpack.c.bf16 %v3765_v20, %v3764_v59  ;;  %v3736_v6 = vadd.f32 %v12013_v2, %v3697_v22  ;;  %v3770_v55 = vmax.f32 %v3738_v36, 0.0  ;;  %v13742_v63 = vld [vmem:[#allocation33_spill] sm:$0xff] }
 0x36e   : > { %v3657_v45 = vpop.f32.mrf.mxu1 }
 0x36f   : > { %v3739_v60 = vadd.f32 %v12013_v2, %v3700_v44  ;;  %v3698_v21 = vadd.f32 %v3657_v45, %v3392_v54  ;;  %9191 = vmatprep.mubr.bf16.mxu0 %v3784_v1  ;;  %v3768_v4 = vmax.f32 %v3736_v6, 0.0  ;;  %v13743_v54 = vld [vmem:[#allocation35_spill] sm:$0xff]  ;;  %v13744_v6 = vld [vmem:[#allocation37_spill] sm:$0xff] }
 0x370   : > { %9192 = vmatmul.mubr.bf16.gmra.mxu0 %v3785_v38  ;;  %v9943_v38 = vld [vmem:[#allocation9 + $0xb0] sm:$0xff]  }
 0x371   : > { %v3771_v12 = vmax.f32 %v3739_v60, 0.0  ;;  %v3737_v40 = vadd.f32 %v12013_v2, %v3698_v21  ;;  %v4234_v2 = vld [vmem:[#allocation2 + $0x1] sm:$0xff] }
 0x372   : > { %v4266_v37 = vpack.c.bf16 %v4235_v48, %v4234_v2 }
 0x373   : > { %v3787_v56 = vpack.c.bf16 %v3771_v12, %v3770_v55  ;;  %v3769_v25 = vmax.f32 %v3737_v40, 0.0  ;;  %v9945_v55 = vld [vmem:[#allocation9 + $0xa8] sm:$0xff]  }
 0x374   : > { %9215 = vmatprep.mubr.bf16.mxu1 %v4266_v37 }
 0x375   : > { %v3786_v11 = vpack.c.bf16 %v3769_v25, %v3768_v4  ;;  %v13745_v4 = vld [vmem:[#allocation39_spill] sm:$0xff] }
 0x377   : > { %9195 = vmatprep.mubr.bf16.mxu0 %v3786_v11 }
 0x378   : > { %9196 = vmatmul.mubr.bf16.gmra.mxu0 %v3787_v56 }
 0x379   : > { %9263 = vmatprep.mubr.bf16.mxu0 %v4202_v28 }
 0x400   : > { %v9169_v43 = vpop.f32.mrf.mxu0 }
 0x401   : > { %v3902_v39 = vadd.f32 %v9169_v43, %v12170_v9 }
 0x402   : > { %v3893_v0 = vpop.f32.mrf.mxu0 }
 0x403   : > { %v4022_v41 = vadd.f32 %v3902_v39, %v13737_v5  ;;  %v3894_v24 = vadd.f32 %v12170_v9, %v3893_v0  ;;  %v13747_v5 = vld [vmem:[#allocation43_spill] sm:$0xff] }
 0x404   : > { %v9170_v30 = vpop.f32.mrf.mxu0 }
 0x405   : > { %v4054_v29 = vmax.f32 %v4022_v41, 0.0  ;;  %v4020_v19 = vadd.f32 %v3894_v24, %v13738_v8  ;;  %v3905_v47 = vadd.f32 %v9170_v30, %v12170_v9  ;;  %v9947_v30 = vld [vmem:[#allocation9 + $0xa0] sm:$0xff]  }
 0x406   : > { %v3896_v7 = vpop.f32.mrf.mxu0 }
 0x407   : > { %4140 = vst [vmem:[#allocation2 + $0x31] sm:$0xff] %v4054_v29  ;;  %v4052_v15 = vmax.f32 %v4020_v19, 0.0  ;;  %v4023_v53 = vadd.f32 %v3905_v47, %v13739_v17  ;;  %v3897_v23 = vadd.f32 %v12170_v9, %v3896_v7  ;;  %v13748_v47 = vld [vmem:[#allocation47_spill] sm:$0xff] }
 0x408   : > { %v9173_v13 = vpop.f32.mrf.mxu0  ;;  %v9946_v17 = vld [vmem:[#allocation9 + $0xe8] sm:$0xff]  }
 0x409   : > { %4138 = vst [vmem:[#allocation2 + $0x19] sm:$0xff] %v4052_v15  ;;  %v4055_v14 = vmax.f32 %v4023_v53, 0.0  ;;  %v4021_v52 = vadd.f32 %v3897_v23, %v13740_v50  ;;  %v3918_v58 = vadd.f32 %v9173_v13, %v12170_v9  ;;  %v13749_v13 = vld [vmem:[#allocation49_spill] sm:$0xff] }
 0x40a   : > { %v3909_v57 = vpop.f32.mrf.mxu0 }
 0x40b   : > { %4141 = vst [vmem:[#allocation2 + $0x39] sm:$0xff] %v4055_v14  ;;  %v4053_v34 = vmax.f32 %v4021_v52, 0.0  ;;  %v4026_v27 = vadd.f32 %v3918_v58, %v13741_v10  ;;  %v3910_v46 = vadd.f32 %v12170_v9, %v3909_v57  ;;  %v4268_v22 = vpack.c.bf16 %v4055_v14, %v4054_v29  ;;  %v9949_v52 = vld [vmem:[#allocation9 + $0x98] sm:$0xff]  }
 0x40c   : > { %v9174_v18 = vpop.f32.mrf.mxu0 }
 0x40d   : > { %4139 = vst [vmem:[#allocation2 + $0x21] sm:$0xff] %v4053_v34  ;;  %v4058_v35 = vmax.f32 %v4026_v27, 0.0  ;;  %v4024_v49 = vadd.f32 %v3910_v46, %v13742_v63  ;;  %v3921_v26 = vadd.f32 %v9174_v18, %v12170_v9  ;;  %v4267_v59 = vpack.c.bf16 %v4053_v34, %v4052_v15  ;;  %v13750_v27 = vld [vmem:[#allocation51_spill] sm:$0xff] }
 0x40e   : > { %v3912_v20 = vpop.f32.mrf.mxu0  ;;  %v4174_v28 = vld [vmem:[#allocation2 + $0x30] sm:$0xff] }
 0x40f   : > { %4144 = vst [vmem:[#allocation2 + $0x61] sm:$0xff] %v4058_v35  ;;  %v4056_v33 = vmax.f32 %v4024_v49, 0.0  ;;  %v4027_v36 = vadd.f32 %v3921_v26, %v13743_v54  ;;  %v3913_v44 = vadd.f32 %v12170_v9, %v3912_v20  ;;  %9216 = vmatmul.mubr.bf16.vlgmr.msra.gmra.mxu1 %v4267_v59  ;;  %v9948_v49 = vld [vmem:[#allocation9 + $0xe0] sm:$0xff]  }
 0x410   : > { %v9177_v1 = vpop.f32.mrf.mxu0  ;;  %9296 = vmatpush3.bf16.msra.mxu1 %v9941_v62  ;;  %9219 = vmatprep.mubr.bf16.mxu1 %v4268_v22  ;;  %v4172_v3 = vld [vmem:[#allocation2 + $0x18] sm:$0xff]  ;;  %v9944_v62 = vld [vmem:[#allocation9 + $0xf0] sm:$0xff]  }
 0x411   : > { %4142 = vst [vmem:[#allocation2 + $0x49] sm:$0xff] %v4056_v33  ;;  %v4059_v45 = vmax.f32 %v4027_v36, 0.0  ;;  %v4025_v60 = vadd.f32 %v3913_v44, %v13744_v6  ;;  %v3934_v21 = vadd.f32 %v9177_v1, %v12170_v9  ;;  %9297 = vmatprep.subr.bf16.mxu1 %v9943_v38  ;;  %v13751_v22 = vld [vmem:[#allocation53_spill] sm:$0xff] }
 0x412   : > { %v3925_v12 = vpop.f32.mrf.mxu0  ;;  %v4175_v11 = vld [vmem:[#allocation2 + $0x38] sm:$0xff]  ;;  %v9951_v36 = vld [vmem:[#allocation9 + $0x90] sm:$0xff]  }
 0x413   : > { %4145 = vst [vmem:[#allocation2 + $0x69] sm:$0xff] %v4059_v45  ;;  %v4057_v40 = vmax.f32 %v4025_v60, 0.0  ;;  %v12190_v56 = vadd.f32 %v3934_v21, %v13745_v4  ;;  %v3926_v25 = vadd.f32 %v12170_v9, %v3925_v12  ;;  %v12198_v43 = vpack.c.bf16 %v4175_v11, %v4174_v28  ;;  %v13752_v6 = vld [vmem:[#allocation57_spill] sm:$0xff]  ;;  %v13753_v4 = vld [vmem:[#allocation24_spill] sm:$0xff] }
 0x414   : > { %v9178_v42 = vpop.f32.mrf.mxu0  ;;  %v4173_v31 = vld [vmem:[#allocation2 + $0x20] sm:$0xff]  ;;  %9298 = vmatpush3.bf16.msra.mxu1 %v9943_v38  ;;  %v4270_v8 = vpack.c.bf16 %v4059_v45, %v4058_v35 }
 0x415   : > { %4143 = vst [vmem:[#allocation2 + $0x51] sm:$0xff] %v4057_v40  ;;  %v4062_v51 = vmax.f32 %v12190_v56, 0.0  ;;  %v4028_v2 = vadd.f32 %v3926_v25, %v13746_v16  ;;  %v3937_v48 = vadd.f32 %v9178_v42, %v12170_v9  ;;  %v12196_v32 = vpack.c.bf16 %v4173_v31, %v4172_v3  ;;  %9299 = vmatprep.subr.bf16.mxu1 %v9945_v55  ;;  %v9953_v42 = vld [vmem:[#allocation9 + $0x88] sm:$0xff]  }
 0x416   : > { %v3928_v37 = vpop.f32.mrf.mxu0  ;;  %v4269_v39 = vpack.c.bf16 %v4057_v40, %v4056_v33  ;;  %v4178_v63 = vld [vmem:[#allocation2 + $0x60] sm:$0xff] }
 0x417   : > { %4148 = vst [vmem:[#allocation2 + $0x91] sm:$0xff] %v4062_v51  ;;  %v4060_v0 = vmax.f32 %v4028_v2, 0.0  ;;  %v4031_v41 = vadd.f32 %v3937_v48, %v13747_v5  ;;  %v3929_v24 = vadd.f32 %v12170_v9, %v3928_v37  ;;  %9264 = vmatmul.mubr.bf16.vlgmr.msra.gmra.mxu0 %v12196_v32  ;;  %v13754_v2 = vld [vmem:[#allocation26_spill] sm:$0xff] }
 0x418   : > { %v9181_v29 = vpop.f32.mrf.mxu0  ;;  %9267 = vmatprep.mubr.bf16.mxu0 %v12198_v43  ;;  %9344 = vmatpush3.bf16.msra.mxu0 %v12164_v61  ;;  %v4176_v57 = vld [vmem:[#allocation2 + $0x48] sm:$0xff] }
 0x419   : > { %4146 = vst [vmem:[#allocation2 + $0x79] sm:$0xff] %v4060_v0  ;;  %v4063_v19 = vmax.f32 %v4031_v41, 0.0  ;;  %v4029_v7 = vadd.f32 %v3929_v24, %v13748_v47  ;;  %v3950_v15 = vadd.f32 %v9181_v29, %v12170_v9  ;;  %9220 = vmatmul.mubr.bf16.gmra.mxu1 %v4269_v39  ;;  %9345 = vmatprep.subr.bf16.mxu0 %v9944_v62  ;;  %v9952_v39 = vld [vmem:[#allocation9 + $0xd0] sm:$0xff]  }
 0x41a   : > { %v3941_v53 = vpop.f32.mrf.mxu0  ;;  %9223 = vmatprep.mubr.bf16.mxu1 %v4270_v8  ;;  %9300 = vmatpush3.bf16.msra.mxu1 %v9945_v55  ;;  %v4179_v50 = vld [vmem:[#allocation2 + $0x68] sm:$0xff] }
 0x41b   : > { %4149 = vst [vmem:[#allocation2 + $0x99] sm:$0xff] %v4063_v19  ;;  %v4061_v23 = vmax.f32 %v4029_v7, 0.0  ;;  %v12208_v14 = vadd.f32 %v3950_v15, %v13749_v13  ;;  %v3942_v61 = vadd.f32 %v12170_v9, %v3941_v53  ;;  %9301 = vmatprep.subr.bf16.mxu1 %v9947_v30  ;;  %v12216_v59 = vpack.c.bf16 %v4179_v50, %v4178_v63  ;;  %v9950_v55 = vld [vmem:[#allocation9 + $0xd8] sm:$0xff]   ;;  %v9954_v13 = vld [vmem:[#allocation9 + $0xc8] sm:$0xff]  }
 0x41c   : > { %v9182_v58 = vpop.f32.mrf.mxu0  ;;  %v4177_v34 = vld [vmem:[#allocation2 + $0x50] sm:$0xff]  ;;  %9346 = vmatpush3.bf16.msra.mxu0 %v9944_v62  ;;  %v4272_v1 = vpack.c.bf16 %v4063_v19, %v4062_v51 }
 0x41d   : > { %4147 = vst [vmem:[#allocation2 + $0x81] sm:$0xff] %v4061_v23  ;;  %v4066_v10 = vmax.f32 %v12208_v14, 0.0  ;;  %v4032_v46 = vadd.f32 %v3942_v61, %v13750_v27  ;;  %v3953_v18 = vadd.f32 %v9182_v58, %v12170_v9  ;;  %v12214_v35 = vpack.c.bf16 %v4177_v34, %v4176_v57  ;;  %9347 = vmatprep.subr.bf16.mxu0 %v9946_v17  ;;  %v9955_v19 = vld [vmem:[#allocation9 + $0x80] sm:$0xff]  }
 0x41e   : > { %v3944_v26 = vpop.f32.mrf.mxu0  ;;  %v4271_v38 = vpack.c.bf16 %v4061_v23, %v4060_v0  ;;  %9302 = vmatpush3.bf16.msra.mxu1 %v9947_v30  ;;  %v4182_v37 = vld [vmem:[#allocation2 + $0x90] sm:$0xff]  ;;  %v13755_v30 = vld [vmem:[#allocation28_spill] sm:$0xff] }
 0x41f   : > { %4152 = vst [vmem:[#allocation2 + $0xc1] sm:$0xff] %v4066_v10  ;;  %v4064_v20 = vmax.f32 %v4032_v46, 0.0  ;;  %v4035_v33 = vadd.f32 %v3953_v18, %v13751_v22  ;;  %v3945_v54 = vadd.f32 %v12170_v9, %v3944_v26  ;;  %9268 = vmatmul.mubr.bf16.gmra.mxu0 %v12214_v35  ;;  %9303 = vmatprep.subr.bf16.mxu1 %v9949_v52  ;;  %v9959_v34 = vld [vmem:[%s13289_s8 + $0x74] ss:$8 sps:$4 sm:$0xff]   ;;  %v13758_v63 = vld [vmem:[#allocation34_spill] sm:$0xff] }
 0x420   : > { %v9185_v44 = vpop.f32.mrf.mxu0  ;;  %9271 = vmatprep.mubr.bf16.mxu0 %v12216_v59  ;;  %9348 = vmatpush3.bf16.msra.mxu0 %v9946_v17  ;;  %v4180_v31 = vld [vmem:[#allocation2 + $0x78] sm:$0xff]  ;;  %v13756_v17 = vld [vmem:[#allocation30_spill] sm:$0xff] }
 0x421   : > { %4150 = vst [vmem:[#allocation2 + $0xa9] sm:$0xff] %v4064_v20  ;;  %v4067_v45 = vmax.f32 %v4035_v33, 0.0  ;;  %v4033_v60 = vadd.f32 %v3945_v54, %v13752_v6  ;;  %v3966_v21 = vadd.f32 %v9185_v44, %v12170_v9  ;;  %9224 = vmatmul.mubr.bf16.gmra.mxu1 %v4271_v38  ;;  %9349 = vmatprep.subr.bf16.mxu0 %v9948_v49  ;;  %v9956_v22 = vld [vmem:[#allocation9 + $0xc0] sm:$0xff]  }
 0x422   : > { %v3957_v12 = vpop.f32.mrf.mxu0  ;;  %9227 = vmatprep.mubr.bf16.mxu1 %v4272_v1  ;;  %9304 = vmatpush3.bf16.msra.mxu1 %v9949_v52  ;;  %v4183_v11 = vld [vmem:[#allocation2 + $0x98] sm:$0xff] }
 0x423   : > { %4153 = vst [vmem:[#allocation2 + $0xc9] sm:$0xff] %v4067_v45  ;;  %v4065_v40 = vmax.f32 %v4033_v60, 0.0  ;;  %v12227_v56 = vadd.f32 %v3966_v21, %v13753_v4  ;;  %v3958_v25 = vadd.f32 %v12170_v9, %v3957_v12  ;;  %9305 = vmatprep.subr.bf16.mxu1 %v9951_v36  ;;  %v12235_v5 = vpack.c.bf16 %v4183_v11, %v4182_v37  ;;  %v13757_v52 = vld [vmem:[#allocation32_spill] sm:$0xff]  ;;  %v13760_v12 = vld [vmem:[#allocation38_spill] sm:$0xff] }
 0x424   : > { %v9186_v3 = vpop.f32.mrf.mxu0  ;;  %v4181_v51 = vld [vmem:[#allocation2 + $0x80] sm:$0xff]  ;;  %9350 = vmatpush3.bf16.msra.mxu0 %v9948_v49  ;;  %v4274_v7 = vpack.c.bf16 %v4067_v45, %v4066_v10  ;;  %v13762_v37 = vld [vmem:[#allocation42_spill] sm:$0xff] }
 0x425   : > { %4151 = vst [vmem:[#allocation2 + $0xb1] sm:$0xff] %v4065_v40  ;;  %v4070_v16 = vmax.f32 %v12227_v56, 0.0  ;;  %v4036_v48 = vadd.f32 %v3958_v25, %v13754_v2  ;;  %v3969_v28 = vadd.f32 %v9186_v3, %v12170_v9  ;;  %v12233_v62 = vpack.c.bf16 %v4181_v51, %v4180_v31  ;;  %9351 = vmatprep.subr.bf16.mxu0 %v9950_v55  ;;  %v13759_v1 = vld [vmem:[#allocation36_spill] sm:$0xff]  ;;  %v12269_v25 = vld [vmem:[#allocation9 + $0x138] sm:$0xff]  }
 0x426   : > { %v3960_v0 = vpop.f32.mrf.mxu0  ;;  %v4273_v41 = vpack.c.bf16 %v4065_v40, %v4064_v20  ;;  %9306 = vmatpush3.bf16.msra.mxu1 %v9951_v36  ;;  %v4186_v20 = vld [vmem:[#allocation2 + $0xc0] sm:$0xff] }
 0x427   : > { %4156 = vst [vmem:[#allocation2 + $0xf1] sm:$0xff] %v4070_v16  ;;  %v4068_v24 = vmax.f32 %v4036_v48, 0.0  ;;  %v4039_v29 = vadd.f32 %v3969_v28, %v13755_v30  ;;  %v3961_v8 = vadd.f32 %v12170_v9, %v3960_v0  ;;  %9272 = vmatmul.mubr.bf16.gmra.mxu0 %v12233_v62  ;;  %9307 = vmatprep.subr.bf16.mxu1 %v9953_v42  ;;  %v13761_v3 = vld [vmem:[#allocation40_spill] sm:$0xff] }
 0x428   : > { %v9189_v47 = vpop.f32.mrf.mxu0  ;;  %9275 = vmatprep.mubr.bf16.mxu0 %v12235_v5  ;;  %9352 = vmatpush3.bf16.msra.mxu0 %v9950_v55  ;;  %v4184_v27 = vld [vmem:[#allocation2 + $0xa8] sm:$0xff] }
 0x429   : > { %4154 = vst [vmem:[#allocation2 + $0xd9] sm:$0xff] %v4068_v24  ;;  %v4071_v15 = vmax.f32 %v4039_v29, 0.0  ;;  %v4037_v53 = vadd.f32 %v3961_v8, %v13756_v17  ;;  %v3982_v23 = vadd.f32 %v9189_v47, %v12170_v9  ;;  %9228 = vmatmul.mubr.bf16.gmra.mxu1 %v4273_v41  ;;  %9353 = vmatprep.subr.bf16.mxu0 %v9952_v39  ;;  %v13763_v47 = vld [vmem:[#allocation44_spill] sm:$0xff] }
 0x42a   : > { %v3973_v61 = vpop.f32.mrf.mxu0  ;;  %9231 = vmatprep.mubr.bf16.mxu1 %v4274_v7  ;;  %9308 = vmatpush3.bf16.msra.mxu1 %v9953_v42  ;;  %v4187_v57 = vld [vmem:[#allocation2 + $0xc8] sm:$0xff] }
 0x42b   : > { %4157 = vst [vmem:[#allocation2 + $0xf9] sm:$0xff] %v4071_v15  ;;  %v4069_v50 = vmax.f32 %v4037_v53, 0.0  ;;  %v12248_v58 = vadd.f32 %v3982_v23, %v13757_v52  ;;  %v3974_v14 = vadd.f32 %v12170_v9, %v3973_v61  ;;  %9309 = vmatprep.subr.bf16.mxu1 %v9955_v19  ;;  %v12259_v54 = vpack.c.bf16 %v4187_v57, %v4186_v20 }
 0x42c   : > { %v9190_v10 = vpop.f32.mrf.mxu0  ;;  %v4185_v46 = vld [vmem:[#allocation2 + $0xb0] sm:$0xff]  ;;  %9354 = vmatpush3.bf16.msra.mxu0 %v9952_v39  ;;  %v4276_v21 = vpack.c.bf16 %v4071_v15, %v4070_v16 }
 0x42d   : > { %4155 = vst [vmem:[#allocation2 + $0xe1] sm:$0xff] %v4069_v50  ;;  %v4074_v18 = vmax.f32 %v12248_v58, 0.0  ;;  %v4040_v49 = vadd.f32 %v3974_v14, %v13758_v63  ;;  %v3985_v26 = vadd.f32 %v9190_v10, %v12170_v9  ;;  %v12257_v38 = vpack.c.bf16 %v4185_v46, %v4184_v27  ;;  %9355 = vmatprep.subr.bf16.mxu0 %v9954_v13  ;;  %v13765_v14 = vld [vmem:[#allocation50_spill] sm:$0xff] }
 0x42e   : > { %v3976_v33 = vpop.f32.mrf.mxu0  ;;  %v4275_v36 = vpack.c.bf16 %v4069_v50, %v4068_v24  ;;  %9310 = vmatpush3.bf16.msra.mxu1 %v9955_v19  ;;  %v4190_v24 = vld [vmem:[#allocation2 + $0xf0] sm:$0xff] }
 0x42f   : > { %4160 = vst [vmem:[#allocation2 + $0x121] sm:$0xff] %v4074_v18  ;;  %v4072_v44 = vmax.f32 %v4040_v49, 0.0  ;;  %v4043_v45 = vadd.f32 %v3985_v26, %v13759_v1  ;;  %v3977_v6 = vadd.f32 %v12170_v9, %v3976_v33  ;;  %9276 = vmatmul.mubr.bf16.gmra.mxu0 %v12257_v38  ;;  %5473 = vmatprep.subr.bf16.mxu1 %v9959_v34  ;;  %v13766_v49 = vld [vmem:[#allocation52_spill] sm:$0xff] }
 0x430   : > { %v9193_v60 = vpop.f32.mrf.mxu0  ;;  %9279 = vmatprep.mubr.bf16.mxu0 %v12259_v54  ;;  %9356 = vmatpush3.bf16.msra.mxu0 %v9954_v13  ;;  %v4188_v2 = vld [vmem:[#allocation2 + $0xd8] sm:$0xff] }
 0x431   : > { %4158 = vst [vmem:[#allocation2 + $0x109] sm:$0xff] %v4072_v44  ;;  %v4075_v55 = vmax.f32 %v4043_v45, 0.0  ;;  %v4041_v40 = vadd.f32 %v3977_v6, %v13760_v12  ;;  %v3998_v4 = vadd.f32 %v9193_v60, %v12170_v9  ;;  %9232 = vmatmul.mubr.bf16.gmra.mxu1 %v4275_v36  ;;  %9357 = vmatprep.subr.bf16.mxu0 %v9956_v22  ;;  %v13764_v13 = vld [vmem:[#allocation48_spill] sm:$0xff]  ;;  %v13767_v6 = vld [vmem:[#allocation54_spill] sm:$0xff] }
 0x432   : > { %v3989_v11 = vpop.f32.mrf.mxu0  ;;  %9235 = vmatprep.mubr.bf16.mxu1 %v4276_v21  ;;  %v4191_v51 = vld [vmem:[#allocation2 + $0xf8] sm:$0xff] }
 0x433   : > { %4161 = vst [vmem:[#allocation2 + $0x129] sm:$0xff] %v4075_v55  ;;  %v4073_v42 = vmax.f32 %v4041_v40, 0.0  ;;  %v4046_v31 = vadd.f32 %v3998_v4, %v13761_v3  ;;  %v3990_v56 = vadd.f32 %v12170_v9, %v3989_v11  ;;  %v12278_v29 = vpack.c.bf16 %v4191_v51, %v4190_v24  ;;  %v13768_v40 = vld [vmem:[#allocation58_spill] sm:$0xff]  ;;  %v4717_v3 = vld [vmem:[#allocation2 + $0x2] sm:$0xff] }
 0x434   : > { %v9194_v16 = vpop.f32.mrf.mxu0  ;;  %v4189_v48 = vld [vmem:[#allocation2 + $0xe0] sm:$0xff]  ;;  %9358 = vmatpush3.bf16.msra.mxu0 %v9956_v22  ;;  %v4278_v53 = vpack.c.bf16 %v4075_v55, %v4074_v18 }
 0x435   : > { %4159 = vst [vmem:[#allocation2 + $0x111] sm:$0xff] %v4073_v42  ;;  %v4078_v28 = vmax.f32 %v4046_v31, 0.0  ;;  %v4044_v39 = vadd.f32 %v3990_v56, %v13762_v37  ;;  %v4001_v0 = vadd.f32 %v9194_v16, %v12170_v9  ;;  %v12275_v41 = vpack.c.bf16 %v4189_v48, %v4188_v2  ;;  %9391 = vmatprep.subr.bf16.mxu0 %v12269_v25  ;;  %v4718_v31 = vld [vmem:[#allocation2 + $0xa] sm:$0xff]  ;;  %v4719_v37 = vld [vmem:[#allocation2 + $0x1a] sm:$0xff]  ;;  %v4720_v24 = vld [vmem:[#allocation2 + $0x22] sm:$0xff] }
 0x436   : > { %v3992_v30 = vpop.f32.mrf.mxu0  ;;  %v4277_v8 = vpack.c.bf16 %v4073_v42, %v4072_v44  ;;  %v4194_v33 = vld [vmem:[#allocation2 + $0x120] sm:$0xff] }
 0x437   : > { %4164 = vst [vmem:[#allocation2 + $0x151] sm:$0xff] %v4078_v28  ;;  %v4076_v19 = vmax.f32 %v4044_v39, 0.0  ;;  %v4047_v7 = vadd.f32 %v4001_v0, %v13763_v47  ;;  %v3993_v15 = vadd.f32 %v12170_v9, %v3992_v30  ;;  %9280 = vmatmul.mubr.bf16.gmra.mxu0 %v12275_v41  ;;  %v9957_v47 = vld [vmem:[%s13289_s8 + $0x70] ss:$8 sps:$4 sm:$0xff]  }
 0x438   : > { %v9197_v17 = vpop.f32.mrf.mxu0  ;;  %9283 = vmatprep.mubr.bf16.mxu0 %v12278_v29  ;;  %v4192_v46 = vld [vmem:[#allocation2 + $0x108] sm:$0xff] }
 0x439   : > { %4162 = vst [vmem:[#allocation2 + $0x139] sm:$0xff] %v4076_v19  ;;  %v4079_v23 = vmax.f32 %v4047_v7, 0.0  ;;  %v4045_v61 = vadd.f32 %v3993_v15, %v13764_v13  ;;  %v4014_v50 = vadd.f32 %v9197_v17, %v12170_v9  ;;  %9236 = vmatmul.mubr.bf16.gmra.mxu1 %v4277_v8  ;;  %v4721_v8 = vld [vmem:[#allocation2 + $0x32] sm:$0xff]  ;;  %v12311_v7 = vpack.c.bf16 %v4720_v24, %v4719_v37  ;;  %v9963_v15 = vld [vmem:[%s13289_s8 + $0x64] ss:$8 sps:$4 sm:$0xff]  }
 0x43a   : > { %v4005_v52 = vpop.f32.mrf.mxu0  ;;  %9239 = vmatprep.mubr.bf16.mxu1 %v4278_v53  ;;  %v4195_v10 = vld [vmem:[#allocation2 + $0x128] sm:$0xff] }
 0x43b   : > { %4165 = vst [vmem:[#allocation2 + $0x159] sm:$0xff] %v4079_v23  ;;  %v4077_v58 = vmax.f32 %v4045_v61, 0.0  ;;  %v4050_v57 = vadd.f32 %v4014_v50, %v13765_v14  ;;  %v4006_v34 = vadd.f32 %v12170_v9, %v4005_v52  ;;  %v12292_v44 = vpack.c.bf16 %v4195_v10, %v4194_v33  ;;  %v9961_v53 = vld [vmem:[%s13289_s8 + $0x60] ss:$8 sps:$4 sm:$0xff]   ;;  %v4724_v61 = vld [vmem:[#allocation2 + $0x52] sm:$0xff] }
 0x43c   : > { %v9198_v27 = vpop.f32.mrf.mxu0  ;;  %v4193_v63 = vld [vmem:[#allocation2 + $0x110] sm:$0xff]  ;;  %v4280_v55 = vpack.c.bf16 %v4079_v23, %v4078_v28  ;;  %v4749_v28 = vpack.c.bf16 %v4718_v31, %v4717_v3  ;;  %v4725_v50 = vld [vmem:[#allocation2 + $0x62] sm:$0xff]  ;;  %v9968_v10 = vld [vmem:[#allocation9 + $0x128] sm:$0xff]  }
 0x43d   : > { %4163 = vst [vmem:[#allocation2 + $0x141] sm:$0xff] %v4077_v58  ;;  %v4082_v18 = vmax.f32 %v4050_v57, 0.0  ;;  %v4048_v26 = vadd.f32 %v4006_v34, %v13766_v49  ;;  %v4017_v20 = vadd.f32 %v9198_v27, %v12170_v9  ;;  %v12290_v22 = vpack.c.bf16 %v4193_v63, %v4192_v46  ;;  %v9967_v23 = vld [vmem:[%s13289_s8 + $0x54] ss:$8 sps:$4 sm:$0xff]   ;;  %v4723_v13 = vld [vmem:[#allocation2 + $0x4a] sm:$0xff]  ;;  %v9964_v52 = vld [vmem:[#allocation9 + $0x130] sm:$0xff]  }
 0x43e   : > { %v4008_v36 = vpop.f32.mrf.mxu0  ;;  %v4279_v1 = vpack.c.bf16 %v4077_v58, %v4076_v19  ;;  %v4198_v16 = vld [vmem:[#allocation2 + $0x150] sm:$0xff]  ;;  %v4722_v19 = vld [vmem:[#allocation2 + $0x3a] sm:$0xff]  ;;  %v12331_v14 = vpack.c.bf16 %v4724_v61, %v4723_v13  ;;  %v9971_v57 = vld [vmem:[%s13289_s8 + $0x44] ss:$8 sps:$4 sm:$0xff]   ;;  %v10238_v61 = vmov 0  }
 0x43f   : > { %4168 = vst [vmem:[#allocation2 + $0x181] sm:$0xff] %v4082_v18  ;;  %v4080_v45 = vmax.f32 %v4048_v26, 0.0  ;;  %v4051_v60 = vadd.f32 %v4017_v20, %v13767_v6  ;;  %v4009_v21 = vadd.f32 %v12170_v9, %v4008_v36  ;;  %9284 = vmatmul.mubr.bf16.gmra.mxu0 %v12290_v22  ;;  %v12317_v17 = vpack.c.bf16 %v4722_v19, %v4721_v8  ;;  %v9965_v58 = vld [vmem:[%s13289_s8 + $0x50] ss:$8 sps:$4 sm:$0xff]   ;;  %v4728_v27 = vld [vmem:[#allocation2 + $0x82] sm:$0xff] }
 0x440   : > { %9287 = vmatprep.mubr.bf16.mxu0 %v12292_v44  ;;  %v4196_v56 = vld [vmem:[#allocation2 + $0x138] sm:$0xff]  ;;  %v9979_v20 = vld [vmem:[%s13289_s8 + $0x24] ss:$8 sps:$4 sm:$0xff]  }
 0x441   : > { %4166 = vst [vmem:[#allocation2 + $0x169] sm:$0xff] %v4080_v45  ;;  %v4083_v12 = vmax.f32 %v4051_v60, 0.0  ;;  %v4049_v4 = vadd.f32 %v4009_v21, %v13768_v40  ;;  %9240 = vmatmul.mubr.bf16.gmra.mxu1 %v4279_v1  ;;  %v4729_v46 = vld [vmem:[#allocation2 + $0x92] sm:$0xff]  ;;  %v4730_v63 = vld [vmem:[#allocation2 + $0x9a] sm:$0xff]  ;;  %v9976_v36 = vld [vmem:[#allocation9 + $0x118] sm:$0xff]  }
 0x442   : > { %9243 = vmatprep.mubr.bf16.mxu1 %v4280_v55  ;;  %v4199_v42 = vld [vmem:[#allocation2 + $0x158] sm:$0xff]  ;;  %v12358_v33 = vpack.c.bf16 %v4730_v63, %v4729_v46  ;;  %v4733_v6 = vld [vmem:[#allocation2 + $0xc2] sm:$0xff]  ;;  %v4734_v60 = vld [vmem:[#allocation2 + $0xca] sm:$0xff] }
 0x443   : > { %4169 = vst [vmem:[#allocation2 + $0x189] sm:$0xff] %v4083_v12  ;;  %v4081_v11 = vmax.f32 %v4049_v4, 0.0  ;;  %v12301_v48 = vpack.c.bf16 %v4199_v42, %v4198_v16  ;;  %v9972_v18 = vld [vmem:[#allocation9 + $0x120] sm:$0xff]   ;;  %v9980_v21 = vld [vmem:[#allocation9 + $0x110] sm:$0xff]   ;;  %v12378_v4 = vpack.c.bf16 %v4734_v60, %v4733_v6  ;;  %v9989_v42 = vld [vmem:[#allocation9 + $0x1b8] sm:$0xff]  }
 0x444   : > { %v4197_v51 = vld [vmem:[#allocation2 + $0x140] sm:$0xff]  ;;  %v9973_v49 = vld [vmem:[%s13289_s8 + $0x30] ss:$8 sps:$4 sm:$0xff]   ;;  %v9983_v1 = vld [vmem:[%s13289_s8 + $0x14] ss:$8 sps:$4 sm:$0xff]  }
 0x445   : > { %4167 = vst [vmem:[#allocation2 + $0x171] sm:$0xff] %v4081_v11  ;;  %v12299_v9 = vpack.c.bf16 %v4197_v51, %v4196_v56  ;;  %v4281_v2 = vpack.c.bf16 %v4081_v11, %v4080_v45  ;;  %v4732_v45 = vld [vmem:[#allocation2 + $0xb2] sm:$0xff]  ;;  %v9987_v40 = vld [vmem:[%s13289_s8 + $0x4] ss:$8 sps:$4 sm:$0xff]   ;;  %v9984_v11 = vld [vmem:[#allocation9 + $0x108] sm:$0xff]  }
 0x446   : > { %v9981_v55 = vld [vmem:[%s13289_s8 + $0x10] ss:$8 sps:$4 sm:$0xff]   ;;  %v4736_v31 = vld [vmem:[#allocation2 + $0xe2] sm:$0xff] }
 0x447   : > { %9288 = vmatmul.mubr.bf16.gmra.mxu0 %v12299_v9  ;;  %v4735_v3 = vld [vmem:[#allocation2 + $0xda] sm:$0xff]  ;;  %v9988_v51 = vld [vmem:[#allocation9 + $0x100] sm:$0xff]   ;;  %v4739_v37 = vld [vmem:[#allocation2 + $0x10a] sm:$0xff] }
 0x448   : > { %9291 = vmatprep.mubr.bf16.mxu0 %v12301_v48  ;;  %v4200_v39 = vld [vmem:[#allocation2 + $0x168] sm:$0xff]  ;;  %v4738_v56 = vld [vmem:[#allocation2 + $0xfa] sm:$0xff]  ;;  %v12386_v16 = vpack.c.bf16 %v4736_v31, %v4735_v3  ;;  %v5334_v46 = vld [vmem:[#allocation2 + $0x51] sm:$0xff] }
 0x449   : > { %9244 = vmatmul.mubr.bf16.gmra.mxu1 %v4281_v2  ;;  %v4742_v24 = vld [vmem:[#allocation2 + $0x12a] sm:$0xff]  ;;  %v4743_v8 = vld [vmem:[#allocation2 + $0x13a] sm:$0xff]  ;;  %v4744_v19 = vld [vmem:[#allocation2 + $0x142] sm:$0xff] }
 0x44a   : > { %9311 = vmatprep.mubr.bf16.mxu1 %v4749_v28  ;;  %v9990_v28 = vld [vmem:[#allocation9 + $0x178] sm:$0xff]   ;;  %v10000_v6 = vld [vmem:[#allocation9 + $0x140] sm:$0xff]   ;;  %v5343_v3 = vld [vmem:[#allocation2 + $0xc1] sm:$0xff] }
 0x44b   : > { %v5333_v63 = vld [vmem:[#allocation2 + $0x49] sm:$0xff] }
 0x44c   : > { %v4201_v0 = vld [vmem:[#allocation2 + $0x170] sm:$0xff] }
 0x44d   : > { %v12305_v30 = vpack.c.bf16 %v4201_v0, %v4200_v39  ;;  %v4740_v39 = vld [vmem:[#allocation2 + $0x112] sm:$0xff]  ;;  %v4741_v0 = vld [vmem:[#allocation2 + $0x122] sm:$0xff] }
 0x44f   : > { %9292 = vmatmul.mubr.bf16.gmra.mxu0 %v12305_v30 }
 0x450   : > { %9359 = vmatprep.mubr.bf16.mxu0 %v12196_v32  ;;  %v4726_v32 = vld [vmem:[#allocation2 + $0x6a] sm:$0xff] }
 0x451   : > { %9312 = vmatmul.mubr.bf16.vlgmr.msra.gmra.mxu1 %v12311_v7  ;;  %v12338_v34 = vpack.c.bf16 %v4726_v32, %v4725_v50  ;;  %v5330_v50 = vld [vmem:[#allocation2 + $0x21] sm:$0xff] }
 0x452   : > { %5474 = vmatpush1.bf16.msra.mxu1 %v9957_v47  ;;  %9315 = vmatprep.mubr.bf16.mxu1 %v12317_v17  ;;  %v4745_v47 = vld [vmem:[#allocation2 + $0x152] sm:$0xff] }
 0x453   : > { %5475 = vmatprep.subr.bf16.mxu1 %v9963_v15  ;;  %v4746_v15 = vld [vmem:[#allocation2 + $0x15a] sm:$0xff] }
 0x456   : > { %5476 = vmatpush1.bf16.msra.mxu1 %v9961_v53  ;;  %v12402_v53 = vpack.c.bf16 %v4744_v19, %v4743_v8  ;;  %v6048_v8 = vld [vmem:[#allocation2 + $0x68] sm:$0xff] }
 0x457   : > { %9360 = vmatmul.mubr.bf16.vlgmr.msra.gmra.mxu0 %v12198_v43  ;;  %5477 = vmatprep.subr.bf16.mxu1 %v9967_v23  ;;  %v9969_v43 = vld [vmem:[%s13289_s8 + $0x40] ss:$8 sps:$4 sm:$0xff]   ;;  %v4748_v23 = vld [vmem:[#allocation2 + $0x172] sm:$0xff] }
 0x458   : > { %9363 = vmatprep.mubr.bf16.mxu0 %v12214_v35  ;;  %9392 = vmatpush3.bf16.msra.mxu0 %v12269_v25  ;;  %v9975_v35 = vld [vmem:[%s13289_s8 + $0x34] ss:$8 sps:$4 sm:$0xff]  }
 0x459   : > { %9316 = vmatmul.mubr.bf16.gmra.mxu1 %v12331_v14  ;;  %9393 = vmatprep.subr.bf16.mxu0 %v9964_v52  ;;  %v4727_v25 = vld [vmem:[#allocation2 + $0x7a] sm:$0xff] }
 0x45a   : > { %9319 = vmatprep.mubr.bf16.mxu1 %v12338_v34  ;;  %5478 = vmatpush1.bf16.msra.mxu1 %v9965_v58  ;;  %v12352_v26 = vpack.c.bf16 %v4728_v27, %v4727_v25  ;;  %v9998_v25 = vld [vmem:[#allocation9 + $0x1a0] sm:$0xff]   ;;  %v10001_v27 = vld [vmem:[#allocation9 + $0x198] sm:$0xff]  }
 0x45b   : > { %5479 = vmatprep.subr.bf16.mxu1 %v9971_v57  ;;  %v9992_v57 = vld [vmem:[#allocation9 + $0x1b0] sm:$0xff]  }
 0x45c   : > { %9394 = vmatpush3.bf16.msra.mxu0 %v9964_v52  ;;  %v5329_v52 = vld [vmem:[#allocation2 + $0x19] sm:$0xff] }
 0x45d   : > { %9395 = vmatprep.subr.bf16.mxu0 %v9968_v10  ;;  %v5361_v58 = vpack.c.bf16 %v5330_v50, %v5329_v52 }
 0x45e   : > { %5480 = vmatpush1.bf16.msra.mxu1 %v9969_v43  ;;  %v5331_v43 = vld [vmem:[#allocation2 + $0x31] sm:$0xff] }
 0x45f   : > { %9364 = vmatmul.mubr.bf16.gmra.mxu0 %v12216_v59  ;;  %5481 = vmatprep.subr.bf16.mxu1 %v9975_v35  ;;  %v9977_v59 = vld [vmem:[%s13289_s8 + $0x20] ss:$8 sps:$4 sm:$0xff]  }
 0x460   : > { %9367 = vmatprep.mubr.bf16.mxu0 %v12233_v62  ;;  %9396 = vmatpush3.bf16.msra.mxu0 %v9968_v10  ;;  %v4731_v62 = vld [vmem:[#allocation2 + $0xaa] sm:$0xff]  ;;  %v9991_v10 = vld [vmem:[#allocation9 + $0x170] sm:$0xff]  }
 0x461   : > { %9320 = vmatmul.mubr.bf16.gmra.mxu1 %v12352_v26  ;;  %9397 = vmatprep.subr.bf16.mxu0 %v9972_v18  ;;  %v12372_v12 = vpack.c.bf16 %v4732_v45, %v4731_v62  ;;  %v9999_v62 = vld [vmem:[#allocation9 + $0x148] sm:$0xff]  }
 0x462   : > { %9323 = vmatprep.mubr.bf16.mxu1 %v12358_v33  ;;  %5482 = vmatpush1.bf16.msra.mxu1 %v9973_v49  ;;  %v9996_v49 = vld [vmem:[#allocation9 + $0x158] sm:$0xff]   ;;  %v5338_v45 = vld [vmem:[#allocation2 + $0x81] sm:$0xff] }
 0x463   : > { %5483 = vmatprep.subr.bf16.mxu1 %v9979_v20  ;;  %v10007_v20 = vld [vmem:[#allocation9 + $0x188] sm:$0xff]  }
 0x464   : > { %9398 = vmatpush3.bf16.msra.mxu0 %v9972_v18  ;;  %v12427_v18 = vpack.c.bf16 %v5334_v46, %v5333_v63  ;;  %v6049_v46 = vld [vmem:[#allocation2 + $0x78] sm:$0xff] }
 0x465   : > { %9399 = vmatprep.subr.bf16.mxu0 %v9976_v36 }
 0x466   : > { %5484 = vmatpush1.bf16.msra.mxu1 %v9977_v59  ;;  %v5335_v59 = vld [vmem:[#allocation2 + $0x61] sm:$0xff] }
 0x467   : > { %9368 = vmatmul.mubr.bf16.gmra.mxu0 %v12235_v5  ;;  %5485 = vmatprep.subr.bf16.mxu1 %v9983_v1  ;;  %v9985_v5 = vld [vmem:[%s13289_s8] ss:$8 sps:$4 sm:$0xff]  }
 0x468   : > { %9371 = vmatprep.mubr.bf16.mxu0 %v12257_v38  ;;  %9400 = vmatpush3.bf16.msra.mxu0 %v9976_v36  ;;  %v4737_v38 = vld [vmem:[#allocation2 + $0xf2] sm:$0xff]  ;;  %v5336_v36 = vld [vmem:[#allocation2 + $0x69] sm:$0xff] }
 0x469   : > { %9324 = vmatmul.mubr.bf16.gmra.mxu1 %v12372_v12  ;;  %9401 = vmatprep.subr.bf16.mxu0 %v9980_v21  ;;  %v12389_v2 = vpack.c.bf16 %v4738_v56, %v4737_v38  ;;  %v12433_v1 = vpack.c.bf16 %v5336_v36, %v5335_v59  ;;  %v5767_v38 = vld [vmem:[#allocation2 + $0x182] sm:$0xff]  ;;  %v5768_v56 = vld [vmem:[#allocation2 + $0x18a] sm:$0xff]  ;;  %v10006_v36 = vld [vmem:[#allocation9 + $0x1e0] sm:$0xff]  }
 0x46a   : > { %9327 = vmatprep.mubr.bf16.mxu1 %v12378_v4  ;;  %5486 = vmatpush1.bf16.msra.mxu1 %v9981_v55  ;;  %v5340_v55 = vld [vmem:[#allocation2 + $0x99] sm:$0xff] }
 0x46b   : > { %5487 = vmatprep.subr.bf16.mxu1 %v9987_v40 }
 0x46c   : > { %9402 = vmatpush3.bf16.msra.mxu0 %v9980_v21  ;;  %v10002_v21 = vld [vmem:[#allocation9 + $0x1f8] sm:$0xff]  }
 0x46d   : > { %9403 = vmatprep.subr.bf16.mxu0 %v9984_v11 }
 0x46e   : > { %5488 = vmatpush1.bf16.msra.mxu1 %v9985_v5 }
 0x46f   : > { %9372 = vmatmul.mubr.bf16.gmra.mxu0 %v12259_v54  ;;  %9487 = vmatprep.subr.bf16.mxu1 %v9989_v42  ;;  %v12394_v54 = vpack.c.bf16 %v4740_v39, %v4739_v37  ;;  %v5345_v39 = vld [vmem:[#allocation2 + $0xd9] sm:$0xff] }
 0x470   : > { %9375 = vmatprep.mubr.bf16.mxu0 %v12275_v41  ;;  %9404 = vmatpush3.bf16.msra.mxu0 %v9984_v11  ;;  %v12397_v41 = vpack.c.bf16 %v4742_v24, %v4741_v0  ;;  %v5341_v11 = vld [vmem:[#allocation2 + $0xa9] sm:$0xff] }
 0x471   : > { %9328 = vmatmul.mubr.bf16.gmra.mxu1 %v12386_v16  ;;  %9405 = vmatprep.subr.bf16.mxu0 %v9988_v51 }
 0x472   : > { %9331 = vmatprep.mubr.bf16.mxu1 %v12389_v2 }
 0x474   : > { %9406 = vmatpush3.bf16.msra.mxu0 %v9988_v51  ;;  %v6044_v51 = vld [vmem:[#allocation2 + $0x38] sm:$0xff] }
 0x475   : > { %9439 = vmatprep.subr.bf16.mxu0 %v9990_v28 }
 0x477   : > { %9376 = vmatmul.mubr.bf16.gmra.mxu0 %v12278_v29  ;;  %v12405_v29 = vpack.c.bf16 %v4746_v15, %v4745_v47  ;;  %v6045_v47 = vld [vmem:[#allocation2 + $0x48] sm:$0xff]  ;;  %v5348_v15 = vld [vmem:[#allocation2 + $0xf9] sm:$0xff] }
 0x478   : > { %9379 = vmatprep.mubr.bf16.mxu0 %v12290_v22  ;;  %v4747_v22 = vld [vmem:[#allocation2 + $0x16a] sm:$0xff] }
 0x479   : > { %9332 = vmatmul.mubr.bf16.gmra.mxu1 %v12394_v54  ;;  %v12410_v13 = vpack.c.bf16 %v4748_v23, %v4747_v22  ;;  %v10003_v23 = vld [vmem:[#allocation9 + $0x1f0] sm:$0xff]  }
 0x47a   : > { %9335 = vmatprep.mubr.bf16.mxu1 %v12397_v41 }
 0x47f   : > { %9380 = vmatmul.mubr.bf16.gmra.mxu0 %v12292_v44  ;;  %v5054_v44 = vld [vmem:[#allocation2 + $0x188] sm:$0xff] }
 0x480   : > { %9383 = vmatprep.mubr.bf16.mxu0 %v12299_v9  ;;  %v5053_v9 = vld [vmem:[#allocation2 + $0x180] sm:$0xff] }
 0x481   : > { %9336 = vmatmul.mubr.bf16.gmra.mxu1 %v12402_v53  ;;  %v12415_v32 = vpack.c.bf16 %v5054_v44, %v5053_v9  ;;  %v5347_v44 = vld [vmem:[#allocation2 + $0xf1] sm:$0xff] }
 0x482   : > { %9339 = vmatprep.mubr.bf16.mxu1 %v12405_v29  ;;  %v12469_v50 = vpack.c.bf16 %v5348_v15, %v5347_v44 }
 0x487   : > { %9384 = vmatmul.mubr.bf16.gmra.mxu0 %v12301_v48  ;;  %v9995_v48 = vld [vmem:[#allocation9 + $0x1a8] sm:$0xff]  }
 0x488   : > { %9387 = vmatprep.mubr.bf16.mxu0 %v12305_v30  ;;  %v5332_v30 = vld [vmem:[#allocation2 + $0x39] sm:$0xff] }
 0x489   : > { %9340 = vmatmul.mubr.bf16.gmra.mxu1 %v12410_v13  ;;  %v12421_v35 = vpack.c.bf16 %v5332_v30, %v5331_v43 }
 0x48a   : > { %5505 = vmatprep.mubr.bf16.mxu1 %v10238_v61 }
 0x48f   : > { %9388 = vmatmul.mubr.bf16.gmra.mxu0 %v12415_v32 }
 0x490   : > { %9407 = vmatprep.mubr.bf16.mxu0 %v12311_v7  ;;  %v9993_v7 = vld [vmem:[#allocation9 + $0x168] sm:$0xff]  }
 0x491   : > { %5506 = vmatmul.mubr.bf16.vlgmr.msra.gmra.mxu1 %v5361_v58 }
 0x492   : > { %9488 = vmatpush3.bf16.msra.mxu1 %v9989_v42  ;;  %5515 = vmatprep.mubr.bf16.mxu1 %v10238_v61  ;;  %v5344_v42 = vld [vmem:[#allocation2 + $0xc9] sm:$0xff] }
 0x493   : > { %9489 = vmatprep.subr.bf16.mxu1 %v9992_v57  ;;  %v12457_v31 = vpack.c.bf16 %v5344_v42, %v5343_v3  ;;  %v6056_v3 = vld [vmem:[#allocation2 + $0xc8] sm:$0xff] }
 0x496   : > { %9490 = vmatpush3.bf16.msra.mxu1 %v9992_v57 }
 0x497   : > { %9408 = vmatmul.mubr.bf16.vlgmr.msra.gmra.mxu0 %v12317_v17  ;;  %9491 = vmatprep.subr.bf16.mxu1 %v9995_v48  ;;  %v9994_v17 = vld [vmem:[#allocation9 + $0x160] sm:$0xff]  }
 0x498   : > { %9411 = vmatprep.mubr.bf16.mxu0 %v12331_v14  ;;  %9440 = vmatpush3.bf16.msra.mxu0 %v9990_v28  ;;  %v10004_v14 = vld [vmem:[#allocation9 + $0x190] sm:$0xff]   ;;  %v6043_v28 = vld [vmem:[#allocation2 + $0x30] sm:$0xff] }
 0x499   : > { %5516 = vmatmul.mubr.bf16.gmra.mxu1 %v12421_v35  ;;  %9441 = vmatprep.subr.bf16.mxu0 %v9991_v10  ;;  %v6075_v37 = vpack.c.bf16 %v6044_v51, %v6043_v28  ;;  %v6053_v51 = vld [vmem:[#allocation2 + $0xa8] sm:$0xff] }
 0x49a   : > { %5525 = vmatprep.mubr.bf16.mxu1 %v10238_v61  ;;  %9492 = vmatpush3.bf16.msra.mxu1 %v9995_v48  ;;  %v10005_v48 = vld [vmem:[#allocation9 + $0x1e8] sm:$0xff]  }
 0x49b   : > { %9493 = vmatprep.subr.bf16.mxu1 %v9998_v25 }
 0x49c   : > { %9442 = vmatpush3.bf16.msra.mxu0 %v9991_v10  ;;  %v6050_v10 = vld [vmem:[#allocation2 + $0x80] sm:$0xff] }
 0x49d   : > { %9443 = vmatprep.subr.bf16.mxu0 %v9993_v7 }
 0x49e   : > { %9494 = vmatpush3.bf16.msra.mxu1 %v9998_v25  ;;  %v6052_v25 = vld [vmem:[#allocation2 + $0x98] sm:$0xff] }
 0x49f   : > { %9412 = vmatmul.mubr.bf16.gmra.mxu0 %v12338_v34  ;;  %9495 = vmatprep.subr.bf16.mxu1 %v10001_v27  ;;  %v9997_v34 = vld [vmem:[#allocation9 + $0x150] sm:$0xff]  }
 0x4a0   : > { %9415 = vmatprep.mubr.bf16.mxu0 %v12352_v26  ;;  %9444 = vmatpush3.bf16.msra.mxu0 %v9993_v7  ;;  %v10010_v26 = vld [vmem:[#allocation9 + $0x180] sm:$0xff]  }
 0x4a1   : > { %5526 = vmatmul.mubr.bf16.gmra.mxu1 %v12427_v18  ;;  %9445 = vmatprep.subr.bf16.mxu0 %v9994_v17 }
 0x4a2   : > { %5535 = vmatprep.mubr.bf16.mxu1 %v10238_v61  ;;  %9496 = vmatpush3.bf16.msra.mxu1 %v10001_v27 }
 0x4a3   : > { %9497 = vmatprep.subr.bf16.mxu1 %v10004_v14 }
 0x4a4   : > { %9446 = vmatpush3.bf16.msra.mxu0 %v9994_v17  ;;  %v5350_v17 = vld [vmem:[#allocation2 + $0x111] sm:$0xff] }
 0x4a5   : > { %9447 = vmatprep.subr.bf16.mxu0 %v9996_v49 }
 0x4a6   : > { %9498 = vmatpush3.bf16.msra.mxu1 %v10004_v14  ;;  %v6078_v14 = vpack.c.bf16 %v6050_v10, %v6049_v46 }
 0x4a7   : > { %9416 = vmatmul.mubr.bf16.gmra.mxu0 %v12358_v33  ;;  %9499 = vmatprep.subr.bf16.mxu1 %v10007_v20  ;;  %v5337_v33 = vld [vmem:[#allocation2 + $0x79] sm:$0xff] }
 0x4a8   : > { %9419 = vmatprep.mubr.bf16.mxu0 %v12372_v12  ;;  %9448 = vmatpush3.bf16.msra.mxu0 %v9996_v49  ;;  %v12439_v60 = vpack.c.bf16 %v5338_v45, %v5337_v33  ;;  %v5339_v12 = vld [vmem:[#allocation2 + $0x91] sm:$0xff] }
 0x4a9   : > { %5536 = vmatmul.mubr.bf16.gmra.mxu1 %v12433_v1  ;;  %9449 = vmatprep.subr.bf16.mxu0 %v9997_v34  ;;  %v12445_v40 = vpack.c.bf16 %v5340_v55, %v5339_v12  ;;  %v6051_v49 = vld [vmem:[#allocation2 + $0x90] sm:$0xff] }
 0x4aa   : > { %5545 = vmatprep.mubr.bf16.mxu1 %v10238_v61  ;;  %9500 = vmatpush3.bf16.msra.mxu1 %v10007_v20  ;;  %v6079_v59 = vpack.c.bf16 %v6052_v25, %v6051_v49  ;;  %v10008_v12 = vld [vmem:[#allocation9 + $0x1d8] sm:$0xff]   ;;  %v5354_v25 = vld [vmem:[#allocation2 + $0x141] sm:$0xff] }
 0x4ab   : > { %9501 = vmatprep.subr.bf16.mxu1 %v10010_v26 }
 0x4ac   : > { %9450 = vmatpush3.bf16.msra.mxu0 %v9997_v34 }
 0x4ad   : > { %9451 = vmatprep.subr.bf16.mxu0 %v9999_v62 }
 0x4ae   : > { %9502 = vmatpush3.bf16.msra.mxu1 %v10010_v26  ;;  %v5349_v26 = vld [vmem:[#allocation2 + $0x109] sm:$0xff] }
 0x4af   : > { %9420 = vmatmul.mubr.bf16.gmra.mxu0 %v12378_v4  ;;  %v5342_v4 = vld [vmem:[#allocation2 + $0xb1] sm:$0xff] }
 0x4b0   : > { %9423 = vmatprep.mubr.bf16.mxu0 %v12386_v16  ;;  %9452 = vmatpush3.bf16.msra.mxu0 %v9999_v62  ;;  %v12451_v5 = vpack.c.bf16 %v5342_v4, %v5341_v11  ;;  %v5346_v16 = vld [vmem:[#allocation2 + $0xe1] sm:$0xff]  ;;  %v6054_v11 = vld [vmem:[#allocation2 + $0xb0] sm:$0xff] }
 0x4b1   : > { %5546 = vmatmul.mubr.bf16.gmra.mxu1 %v12439_v60  ;;  %9453 = vmatprep.subr.bf16.mxu0 %v10000_v6  ;;  %v12465_v24 = vpack.c.bf16 %v5346_v16, %v5345_v39  ;;  %v5352_v16 = vld [vmem:[#allocation2 + $0x129] sm:$0xff]  ;;  %v6055_v39 = vld [vmem:[#allocation2 + $0xc0] sm:$0xff] }
 0x4b2   : > { %5555 = vmatprep.mubr.bf16.mxu1 %v10238_v61 }
 0x4b4   : > { %9454 = vmatpush3.bf16.msra.mxu0 %v10000_v6  ;;  %v12481_v6 = vpack.c.bf16 %v5350_v17, %v5349_v26  ;;  %v6059_v17 = vld [vmem:[#allocation2 + $0xf0] sm:$0xff] }
 0x4b5   : > { %9535 = vmatprep.subr.bf16.mxu0 %v10002_v21 }
 0x4b7   : > { %9424 = vmatmul.mubr.bf16.gmra.mxu0 %v12389_v2  ;;  %v12462_v2 = vpack.c.bf16 %v5768_v56, %v5767_v38 }
 0x4b8   : > { %9427 = vmatprep.mubr.bf16.mxu0 %v12394_v54 }
 0x4b9   : > { %5556 = vmatmul.mubr.bf16.gmra.mxu1 %v12445_v40 }
 0x4ba   : > { %5565 = vmatprep.mubr.bf16.mxu1 %v10238_v61 }
 0x4bf   : > { %9428 = vmatmul.mubr.bf16.gmra.mxu0 %v12397_v41  ;;  %v6046_v41 = vld [vmem:[#allocation2 + $0x50] sm:$0xff] }
 0x4c0   : > { %9431 = vmatprep.mubr.bf16.mxu0 %v12402_v53  ;;  %v6076_v53 = vpack.c.bf16 %v6046_v41, %v6045_v47 }
 0x4c1   : > { %5566 = vmatmul.mubr.bf16.gmra.mxu1 %v12451_v5 }
 0x4c2   : > { %5575 = vmatprep.mubr.bf16.mxu1 %v10238_v61 }
 0x4c7   : > { %9432 = vmatmul.mubr.bf16.gmra.mxu0 %v12405_v29  ;;  %v6047_v29 = vld [vmem:[#allocation2 + $0x60] sm:$0xff] }
 0x4c8   : > { %9435 = vmatprep.mubr.bf16.mxu0 %v12410_v13  ;;  %v6077_v13 = vpack.c.bf16 %v6048_v8, %v6047_v29  ;;  %v6081_v8 = vpack.c.bf16 %v6056_v3, %v6055_v39  ;;  %v6064_v3 = vld [vmem:[#allocation2 + $0x128] sm:$0xff] }
 0x4c9   : > { %5576 = vmatmul.mubr.bf16.gmra.mxu1 %v12457_v31 }
 0x4ca   : > { %5585 = vmatprep.mubr.bf16.mxu1 %v10238_v61 }
 0x4cf   : > { %9436 = vmatmul.mubr.bf16.gmra.mxu0 %v12462_v2  ;;  %v9217_v0 = vpop.f32.mrf.mxu1 }
 0x4d0   : > { %9455 = vmatprep.mubr.bf16.mxu0 %v6075_v37  ;;  %v6080_v37 = vpack.c.bf16 %v6054_v11, %v6053_v51  ;;  %v6062_v11 = vld [vmem:[#allocation2 + $0x110] sm:$0xff] }
 0x4d1   : > { %5586 = vmatmul.mubr.bf16.gmra.mxu1 %v12465_v24  ;;  %v4381_v54 = vpop.f32.mrf.mxu1 }
 0x4d2   : > { %5595 = vmatprep.mubr.bf16.mxu1 %v10238_v61 }
 0x4d3   : > { %v9218_v19 = vpop.f32.mrf.mxu1 }
 0x4d5   : > { %v4384_v22 = vpop.f32.mrf.mxu1 }
 0x4d7   : > { %v9265_v9 = vpop.f32.mrf.mxu0  ;;  %9456 = vmatmul.mubr.bf16.vlgmr.msra.gmra.mxu0 %v6076_v53 }
 0x4d8   : > { %v12471_v52 = vadd.f32 %v9265_v9, %v9217_v0  ;;  %9459 = vmatprep.mubr.bf16.mxu0 %v6077_v13  ;;  %9536 = vmatpush3.bf16.msra.mxu0 %v10002_v21  ;;  %v10011_v13 = vld [vmem:[#allocation9 + $0x1c8] sm:$0xff]  }
 0x4d9   : > { %v4590_v58 = vpop.f32.mrf.mxu0  ;;  %v9221_v57 = vpop.f32.mrf.mxu1  ;;  %5596 = vmatmul.mubr.bf16.gmra.mxu1 %v12469_v50  ;;  %9537 = vmatprep.subr.bf16.mxu0 %v10003_v23  ;;  %v6058_v9 = vld [vmem:[#allocation2 + $0xe0] sm:$0xff] }
 0x4da   : > { %v12474_v30 = vadd.f32 %v4590_v58, %v4381_v54  ;;  %5605 = vmatprep.mubr.bf16.mxu1 %v10238_v61  ;;  %v10009_v54 = vld [vmem:[#allocation9 + $0x1d0] sm:$0xff]  }
 0x4db   : > { %v9266_v43 = vpop.f32.mrf.mxu0  ;;  %v4397_v7 = vpop.f32.mrf.mxu1 }
 0x4dc   : > { %v12477_v27 = vadd.f32 %v9266_v43, %v9218_v19  ;;  %9538 = vmatpush3.bf16.msra.mxu0 %v10003_v23  ;;  %v5351_v19 = vld [vmem:[#allocation2 + $0x121] sm:$0xff]  ;;  %v6057_v43 = vld [vmem:[#allocation2 + $0xd8] sm:$0xff] }
 0x4dd   : > { %v4593_v63 = vpop.f32.mrf.mxu0  ;;  %v9222_v20 = vpop.f32.mrf.mxu1  ;;  %9539 = vmatprep.subr.bf16.mxu0 %v10005_v48  ;;  %v12493_v53 = vpack.c.bf16 %v5352_v16, %v5351_v19  ;;  %v6082_v46 = vpack.c.bf16 %v6058_v9, %v6057_v43  ;;  %v6061_v16 = vld [vmem:[#allocation2 + $0x108] sm:$0xff] }
 0x4de   : > { %v12479_v34 = vadd.f32 %v4593_v63, %v4384_v22  ;;  %v6084_v39 = vpack.c.bf16 %v6062_v11, %v6061_v16 }
 0x4df   : > { %v9269_v62 = vpop.f32.mrf.mxu0  ;;  %9460 = vmatmul.mubr.bf16.gmra.mxu0 %v6078_v14  ;;  %v4400_v45 = vpop.f32.mrf.mxu1  ;;  %v10012_v14 = vld [vmem:[#allocation9 + $0x1c0] sm:$0xff]  }
 0x4e0   : > { %v12483_v33 = vadd.f32 %v9269_v62, %v9221_v57  ;;  %9463 = vmatprep.mubr.bf16.mxu0 %v6079_v59  ;;  %9540 = vmatpush3.bf16.msra.mxu0 %v10005_v48  ;;  %v6060_v57 = vld [vmem:[#allocation2 + $0xf8] sm:$0xff] }
 0x4e1   : > { %v4606_v21 = vpop.f32.mrf.mxu0  ;;  %v9225_v55 = vpop.f32.mrf.mxu1  ;;  %5606 = vmatmul.mubr.bf16.gmra.mxu1 %v12481_v6  ;;  %9541 = vmatprep.subr.bf16.mxu0 %v10006_v36 }
 0x4e2   : > { %v12486_v4 = vadd.f32 %v4606_v21, %v4397_v7  ;;  %5615 = vmatprep.mubr.bf16.mxu1 %v10238_v61 }
 0x4e3   : > { %v9270_v42 = vpop.f32.mrf.mxu0  ;;  %v4413_v38 = vpop.f32.mrf.mxu1 }
 0x4e4   : > { %v12489_v56 = vadd.f32 %v9270_v42, %v9222_v20  ;;  %9542 = vmatpush3.bf16.msra.mxu0 %v10006_v36  ;;  %v6083_v20 = vpack.c.bf16 %v6060_v57, %v6059_v17  ;;  %v5353_v36 = vld [vmem:[#allocation2 + $0x139] sm:$0xff] }
 0x4e5   : > { %v4609_v28 = vpop.f32.mrf.mxu0  ;;  %v9226_v0 = vpop.f32.mrf.mxu1  ;;  %9543 = vmatprep.subr.bf16.mxu0 %v10008_v12  ;;  %v12505_v62 = vpack.c.bf16 %v5354_v25, %v5353_v36  ;;  %v6068_v25 = vld [vmem:[#allocation2 + $0x158] sm:$0xff]  ;;  %v6067_v36 = vld [vmem:[#allocation2 + $0x150] sm:$0xff] }
 0x4e6   : > { %v12491_v41 = vadd.f32 %v4609_v28, %v4400_v45  ;;  %v5356_v28 = vld [vmem:[#allocation2 + $0x159] sm:$0xff] }
 0x4e7   : > { %v9273_v47 = vpop.f32.mrf.mxu0  ;;  %9464 = vmatmul.mubr.bf16.gmra.mxu0 %v6080_v37  ;;  %v4416_v15 = vpop.f32.mrf.mxu1  ;;  %v6065_v17 = vld [vmem:[#allocation2 + $0x138] sm:$0xff] }
 0x4e8   : > { %v12495_v29 = vadd.f32 %v9273_v47, %v9225_v55  ;;  %9467 = vmatprep.mubr.bf16.mxu0 %v6081_v8  ;;  %9544 = vmatpush3.bf16.msra.mxu0 %v10008_v12  ;;  %v5355_v47 = vld [vmem:[#allocation2 + $0x151] sm:$0xff] }
 0x4e9   : > { %v4622_v22 = vpop.f32.mrf.mxu0  ;;  %v9229_v23 = vpop.f32.mrf.mxu1  ;;  %5616 = vmatmul.mubr.bf16.gmra.mxu1 %v12493_v53  ;;  %9545 = vmatprep.subr.bf16.mxu0 %v10009_v54 }
 0x4ea   : > { %v12498_v44 = vadd.f32 %v4622_v22, %v4413_v38  ;;  %5625 = vmatprep.mubr.bf16.mxu1 %v10238_v61 }
 0x4eb   : > { %v9274_v58 = vpop.f32.mrf.mxu0  ;;  %v4429_v48 = vpop.f32.mrf.mxu1 }
 0x4ec   : > { %v12501_v10 = vadd.f32 %v9274_v58, %v9226_v0  ;;  %9546 = vmatpush3.bf16.msra.mxu0 %v10009_v54  ;;  %v6063_v0 = vld [vmem:[#allocation2 + $0x120] sm:$0xff] }
 0x4ed   : > { %v4625_v7 = vpop.f32.mrf.mxu0  ;;  %v9230_v63 = vpop.f32.mrf.mxu1  ;;  %9547 = vmatprep.subr.bf16.mxu0 %v10011_v13  ;;  %v6085_v19 = vpack.c.bf16 %v6064_v3, %v6063_v0 }
 0x4ee   : > { %v12503_v49 = vadd.f32 %v4625_v7, %v4416_v15 }
 0x4ef   : > { %v9277_v59 = vpop.f32.mrf.mxu0  ;;  %9468 = vmatmul.mubr.bf16.gmra.mxu0 %v6082_v46  ;;  %v4432_v26 = vpop.f32.mrf.mxu1 }
 0x4f0   : > { %v12507_v45 = vadd.f32 %v9277_v59, %v9229_v23  ;;  %9471 = vmatprep.mubr.bf16.mxu0 %v6083_v20  ;;  %9548 = vmatpush3.bf16.msra.mxu0 %v10011_v13  ;;  %v12517_v23 = vpack.c.bf16 %v5356_v28, %v5355_v47  ;;  %v6069_v47 = vld [vmem:[#allocation2 + $0x168] sm:$0xff] }
 0x4f1   : > { %v4638_v21 = vpop.f32.mrf.mxu0  ;;  %v9233_v55 = vpop.f32.mrf.mxu1  ;;  %5626 = vmatmul.mubr.bf16.gmra.mxu1 %v12505_v62  ;;  %9549 = vmatprep.subr.bf16.mxu0 %v10012_v14 }
 0x4f2   : > { %v12510_v12 = vadd.f32 %v4638_v21, %v4429_v48  ;;  %5635 = vmatprep.mubr.bf16.mxu1 %v10238_v61  ;;  %v6066_v48 = vld [vmem:[#allocation2 + $0x140] sm:$0xff]  ;;  %v6087_v21 = vpack.c.bf16 %v6068_v25, %v6067_v36 }
 0x4f3   : > { %v9278_v42 = vpop.f32.mrf.mxu0  ;;  %v4445_v38 = vpop.f32.mrf.mxu1  ;;  %v6086_v20 = vpack.c.bf16 %v6066_v48, %v6065_v17 }
 0x4f4   : > { %v12513_v51 = vadd.f32 %v9278_v42, %v9230_v63  ;;  %9550 = vmatpush3.bf16.msra.mxu0 %v10012_v14  ;;  %v5358_v63 = vld [vmem:[#allocation2 + $0x171] sm:$0xff] }
 0x4f5   : > { %v4641_v37 = vpop.f32.mrf.mxu0  ;;  %v9234_v54 = vpop.f32.mrf.mxu1 }
 0x4f6   : > { %v12515_v8 = vadd.f32 %v4641_v37, %v4432_v26 }
 0x4f7   : > { %v9281_v15 = vpop.f32.mrf.mxu0  ;;  %9472 = vmatmul.mubr.bf16.gmra.mxu0 %v6084_v39  ;;  %v4448_v22 = vpop.f32.mrf.mxu1  ;;  %v6070_v39 = vld [vmem:[#allocation2 + $0x170] sm:$0xff] }
 0x4f8   : > { %v12519_v13 = vadd.f32 %v9281_v15, %v9233_v55  ;;  %9475 = vmatprep.mubr.bf16.mxu0 %v6085_v19  ;;  %v5357_v55 = vld [vmem:[#allocation2 + $0x169] sm:$0xff] }
 0x4f9   : > { %v4654_v9 = vpop.f32.mrf.mxu0  ;;  %v9237_v58 = vpop.f32.mrf.mxu1  ;;  %5636 = vmatmul.mubr.bf16.gmra.mxu1 %v12517_v23  ;;  %v12529_v3 = vpack.c.bf16 %v5358_v63, %v5357_v55  ;;  %v5360_v15 = vld [vmem:[#allocation2 + $0x189] sm:$0xff]  ;;  %v6655_v55 = vld [vmem:[#allocation2 + $0x32] sm:$0xff] }
 0x4fa   : > { %v12522_v57 = vadd.f32 %v4654_v9, %v4445_v38  ;;  %5645 = vmatprep.mubr.bf16.mxu1 %v10238_v61  ;;  %v6088_v9 = vpack.c.bf16 %v6070_v39, %v6069_v47 }
 0x4fb   : > { %v9282_v43 = vpop.f32.mrf.mxu0  ;;  %v4461_v7 = vpop.f32.mrf.mxu1 }
 0x4fc   : > { %v12525_v46 = vadd.f32 %v9282_v43, %v9234_v54  ;;  %v5359_v43 = vld [vmem:[#allocation2 + $0x181] sm:$0xff] }
 0x4fd   : > { %v4657_v14 = vpop.f32.mrf.mxu0  ;;  %v9238_v59 = vpop.f32.mrf.mxu1 }
 0x4fe   : > { %v12527_v26 = vadd.f32 %v4657_v14, %v4448_v22 }
 0x4ff   : > { %v9285_v11 = vpop.f32.mrf.mxu0  ;;  %9476 = vmatmul.mubr.bf16.gmra.mxu0 %v6086_v20  ;;  %v4464_v42 = vpop.f32.mrf.mxu1 }
 0x500   : > { %v12531_v38 = vadd.f32 %v9285_v11, %v9237_v58  ;;  %9479 = vmatprep.mubr.bf16.mxu0 %v6087_v21  ;;  %v6656_v11 = vld [vmem:[#allocation2 + $0x3a] sm:$0xff] }
 0x501   : > { %v4670_v16 = vpop.f32.mrf.mxu0  ;;  %v9241_v28 = vpop.f32.mrf.mxu1  ;;  %5646 = vmatmul.mubr.bf16.gmra.mxu1 %v12529_v3 }
 0x502   : > { %v12534_v37 = vadd.f32 %v4670_v16, %v4461_v7  ;;  %5655 = vmatprep.mubr.bf16.mxu1 %v10238_v61  ;;  %v12541_v7 = vpack.c.bf16 %v5360_v15, %v5359_v43  ;;  %v6657_v43 = vld [vmem:[#allocation2 + $0x4a] sm:$0xff] }
 0x503   : > { %v9286_v0 = vpop.f32.mrf.mxu0  ;;  %v4477_v54 = vpop.f32.mrf.mxu1 }
 0x504   : > { %v12537_v19 = vadd.f32 %v9286_v0, %v9238_v59  ;;  %v10023_v59 = vld [vmem:[#allocation2] sm:$0xff] }
 0x505   : > { %v4673_v22 = vpop.f32.mrf.mxu0  ;;  %v9242_v58 = vpop.f32.mrf.mxu1  ;;  %v6090_v21 = vpack.c.bf16 %v10023_v59, %v10023_v59 }
 0x506   : > { %v12539_v48 = vadd.f32 %v4673_v22, %v4464_v42 }
 0x507   : > { %v9289_v25 = vpop.f32.mrf.mxu0  ;;  %9480 = vmatmul.mubr.bf16.gmra.mxu0 %v6088_v9  ;;  %v4480_v17 = vpop.f32.mrf.mxu1 }
 0x508   : > { %v12543_v63 = vadd.f32 %v9289_v25, %v9241_v28  ;;  %9483 = vmatprep.mubr.bf16.mxu0 %v12415_v32  ;;  %v6687_v32 = vpack.c.bf16 %v6656_v11, %v6655_v55  ;;  %v6658_v25 = vld [vmem:[#allocation2 + $0x52] sm:$0xff] }
 0x509   : > { %v4686_v61 = vpop.f32.mrf.mxu0  ;;  %v9245_v14 = vpop.f32.mrf.mxu1  ;;  %5656 = vmatmul.mubr.bf16.gmra.mxu1 %v12541_v7  ;;  %v6688_v11 = vpack.c.bf16 %v6658_v25, %v6657_v43  ;;  %v6661_v43 = vld [vmem:[#allocation2 + $0x7a] sm:$0xff]  ;;  %v6662_v25 = vld [vmem:[#allocation2 + $0x82] sm:$0xff] }
 0x50a   : > { %v12547_v20 = vadd.f32 %v4686_v61, %v4477_v54  ;;  %9503 = vmatprep.mubr.bf16.mxu1 %v12421_v35  ;;  %v6659_v61 = vld [vmem:[#allocation2 + $0x62] sm:$0xff] }
 0x50b   : > { %v9290_v36 = vpop.f32.mrf.mxu0  ;;  %v4493_v42 = vpop.f32.mrf.mxu1 }
 0x50c   : > { %v12550_v16 = vadd.f32 %v9290_v36, %v9242_v58  ;;  %v6660_v36 = vld [vmem:[#allocation2 + $0x6a] sm:$0xff] }
 0x50d   : > { %v4689_v28 = vpop.f32.mrf.mxu0  ;;  %v9246_v39 = vpop.f32.mrf.mxu1 }
 0x50e   : > { %v12552_v0 = vadd.f32 %v4689_v28, %v4480_v17 }
 0x50f   : > { %v9293_v47 = vpop.f32.mrf.mxu0  ;;  %9484 = vmatmul.mubr.bf16.gmra.mxu0 %v6090_v21  ;;  %v4496_v15 = vpop.f32.mrf.mxu1 }
 0x510   : > { %v12554_v54 = vadd.f32 %v9293_v47, %v9245_v14  ;;  %9551 = vmatprep.mubr.bf16.mxu0 %v6687_v32 }
 0x511   : > { %v4702_v35 = vpop.f32.mrf.mxu0  ;;  %v9313_v22 = vpop.f32.mrf.mxu1  ;;  %9504 = vmatmul.mubr.bf16.vlgmr.msra.gmra.mxu1 %v12427_v18 }
 0x512   : > { %v12557_v9 = vadd.f32 %v4702_v35, %v4493_v42  ;;  %v4993_v58 = vadd.f32 %v9313_v22, %v12471_v52  ;;  %9507 = vmatprep.mubr.bf16.mxu1 %v12433_v1  ;;  %v6689_v42 = vpack.c.bf16 %v6660_v36, %v6659_v61  ;;  %v6664_v61 = vld [vmem:[#allocation2 + $0x9a] sm:$0xff] }
 0x513   : > { %v9294_v17 = vpop.f32.mrf.mxu0  ;;  %v4864_v59 = vpop.f32.mrf.mxu1 }
 0x514   : > { %v12561_v21 = vadd.f32 %v9294_v17, %v9246_v39  ;;  %v4991_v14 = vadd.f32 %v4864_v59, %v12474_v30  ;;  %v6663_v17 = vld [vmem:[#allocation2 + $0x92] sm:$0xff] }
 0x515   : > { %v4705_v55 = vpop.f32.mrf.mxu0  ;;  %v9314_v28 = vpop.f32.mrf.mxu1 }
 0x516   : > { %v12564_v18 = vadd.f32 %v4705_v55, %v4496_v15  ;;  %v4994_v52 = vadd.f32 %v9314_v28, %v12477_v27  ;;  %v6690_v55 = vpack.c.bf16 %v6662_v25, %v6661_v43  ;;  %v6667_v43 = vld [vmem:[#allocation2 + $0xc2] sm:$0xff]  ;;  %v6668_v25 = vld [vmem:[#allocation2 + $0xca] sm:$0xff] }
 0x517   : > { %v9361_v32 = vpop.f32.mrf.mxu0  ;;  %9552 = vmatmul.mubr.bf16.vlgmr.msra.gmra.mxu0 %v6688_v11  ;;  %v4867_v47 = vpop.f32.mrf.mxu1 }
 0x518   : > { %v12567_v1 = vadd.f32 %v9361_v32, %v4993_v58  ;;  %9555 = vmatprep.mubr.bf16.mxu0 %v6689_v42  ;;  %v4992_v35 = vadd.f32 %v4867_v47, %v12479_v34 }
 0x519   : > { %v5170_v39 = vpop.f32.mrf.mxu0  ;;  %v9317_v22 = vpop.f32.mrf.mxu1  ;;  %9508 = vmatmul.mubr.bf16.gmra.mxu1 %v12439_v60 }
 0x51a   : > { %v12571_v30 = vadd.f32 %v5170_v39, %v4991_v14  ;;  %v4997_v15 = vadd.f32 %v9317_v22, %v12483_v33  ;;  %9511 = vmatprep.mubr.bf16.mxu1 %v12445_v40  ;;  %v6691_v14 = vpack.c.bf16 %v6664_v61, %v6663_v17  ;;  %v6665_v39 = vld [vmem:[#allocation2 + $0xaa] sm:$0xff]  ;;  %v6666_v22 = vld [vmem:[#allocation2 + $0xb2] sm:$0xff] }
 0x51b   : > { %v9362_v27 = vpop.f32.mrf.mxu0  ;;  %v4880_v58 = vpop.f32.mrf.mxu1  ;;  %v6692_v61 = vpack.c.bf16 %v6666_v22, %v6665_v39 }
 0x51c   : > { %v12575_v36 = vadd.f32 %v9362_v27, %v4994_v52  ;;  %v4995_v34 = vadd.f32 %v4880_v58, %v12486_v4 }
 0x51d   : > { %v5173_v59 = vpop.f32.mrf.mxu0  ;;  %v9318_v11 = vpop.f32.mrf.mxu1 }
 0x51e   : > { %v12578_v60 = vadd.f32 %v5173_v59, %v4992_v35  ;;  %v4998_v33 = vadd.f32 %v9318_v11, %v12489_v56 }
 0x51f   : > { %v9365_v28 = vpop.f32.mrf.mxu0  ;;  %9556 = vmatmul.mubr.bf16.gmra.mxu0 %v6690_v55  ;;  %v4883_v42 = vpop.f32.mrf.mxu1 }
 0x520   : > { %v12581_v40 = vadd.f32 %v9365_v28, %v4997_v15  ;;  %9559 = vmatprep.mubr.bf16.mxu0 %v6691_v14  ;;  %v4996_v32 = vadd.f32 %v4883_v42, %v12491_v41  ;;  %v10013_v14 = vld [vmem:[#allocation11 + $0x38] sm:$0xff]  }
 0x521   : > { %v5186_v52 = vpop.f32.mrf.mxu0  ;;  %v9321_v47 = vpop.f32.mrf.mxu1  ;;  %9512 = vmatmul.mubr.bf16.gmra.mxu1 %v12451_v5  ;;  %9583 = vmatprep.subr.bf16.mxu1 %v10013_v14 }
 0x522   : > { %v12585_v4 = vadd.f32 %v5186_v52, %v4995_v34  ;;  %v5001_v35 = vadd.f32 %v9321_v47, %v12495_v29  ;;  %9515 = vmatprep.mubr.bf16.mxu1 %v12457_v31  ;;  %v6693_v34 = vpack.c.bf16 %v6668_v25, %v6667_v43  ;;  %v6670_v52 = vld [vmem:[#allocation2 + $0xe2] sm:$0xff]  ;;  %v6671_v47 = vld [vmem:[#allocation2 + $0xf2] sm:$0xff]  ;;  %9584 = vmatpush3.bf16.msra.mxu1 %v10013_v14 }
 0x523   : > { %v9366_v56 = vpop.f32.mrf.mxu0  ;;  %v4896_v15 = vpop.f32.mrf.mxu1  ;;  %v6675_v14 = vld [vmem:[#allocation2 + $0x122] sm:$0xff] }
 0x524   : > { %v12589_v27 = vadd.f32 %v9366_v56, %v4998_v33  ;;  %v4999_v41 = vadd.f32 %v4896_v15, %v12498_v44 }
 0x525   : > { %v5189_v17 = vpop.f32.mrf.mxu0  ;;  %v9322_v58 = vpop.f32.mrf.mxu1 }
 0x526   : > { %v12592_v5 = vadd.f32 %v5189_v17, %v4996_v32  ;;  %v5002_v29 = vadd.f32 %v9322_v58, %v12501_v10  ;;  %v6669_v32 = vld [vmem:[#allocation2 + $0xda] sm:$0xff]  ;;  %v10014_v58 = vld [vmem:[#allocation11 + $0x30] sm:$0xff]  }
 0x527   : > { %v9369_v59 = vpop.f32.mrf.mxu0  ;;  %9560 = vmatmul.mubr.bf16.gmra.mxu0 %v6692_v61  ;;  %v4899_v55 = vpop.f32.mrf.mxu1  ;;  %9585 = vmatprep.subr.bf16.mxu1 %v10014_v58 }
 0x528   : > { %v12595_v31 = vadd.f32 %v9369_v59, %v5001_v35  ;;  %9563 = vmatprep.mubr.bf16.mxu0 %v6693_v34  ;;  %v5000_v11 = vadd.f32 %v4899_v55, %v12503_v49  ;;  %v6672_v35 = vld [vmem:[#allocation2 + $0xfa] sm:$0xff]  ;;  %v6673_v55 = vld [vmem:[#allocation2 + $0x10a] sm:$0xff]  ;;  %9586 = vmatpush3.bf16.msra.mxu1 %v10014_v58 }
 0x529   : > { %v5202_v33 = vpop.f32.mrf.mxu0  ;;  %v9325_v28 = vpop.f32.mrf.mxu1  ;;  %9516 = vmatmul.mubr.bf16.gmra.mxu1 %v12465_v24  ;;  %v6694_v24 = vpack.c.bf16 %v6670_v52, %v6669_v32 }
 0x52a   : > { %v12599_v44 = vadd.f32 %v5202_v33, %v4999_v41  ;;  %v5005_v42 = vadd.f32 %v9325_v28, %v12507_v45  ;;  %9519 = vmatprep.mubr.bf16.mxu1 %v12469_v50  ;;  %v6695_v45 = vpack.c.bf16 %v6672_v35, %v6671_v47  ;;  %v6676_v33 = vld [vmem:[#allocation2 + $0x12a] sm:$0xff] }
 0x52b   : > { %v9370_v10 = vpop.f32.mrf.mxu0  ;;  %v4912_v39 = vpop.f32.mrf.mxu1 }
 0x52c   : > { %v12603_v49 = vadd.f32 %v9370_v10, %v5002_v29  ;;  %v5003_v22 = vadd.f32 %v4912_v39, %v12510_v12 }
 0x52d   : > { %v5205_v56 = vpop.f32.mrf.mxu0  ;;  %v9326_v43 = vpop.f32.mrf.mxu1 }
 0x52e   : > { %v12606_v25 = vadd.f32 %v5205_v56, %v5000_v11  ;;  %v5006_v15 = vadd.f32 %v9326_v43, %v12513_v51  ;;  %v6674_v11 = vld [vmem:[#allocation2 + $0x112] sm:$0xff]  ;;  %v6677_v43 = vld [vmem:[#allocation2 + $0x13a] sm:$0xff] }
 0x52f   : > { %v9373_v41 = vpop.f32.mrf.mxu0  ;;  %9564 = vmatmul.mubr.bf16.gmra.mxu0 %v6694_v24  ;;  %v4915_v50 = vpop.f32.mrf.mxu1  ;;  %v6696_v32 = vpack.c.bf16 %v6674_v11, %v6673_v55 }
 0x530   : > { %v12609_v17 = vadd.f32 %v9373_v41, %v5005_v42  ;;  %9567 = vmatprep.mubr.bf16.mxu0 %v6695_v45  ;;  %v5004_v61 = vadd.f32 %v4915_v50, %v12515_v8  ;;  %v6678_v45 = vld [vmem:[#allocation2 + $0x142] sm:$0xff]  ;;  %v6680_v41 = vld [vmem:[#allocation2 + $0x15a] sm:$0xff] }
 0x531   : > { %v5218_v34 = vpop.f32.mrf.mxu0  ;;  %v9329_v29 = vpop.f32.mrf.mxu1  ;;  %9520 = vmatmul.mubr.bf16.gmra.mxu1 %v12481_v6 }
 0x532   : > { %v12613_v12 = vadd.f32 %v5218_v34, %v5003_v22  ;;  %v5009_v59 = vadd.f32 %v9329_v29, %v12519_v13  ;;  %9523 = vmatprep.mubr.bf16.mxu1 %v12493_v53  ;;  %v6697_v13 = vpack.c.bf16 %v6676_v33, %v6675_v14  ;;  %v10015_v22 = vld [vmem:[#allocation11 + $0x28] sm:$0xff]  }
 0x533   : > { %v9374_v51 = vpop.f32.mrf.mxu0  ;;  %v4928_v28 = vpop.f32.mrf.mxu1  ;;  %9587 = vmatprep.subr.bf16.mxu1 %v10015_v22 }
 0x534   : > { %v12617_v8 = vadd.f32 %v9374_v51, %v5006_v15  ;;  %v12620_v42 = vadd.f32 %v4928_v28, %v12522_v57  ;;  %v6679_v15 = vld [vmem:[#allocation2 + $0x152] sm:$0xff]  ;;  %9588 = vmatpush3.bf16.msra.mxu1 %v10015_v22 }
 0x535   : > { %v5221_v6 = vpop.f32.mrf.mxu0  ;;  %v9330_v52 = vpop.f32.mrf.mxu1  ;;  %v10016_v51 = vld [vmem:[#allocation11 + $0x20] sm:$0xff]  }
 0x536   : > { %v12622_v10 = vadd.f32 %v5221_v6, %v5004_v61  ;;  %v5010_v47 = vadd.f32 %v9330_v52, %v12525_v46  ;;  %v6682_v6 = vld [vmem:[#allocation2 + $0x172] sm:$0xff]  ;;  %9589 = vmatprep.subr.bf16.mxu1 %v10016_v51 }
 0x537   : > { %v9377_v53 = vpop.f32.mrf.mxu0  ;;  %9568 = vmatmul.mubr.bf16.gmra.mxu0 %v6696_v32  ;;  %v12625_v35 = vpop.f32.mrf.mxu1  ;;  %v6380_v32 = vld [vmem:[#allocation2 + $0x1a1] sm:$0xff] }
 0x538   : > { %v12627_v39 = vadd.f32 %v9377_v53, %v5009_v59  ;;  %9571 = vmatprep.mubr.bf16.mxu0 %v6697_v13  ;;  %9590 = vmatpush3.bf16.msra.mxu1 %v10016_v51 }
 0x539   : > { %v12629_v56 = vpop.f32.mrf.mxu0  ;;  %v9333_v57 = vpop.f32.mrf.mxu1  ;;  %9524 = vmatmul.mubr.bf16.gmra.mxu1 %v12505_v62  ;;  %v6698_v62 = vpack.c.bf16 %v6678_v45, %v6677_v43 }
 0x53a   : > { %v5013_v24 = vadd.f32 %v9333_v57, %v12531_v38  ;;  %9527 = vmatprep.mubr.bf16.mxu1 %v12517_v23  ;;  %v6699_v38 = vpack.c.bf16 %v6680_v41, %v6679_v15  ;;  %v6686_v15 = vld [vmem:[#allocation2 + $0x1a2] sm:$0xff]  ;;  %v10017_v41 = vld [vmem:[#allocation11 + $0x18] sm:$0xff]  }
 0x53b   : > { %v9378_v46 = vpop.f32.mrf.mxu0  ;;  %v4944_v50 = vpop.f32.mrf.mxu1  ;;  %9591 = vmatprep.subr.bf16.mxu1 %v10017_v41 }
 0x53c   : > { %v12634_v61 = vadd.f32 %v9378_v46, %v5010_v47  ;;  %v12637_v58 = vadd.f32 %v4944_v50, %v12534_v37  ;;  %v6681_v37 = vld [vmem:[#allocation2 + $0x16a] sm:$0xff]  ;;  %v6685_v46 = vld [vmem:[#allocation2 + $0x19a] sm:$0xff]  ;;  %9592 = vmatpush3.bf16.msra.mxu1 %v10017_v41 }
 0x53d   : > { %v12639_v34 = vpop.f32.mrf.mxu0  ;;  %v9334_v29 = vpop.f32.mrf.mxu1 }
 0x53e   : > { %v5014_v59 = vadd.f32 %v9334_v29, %v12537_v19  ;;  %v6379_v19 = vld [vmem:[#allocation2 + $0x199] sm:$0xff] }
 0x53f   : > { %v9381_v55 = vpop.f32.mrf.mxu0  ;;  %9572 = vmatmul.mubr.bf16.gmra.mxu0 %v6698_v62  ;;  %v12642_v23 = vpop.f32.mrf.mxu1 }
 0x540   : > { %v12644_v11 = vadd.f32 %v9381_v55, %v5013_v24  ;;  %9575 = vmatprep.mubr.bf16.mxu0 %v6699_v38  ;;  %v6396_v24 = vpack.c.bf16 %v6380_v32, %v6379_v19 }
 0x541   : > { %v12646_v14 = vpop.f32.mrf.mxu0  ;;  %v9337_v33 = vpop.f32.mrf.mxu1  ;;  %9528 = vmatmul.mubr.bf16.gmra.mxu1 %v12529_v3  ;;  %v6700_v3 = vpack.c.bf16 %v6682_v6, %v6681_v37  ;;  %v10018_v6 = vld [vmem:[#allocation11 + $0x10] sm:$0xff]  }
 0x542   : > { %v5017_v28 = vadd.f32 %v9337_v33, %v12543_v63  ;;  %9531 = vmatprep.mubr.bf16.mxu1 %v12541_v7  ;;  %9593 = vmatprep.subr.bf16.mxu1 %v10018_v6 }
 0x543   : > { %v9382_v52 = vpop.f32.mrf.mxu0  ;;  %v4960_v13 = vpop.f32.mrf.mxu1  ;;  %9594 = vmatpush3.bf16.msra.mxu1 %v10018_v6 }
 0x544   : > { %v12651_v47 = vadd.f32 %v9382_v52, %v5014_v59  ;;  %v12654_v53 = vadd.f32 %v4960_v13, %v12547_v20 }
 0x545   : > { %v12656_v22 = vpop.f32.mrf.mxu0  ;;  %v9338_v57 = vpop.f32.mrf.mxu1 }
 0x546   : > { %v5018_v63 = vadd.f32 %v9338_v57, %v12550_v16  ;;  %v6702_v16 = vpack.c.bf16 %v6686_v15, %v6685_v46 }
 0x547   : > { %v9385_v43 = vpop.f32.mrf.mxu0  ;;  %9576 = vmatmul.mubr.bf16.gmra.mxu0 %v6700_v3  ;;  %v12659_v7 = vpop.f32.mrf.mxu1 }
 0x548   : > { %v12661_v45 = vadd.f32 %v9385_v43, %v5017_v28  ;;  %9579 = vmatprep.mubr.bf16.mxu0 %v12462_v2 }
 0x549   : > { %v12664_v20 = vpop.f32.mrf.mxu0  ;;  %v9341_v50 = vpop.f32.mrf.mxu1  ;;  %9532 = vmatmul.mubr.bf16.gmra.mxu1 %v6396_v24 }
 0x54a   : > { %v5021_v62 = vadd.f32 %v9341_v50, %v12554_v54 }
 0x54b   : > { %v9386_v29 = vpop.f32.mrf.mxu0  ;;  %v4976_v38 = vpop.f32.mrf.mxu1 }
 0x54c   : > { %v12667_v59 = vadd.f32 %v9386_v29, %v5018_v63  ;;  %v12670_v55 = vadd.f32 %v4976_v38, %v12557_v9  ;;  %v10019_v29 = vld [vmem:[#allocation11 + $0x8] sm:$0xff]  }
 0x54d   : > { %v12672_v2 = vpop.f32.mrf.mxu0  ;;  %v9342_v51 = vpop.f32.mrf.mxu1  ;;  %9595 = vmatprep.subr.bf16.mxu1 %v10019_v29 }
 0x54e   : > { %v5022_v33 = vadd.f32 %v9342_v51, %v12561_v21  ;;  %9596 = vmatpush3.bf16.msra.mxu1 %v10019_v29 }
 0x54f   : > { %v9389_v37 = vpop.f32.mrf.mxu0  ;;  %9580 = vmatmul.mubr.bf16.gmra.mxu0 %v6702_v16  ;;  %v12675_v28 = vpop.f32.mrf.mxu1 }
 0x550   : > { %v12677_v54 = vadd.f32 %v9389_v37, %v5021_v62 }
 0x551   : > { %v12679_v19 = vpop.f32.mrf.mxu0  ;;  %v5507_v32 = vpop.f32.mrf.mxu1 }
 0x552   : > { %13769 = vst [vmem:[#allocation123_spill] sm:$0xff] %v12677_v54  ;;  %v12682_v52 = vadd.f32 %v5507_v32, %v12571_v30 }
 0x553   : > { %v9390_v9 = vpop.f32.mrf.mxu0  ;;  %v12684_v13 = vpop.f32.mrf.mxu1 }
 0x554   : > { %13770 = vst [vmem:[#allocation127_spill] sm:$0xff] %v12684_v13  ;;  %v12686_v3 = vadd.f32 %v9390_v9, %v5022_v33 }
 0x555   : > { %v12688_v21 = vpop.f32.mrf.mxu0  ;;  %v5511_v57 = vpop.f32.mrf.mxu1 }
 0x556   : > { %13771 = vst [vmem:[#allocation128_spill] sm:$0xff] %v12686_v3  ;;  %v12691_v24 = vadd.f32 %v5511_v57, %v12578_v60 }
 0x557   : > { %v9409_v63 = vpop.f32.mrf.mxu0  ;;  %v12693_v43 = vpop.f32.mrf.mxu1 }
 0x558   : > { %13772 = vst [vmem:[#allocation84_spill] sm:$0xff] %v12691_v24  ;;  %13773 = vst [vmem:[#allocation83_spill] sm:$0xff] %v12693_v43 }
 0x559   : > { %v12695_v46 = vpop.f32.mrf.mxu0  ;;  %v5517_v30 = vpop.f32.mrf.mxu1 }
 0x55a   : > { %v5668_v15 = vadd.f32 %v5517_v30, %v12567_v1 }
 0x55b   : > { %v9410_v41 = vpop.f32.mrf.mxu0  ;;  %v12698_v50 = vpop.f32.mrf.mxu1 }
 0x55c   : > { %13774 = vst [vmem:[#allocation86_spill] sm:$0xff] %v12698_v50  ;;  %v12700_v62 = vadd.f32 %v9409_v63, %v5668_v15  ;;  %v10020_v63 = vld [vmem:[#allocation11] sm:$0xff]  }
 0x55d   : > { %v12702_v16 = vpop.f32.mrf.mxu0  ;;  %v5521_v38 = vpop.f32.mrf.mxu1  ;;  %9597 = vmatprep.subr.bf16.mxu1 %v10020_v63 }
 0x55e   : > { %13775 = vst [vmem:[#allocation85_spill] sm:$0xff] %v12702_v16  ;;  %v5669_v60 = vadd.f32 %v5521_v38, %v12575_v36  ;;  %9598 = vmatpush3.bf16.msra.mxu1 %v10020_v63 }
 0x55f   : > { %v9413_v51 = vpop.f32.mrf.mxu0  ;;  %v12705_v33 = vpop.f32.mrf.mxu1 }
 0x560   : > { %13776 = vst [vmem:[#allocation131_spill] sm:$0xff] %v12705_v33  ;;  %v12707_v37 = vadd.f32 %v9410_v41, %v5669_v60 }
 0x561   : > { %v12709_v6 = vpop.f32.mrf.mxu0  ;;  %v5527_v1 = vpop.f32.mrf.mxu1 }
 0x562   : > { %13777 = vst [vmem:[#allocation132_spill] sm:$0xff] %v12707_v37  ;;  %v12712_v32 = vadd.f32 %v5527_v1, %v12585_v4 }
 0x563   : > { %v9414_v9 = vpop.f32.mrf.mxu0  ;;  %v12714_v57 = vpop.f32.mrf.mxu1 }
 0x564   : > { %13778 = vst [vmem:[#allocation136_spill] sm:$0xff] %v12714_v57 }
 0x565   : > { %v12716_v30 = vpop.f32.mrf.mxu0  ;;  %v5531_v36 = vpop.f32.mrf.mxu1 }
 0x566   : > { %13779 = vst [vmem:[#allocation92_spill] sm:$0xff] %v12716_v30  ;;  %v12719_v15 = vadd.f32 %v5531_v36, %v12592_v5 }
 0x567   : > { %v9417_v29 = vpop.f32.mrf.mxu0  ;;  %v12721_v41 = vpop.f32.mrf.mxu1 }
 0x568   : > { %13780 = vst [vmem:[#allocation91_spill] sm:$0xff] %v12719_v15  ;;  %13781 = vst [vmem:[#allocation137_spill] sm:$0xff] %v12721_v41 }
 0x569   : > { %v12723_v38 = vpop.f32.mrf.mxu0  ;;  %v5537_v60 = vpop.f32.mrf.mxu1 }
 0x56a   : > { %v5672_v4 = vadd.f32 %v5537_v60, %v12581_v40 }
 0x56b   : > { %v9418_v1 = vpop.f32.mrf.mxu0  ;;  %v12726_v33 = vpop.f32.mrf.mxu1 }
 0x56c   : > { %13782 = vst [vmem:[#allocation138_spill] sm:$0xff] %v12726_v33  ;;  %v12728_v57 = vadd.f32 %v9413_v51, %v5672_v4 }
 0x56d   : > { %v12730_v43 = vpop.f32.mrf.mxu0  ;;  %v5541_v50 = vpop.f32.mrf.mxu1 }
 0x56e   : > { %13783 = vst [vmem:[#allocation97_spill] sm:$0xff] %v12730_v43  ;;  %v5673_v5 = vadd.f32 %v5541_v50, %v12589_v27 }
 0x56f   : > { %v9421_v36 = vpop.f32.mrf.mxu0  ;;  %v12733_v13 = vpop.f32.mrf.mxu1 }
 0x570   : > { %13784 = vst [vmem:[#allocation98_spill] sm:$0xff] %v12733_v13  ;;  %v12735_v41 = vadd.f32 %v9414_v9, %v5673_v5 }
 0x571   : > { %v12737_v63 = vpop.f32.mrf.mxu0  ;;  %v5547_v30 = vpop.f32.mrf.mxu1 }
 0x572   : > { %13785 = vst [vmem:[#allocation102_spill] sm:$0xff] %v12735_v41  ;;  %v12740_v40 = vadd.f32 %v5547_v30, %v12599_v44 }
 0x573   : > { %v9422_v60 = vpop.f32.mrf.mxu0  ;;  %v12742_v33 = vpop.f32.mrf.mxu1 }
 0x574   : > { %13786 = vst [vmem:[#allocation103_spill] sm:$0xff] %v12742_v33 }
 0x575   : > { %v12744_v51 = vpop.f32.mrf.mxu0  ;;  %v5551_v4 = vpop.f32.mrf.mxu1 }
 0x576   : > { %13787 = vst [vmem:[#allocation104_spill] sm:$0xff] %v12744_v51  ;;  %v12747_v43 = vadd.f32 %v5551_v4, %v12606_v25 }
 0x577   : > { %v9425_v27 = vpop.f32.mrf.mxu0  ;;  %v12749_v50 = vpop.f32.mrf.mxu1 }
 0x578   : > { %13788 = vst [vmem:[#allocation108_spill] sm:$0xff] %v12747_v43  ;;  %13789 = vst [vmem:[#allocation109_spill] sm:$0xff] %v12749_v50 }
 0x579   : > { %v5948_v9 = vpop.f32.mrf.mxu0  ;;  %v5557_v5 = vpop.f32.mrf.mxu1 }
 0x57a   : > { %v5676_v13 = vadd.f32 %v5557_v5, %v12595_v31 }
 0x57b   : > { %v12752_v15 = vpop.f32.mrf.mxu0  ;;  %v12754_v44 = vpop.f32.mrf.mxu1 }
 0x57c   : > { %13790 = vst [vmem:[#allocation110_spill] sm:$0xff] %v12754_v44  ;;  %v12756_v30 = vadd.f32 %v9417_v29, %v5676_v13 }
 0x57d   : > { %v5951_v33 = vpop.f32.mrf.mxu0  ;;  %v5561_v41 = vpop.f32.mrf.mxu1 }
 0x57e   : > { %v5677_v51 = vadd.f32 %v5561_v41, %v12603_v49 }
 0x57f   : > { %v12759_v37 = vpop.f32.mrf.mxu0  ;;  %v12761_v25 = vpop.f32.mrf.mxu1 }
 0x580   : > { %13791 = vst [vmem:[#allocation114_spill] sm:$0xff] %v12761_v25  ;;  %v12763_v4 = vadd.f32 %v9418_v1, %v5677_v51 }
 0x581   : > { %v12765_v50 = vpop.f32.mrf.mxu0  ;;  %v5567_v43 = vpop.f32.mrf.mxu1 }
 0x582   : > { %13792 = vst [vmem:[#allocation115_spill] sm:$0xff] %v12763_v4  ;;  %v12768_v31 = vadd.f32 %v5567_v43, %v12613_v12 }
 0x583   : > { %v12770_v5 = vpop.f32.mrf.mxu0  ;;  %v12772_v13 = vpop.f32.mrf.mxu1 }
 0x584   : > { %13793 = vst [vmem:[#allocation116_spill] sm:$0xff] %v12772_v13 }
 0x585   : > { %v12774_v29 = vpop.f32.mrf.mxu0  ;;  %v5571_v44 = vpop.f32.mrf.mxu1 }
 0x586   : > { %v12777_v49 = vadd.f32 %v5571_v44, %v12622_v10 }
 0x587   : > { %v12779_v41 = vpop.f32.mrf.mxu0  ;;  %v12781_v1 = vpop.f32.mrf.mxu1 }
 0x588   : > { %13794 = vst [vmem:[#allocation118_spill] sm:$0xff] %v12777_v49  ;;  %13795 = vst [vmem:[#allocation119_spill] sm:$0xff] %v12781_v1  ;;  %v5313_v1 = vadd.f32 %v12629_v56, %v12620_v42 }
 0x589   : > { %v12783_v51 = vpop.f32.mrf.mxu0  ;;  %v5577_v25 = vpop.f32.mrf.mxu1 }
 0x58a   : > { %v5680_v12 = vadd.f32 %v5577_v25, %v12609_v17 }
 0x58b   : > { %v12786_v43 = vpop.f32.mrf.mxu0  ;;  %v12788_v4 = vpop.f32.mrf.mxu1 }
 0x58c   : > { %13796 = vst [vmem:[#allocation120_spill] sm:$0xff] %v12788_v4  ;;  %v12790_v13 = vadd.f32 %v9421_v36, %v5680_v12  ;;  %v5008_v36 = vadd.f32 %v12625_v35, %v12527_v26 }
 0x58d   : > { %v12792_v16 = vpop.f32.mrf.mxu0  ;;  %v5581_v24 = vpop.f32.mrf.mxu1 }
 0x58e   : > { %v5681_v10 = vadd.f32 %v5581_v24, %v12617_v8  ;;  %v5314_v8 = vadd.f32 %v12639_v34, %v5008_v36 }
 0x58f   : > { %v12795_v44 = vpop.f32.mrf.mxu0  ;;  %v12797_v49 = vpop.f32.mrf.mxu1 }
 0x590   : > { %13797 = vst [vmem:[#allocation124_spill] sm:$0xff] %v12797_v49  ;;  %v12801_v3 = vadd.f32 %v9422_v60, %v5681_v10 }
 0x591   : > { %v12803_v17 = vpop.f32.mrf.mxu0  ;;  %v5587_v25 = vpop.f32.mrf.mxu1 }
 0x592   : > { %13798 = vst [vmem:[#allocation125_spill] sm:$0xff] %v12801_v3  ;;  %v5682_v12 = vadd.f32 %v5587_v25, %v5313_v1  ;;  %v6011_v3 = vadd.f32 %v12695_v46, %v12682_v52 }
 0x593   : > { %v12807_v4 = vpop.f32.mrf.mxu0  ;;  %v12809_v54 = vpop.f32.mrf.mxu1 }
 0x594   : > { %13799 = vst [vmem:[#allocation129_spill] sm:$0xff] %v12809_v54  ;;  %v12812_v24 = vadd.f32 %v5948_v9, %v5682_v12 }
 0x595   : > { %v12814_v49 = vpop.f32.mrf.mxu0  ;;  %v5591_v42 = vpop.f32.mrf.mxu1 }
 0x596   : > { %v5683_v56 = vadd.f32 %v5591_v42, %v5314_v8 }
 0x597   : > { %v9457_v60 = vpop.f32.mrf.mxu0  ;;  %v12816_v10 = vpop.f32.mrf.mxu1 }
 0x598   : > { %13800 = vst [vmem:[#allocation133_spill] sm:$0xff] %v12816_v10  ;;  %v12821_v26 = vadd.f32 %v9457_v60, %v12700_v62  ;;  %v12823_v35 = vadd.f32 %v5951_v33, %v5683_v56 }
 0x599   : > { %v6190_v1 = vpop.f32.mrf.mxu0  ;;  %v5597_v25 = vpop.f32.mrf.mxu1 }
 0x59a   : > { %v12825_v34 = vadd.f32 %v6190_v1, %v6011_v3  ;;  %v5684_v9 = vadd.f32 %v5597_v25, %v12627_v39  ;;  %v7410_v3 = vld [vmem:[%s13294_s13 + $0x78] sm:$0xff]  ;;  %v7409_v39 = vld [vmem:[%s13294_s13 + $0x70] sm:$0xff] }
 0x59b   : > { %v12828_v36 = vpop.f32.mrf.mxu0  ;;  %v12830_v12 = vpop.f32.mrf.mxu1  ;;  %9631 = vmatprep.subr.mxu0 %v7410_v3 }
 0x59c   : > { %13801 = vst [vmem:[#allocation134_spill] sm:$0xff] %v12830_v12  ;;  %v12832_v8 = vadd.f32 %v9425_v27, %v5684_v9  ;;  %v5317_v27 = vadd.f32 %v12646_v14, %v12637_v58  ;;  %9632 = vmatpush3.msra.mxu0 %v7410_v3  ;;  %v7408_v9 = vld [vmem:[%s13294_s13 + $0x68] sm:$0xff]  ;;  %v5012_v58 = vadd.f32 %v12642_v23, %v12539_v48 }
 0x59d   : > { %v12834_v42 = vpop.f32.mrf.mxu0  ;;  %v5601_v52 = vpop.f32.mrf.mxu1  ;;  %9633 = vmatprep.subr.mxu0 %v7409_v39 }
 0x59e   : > { %v5685_v46 = vadd.f32 %v5601_v52, %v12634_v61  ;;  %v6015_v61 = vadd.f32 %v12709_v6, %v12712_v32  ;;  %9634 = vmatpush3.msra.mxu0 %v7409_v39  ;;  %v7407_v32 = vld [vmem:[%s13294_s13 + $0x60] sm:$0xff] }
 0x59f   : > { %v9461_v62 = vpop.f32.mrf.mxu0  ;;  %v12837_v33 = vpop.f32.mrf.mxu1  ;;  %9635 = vmatprep.subr.mxu0 %v7408_v9 }
 0x5a0   : > { %13802 = vst [vmem:[#allocation135_spill] sm:$0xff] %v12837_v33  ;;  %v12848_v56 = vadd.f32 %v9461_v62, %v12728_v57  ;;  %v12853_v60 = vadd.f32 %v12752_v15, %v5685_v46  ;;  %v5318_v15 = vadd.f32 %v12656_v22, %v5012_v58  ;;  %9636 = vmatpush3.msra.mxu0 %v7408_v9  ;;  %v7406_v62 = vld [vmem:[%s13294_s13 + $0x58] sm:$0xff]  ;;  %v7405_v22 = vld [vmem:[%s13294_s13 + $0x50] sm:$0xff]  ;;  %v7404_v58 = vld [vmem:[%s13294_s13 + $0x48] sm:$0xff] }
 0x5a1   : > { %v6206_v1 = vpop.f32.mrf.mxu0  ;;  %v5607_v25 = vpop.f32.mrf.mxu1  ;;  %9637 = vmatprep.subr.mxu0 %v7407_v32 }
 0x5a2   : > { %v12860_v14 = vadd.f32 %v6206_v1, %v6015_v61  ;;  %v5686_v57 = vadd.f32 %v5607_v25, %v5317_v27  ;;  %9638 = vmatpush3.msra.mxu0 %v7407_v32  ;;  %v6019_v61 = vadd.f32 %v12723_v38, %v12740_v40  ;;  %v7403_v38 = vld [vmem:[%s13294_s13 + $0x40] sm:$0xff] }
 0x5a3   : > { %v12862_v52 = vpop.f32.mrf.mxu0  ;;  %v12864_v6 = vpop.f32.mrf.mxu1  ;;  %9639 = vmatprep.subr.mxu0 %v7406_v62 }
 0x5a4   : > { %13803 = vst [vmem:[#allocation139_spill] sm:$0xff] %v12864_v6  ;;  %v12871_v46 = vadd.f32 %v12765_v50, %v5686_v57  ;;  %9640 = vmatpush3.msra.mxu0 %v7406_v62 }
 0x5a5   : > { %v12873_v48 = vpop.f32.mrf.mxu0  ;;  %v5611_v23 = vpop.f32.mrf.mxu1  ;;  %9641 = vmatprep.subr.mxu0 %v7405_v22 }
 0x5a6   : > { %v5687_v3 = vadd.f32 %v5611_v23, %v5318_v15  ;;  %9642 = vmatpush3.msra.mxu0 %v7405_v22  ;;  %v5321_v22 = vadd.f32 %v12664_v20, %v12654_v53  ;;  %v5016_v53 = vadd.f32 %v12659_v7, %v12552_v0  ;;  %v7398_v7 = vld [vmem:[%s13294_s13 + $0x18] sm:$0xff] }
 0x5a7   : > { %v9465_v39 = vpop.f32.mrf.mxu0  ;;  %v12878_v27 = vpop.f32.mrf.mxu1  ;;  %9643 = vmatprep.subr.mxu0 %v7404_v58 }
 0x5a8   : > { %13804 = vst [vmem:[#allocation140_spill] sm:$0xff] %v12878_v27  ;;  %v12884_v50 = vadd.f32 %v9465_v39, %v12756_v30  ;;  %v12889_v1 = vadd.f32 %v12774_v29, %v5687_v3  ;;  %9644 = vmatpush3.msra.mxu0 %v7404_v58 }
 0x5a9   : > { %v6222_v25 = vpop.f32.mrf.mxu0  ;;  %v5617_v9 = vpop.f32.mrf.mxu1  ;;  %9645 = vmatprep.subr.mxu0 %v7403_v38 }
 0x5aa   : > { %v12894_v57 = vadd.f32 %v6222_v25, %v6019_v61  ;;  %v5688_v32 = vadd.f32 %v5617_v9, %v12644_v11  ;;  %v7402_v11 = vld [vmem:[%s13294_s13 + $0x38] sm:$0xff]  ;;  %9646 = vmatpush3.msra.mxu0 %v7403_v38  ;;  %v6023_v25 = vadd.f32 %v12737_v63, %v12768_v31  ;;  %v7399_v31 = vld [vmem:[%s13294_s13 + $0x20] sm:$0xff] }
 0x5ab   : > { %v12897_v30 = vpop.f32.mrf.mxu0  ;;  %v12899_v15 = vpop.f32.mrf.mxu1  ;;  %9647 = vmatprep.subr.mxu0 %v7402_v11 }
 0x5ac   : > { %13805 = vst [vmem:[#allocation141_spill] sm:$0xff] %v12899_v15  ;;  %v6033_v40 = vadd.f32 %v12759_v37, %v5688_v32  ;;  %v7401_v37 = vld [vmem:[%s13294_s13 + $0x30] sm:$0xff]  ;;  %9648 = vmatpush3.msra.mxu0 %v7402_v11  ;;  %v7400_v32 = vld [vmem:[%s13294_s13 + $0x28] sm:$0xff] }
 0x5ad   : > { %v12905_v29 = vpop.f32.mrf.mxu0  ;;  %v5621_v23 = vpop.f32.mrf.mxu1  ;;  %9649 = vmatprep.subr.mxu0 %v7401_v37 }
 0x5ae   : > { %v5689_v62 = vadd.f32 %v5621_v23, %v12651_v47  ;;  %9650 = vmatpush3.msra.mxu0 %v7401_v37 }
 0x5af   : > { %v9469_v3 = vpop.f32.mrf.mxu0  ;;  %v12911_v39 = vpop.f32.mrf.mxu1  ;;  %9651 = vmatprep.subr.mxu0 %v7400_v32 }
 0x5b0   : > { %13806 = vst [vmem:[#allocation142_spill] sm:$0xff] %v12911_v39  ;;  %v12919_v61 = vadd.f32 %v9469_v3, %v12790_v13  ;;  %v12924_v47 = vadd.f32 %v12770_v5, %v5689_v62  ;;  %v5322_v5 = vadd.f32 %v12672_v2, %v5016_v53  ;;  %9652 = vmatpush3.msra.mxu0 %v7400_v32 }
 0x5b1   : > { %v6238_v9 = vpop.f32.mrf.mxu0  ;;  %v5627_v58 = vpop.f32.mrf.mxu1  ;;  %9653 = vmatprep.subr.mxu0 %v7399_v31 }
 0x5b2   : > { %v12931_v20 = vadd.f32 %v6238_v9, %v6023_v25  ;;  %v5690_v13 = vadd.f32 %v5627_v58, %v5321_v22  ;;  %9654 = vmatpush3.msra.mxu0 %v7399_v31 }
 0x5b3   : > { %v12933_v38 = vpop.f32.mrf.mxu0  ;;  %v12935_v63 = vpop.f32.mrf.mxu1  ;;  %9655 = vmatprep.subr.mxu0 %v7398_v7 }
 0x5b4   : > { %13807 = vst [vmem:[#allocation143_spill] sm:$0xff] %v12935_v63  ;;  %v6035_v23 = vadd.f32 %v12783_v51, %v5690_v13  ;;  %9656 = vmatpush3.msra.mxu0 %v7398_v7 }
 0x5b5   : > { %v12942_v11 = vpop.f32.mrf.mxu0  ;;  %v5631_v0 = vpop.f32.mrf.mxu1 }
 0x5b6   : > { %v5691_v62 = vadd.f32 %v5631_v0, %v5322_v5 }
 0x5b7   : > { %v9473_v3 = vpop.f32.mrf.mxu0  ;;  %v12947_v37 = vpop.f32.mrf.mxu1 }
 0x5b8   : > { %13808 = vst [vmem:[#allocation111_spill] sm:$0xff] %v12947_v37  ;;  %v12950_v22 = vadd.f32 %v9473_v3, %v12832_v8  ;;  %v12953_v2 = vadd.f32 %v12792_v16, %v5691_v62  ;;  %v13817_v37 = vld [vmem:[#allocation84_spill] sm:$0xff] }
 0x5b9   : > { %v6254_v51 = vpop.f32.mrf.mxu0  ;;  %v5637_v25 = vpop.f32.mrf.mxu1 }
 0x5ba   : > { %v12956_v9 = vadd.f32 %v6254_v51, %v12812_v24  ;;  %v5692_v58 = vadd.f32 %v5637_v25, %v12661_v45  ;;  %v5325_v24 = vadd.f32 %v12679_v19, %v12670_v55 }
 0x5bb   : > { %v12959_v32 = vpop.f32.mrf.mxu0  ;;  %v12961_v53 = vpop.f32.mrf.mxu1 }
 0x5bc   : > { %13809 = vst [vmem:[#allocation74_spill] sm:$0xff] %v12961_v53  ;;  %v6037_v13 = vadd.f32 %v12779_v41, %v5692_v58  ;;  %v5020_v41 = vadd.f32 %v12675_v28, %v12564_v18  ;;  %v13819_v53 = vld [vmem:[#allocation132_spill] sm:$0xff] }
 0x5bd   : > { %v12964_v8 = vpop.f32.mrf.mxu0  ;;  %v5641_v31 = vpop.f32.mrf.mxu1 }
 0x5be   : > { %v5693_v16 = vadd.f32 %v5641_v31, %v12667_v59  ;;  %v5326_v55 = vadd.f32 %v12688_v21, %v5020_v41 }
 0x5bf   : > { %v9477_v5 = vpop.f32.mrf.mxu0  ;;  %v12967_v0 = vpop.f32.mrf.mxu1 }
 0x5c0   : > { %13810 = vst [vmem:[#allocation87_spill] sm:$0xff] %v12967_v0  ;;  %v12971_v7 = vadd.f32 %v9477_v5, %v6033_v40  ;;  %v12974_v45 = vadd.f32 %v12786_v43, %v5693_v16 }
 0x5c1   : > { %v6270_v62 = vpop.f32.mrf.mxu0  ;;  %v5647_v3 = vpop.f32.mrf.mxu1 }
 0x5c2   : > { %v12979_v51 = vadd.f32 %v6270_v62, %v12871_v46  ;;  %v5694_v59 = vadd.f32 %v5647_v3, %v5325_v24  ;;  %v13813_v3 = vld [vmem:[#allocation123_spill] sm:$0xff] }
 0x5c3   : > { %v12981_v25 = vpop.f32.mrf.mxu0  ;;  %v12983_v58 = vpop.f32.mrf.mxu1 }
 0x5c4   : > { %13811 = vst [vmem:[#allocation88_spill] sm:$0xff] %v12983_v58  ;;  %v6039_v19 = vadd.f32 %v12803_v17, %v5694_v59 }
 0x5c5   : > { %v12987_v40 = vpop.f32.mrf.mxu0  ;;  %v5651_v43 = vpop.f32.mrf.mxu1 }
 0x5c6   : > { %v5695_v31 = vadd.f32 %v5651_v43, %v5326_v55 }
 0x5c7   : > { %v9481_v16 = vpop.f32.mrf.mxu0  ;;  %v12989_v5 = vpop.f32.mrf.mxu1 }
 0x5c8   : > { %13812 = vst [vmem:[#allocation64_spill] sm:$0xff] %v12989_v5  ;;  %v12991_v18 = vadd.f32 %v9481_v16, %v6037_v13  ;;  %v12994_v28 = vadd.f32 %v12814_v49, %v5695_v31  ;;  %v13815_v13 = vld [vmem:[#allocation128_spill] sm:$0xff] }
 0x5c9   : > { %v6286_v46 = vpop.f32.mrf.mxu0  ;;  %v5657_v24 = vpop.f32.mrf.mxu1  ;;  %v13010_v49 = vld [vmem:[%s13291_s10] ss:$0 sm:$0xff] }
 0x5ca   : > { %v12996_v62 = vadd.f32 %v6286_v46, %v6035_v23  ;;  %v5696_v21 = vadd.f32 %v5657_v24, %v13813_v3 }
 0x5cb   : > { %v12999_v41 = vpop.f32.mrf.mxu0  ;;  %v13001_v17 = vpop.f32.mrf.mxu1 }
 0x5cc   : > { %13814 = vst [vmem:[#allocation73_spill] sm:$0xff] %v13001_v17  ;;  %v6041_v59 = vadd.f32 %v12795_v44, %v5696_v21 }
 0x5cd   : > { %v13004_v55 = vpop.f32.mrf.mxu0  ;;  %v5661_v43 = vpop.f32.mrf.mxu1 }
 0x5ce   : > { %v5697_v16 = vadd.f32 %v5661_v43, %v13815_v13 }
 0x5cf   : > { %v9485_v23 = vpop.f32.mrf.mxu0  ;;  %v5663_v31 = vpop.f32.mrf.mxu1 }
 0x5d0   : > { %v13012_v46 = vadd.f32 %v9485_v23, %v6041_v59  ;;  %v13015_v24 = vadd.f32 %v12807_v4, %v5697_v16  ;;  %v13018_v3 = vadd.f32 %v13010_v49, %v5663_v31  ;;  %v13818_v4 = vld [vmem:[#allocation85_spill] sm:$0xff]  ;;  %v6320_v31 = vadd.f32 %v12828_v36, %v13819_v53 }
 0x5d1   : > { %v6302_v44 = vpop.f32.mrf.mxu0  ;;  %v9505_v21 = vpop.f32.mrf.mxu1  ;;  %v6012_v16 = vadd.f32 %v13818_v4, %v13817_v37 }
 0x5d2   : > { %13816 = vst [vmem:[#allocation99_spill] sm:$0xff] %v13018_v3  ;;  %v13020_v5 = vadd.f32 %v6302_v44, %v6039_v19  ;;  %v6625_v0 = vadd.f32 %v9505_v21, %v12821_v26  ;;  %v13034_v19 = vld [vmem:[%s13290_s9] ss:$0 sm:$0xff] }
 0x5d3   : > { %v13022_v43 = vpop.f32.mrf.mxu0  ;;  %v6496_v13 = vpop.f32.mrf.mxu1  ;;  %v6318_v26 = vadd.f32 %v12834_v42, %v6012_v16 }
 0x5d4   : > { %v6623_v44 = vadd.f32 %v6496_v13, %v12825_v34  ;;  %v13820_v13 = vld [vmem:[#allocation102_spill] sm:$0xff] }
 0x5d5   : > { %v13024_v17 = vpop.f32.mrf.mxu0  ;;  %v9506_v58 = vpop.f32.mrf.mxu1  ;;  %v6324_v42 = vadd.f32 %v12862_v52, %v13820_v13 }
 0x5d6   : > { %v6626_v27 = vadd.f32 %v9506_v58, %v6320_v31  ;;  %v13822_v58 = vld [vmem:[#allocation92_spill] sm:$0xff] }
 0x5d7   : > { %v9553_v59 = vpop.f32.mrf.mxu0  ;;  %v6499_v23 = vpop.f32.mrf.mxu1 }
 0x5d8   : > { %v6931_v3 = vadd.f32 %v9553_v59, %v6625_v0  ;;  %v6624_v36 = vadd.f32 %v6499_v23, %v6318_v26 }
 0x5d9   : > { %v6802_v63 = vpop.f32.mrf.mxu0  ;;  %v9509_v39 = vpop.f32.mrf.mxu1 }
 0x5da   : > { %v6929_v21 = vadd.f32 %v6802_v63, %v6623_v44  ;;  %v6970_v15 = vadd.f32 %v13034_v19, %v6931_v3  ;;  %v6629_v34 = vadd.f32 %v9509_v39, %v12848_v56  ;;  %v13821_v63 = vld [vmem:[#allocation91_spill] sm:$0xff] }
 0x5db   : > { %v9554_v37 = vpop.f32.mrf.mxu0  ;;  %v6512_v4 = vpop.f32.mrf.mxu1  ;;  %v6016_v16 = vadd.f32 %v13822_v58, %v13821_v63 }
 0x5dc   : > { %v6932_v6 = vadd.f32 %v9554_v37, %v6626_v27  ;;  %v6968_v53 = vadd.f32 %v13034_v19, %v6929_v21  ;;  %v7002_v3 = vmax.f32 %v6970_v15, 0.0  ;;  %v6627_v21 = vadd.f32 %v6512_v4, %v12860_v14 }
 0x5dd   : > { %v6805_v0 = vpop.f32.mrf.mxu0  ;;  %v9510_v59 = vpop.f32.mrf.mxu1 }
 0x5de   : > { %v6971_v33 = vadd.f32 %v13034_v19, %v6932_v6  ;;  %v6930_v10 = vadd.f32 %v6805_v0, %v6624_v36  ;;  %v6322_v6 = vadd.f32 %v12873_v48, %v6016_v16  ;;  %v7000_v37 = vmax.f32 %v6968_v53, 0.0  ;;  %v13823_v16 = vld [vmem:[#allocation115_spill] sm:$0xff] }
 0x5df   : > { %v9557_v31 = vpop.f32.mrf.mxu0  ;;  %v6515_v44 = vpop.f32.mrf.mxu1  ;;  %v6630_v13 = vadd.f32 %v9510_v59, %v6324_v42  ;;  %v6328_v59 = vadd.f32 %v12897_v30, %v13823_v16  ;;  %v13824_v42 = vld [vmem:[#allocation108_spill] sm:$0xff]  ;;  %v13827_v16 = vld [vmem:[#allocation118_spill] sm:$0xff] }
 0x5e0   : > { %v7003_v27 = vmax.f32 %v6971_v33, 0.0  ;;  %v6969_v23 = vadd.f32 %v13034_v19, %v6930_v10  ;;  %v6935_v26 = vadd.f32 %v9557_v31, %v6629_v34  ;;  %v6628_v33 = vadd.f32 %v6515_v44, %v6322_v6 }
 0x5e1   : > { %v6818_v36 = vpop.f32.mrf.mxu0  ;;  %v9513_v56 = vpop.f32.mrf.mxu1 }
 0x5e2   : > { %v7033_v39 = vpack.c.bf16 %v7003_v27, %v7002_v3  ;;  %v7001_v0 = vmax.f32 %v6969_v23, 0.0  ;;  %v6933_v52 = vadd.f32 %v6818_v36, %v6627_v21  ;;  %v6974_v63 = vadd.f32 %v13034_v19, %v6935_v26  ;;  %v13825_v3 = vld [vmem:[#allocation97_spill] sm:$0xff] }
 0x5e3   : > { %v9558_v15 = vpop.f32.mrf.mxu0  ;;  %v6528_v58 = vpop.f32.mrf.mxu1  ;;  %v6633_v53 = vadd.f32 %v9513_v56, %v12884_v50  ;;  %v6020_v31 = vadd.f32 %v13825_v3, %v13824_v42 }
 0x5e4   : > { %v6936_v12 = vadd.f32 %v9558_v15, %v6630_v13  ;;  %v7032_v54 = vpack.c.bf16 %v7001_v0, %v7000_v37  ;;  %v6972_v10 = vadd.f32 %v13034_v19, %v6933_v52  ;;  %v7006_v27 = vmax.f32 %v6974_v63, 0.0 }
 0x5e5   : > { %v6821_v34 = vpop.f32.mrf.mxu0  ;;  %v9514_v14 = vpop.f32.mrf.mxu1  ;;  %v6326_v37 = vadd.f32 %v12905_v29, %v6020_v31 }
 0x5e6   : > { %v6975_v48 = vadd.f32 %v13034_v19, %v6936_v12  ;;  %v6934_v4 = vadd.f32 %v6821_v34, %v6628_v33  ;;  %9599 = vmatprep.mubr.bf16.mxu1 %v7032_v54  ;;  %v6631_v12 = vadd.f32 %v6528_v58, %v12894_v57  ;;  %v7004_v50 = vmax.f32 %v6972_v10, 0.0 }
 0x5e7   : > { %v9561_v23 = vpop.f32.mrf.mxu0  ;;  %9600 = vmatmul.mubr.bf16.vlgmr.msra.gmra.mxu1 %v7033_v39  ;;  %v6531_v44 = vpop.f32.mrf.mxu1  ;;  %v6634_v52 = vadd.f32 %v9514_v14, %v6328_v59  ;;  %v13828_v59 = vld [vmem:[#allocation104_spill] sm:$0xff] }
 0x5e8   : > { %v7007_v26 = vmax.f32 %v6975_v48, 0.0  ;;  %v6973_v21 = vadd.f32 %v13034_v19, %v6934_v4  ;;  %v6939_v6 = vadd.f32 %v9561_v23, %v6633_v53  ;;  %v6632_v33 = vadd.f32 %v6531_v44, %v6326_v37  ;;  %v13826_v53 = vld [vmem:[#allocation125_spill] sm:$0xff] }
 0x5e9   : > { %v6834_v54 = vpop.f32.mrf.mxu0  ;;  %v9517_v36 = vpop.f32.mrf.mxu1  ;;  %v6332_v14 = vadd.f32 %v12933_v38, %v13826_v53  ;;  %v6024_v42 = vadd.f32 %v13828_v59, %v13827_v16  ;;  %v6334_v16 = vadd.f32 %v12964_v8, %v12823_v35 }
 0x5ea   : > { %v7035_v56 = vpack.c.bf16 %v7007_v26, %v7006_v27  ;;  %v7005_v30 = vmax.f32 %v6973_v21, 0.0  ;;  %v6937_v0 = vadd.f32 %v6834_v54, %v6631_v12  ;;  %v6978_v13 = vadd.f32 %v13034_v19, %v6939_v6 }
 0x5eb   : > { %v9562_v63 = vpop.f32.mrf.mxu0  ;;  %v6544_v39 = vpop.f32.mrf.mxu1  ;;  %v6637_v10 = vadd.f32 %v9517_v36, %v12919_v61  ;;  %v6330_v6 = vadd.f32 %v12942_v11, %v6024_v42 }
 0x5ec   : > { %v6940_v15 = vadd.f32 %v9562_v63, %v6634_v52  ;;  %v7034_v34 = vpack.c.bf16 %v7005_v30, %v7004_v50  ;;  %v6976_v48 = vadd.f32 %v13034_v19, %v6937_v0  ;;  %v7010_v3 = vmax.f32 %v6978_v13, 0.0 }
 0x5ed   : > { %v6837_v4 = vpop.f32.mrf.mxu0  ;;  %v9518_v57 = vpop.f32.mrf.mxu1  ;;  %v6635_v21 = vadd.f32 %v6544_v39, %v12931_v20 }
 0x5ee   : > { %v6979_v29 = vadd.f32 %v13034_v19, %v6940_v15  ;;  %v6938_v58 = vadd.f32 %v6837_v4, %v6632_v33  ;;  %9603 = vmatprep.mubr.bf16.mxu1 %v7034_v34  ;;  %v7008_v61 = vmax.f32 %v6976_v48, 0.0  ;;  %v6638_v36 = vadd.f32 %v9518_v57, %v6332_v14 }
 0x5ef   : > { %v9565_v31 = vpop.f32.mrf.mxu0  ;;  %9604 = vmatmul.mubr.bf16.gmra.mxu1 %v7035_v56  ;;  %v6547_v27 = vpop.f32.mrf.mxu1  ;;  %v6336_v48 = vadd.f32 %v12959_v32, %v12853_v60 }
 0x5f0   : > { %v7011_v23 = vmax.f32 %v6979_v29, 0.0  ;;  %v6977_v44 = vadd.f32 %v13034_v19, %v6938_v58  ;;  %v6943_v26 = vadd.f32 %v9565_v31, %v6637_v10  ;;  %v6636_v13 = vadd.f32 %v6547_v27, %v6330_v6 }
 0x5f1   : > { %v6850_v12 = vpop.f32.mrf.mxu0  ;;  %v9521_v37 = vpop.f32.mrf.mxu1 }
 0x5f2   : > { %v7037_v50 = vpack.c.bf16 %v7011_v23, %v7010_v3  ;;  %v7009_v38 = vmax.f32 %v6977_v44, 0.0  ;;  %v6941_v54 = vadd.f32 %v6850_v12, %v6635_v21  ;;  %v6982_v30 = vadd.f32 %v13034_v19, %v6943_v26 }
 0x5f3   : > { %v9566_v0 = vpop.f32.mrf.mxu0  ;;  %v6560_v56 = vpop.f32.mrf.mxu1  ;;  %v6641_v34 = vadd.f32 %v9521_v37, %v12950_v22 }
 0x5f4   : > { %v6944_v52 = vadd.f32 %v9566_v0, %v6638_v36  ;;  %v7036_v63 = vpack.c.bf16 %v7009_v38, %v7008_v61  ;;  %v6980_v15 = vadd.f32 %v13034_v19, %v6941_v54  ;;  %v7014_v4 = vmax.f32 %v6982_v30, 0.0 }
 0x5f5   : > { %v6853_v33 = vpop.f32.mrf.mxu0  ;;  %v9522_v20 = vpop.f32.mrf.mxu1  ;;  %v6639_v14 = vadd.f32 %v6560_v56, %v12956_v9 }
 0x5f6   : > { %v6983_v11 = vadd.f32 %v13034_v19, %v6944_v52  ;;  %v6942_v39 = vadd.f32 %v6853_v33, %v6636_v13  ;;  %9607 = vmatprep.mubr.bf16.mxu1 %v7036_v63  ;;  %v7012_v59 = vmax.f32 %v6980_v15, 0.0  ;;  %v6642_v60 = vadd.f32 %v9522_v20, %v6336_v48 }
 0x5f7   : > { %v9569_v57 = vpop.f32.mrf.mxu0  ;;  %9608 = vmatmul.mubr.bf16.gmra.mxu1 %v7037_v50  ;;  %v6563_v29 = vpop.f32.mrf.mxu1  ;;  %v6340_v50 = vadd.f32 %v12981_v25, %v12924_v47  ;;  %v6338_v13 = vadd.f32 %v12987_v40, %v12889_v1 }
 0x5f8   : > { %v7015_v58 = vmax.f32 %v6983_v11, 0.0  ;;  %v6981_v10 = vadd.f32 %v13034_v19, %v6942_v39  ;;  %v6947_v53 = vadd.f32 %v9569_v57, %v6641_v34  ;;  %v6640_v21 = vadd.f32 %v6563_v29, %v6334_v16 }
 0x5f9   : > { %v6866_v42 = vpop.f32.mrf.mxu0  ;;  %v9525_v22 = vpop.f32.mrf.mxu1 }
 0x5fa   : > { %v7039_v3 = vpack.c.bf16 %v7015_v58, %v7014_v4  ;;  %v7013_v31 = vmax.f32 %v6981_v10, 0.0  ;;  %v6945_v27 = vadd.f32 %v6866_v42, %v6639_v14  ;;  %v6986_v32 = vadd.f32 %v13034_v19, %v6947_v53 }
 0x5fb   : > { %v9570_v23 = vpop.f32.mrf.mxu0  ;;  %v6576_v44 = vpop.f32.mrf.mxu1  ;;  %v6645_v37 = vadd.f32 %v9525_v22, %v12971_v7  ;;  %v6344_v53 = vadd.f32 %v12999_v41, %v12974_v45 }
 0x5fc   : > { %v6948_v26 = vadd.f32 %v9570_v23, %v6642_v60  ;;  %v7038_v6 = vpack.c.bf16 %v7013_v31, %v7012_v59  ;;  %v6984_v61 = vadd.f32 %v13034_v19, %v6945_v27  ;;  %v7018_v38 = vmax.f32 %v6986_v32, 0.0 }
 0x5fd   : > { %v6869_v9 = vpop.f32.mrf.mxu0  ;;  %v9526_v12 = vpop.f32.mrf.mxu1  ;;  %v6643_v52 = vadd.f32 %v6576_v44, %v12979_v51  ;;  %v6342_v27 = vadd.f32 %v13004_v55, %v12953_v2 }
 0x5fe   : > { %v6987_v35 = vadd.f32 %v13034_v19, %v6948_v26  ;;  %v6946_v8 = vadd.f32 %v6869_v9, %v6640_v21  ;;  %9611 = vmatprep.mubr.bf16.mxu1 %v7038_v6  ;;  %v7016_v63 = vmax.f32 %v6984_v61, 0.0  ;;  %v6646_v47 = vadd.f32 %v9526_v12, %v6340_v50 }
 0x5ff   : > { %v9573_v54 = vpop.f32.mrf.mxu0  ;;  %9612 = vmatmul.mubr.bf16.gmra.mxu1 %v7039_v3  ;;  %v6579_v36 = vpop.f32.mrf.mxu1  ;;  %v6348_v50 = vadd.f32 %v13022_v43, %v13015_v24 }
 0x600   : > { %v7019_v30 = vmax.f32 %v6987_v35, 0.0  ;;  %v6985_v0 = vadd.f32 %v13034_v19, %v6946_v8  ;;  %v6951_v56 = vadd.f32 %v9573_v54, %v6645_v37  ;;  %v6644_v4 = vadd.f32 %v6579_v36, %v6338_v13 }
 0x601   : > { %v6882_v15 = vpop.f32.mrf.mxu0  ;;  %v9529_v7 = vpop.f32.mrf.mxu1 }
 0x602   : > { %v7041_v33 = vpack.c.bf16 %v7019_v30, %v7018_v38  ;;  %v7017_v20 = vmax.f32 %v6985_v0, 0.0  ;;  %v6949_v11 = vadd.f32 %v6882_v15, %v6643_v52  ;;  %v6990_v25 = vadd.f32 %v13034_v19, %v6951_v56 }
 0x603   : > { %v9574_v39 = vpop.f32.mrf.mxu0  ;;  %v6592_v34 = vpop.f32.mrf.mxu1  ;;  %v6649_v10 = vadd.f32 %v9529_v7, %v12991_v18  ;;  %v6346_v52 = vadd.f32 %v13024_v17, %v12994_v28 }
 0x604   : > { %v6952_v48 = vadd.f32 %v9574_v39, %v6646_v47  ;;  %v7040_v57 = vpack.c.bf16 %v7017_v20, %v7016_v63  ;;  %v6988_v29 = vadd.f32 %v13034_v19, %v6949_v11  ;;  %v7022_v14 = vmax.f32 %v6990_v25, 0.0 }
 0x605   : > { %v6885_v51 = vpop.f32.mrf.mxu0  ;;  %v9530_v58 = vpop.f32.mrf.mxu1  ;;  %v6647_v31 = vadd.f32 %v6592_v34, %v12996_v62 }
 0x606   : > { %v6991_v1 = vadd.f32 %v13034_v19, %v6952_v48  ;;  %v6950_v40 = vadd.f32 %v6885_v51, %v6644_v4  ;;  %9615 = vmatprep.mubr.bf16.mxu1 %v7040_v57  ;;  %v7020_v60 = vmax.f32 %v6988_v29, 0.0  ;;  %v6650_v45 = vadd.f32 %v9530_v58, %v6344_v53 }
 0x607   : > { %v9577_v16 = vpop.f32.mrf.mxu0  ;;  %9616 = vmatmul.mubr.bf16.gmra.mxu1 %v7041_v33  ;;  %v6595_v59 = vpop.f32.mrf.mxu1 }
 0x608   : > { %v7023_v42 = vmax.f32 %v6991_v1, 0.0  ;;  %v6989_v22 = vadd.f32 %v13034_v19, %v6950_v40  ;;  %v6955_v3 = vadd.f32 %v9577_v16, %v6649_v10  ;;  %v6648_v9 = vadd.f32 %v6595_v59, %v6342_v27  ;;  %v7397_v1 = vld [vmem:[%s13294_s13 + $0x10] sm:$0xff]  ;;  %v7396_v40 = vld [vmem:[%s13294_s13 + $0x8] sm:$0xff] }
 0x609   : > { %v6898_v32 = vpop.f32.mrf.mxu0  ;;  %v9533_v18 = vpop.f32.mrf.mxu1  ;;  %9657 = vmatprep.subr.mxu0 %v7397_v1  ;;  %v7344_v10 = vlaneseq }
 0x60a   : > { %v7043_v23 = vpack.c.bf16 %v7023_v42, %v7022_v14  ;;  %v7021_v44 = vmax.f32 %v6989_v22, 0.0  ;;  %v6953_v26 = vadd.f32 %v6898_v32, %v6647_v31  ;;  %v6994_v41 = vadd.f32 %v13034_v19, %v6955_v3  ;;  %9658 = vmatpush3.msra.mxu0 %v7397_v1  ;;  %v13127_v14 = vld [vmem:[%s13293_s12] ss:$0 sm:$0xff]  ;;  %v13829_v31 = vld [vmem:[#allocation127_spill] sm:$0xff] }
 0x60b   : > { %v9578_v21 = vpop.f32.mrf.mxu0  ;;  %v6608_v6 = vpop.f32.mrf.mxu1  ;;  %v6653_v37 = vadd.f32 %v9533_v18, %v13012_v46  ;;  %9659 = vmatprep.subr.mxu0 %v7396_v40  ;;  %v7345_v53 = vshrl.u32 %v7344_v10, 7  ;;  %v5705_v27 = vadd.f32 %v13010_v49, %v13829_v31  ;;  %v13830_v18 = vld [vmem:[#allocation86_spill] sm:$0xff]  ;;  %v13837_v10 = vld [vmem:[#allocation103_spill] sm:$0xff] }
 0x60c   : > { %v6956_v61 = vadd.f32 %v9578_v21, %v6650_v45  ;;  %v7042_v12 = vpack.c.bf16 %v7021_v44, %v7020_v60  ;;  %v6992_v35 = vadd.f32 %v13034_v19, %v6953_v26  ;;  %v7026_v38 = vmax.f32 %v6994_v41, 0.0  ;;  %9660 = vmatpush3.msra.mxu0 %v7396_v40  ;;  %v13831_v41 = vld [vmem:[#allocation83_spill] sm:$0xff] }
 0x60d   : > { %v6901_v62 = vpop.f32.mrf.mxu0  ;;  %v9534_v8 = vpop.f32.mrf.mxu1  ;;  %v6651_v56 = vadd.f32 %v6608_v6, %v13020_v5  ;;  %v7346_v16 = vadd.s32 8, %v7345_v53  ;;  %v7347_v59 = vand.u32 1, %v7345_v53  ;;  %v5706_v21 = vadd.f32 %v13010_v49, %v13831_v41  ;;  %v13840_v41 = vld [vmem:[#allocation114_spill] sm:$0xff] }
 0x60e   : > { %v6995_v2 = vadd.f32 %v13034_v19, %v6956_v61  ;;  %v6954_v55 = vadd.f32 %v6901_v62, %v6648_v9  ;;  %9619 = vmatprep.mubr.bf16.mxu1 %v7042_v12  ;;  %v7024_v13 = vmax.f32 %v6992_v35, 0.0  ;;  %v6654_v20 = vadd.f32 %v9534_v8, %v6348_v50  ;;  %v10024_v9 = vld [vmem:[#allocation2] sm:$0xff]  ;;  %v13832_v35 = vld [vmem:[#allocation131_spill] sm:$0xff] }
 0x60f   : > { %v9581_v54 = vpop.f32.mrf.mxu0  ;;  %9620 = vmatmul.mubr.bf16.gmra.mxu1 %v7043_v23  ;;  %v6611_v15 = vpop.f32.mrf.mxu1  ;;  %v7348_v32 = vand.u32 1, %v7346_v16  ;;  %vm7349_vm0 = vcmp.eq.s32.totalorder %v7347_v59, 0  ;;  %v5707_v23 = vadd.f32 %v13010_v49, %v13830_v18  ;;  %v5708_v62 = vadd.f32 %v13010_v49, %v13832_v35 }
 0x610   : > { %v7027_v36 = vmax.f32 %v6995_v2, 0.0  ;;  %v6993_v30 = vadd.f32 %v13034_v19, %v6954_v55  ;;  %v6959_v0 = vadd.f32 %v9581_v54, %v6653_v37  ;;  %v6652_v47 = vadd.f32 %v6611_v15, %v6346_v52  ;;  %v13834_v15 = vld [vmem:[#allocation138_spill] sm:$0xff] }
 0x611   : > { %v6914_v63 = vpop.f32.mrf.mxu0  ;;  %v13138_v12 = vsel %vm7349_vm0, 1.0, %v10024_v9  ;;  %vm7350_vm1 = vcmp.eq.s32.totalorder %v7348_v32, 0  ;;  %v5713_v53 = vadd.f32 %v13010_v49, %v13837_v10  ;;  %v13846_v10 = vld [vmem:[#allocation134_spill] sm:$0xff] }
 0x612   : > { %v7045_v46 = vpack.c.bf16 %v7027_v36, %v7026_v38  ;;  %v7025_v7 = vmax.f32 %v6993_v30, 0.0  ;;  %v6957_v33 = vadd.f32 %v6914_v63, %v6651_v56  ;;  %v6998_v43 = vadd.f32 %v13034_v19, %v6959_v0  ;;  %v13833_v56 = vld [vmem:[#allocation136_spill] sm:$0xff] }
 0x613   : > { %v9582_v24 = vpop.f32.mrf.mxu0  ;;  %v13144_v36 = vsel %vm7350_vm1, 1.0, %v10024_v9  ;;  %v5709_v52 = vadd.f32 %v13010_v49, %v13833_v56  ;;  %v13842_v56 = vld [vmem:[#allocation120_spill] sm:$0xff] }
 0x614   : > { %v6960_v11 = vadd.f32 %v9582_v24, %v6654_v20  ;;  %v7044_v25 = vpack.c.bf16 %v7025_v7, %v7024_v13  ;;  %v6996_v34 = vadd.f32 %v13034_v19, %v6957_v33  ;;  %v7030_v28 = vmax.f32 %v6998_v43, 0.0 }
 0x615   : > { %v6917_v39 = vpop.f32.mrf.mxu0 }
 0x616   : > { %v6999_v5 = vadd.f32 %v13034_v19, %v6960_v11  ;;  %v6958_v48 = vadd.f32 %v6917_v39, %v6652_v47  ;;  %9623 = vmatprep.mubr.bf16.mxu1 %v7044_v25  ;;  %v7028_v57 = vmax.f32 %v6996_v34, 0.0  ;;  %v13835_v39 = vld [vmem:[#allocation137_spill] sm:$0xff] }
 0x617   : > { %9624 = vmatmul.mubr.bf16.gmra.mxu1 %v7045_v46  ;;  %v5711_v46 = vadd.f32 %v13010_v49, %v13834_v15  ;;  %v5710_v34 = vadd.f32 %v13010_v49, %v13835_v39 }
 0x618   : > { %v7031_v17 = vmax.f32 %v6999_v5, 0.0  ;;  %v6997_v4 = vadd.f32 %v13034_v19, %v6958_v48  ;;  %v7395_v19 = vld [vmem:[%s13294_s13] sm:$0xff]  ;;  %v13836_v5 = vld [vmem:[#allocation98_spill] sm:$0xff] }
 0x619   : > { %9661 = vmatprep.subr.mxu0 %v7395_v19  ;;  %v5712_v48 = vadd.f32 %v13010_v49, %v13836_v5 }
 0x61a   : > { %v7047_v29 = vpack.c.bf16 %v7031_v17, %v7030_v28  ;;  %v7029_v51 = vmax.f32 %v6997_v4, 0.0  ;;  %9662 = vmatpush3.msra.mxu0 %v7395_v19 }
 0x61c   : > { %v7046_v58 = vpack.c.bf16 %v7029_v51, %v7028_v57 }
 0x61e   : > { %9627 = vmatprep.mubr.bf16.mxu1 %v7046_v58 }
 0x61f   : > { %9628 = vmatmul.mubr.bf16.gmra.mxu1 %v7047_v29 }
 0x6a7   : > { %v9601_v42 = vpop.f32.mrf.mxu1 }
 0x6a8   : > { %v7162_v22 = vadd.f32 %v9601_v42, %v13127_v14  ;;  %v13838_v42 = vld [vmem:[#allocation110_spill] sm:$0xff] }
 0x6a9   : > { %v7153_v3 = vpop.f32.mrf.mxu1 }
 0x6aa   : > { %v7154_v60 = vadd.f32 %v13127_v14, %v7153_v3  ;;  %v7282_v6 = vadd.f32 %v7162_v22, %v5707_v23  ;;  %v5715_v22 = vadd.f32 %v13010_v49, %v13838_v42 }
 0x6ab   : > { %v9602_v44 = vpop.f32.mrf.mxu1 }
 0x6ac   : > { %v7280_v26 = vadd.f32 %v7154_v60, %v5705_v27  ;;  %v7165_v45 = vadd.f32 %v9602_v44, %v13127_v14  ;;  %v7314_v54 = vmax.f32 %v7282_v6, 0.0 }
 0x6ad   : > { %v7156_v61 = vpop.f32.mrf.mxu1 }
 0x6ae   : > { %v7312_v8 = vmax.f32 %v7280_v26, 0.0  ;;  %v7157_v2 = vadd.f32 %v13127_v14, %v7156_v61  ;;  %v7283_v37 = vadd.f32 %v7165_v45, %v5708_v62  ;;  %v7365_v11 = vmul.f32 0.0, %v7314_v54  ;;  %v13839_v26 = vld [vmem:[#allocation109_spill] sm:$0xff] }
 0x6af   : > { %v9605_v55 = vpop.f32.mrf.mxu1  ;;  %v5714_v45 = vadd.f32 %v13010_v49, %v13839_v26 }
 0x6b0   : > { %v7281_v50 = vadd.f32 %v7157_v2, %v5706_v21  ;;  %v7363_v38 = vmul.f32 %v13138_v12, %v7312_v8  ;;  %v7178_v30 = vadd.f32 %v9605_v55, %v13127_v14  ;;  %v7315_v33 = vmax.f32 %v7283_v37, 0.0 }
 0x6b1   : > { %v7169_v0 = vpop.f32.mrf.mxu1  ;;  %v5716_v21 = vadd.f32 %v13010_v49, %v13840_v41 }
 0x6b2   : > { %v7313_v13 = vmax.f32 %v7281_v50, 0.0  ;;  %v7170_v63 = vadd.f32 %v13127_v14, %v7169_v0  ;;  %9663 = vmatprep.mubr.f32.mxu0 %v7363_v38  ;;  %v7286_v47 = vadd.f32 %v7178_v30, %v5711_v46  ;;  %v7366_v57 = vmul.f32 0.0, %v7315_v33  ;;  %v13841_v38 = vld [vmem:[#allocation116_spill] sm:$0xff] }
 0x6b3   : > { %v9606_v7 = vpop.f32.mrf.mxu1  ;;  %v5717_v54 = vadd.f32 %v13010_v49, %v13841_v38  ;;  %v13850_v38 = vld [vmem:[#allocation141_spill] sm:$0xff] }
 0x6b4   : > { %v7364_v20 = vmul.f32 %v13144_v36, %v7313_v13  ;;  %v7284_v24 = vadd.f32 %v7170_v63, %v5709_v52  ;;  %v7181_v43 = vadd.f32 %v9606_v7, %v13127_v14  ;;  %v7318_v1 = vmax.f32 %v7286_v47, 0.0  ;;  %v13844_v47 = vld [vmem:[#allocation124_spill] sm:$0xff] }
 0x6b5   : > { %v7172_v25 = vpop.f32.mrf.mxu1  ;;  %v5719_v52 = vadd.f32 %v13010_v49, %v13842_v56 }
 0x6b6   : > { %v7316_v28 = vmax.f32 %v7284_v24, 0.0  ;;  %v7173_v17 = vadd.f32 %v13127_v14, %v7172_v25  ;;  %9664 = vmatmul.mubr.f32.vlgmr.msra.gmra.mxu0 %v7364_v20  ;;  %v7287_v29 = vadd.f32 %v7181_v43, %v5712_v48  ;;  %v7369_v18 = vmul.f32 0.0, %v7318_v1  ;;  %v13843_v43 = vld [vmem:[#allocation119_spill] sm:$0xff] }
 0x6b7   : > { %v9609_v4 = vpop.f32.mrf.mxu1  ;;  %9666 = vmatprep.mubr.f32.mxu0 %v7365_v11  ;;  %v5718_v11 = vadd.f32 %v13010_v49, %v13843_v43  ;;  %v5720_v25 = vadd.f32 %v13010_v49, %v13844_v47 }
 0x6b8   : > { %v7285_v51 = vadd.f32 %v7173_v17, %v5710_v34  ;;  %v7367_v58 = vmul.f32 %v13138_v12, %v7316_v28  ;;  %v7194_v40 = vadd.f32 %v9609_v4, %v13127_v14  ;;  %v7319_v31 = vmax.f32 %v7287_v29, 0.0 }
 0x6b9   : > { %v7185_v19 = vpop.f32.mrf.mxu1 }
 0x6ba   : > { %v7317_v16 = vmax.f32 %v7285_v51, 0.0  ;;  %v7186_v59 = vadd.f32 %v13127_v14, %v7185_v19  ;;  %9667 = vmatmul.mubr.f32.gmra.mxu0 %v7366_v57  ;;  %v7290_v23 = vadd.f32 %v7194_v40, %v5715_v22  ;;  %v7370_v35 = vmul.f32 0.0, %v7319_v31 }
 0x6bb   : > { %v9610_v3 = vpop.f32.mrf.mxu1  ;;  %9669 = vmatprep.mubr.f32.mxu0 %v7367_v58  ;;  %v13845_v58 = vld [vmem:[#allocation129_spill] sm:$0xff] }
 0x6bc   : > { %v7368_v27 = vmul.f32 %v13144_v36, %v7317_v16  ;;  %v7288_v60 = vadd.f32 %v7186_v59, %v5713_v53  ;;  %v7197_v32 = vadd.f32 %v9610_v3, %v13127_v14  ;;  %v7322_v55 = vmax.f32 %v7290_v23, 0.0  ;;  %v13848_v23 = vld [vmem:[#allocation135_spill] sm:$0xff] }
 0x6bd   : > { %v7188_v44 = vpop.f32.mrf.mxu1  ;;  %v5721_v1 = vadd.f32 %v13010_v49, %v13845_v58  ;;  %v5723_v53 = vadd.f32 %v13010_v49, %v13846_v10  ;;  %v13854_v58 = vld [vmem:[#allocation74_spill] sm:$0xff] }
 0x6be   : > { %v7320_v6 = vmax.f32 %v7288_v60, 0.0  ;;  %v7189_v61 = vadd.f32 %v13127_v14, %v7188_v44  ;;  %9670 = vmatmul.mubr.f32.gmra.mxu0 %v7368_v27  ;;  %v7291_v62 = vadd.f32 %v7197_v32, %v5716_v21  ;;  %v7373_v33 = vmul.f32 0.0, %v7322_v55  ;;  %v13847_v32 = vld [vmem:[#allocation133_spill] sm:$0xff] }
 0x6bf   : > { %v9613_v9 = vpop.f32.mrf.mxu1  ;;  %9672 = vmatprep.mubr.f32.mxu0 %v7369_v18  ;;  %v5722_v18 = vadd.f32 %v13010_v49, %v13847_v32  ;;  %v5724_v44 = vadd.f32 %v13010_v49, %v13848_v23 }
 0x6c0   : > { %v7289_v8 = vadd.f32 %v7189_v61, %v5714_v45  ;;  %v7371_v2 = vmul.f32 %v13138_v12, %v7320_v6  ;;  %v7210_v37 = vadd.f32 %v9613_v9, %v13127_v14  ;;  %v7323_v63 = vmax.f32 %v7291_v62, 0.0 }
 0x6c1   : > { %v7201_v50 = vpop.f32.mrf.mxu1 }
 0x6c2   : > { %v7321_v30 = vmax.f32 %v7289_v8, 0.0  ;;  %v7202_v0 = vadd.f32 %v13127_v14, %v7201_v50  ;;  %9673 = vmatmul.mubr.f32.gmra.mxu0 %v7370_v35  ;;  %v7294_v20 = vadd.f32 %v7210_v37, %v5719_v52  ;;  %v7374_v48 = vmul.f32 0.0, %v7323_v63 }
 0x6c3   : > { %v9614_v13 = vpop.f32.mrf.mxu1  ;;  %9675 = vmatprep.mubr.f32.mxu0 %v7371_v2  ;;  %v13849_v2 = vld [vmem:[#allocation139_spill] sm:$0xff] }
 0x6c4   : > { %v7372_v15 = vmul.f32 %v13144_v36, %v7321_v30  ;;  %v7292_v46 = vadd.f32 %v7202_v0, %v5717_v54  ;;  %v7213_v7 = vadd.f32 %v9614_v13, %v13127_v14  ;;  %v7326_v57 = vmax.f32 %v7294_v20, 0.0  ;;  %v13852_v20 = vld [vmem:[#allocation142_spill] sm:$0xff] }
 0x6c5   : > { %v7204_v24 = vpop.f32.mrf.mxu1  ;;  %v5725_v55 = vadd.f32 %v13010_v49, %v13849_v2  ;;  %v5727_v54 = vadd.f32 %v13010_v49, %v13850_v38  ;;  %v13858_v2 = vld [vmem:[#allocation73_spill] sm:$0xff] }
 0x6c6   : > { %v7324_v39 = vmax.f32 %v7292_v46, 0.0  ;;  %v7205_v34 = vadd.f32 %v13127_v14, %v7204_v24  ;;  %9676 = vmatmul.mubr.f32.gmra.mxu0 %v7372_v15  ;;  %v7295_v28 = vadd.f32 %v7213_v7, %v5720_v25  ;;  %v7377_v31 = vmul.f32 0.0, %v7326_v57  ;;  %v13851_v7 = vld [vmem:[#allocation140_spill] sm:$0xff] }
 0x6c7   : > { %v9617_v5 = vpop.f32.mrf.mxu1  ;;  %9678 = vmatprep.mubr.f32.mxu0 %v7373_v33  ;;  %v5726_v33 = vadd.f32 %v13010_v49, %v13851_v7  ;;  %v5728_v24 = vadd.f32 %v13010_v49, %v13852_v20 }
 0x6c8   : > { %v7293_v17 = vadd.f32 %v7205_v34, %v5718_v11  ;;  %v7375_v4 = vmul.f32 %v13138_v12, %v7324_v39  ;;  %v7226_v29 = vadd.f32 %v9617_v5, %v13127_v14  ;;  %v7327_v59 = vmax.f32 %v7295_v28, 0.0 }
 0x6c9   : > { %v7217_v51 = vpop.f32.mrf.mxu1 }
 0x6ca   : > { %v7325_v40 = vmax.f32 %v7293_v17, 0.0  ;;  %v7218_v19 = vadd.f32 %v13127_v14, %v7217_v51  ;;  %9679 = vmatmul.mubr.f32.gmra.mxu0 %v7374_v48  ;;  %v7298_v27 = vadd.f32 %v7226_v29, %v5723_v53  ;;  %v7378_v21 = vmul.f32 0.0, %v7327_v59 }
 0x6cb   : > { %v9618_v16 = vpop.f32.mrf.mxu1  ;;  %9681 = vmatprep.mubr.f32.mxu0 %v7375_v4  ;;  %v13853_v4 = vld [vmem:[#allocation143_spill] sm:$0xff] }
 0x6cc   : > { %v7376_v42 = vmul.f32 %v13144_v36, %v7325_v40  ;;  %v7296_v22 = vadd.f32 %v7218_v19, %v5721_v1  ;;  %v7229_v3 = vadd.f32 %v9618_v16, %v13127_v14  ;;  %v7330_v35 = vmax.f32 %v7298_v27, 0.0  ;;  %v13856_v27 = vld [vmem:[#allocation87_spill] sm:$0xff] }
 0x6cd   : > { %v7220_v60 = vpop.f32.mrf.mxu1  ;;  %v5729_v57 = vadd.f32 %v13010_v49, %v13853_v4  ;;  %v5731_v1 = vadd.f32 %v13010_v49, %v13854_v58 }
 0x6ce   : > { %v7328_v26 = vmax.f32 %v7296_v22, 0.0  ;;  %v7221_v45 = vadd.f32 %v13127_v14, %v7220_v60  ;;  %9682 = vmatmul.mubr.f32.gmra.mxu0 %v7376_v42  ;;  %v7299_v6 = vadd.f32 %v7229_v3, %v5724_v44  ;;  %v7381_v63 = vmul.f32 0.0, %v7330_v35  ;;  %v13855_v3 = vld [vmem:[#allocation111_spill] sm:$0xff] }
 0x6cf   : > { %v9621_v41 = vpop.f32.mrf.mxu1  ;;  %9684 = vmatprep.mubr.f32.mxu0 %v7377_v31  ;;  %v5730_v31 = vadd.f32 %v13010_v49, %v13855_v3  ;;  %v5732_v60 = vadd.f32 %v13010_v49, %v13856_v27 }
 0x6d0   : > { %v7297_v61 = vadd.f32 %v7221_v45, %v5722_v18  ;;  %v7379_v9 = vmul.f32 %v13138_v12, %v7328_v26  ;;  %v7242_v62 = vadd.f32 %v9621_v41, %v13127_v14  ;;  %v7331_v0 = vmax.f32 %v7299_v6, 0.0 }
 0x6d1   : > { %v7233_v8 = vpop.f32.mrf.mxu1 }
 0x6d2   : > { %v7329_v37 = vmax.f32 %v7297_v61, 0.0  ;;  %v7234_v50 = vadd.f32 %v13127_v14, %v7233_v8  ;;  %9685 = vmatmul.mubr.f32.gmra.mxu0 %v7378_v21  ;;  %v7302_v15 = vadd.f32 %v7242_v62, %v5727_v54  ;;  %v7382_v25 = vmul.f32 0.0, %v7331_v0 }
 0x6d3   : > { %v9622_v30 = vpop.f32.mrf.mxu1  ;;  %9687 = vmatprep.mubr.f32.mxu0 %v7379_v9  ;;  %v13857_v9 = vld [vmem:[#allocation88_spill] sm:$0xff] }
 0x6d4   : > { %v7380_v56 = vmul.f32 %v13144_v36, %v7329_v37  ;;  %v7300_v52 = vadd.f32 %v7234_v50, %v5725_v55  ;;  %v7245_v13 = vadd.f32 %v9622_v30, %v13127_v14  ;;  %v7334_v48 = vmax.f32 %v7302_v15, 0.0 }
 0x6d5   : > { %v7236_v46 = vpop.f32.mrf.mxu1  ;;  %v5733_v35 = vadd.f32 %v13010_v49, %v13857_v9  ;;  %v5735_v55 = vadd.f32 %v13010_v49, %v13858_v2 }
 0x6d6   : > { %v7332_v43 = vmax.f32 %v7300_v52, 0.0  ;;  %v7237_v11 = vadd.f32 %v13127_v14, %v7236_v46  ;;  %9688 = vmatmul.mubr.f32.gmra.mxu0 %v7380_v56  ;;  %v7303_v39 = vadd.f32 %v7245_v13, %v5728_v24  ;;  %v7385_v59 = vmul.f32 0.0, %v7334_v48  ;;  %v13859_v13 = vld [vmem:[#allocation64_spill] sm:$0xff]  ;;  %v13860_v46 = vld [vmem:[#allocation99_spill] sm:$0xff] }
 0x6d7   : > { %v9625_v47 = vpop.f32.mrf.mxu1  ;;  %9690 = vmatprep.mubr.f32.mxu0 %v7381_v63  ;;  %v5734_v63 = vadd.f32 %v13010_v49, %v13859_v13 }
 0x6d8   : > { %v7301_v34 = vadd.f32 %v7237_v11, %v5726_v33  ;;  %v7383_v5 = vmul.f32 %v13138_v12, %v7332_v43  ;;  %v7258_v28 = vadd.f32 %v9625_v47, %v13127_v14  ;;  %v7335_v19 = vmax.f32 %v7303_v39, 0.0 }
 0x6d9   : > { %v7249_v17 = vpop.f32.mrf.mxu1 }
 0x6da   : > { %v7333_v29 = vmax.f32 %v7301_v34, 0.0  ;;  %v7250_v51 = vadd.f32 %v13127_v14, %v7249_v17  ;;  %9691 = vmatmul.mubr.f32.gmra.mxu0 %v7382_v25  ;;  %v7306_v42 = vadd.f32 %v7258_v28, %v5731_v1  ;;  %v7386_v44 = vmul.f32 0.0, %v7335_v19 }
 0x6db   : > { %v9626_v40 = vpop.f32.mrf.mxu1  ;;  %9693 = vmatprep.mubr.f32.mxu0 %v7383_v5 }
 0x6dc   : > { %v7384_v10 = vmul.f32 %v13144_v36, %v7333_v29  ;;  %v7304_v53 = vadd.f32 %v7250_v51, %v5729_v57  ;;  %v7261_v16 = vadd.f32 %v9626_v40, %v13127_v14  ;;  %v7338_v21 = vmax.f32 %v7306_v42, 0.0 }
 0x6dd   : > { %v7252_v22 = vpop.f32.mrf.mxu1 }
 0x6de   : > { %v7336_v32 = vmax.f32 %v7304_v53, 0.0  ;;  %v7253_v18 = vadd.f32 %v13127_v14, %v7252_v22  ;;  %9694 = vmatmul.mubr.f32.gmra.mxu0 %v7384_v10  ;;  %v7307_v26 = vadd.f32 %v7261_v16, %v5732_v60  ;;  %v7389_v0 = vmul.f32 0.0, %v7338_v21 }
 0x6df   : > { %v9629_v23 = vpop.f32.mrf.mxu1  ;;  %9696 = vmatprep.mubr.f32.mxu0 %v7385_v59 }
 0x6e0   : > { %v7305_v45 = vadd.f32 %v7253_v18, %v5730_v31  ;;  %v7387_v41 = vmul.f32 %v13138_v12, %v7336_v32  ;;  %v7274_v6 = vadd.f32 %v9629_v23, %v13127_v14  ;;  %v7339_v50 = vmax.f32 %v7307_v26, 0.0 }
 0x6e1   : > { %v7265_v61 = vpop.f32.mrf.mxu1 }
 0x6e2   : > { %v7337_v62 = vmax.f32 %v7305_v45, 0.0  ;;  %v7266_v8 = vadd.f32 %v13127_v14, %v7265_v61  ;;  %9697 = vmatmul.mubr.f32.gmra.mxu0 %v7386_v44  ;;  %v7310_v56 = vadd.f32 %v7274_v6, %v5735_v55  ;;  %v7390_v20 = vmul.f32 0.0, %v7339_v50 }
 0x6e3   : > { %v9630_v37 = vpop.f32.mrf.mxu1  ;;  %9699 = vmatprep.mubr.f32.mxu0 %v7387_v41 }
 0x6e4   : > { %v7388_v38 = vmul.f32 %v13144_v36, %v7337_v62  ;;  %v7308_v54 = vadd.f32 %v7266_v8, %v5733_v35  ;;  %v7277_v30 = vadd.f32 %v9630_v37, %v13127_v14  ;;  %v7342_v11 = vmax.f32 %v7310_v56, 0.0 }
 0x6e5   : > { %v7268_v52 = vpop.f32.mrf.mxu1 }
 0x6e6   : > { %v7340_v15 = vmax.f32 %v7308_v54, 0.0  ;;  %v7311_v7 = vadd.f32 %v7277_v30, %v13860_v46  ;;  %v7269_v33 = vadd.f32 %v13127_v14, %v7268_v52  ;;  %9700 = vmatmul.mubr.f32.gmra.mxu0 %v7388_v38  ;;  %v7393_v34 = vmul.f32 0.0, %v7342_v11 }
 0x6e7   : > { %9702 = vmatprep.mubr.f32.mxu0 %v7389_v0 }
 0x6e8   : > { %v7309_v24 = vadd.f32 %v7269_v33, %v5734_v63  ;;  %v7391_v43 = vmul.f32 %v13138_v12, %v7340_v15  ;;  %v7343_v25 = vmax.f32 %v7311_v7, 0.0 }
 0x6ea   : > { %v7341_v47 = vmax.f32 %v7309_v24, 0.0  ;;  %9703 = vmatmul.mubr.f32.gmra.mxu0 %v7390_v20  ;;  %v7394_v49 = vmul.f32 0.0, %v7343_v25 }
 0x6eb   : > { %9705 = vmatprep.mubr.f32.mxu0 %v7391_v43 }
 0x6ec   : > { %v7392_v39 = vmul.f32 %v13144_v36, %v7341_v47 }
 0x6ee   : > { %9706 = vmatmul.mubr.f32.gmra.mxu0 %v7392_v39 }
 0x6ef   : > { %9708 = vmatprep.mubr.f32.mxu0 %v7393_v34 }
 0x6f2   : > { %9709 = vmatmul.mubr.f32.gmra.mxu0 %v7394_v49 }
 0x776   : > { %v9665_v5 = vpop.f32.mrf.mxu0 }
 0x778   : > { %v7477_v14 = vpop.f32.mrf.mxu0 }
 0x779   : > { %v7636_v28 = vadd.f32 %v9665_v5, %v7477_v14 }
 0x77a   : > { %v9668_v48 = vpop.f32.mrf.mxu0 }
 0x77c   : > { %v7487_v17 = vpop.f32.mrf.mxu0 }
 0x77d   : > { %v7637_v4 = vadd.f32 %v7636_v28, %v7487_v17 }
 0x77e   : > { %v9671_v57 = vpop.f32.mrf.mxu0 }
 0x77f   : > { %v7638_v12 = vadd.f32 %v9668_v48, %v7637_v4  ;;  %v7674_v4 = vld [vmem:[%s13295_s14] sm:$0x1] }
 0x780   : > { %v7497_v29 = vpop.f32.mrf.mxu0 }
 0x781   : > { %v7639_v51 = vadd.f32 %v7638_v12, %v7497_v29 }
 0x782   : > { %v9674_v58 = vpop.f32.mrf.mxu0 }
 0x783   : > { %v7640_v1 = vadd.f32 %v9671_v57, %v7639_v51 }
 0x784   : > { %v7507_v40 = vpop.f32.mrf.mxu0 }
 0x785   : > { %v7641_v19 = vadd.f32 %v7640_v1, %v7507_v40 }
 0x786   : > { %v9677_v36 = vpop.f32.mrf.mxu0 }
 0x787   : > { %v7642_v10 = vadd.f32 %v9674_v58, %v7641_v19 }
 0x788   : > { %v7517_v53 = vpop.f32.mrf.mxu0 }
 0x789   : > { %v7643_v16 = vadd.f32 %v7642_v10, %v7517_v53 }
 0x78a   : > { %v9680_v59 = vpop.f32.mrf.mxu0 }
 0x78b   : > { %v7644_v42 = vadd.f32 %v9677_v36, %v7643_v16 }
 0x78c   : > { %v7527_v22 = vpop.f32.mrf.mxu0 }
 0x78d   : > { %v7645_v3 = vadd.f32 %v7644_v42, %v7527_v22 }
 0x78e   : > { %v9683_v31 = vpop.f32.mrf.mxu0 }
 0x78f   : > { %v7646_v27 = vadd.f32 %v9680_v59, %v7645_v3 }
 0x790   : > { %v7537_v60 = vpop.f32.mrf.mxu0 }
 0x791   : > { %v7647_v32 = vadd.f32 %v7646_v27, %v7537_v60 }
 0x792   : > { %v9686_v18 = vpop.f32.mrf.mxu0 }
 0x793   : > { %v7648_v23 = vadd.f32 %v9683_v31, %v7647_v32 }
 0x794   : > { %v7547_v44 = vpop.f32.mrf.mxu0 }
 0x795   : > { %v7649_v26 = vadd.f32 %v7648_v23, %v7547_v44 }
 0x796   : > { %v9689_v45 = vpop.f32.mrf.mxu0 }
 0x797   : > { %v7650_v41 = vadd.f32 %v9686_v18, %v7649_v26 }
 0x798   : > { %v7557_v21 = vpop.f32.mrf.mxu0 }
 0x799   : > { %v7651_v6 = vadd.f32 %v7650_v41, %v7557_v21 }
 0x79a   : > { %v9692_v61 = vpop.f32.mrf.mxu0 }
 0x79b   : > { %v7652_v9 = vadd.f32 %v9689_v45, %v7651_v6 }
 0x79c   : > { %v7567_v35 = vpop.f32.mrf.mxu0 }
 0x79d   : > { %v7653_v62 = vadd.f32 %v7652_v9, %v7567_v35 }
 0x79e   : > { %v9695_v8 = vpop.f32.mrf.mxu0 }
 0x79f   : > { %v7654_v2 = vadd.f32 %v9692_v61, %v7653_v62 }
 0x7a0   : > { %v7577_v55 = vpop.f32.mrf.mxu0 }
 0x7a1   : > { %v7655_v37 = vadd.f32 %v7654_v2, %v7577_v55 }
 0x7a2   : > { %v9698_v50 = vpop.f32.mrf.mxu0 }
 0x7a3   : > { %v7656_v38 = vadd.f32 %v9695_v8, %v7655_v37 }
 0x7a4   : > { %v7587_v54 = vpop.f32.mrf.mxu0 }
 0x7a5   : > { %v7657_v30 = vadd.f32 %v7656_v38, %v7587_v54 }
 0x7a6   : > { %v9701_v0 = vpop.f32.mrf.mxu0 }
 0x7a7   : > { %v7658_v56 = vadd.f32 %v9698_v50, %v7657_v30 }
 0x7a8   : > { %v7597_v52 = vpop.f32.mrf.mxu0 }
 0x7a9   : > { %v7659_v13 = vadd.f32 %v7658_v56, %v7597_v52 }
 0x7aa   : > { %v9704_v63 = vpop.f32.mrf.mxu0 }
 0x7ab   : > { %v7660_v15 = vadd.f32 %v9701_v0, %v7659_v13 }
 0x7ac   : > { %v7607_v46 = vpop.f32.mrf.mxu0 }
 0x7ad   : > { %v7661_v7 = vadd.f32 %v7660_v15, %v7607_v46 }
 0x7ae   : > { %v9707_v33 = vpop.f32.mrf.mxu0 }
 0x7af   : > { %v7662_v20 = vadd.f32 %v9704_v63, %v7661_v7 }
 0x7b0   : > { %v7617_v24 = vpop.f32.mrf.mxu0 }
 0x7b1   : > { %v7663_v43 = vadd.f32 %v7662_v20, %v7617_v24 }
 0x7b2   : > { %v9710_v11 = vpop.f32.mrf.mxu0 }
 0x7b3   : > { %v7664_v47 = vadd.f32 %v9707_v33, %v7663_v43 }
 0x7b4   : > { %v7627_v25 = vpop.f32.mrf.mxu0 }
 0x7b5   : > { %v7665_v39 = vadd.f32 %v7664_v47, %v7627_v25 }
 0x7b7   : > { %v7666_v34 = vadd.f32 %v9710_v11, %v7665_v39 }
 0x7b9   : > { %v7667_v49 = vrot.slane %v7666_v34, 4 }
 0x7bb   : > { %v7668_v5 = vadd.f32 %v7667_v49, %v7666_v34 }
 0x7bd   : > { %v7669_v14 = vrot.slane %v7668_v5, 2 }
 0x7bf   : > { %v7670_v48 = vadd.f32 %v7669_v14, %v7668_v5 }
 0x7c1   : > { %v7671_v28 = vrot.slane %v7670_v48, 1 }
 0x7c3   : > { %v7672_v17 = vadd.f32 %v7671_v28, %v7670_v48 }
 0x7c5   : > { %v7673_v57 = vmul.f32 0.015625, %v7672_v17 }
 0x7c7   : > { %v7675_v12 = vadd.f32 %v7674_v4, %v7673_v57 }
 0x7c9   : > { %7676 = vst [vmem:[%s557_s23] sm:$0x1] %v7675_v12 }
 0x7ca   : > { %10168 = shalt.err (!%p10165_p11)
}
 0x7cb   : > { %s10169_s21 = scalar_lea.hbm %s7688_s27, 16  ;;  %s10173_s24 = scalar_lea.hbm %s13296_s15, 32 }
 0x7cc   : > { %p10170_p0 = scmp.ne.s32.totalorder %s7688_s27, %s10169_s21  ;;  %p10174_p12 = scmp.lt.s32.totalorder %s7688_s27, %s13296_s15 }
 0x7cd   : > { %p10175_p10 = scmp.lt.s32.totalorder %s10173_s24, %s10169_s21 }
 0x7ce   : > { %p10171_p1 = pnand %p10170_p0, %p10358_p5 }
 0x7cf   : > { %p10176_p2 = por %p10175_p10, %p10174_p12 }
 0x7d0   : > { %p10172_p3 = pneg %p10171_p1 }
 0x7d2   : > { %p10177_p4 = pnand %p10176_p2, %p10172_p3 }
 0x7d4   : > { %10180 = shalt.err (!%p10177_p4)
}
 0x7d5   : > { %9747 = dma.vmem_to_hbm [thread:$0]  (%p10358_p5), %s7691_s16, 16, %s7688_s27, %s7678_s2  }
 0x7d6 PF: > { %s13861_s26 = sld [smem:[#allocation19_spill]] }
 0x7d7   : > { %s13862_s17 = sld [smem:[#allocation17_spill]] }
 0x7dc   : > { %p9779_p9 = scmp.ge.s32.totalorder %s13861_s26, 2 }
 0x7dd   : > { %s7702_s25 = sand.u32 1, %s13862_s17  }
 0x7de   : > { %p9766_p7 = pnand %p9779_p9, %p10362_p6  ;;  %s7703_s29 = scalar_lea.sflag [#allocation5], %s7702_s25 }
 0x7e0   : > { %p9767_p8 = pneg %p9766_p7 }
 0x7e2   : > { %10210 = dma.done.wait (%p9767_p8), %s7703_s29, 16  }
 0x7e3   : > { %10212 = vsyncadd (%p9767_p8), %s7703_s29, 4294967280  ;;  %s13864_s21 = sld [smem:[#allocation20_spill]]  ;;  %s13867_s18 = smov %s10219_s19 }
 0x7e4   : > { %s13865_s22 = sld [smem:[#allocation18_spill]] }
 0x7e5   : > { %s13866_s20 = sld [smem:[#allocation21_spill]] }
 0x7e9   : > { %p28_p13 = scmp.ge.s32.totalorder %s13864_s21, 4  }
 0x7ea   : > { %s13868_s19 = smov %s13865_s22 }
 0x7eb   :  { %30 = sbr.rel (!%p28_p13) target bundleno = 9 (0x9), region = 153 }
 0x7f0   :  { %7707 = vsyncpa [#allocation4], 1 }
 0x7f1   :  { %7709 = vsyncpa [#allocation4 + $0x1], 1 }
 0x7f2   :  { %7710 = vsyncpa [#allocation7], 1 }
 0x7f3   :  { %7711 = vsyncpa [#allocation10], 1 }
 0x7f4   :  { %7712 = vsyncpa [#allocation5], 1 }
 0x7f5   :  { %7714 = vsyncpa [#allocation5 + $0x1], 1 }

</bundles_post_ra>
